<compile_context>
chip_gen: v6e
topology: v6e:2x2x1
jax: 0.10.0
libtpu: 0.0.40
codegen_flags: <defaults>
</compile_context>

<pallas_src>
import functools

import jax
import jax.numpy as jnp
from jax import lax
from jax.experimental import pallas as pl
from jax.experimental.pallas import tpu as pltpu

SR = 2048                 # small synthetic sample rate
SECONDS = 1.0
LENGTH_TUNING = 0.11      # "tuned by hand" in the Faust source
G_NUTS = -0.997           # nut reflection gain
G_BRIDGE = -0.95          # bridge reflection gain
DISP = (0.05, 0.90, 0.05) # dispersion FIR taps

TB = 8                    # sublane block: rows (strings) per grid step


# ----------------------------- Pallas kernel --------------------------------
def _guitar_kernel(mute_ref, exc_ref, left_ref, right_ref, *, n_up, n_down,
                   n_loops):
    """One grid step: an (TB, N) sublane-packed slab of independent strings.

    mute_ref : SMEM (1,) f32        scalar mute gain
    exc_ref  : VMEM (TB, N) f32     excitation rows
    left_ref / right_ref : VMEM (TB, N) f32 outputs (sum over the loop axis)
    """
    mute = mute_ref[0]
    x = exc_ref[...].astype(jnp.float32)
    idx = lax.broadcasted_iota(jnp.int32, x.shape, 1)

    # Hoisted, de-duplicated zero-fill masks for every delay offset used below.
    offsets = sorted({n_up, n_up + 1,
                      n_down, n_down + 1, n_down + 2, n_down + 3})
    masks = {d: idx >= d for d in offsets if d > 0}

    def delay(v, d):                      # StringSegment(d): d-sample delay
        if d == 0:
            return v
        return jnp.where(masks[d], pltpu.roll(v, d, axis=1), 0.0)

    # Folded per-path gains: 0.5 (termination lowpass) * reflection * mute.
    c_nut = (0.5 * G_NUTS) * mute
    c_br = (0.5 * G_BRIDGE) * mute
    d0, d1, d2 = DISP
    # dispersion FIR followed by the termination lowpass, fused into 4 taps,
    # with the bridge/mute gain folded in (saves one full-vector multiply).
    w0 = c_br * d0
    w1 = c_br * (d0 + d1)
    w2 = c_br * (d1 + d2)
    w3 = c_br * d2

    # chain._start(zeros, zeros): inject excitation at the pick position.
    left0 = 0.5 * delay(x, n_up)
    right0 = 0.5 * delay(x, n_down)

    def body(_, carry):
        l_cur, r_cur, l_sum, r_sum = carry
        # _lterminate (+ _vibrate mute), fused: nut reflection of the left wave.
        r_new = c_nut * (delay(l_cur, n_up) + delay(l_cur, n_up + 1))
        # _rterminate (+ _vibrate mute), fused: dispersion + bridge reflection.
        l_new = (w0 * delay(r_cur, n_down)
                 + w1 * delay(r_cur, n_down + 1)
                 + w2 * delay(r_cur, n_down + 2)
                 + w3 * delay(r_cur, n_down + 3))
        return l_new, r_new, l_sum + l_new, r_sum + r_new

    unroll = True if n_loops <= 16 else 4
    _, _, l_sum, r_sum = lax.fori_loop(
        0, n_loops, body, (left0, right0, left0, right0), unroll=unroll)

    left_ref[...] = l_sum.astype(left_ref.dtype)   # sum over loop axis
    right_ref[...] = r_sum.astype(right_ref.dtype)


# ------------------------------- wrapper -------------------------------------
def guitar_string_forward(length, pluck_position, excitation, mute=1.0):
    """Mirrors GuitarString.forward. `length`, `pluck_position`, `mute` are
    Python scalars (treated as static); `excitation` is a (B, N) or (N,) f32
    array whose last dim equals the output length (multiple of 128)."""
    excitation = jnp.asarray(excitation, dtype=jnp.float32)
    squeeze = excitation.ndim == 1
    if squeeze:
        excitation = excitation[None, :]
    batch, n_samp = excitation.shape
    if n_samp % 128 != 0:
        raise ValueError("excitation length must be a multiple of 128 "
                         "(TPU lane width)")

    length_t = float(length) - LENGTH_TUNING
    n_up = int(round(length_t * float(pluck_position)))
    n_down = int(round(length_t * (1.0 - float(pluck_position))))
    # TODO(synk): PyTorch uses length.min() for batched per-string lengths;
    # here a single static scalar length is assumed for the whole batch.
    n_loops = n_samp // int(length)

    # Pad the batch to a multiple of the sublane block so every vreg is full.
    pad = (-batch) % TB
    if pad:
        excitation = jnp.pad(excitation, ((0, pad), (0, 0)))
    batch_p = batch + pad

    mute_arr = jnp.asarray([mute], dtype=jnp.float32)

    kernel = functools.partial(
        _guitar_kernel, n_up=n_up, n_down=n_down, n_loops=n_loops)

    # Advisory scheduling hint: ~20 VPU flops / element / loop, 3 HBM slabs.
    flops = int(n_loops) * 20 * batch_p * n_samp
    bytes_accessed = 3 * 4 * batch_p * n_samp

    left, right = pl.pallas_call(
        kernel,
        out_shape=(jax.ShapeDtypeStruct((batch_p, n_samp), jnp.float32),
                   jax.ShapeDtypeStruct((batch_p, n_samp), jnp.float32)),
        grid=(batch_p // TB,),
        in_specs=[pl.BlockSpec(memory_space=pltpu.MemorySpace.SMEM),
                  pl.BlockSpec((TB, n_samp), lambda b: (b, 0))],
        out_specs=(pl.BlockSpec((TB, n_samp), lambda b: (b, 0)),
                   pl.BlockSpec((TB, n_samp), lambda b: (b, 0))),
        compiler_params=pltpu.CompilerParams(
            dimension_semantics=("parallel",)),
        cost_estimate=pl.CostEstimate(
            flops=flops, transcendentals=0, bytes_accessed=bytes_accessed),
    )(mute_arr, excitation)

    left = left[:batch]
    right = right[:batch]
    if squeeze:
        left = left[0]
        right = right[0]
    return left, right


# -------------------------- pure-JAX reference --------------------------------
def _reference_forward(length, pluck_position, excitation, mute=1.0):
    """Unfused batched reference mirroring the original forward structure."""
    x = jnp.asarray(excitation, dtype=jnp.float32)
    if x.ndim == 1:
        x = x[None, :]
    n_samp = int(x.shape[-1])
    length_t = float(length) - LENGTH_TUNING
    n_up = int(round(length_t * float(pluck_position)))
    n_down = int(round(length_t * (1.0 - float(pluck_position))))
    n_loops = n_samp // int(length)

    idx = jnp.arange(n_samp)[None, :]

    def delay(v, d):
        if d == 0:
            return v
        return jnp.where(idx >= d, jnp.roll(v, d, axis=-1), 0.0)

    def lowpass(v):
        return 0.5 * (v + delay(v, 1))

    def dispersion(v):
        return DISP[0] * v + DISP[1] * delay(v, 1) + DISP[2] * delay(v, 2)

    left = 0.5 * delay(x, n_up)
    right = 0.5 * delay(x, n_down)
    lsum, rsum = left, right
    l_cur, r_cur = left, right
    for _ in range(n_loops):
        r_new = mute * (G_NUTS * lowpass(delay(l_cur, n_up)))
        l_new = mute * (G_BRIDGE * lowpass(delay(dispersion(r_cur), n_down)))
        l_cur, r_cur = l_new, r_new
        lsum = lsum + l_new
        rsum = rsum + r_new
    return lsum, rsum


# --------------------------------- main ---------------------------------------
if __name__ == "__main__":
    n_samp = int(SECONDS * SR)            # 2048 samples, multiple of 128
    batch = 16                            # two sublane-packed (8, N) blocks
    key = jax.random.PRNGKey(0)
    # Deterministic excitation: short noise burst (pluck), zero afterwards.
    noise = jax.random.normal(key, (batch, n_samp), dtype=jnp.float32)
    burst_mask = (jnp.arange(n_samp) < 128).astype(jnp.float32)[None, :]
    excitation = noise * burst_mask

    length = 256.0          # delay-line length in samples
    pluck_position = 0.27   # in (0, 1)
    mute = 0.98

    left, right = guitar_string_forward(length, pluck_position, excitation, mute)
    jax.block_until_ready((left, right))

    ref_left, ref_right = _reference_forward(length, pluck_position, excitation,
                                             mute)
    if not (jnp.allclose(left, ref_left, atol=1e-4, rtol=1e-4)
            and jnp.allclose(right, ref_right, atol=1e-4, rtol=1e-4)):
        raise AssertionError("Pallas kernel does not match JAX reference")

    print("KERNEL_OK")
</pallas_src>

<mosaic_0001>
module attributes {stable_mosaic.version = 11 : i64} {
  func.func @_guitar_kernel(%arg0: i32, %arg1: memref<1xf32, #tpu.memory_space<smem>>, %arg2: memref<8x2048xf32, #tpu.memory_space<vmem>>, %arg3: memref<8x2048xf32, #tpu.memory_space<vmem>>, %arg4: memref<8x2048xf32, #tpu.memory_space<vmem>>) attributes {dimension_semantics = [#tpu.dimension_semantics<parallel>], iteration_bounds = array<i64: 2>, scalar_prefetch = 0 : i64, scratch_operands = 0 : i64, tpu.core_type = #tpu.core_type<tc>, window_params = [{transform_indices = @transform_0, window_bounds = array<i64: 1>}, {transform_indices = @transform_1, window_bounds = array<i64: 8, 2048>}, {transform_indices = @transform_2, window_bounds = array<i64: 8, 2048>}, {transform_indices = @transform_3, window_bounds = array<i64: 8, 2048>}]} {
    %c0 = arith.constant 0 : index
    %0 = memref.load %arg1[%c0] : memref<1xf32, #tpu.memory_space<smem>>
    %c0_0 = arith.constant 0 : index
    %c0_1 = arith.constant 0 : index
    %1 = vector.load %arg2[%c0_0, %c0_1] : memref<8x2048xf32, #tpu.memory_space<vmem>>, vector<8x2048xf32>
    %2 = tpu.iota {dimensions = array<i32: 1>} : vector<8x2048xi32>
    %c69_i32 = arith.constant 69 : i32
    %3 = vector.broadcast %c69_i32 : i32 to vector<8x2048xi32>
    %4 = arith.cmpi sge, %2, %3 : vector<8x2048xi32>
    %c70_i32 = arith.constant 70 : i32
    %5 = vector.broadcast %c70_i32 : i32 to vector<8x2048xi32>
    %6 = arith.cmpi sge, %2, %5 : vector<8x2048xi32>
    %c187_i32 = arith.constant 187 : i32
    %7 = vector.broadcast %c187_i32 : i32 to vector<8x2048xi32>
    %8 = arith.cmpi sge, %2, %7 : vector<8x2048xi32>
    %c188_i32 = arith.constant 188 : i32
    %9 = vector.broadcast %c188_i32 : i32 to vector<8x2048xi32>
    %10 = arith.cmpi sge, %2, %9 : vector<8x2048xi32>
    %c189_i32 = arith.constant 189 : i32
    %11 = vector.broadcast %c189_i32 : i32 to vector<8x2048xi32>
    %12 = arith.cmpi sge, %2, %11 : vector<8x2048xi32>
    %c190_i32 = arith.constant 190 : i32
    %13 = vector.broadcast %c190_i32 : i32 to vector<8x2048xi32>
    %14 = arith.cmpi sge, %2, %13 : vector<8x2048xi32>
    %cst = arith.constant -4.985000e-01 : f32
    %15 = arith.mulf %cst, %0 : f32
    %cst_2 = arith.constant -4.750000e-01 : f32
    %16 = arith.mulf %cst_2, %0 : f32
    %cst_3 = arith.constant 5.000000e-02 : f32
    %17 = arith.mulf %16, %cst_3 : f32
    %cst_4 = arith.constant 0.949999988 : f32
    %18 = arith.mulf %16, %cst_4 : f32
    %cst_5 = arith.constant 0.949999988 : f32
    %19 = arith.mulf %16, %cst_5 : f32
    %cst_6 = arith.constant 5.000000e-02 : f32
    %20 = arith.mulf %16, %cst_6 : f32
    %c69_i32_7 = arith.constant 69 : i32
    %21 = tpu.dynamic_rotate %1 by %c69_i32_7 dim 1 : vector<8x2048xf32>, i32 -> vector<8x2048xf32>
    %cst_8 = arith.constant 0.000000e+00 : f32
    %22 = vector.broadcast %cst_8 : f32 to vector<8x2048xf32>
    %23 = arith.select %4, %21, %22 : vector<8x2048xi1>, vector<8x2048xf32>
    %cst_9 = arith.constant 5.000000e-01 : f32
    %24 = vector.broadcast %cst_9 : f32 to vector<8x2048xf32>
    %25 = arith.mulf %24, %23 : vector<8x2048xf32>
    %c187_i32_10 = arith.constant 187 : i32
    %26 = tpu.dynamic_rotate %1 by %c187_i32_10 dim 1 : vector<8x2048xf32>, i32 -> vector<8x2048xf32>
    %cst_11 = arith.constant 0.000000e+00 : f32
    %27 = vector.broadcast %cst_11 : f32 to vector<8x2048xf32>
    %28 = arith.select %8, %26, %27 : vector<8x2048xi1>, vector<8x2048xf32>
    %cst_12 = arith.constant 5.000000e-01 : f32
    %29 = vector.broadcast %cst_12 : f32 to vector<8x2048xf32>
    %30 = arith.mulf %29, %28 : vector<8x2048xf32>
    %c0_i32 = arith.constant 0 : i32
    %c69_i32_13 = arith.constant 69 : i32
    %31 = tpu.dynamic_rotate %25 by %c69_i32_13 dim 1 : vector<8x2048xf32>, i32 -> vector<8x2048xf32>
    %cst_14 = arith.constant 0.000000e+00 : f32
    %32 = vector.broadcast %cst_14 : f32 to vector<8x2048xf32>
    %33 = arith.select %4, %31, %32 : vector<8x2048xi1>, vector<8x2048xf32>
    %c70_i32_15 = arith.constant 70 : i32
    %34 = tpu.dynamic_rotate %25 by %c70_i32_15 dim 1 : vector<8x2048xf32>, i32 -> vector<8x2048xf32>
    %cst_16 = arith.constant 0.000000e+00 : f32
    %35 = vector.broadcast %cst_16 : f32 to vector<8x2048xf32>
    %36 = arith.select %6, %34, %35 : vector<8x2048xi1>, vector<8x2048xf32>
    %37 = arith.addf %33, %36 : vector<8x2048xf32>
    %38 = vector.broadcast %15 : f32 to vector<8x2048xf32>
    %39 = arith.mulf %38, %37 : vector<8x2048xf32>
    %c187_i32_17 = arith.constant 187 : i32
    %40 = tpu.dynamic_rotate %30 by %c187_i32_17 dim 1 : vector<8x2048xf32>, i32 -> vector<8x2048xf32>
    %cst_18 = arith.constant 0.000000e+00 : f32
    %41 = vector.broadcast %cst_18 : f32 to vector<8x2048xf32>
    %42 = arith.select %8, %40, %41 : vector<8x2048xi1>, vector<8x2048xf32>
    %43 = vector.broadcast %17 : f32 to vector<8x2048xf32>
    %44 = arith.mulf %43, %42 : vector<8x2048xf32>
    %c188_i32_19 = arith.constant 188 : i32
    %45 = tpu.dynamic_rotate %30 by %c188_i32_19 dim 1 : vector<8x2048xf32>, i32 -> vector<8x2048xf32>
    %cst_20 = arith.constant 0.000000e+00 : f32
    %46 = vector.broadcast %cst_20 : f32 to vector<8x2048xf32>
    %47 = arith.select %10, %45, %46 : vector<8x2048xi1>, vector<8x2048xf32>
    %48 = vector.broadcast %18 : f32 to vector<8x2048xf32>
    %49 = arith.mulf %48, %47 : vector<8x2048xf32>
    %50 = arith.addf %44, %49 : vector<8x2048xf32>
    %c189_i32_21 = arith.constant 189 : i32
    %51 = tpu.dynamic_rotate %30 by %c189_i32_21 dim 1 : vector<8x2048xf32>, i32 -> vector<8x2048xf32>
    %cst_22 = arith.constant 0.000000e+00 : f32
    %52 = vector.broadcast %cst_22 : f32 to vector<8x2048xf32>
    %53 = arith.select %12, %51, %52 : vector<8x2048xi1>, vector<8x2048xf32>
    %54 = vector.broadcast %19 : f32 to vector<8x2048xf32>
    %55 = arith.mulf %54, %53 : vector<8x2048xf32>
    %56 = arith.addf %50, %55 : vector<8x2048xf32>
    %c190_i32_23 = arith.constant 190 : i32
    %57 = tpu.dynamic_rotate %30 by %c190_i32_23 dim 1 : vector<8x2048xf32>, i32 -> vector<8x2048xf32>
    %cst_24 = arith.constant 0.000000e+00 : f32
    %58 = vector.broadcast %cst_24 : f32 to vector<8x2048xf32>
    %59 = arith.select %14, %57, %58 : vector<8x2048xi1>, vector<8x2048xf32>
    %60 = vector.broadcast %20 : f32 to vector<8x2048xf32>
    %61 = arith.mulf %60, %59 : vector<8x2048xf32>
    %62 = arith.addf %56, %61 : vector<8x2048xf32>
    %63 = arith.addf %25, %62 : vector<8x2048xf32>
    %64 = arith.addf %30, %39 : vector<8x2048xf32>
    %c1_i32 = arith.constant 1 : i32
    %c69_i32_25 = arith.constant 69 : i32
    %65 = tpu.dynamic_rotate %62 by %c69_i32_25 dim 1 : vector<8x2048xf32>, i32 -> vector<8x2048xf32>
    %cst_26 = arith.constant 0.000000e+00 : f32
    %66 = vector.broadcast %cst_26 : f32 to vector<8x2048xf32>
    %67 = arith.select %4, %65, %66 : vector<8x2048xi1>, vector<8x2048xf32>
    %c70_i32_27 = arith.constant 70 : i32
    %68 = tpu.dynamic_rotate %62 by %c70_i32_27 dim 1 : vector<8x2048xf32>, i32 -> vector<8x2048xf32>
    %cst_28 = arith.constant 0.000000e+00 : f32
    %69 = vector.broadcast %cst_28 : f32 to vector<8x2048xf32>
    %70 = arith.select %6, %68, %69 : vector<8x2048xi1>, vector<8x2048xf32>
    %71 = arith.addf %67, %70 : vector<8x2048xf32>
    %72 = vector.broadcast %15 : f32 to vector<8x2048xf32>
    %73 = arith.mulf %72, %71 : vector<8x2048xf32>
    %c187_i32_29 = arith.constant 187 : i32
    %74 = tpu.dynamic_rotate %39 by %c187_i32_29 dim 1 : vector<8x2048xf32>, i32 -> vector<8x2048xf32>
    %cst_30 = arith.constant 0.000000e+00 : f32
    %75 = vector.broadcast %cst_30 : f32 to vector<8x2048xf32>
    %76 = arith.select %8, %74, %75 : vector<8x2048xi1>, vector<8x2048xf32>
    %77 = vector.broadcast %17 : f32 to vector<8x2048xf32>
    %78 = arith.mulf %77, %76 : vector<8x2048xf32>
    %c188_i32_31 = arith.constant 188 : i32
    %79 = tpu.dynamic_rotate %39 by %c188_i32_31 dim 1 : vector<8x2048xf32>, i32 -> vector<8x2048xf32>
    %cst_32 = arith.constant 0.000000e+00 : f32
    %80 = vector.broadcast %cst_32 : f32 to vector<8x2048xf32>
    %81 = arith.select %10, %79, %80 : vector<8x2048xi1>, vector<8x2048xf32>
    %82 = vector.broadcast %18 : f32 to vector<8x2048xf32>
    %83 = arith.mulf %82, %81 : vector<8x2048xf32>
    %84 = arith.addf %78, %83 : vector<8x2048xf32>
    %c189_i32_33 = arith.constant 189 : i32
    %85 = tpu.dynamic_rotate %39 by %c189_i32_33 dim 1 : vector<8x2048xf32>, i32 -> vector<8x2048xf32>
    %cst_34 = arith.constant 0.000000e+00 : f32
    %86 = vector.broadcast %cst_34 : f32 to vector<8x2048xf32>
    %87 = arith.select %12, %85, %86 : vector<8x2048xi1>, vector<8x2048xf32>
    %88 = vector.broadcast %19 : f32 to vector<8x2048xf32>
    %89 = arith.mulf %88, %87 : vector<8x2048xf32>
    %90 = arith.addf %84, %89 : vector<8x2048xf32>
    %c190_i32_35 = arith.constant 190 : i32
    %91 = tpu.dynamic_rotate %39 by %c190_i32_35 dim 1 : vector<8x2048xf32>, i32 -> vector<8x2048xf32>
    %cst_36 = arith.constant 0.000000e+00 : f32
    %92 = vector.broadcast %cst_36 : f32 to vector<8x2048xf32>
    %93 = arith.select %14, %91, %92 : vector<8x2048xi1>, vector<8x2048xf32>
    %94 = vector.broadcast %20 : f32 to vector<8x2048xf32>
    %95 = arith.mulf %94, %93 : vector<8x2048xf32>
    %96 = arith.addf %90, %95 : vector<8x2048xf32>
    %97 = arith.addf %63, %96 : vector<8x2048xf32>
    %98 = arith.addf %64, %73 : vector<8x2048xf32>
    %c2_i32 = arith.constant 2 : i32
    %c69_i32_37 = arith.constant 69 : i32
    %99 = tpu.dynamic_rotate %96 by %c69_i32_37 dim 1 : vector<8x2048xf32>, i32 -> vector<8x2048xf32>
    %cst_38 = arith.constant 0.000000e+00 : f32
    %100 = vector.broadcast %cst_38 : f32 to vector<8x2048xf32>
    %101 = arith.select %4, %99, %100 : vector<8x2048xi1>, vector<8x2048xf32>
    %c70_i32_39 = arith.constant 70 : i32
    %102 = tpu.dynamic_rotate %96 by %c70_i32_39 dim 1 : vector<8x2048xf32>, i32 -> vector<8x2048xf32>
    %cst_40 = arith.constant 0.000000e+00 : f32
    %103 = vector.broadcast %cst_40 : f32 to vector<8x2048xf32>
    %104 = arith.select %6, %102, %103 : vector<8x2048xi1>, vector<8x2048xf32>
    %105 = arith.addf %101, %104 : vector<8x2048xf32>
    %106 = vector.broadcast %15 : f32 to vector<8x2048xf32>
    %107 = arith.mulf %106, %105 : vector<8x2048xf32>
    %c187_i32_41 = arith.constant 187 : i32
    %108 = tpu.dynamic_rotate %73 by %c187_i32_41 dim 1 : vector<8x2048xf32>, i32 -> vector<8x2048xf32>
    %cst_42 = arith.constant 0.000000e+00 : f32
    %109 = vector.broadcast %cst_42 : f32 to vector<8x2048xf32>
    %110 = arith.select %8, %108, %109 : vector<8x2048xi1>, vector<8x2048xf32>
    %111 = vector.broadcast %17 : f32 to vector<8x2048xf32>
    %112 = arith.mulf %111, %110 : vector<8x2048xf32>
    %c188_i32_43 = arith.constant 188 : i32
    %113 = tpu.dynamic_rotate %73 by %c188_i32_43 dim 1 : vector<8x2048xf32>, i32 -> vector<8x2048xf32>
    %cst_44 = arith.constant 0.000000e+00 : f32
    %114 = vector.broadcast %cst_44 : f32 to vector<8x2048xf32>
    %115 = arith.select %10, %113, %114 : vector<8x2048xi1>, vector<8x2048xf32>
    %116 = vector.broadcast %18 : f32 to vector<8x2048xf32>
    %117 = arith.mulf %116, %115 : vector<8x2048xf32>
    %118 = arith.addf %112, %117 : vector<8x2048xf32>
    %c189_i32_45 = arith.constant 189 : i32
    %119 = tpu.dynamic_rotate %73 by %c189_i32_45 dim 1 : vector<8x2048xf32>, i32 -> vector<8x2048xf32>
    %cst_46 = arith.constant 0.000000e+00 : f32
    %120 = vector.broadcast %cst_46 : f32 to vector<8x2048xf32>
    %121 = arith.select %12, %119, %120 : vector<8x2048xi1>, vector<8x2048xf32>
    %122 = vector.broadcast %19 : f32 to vector<8x2048xf32>
    %123 = arith.mulf %122, %121 : vector<8x2048xf32>
    %124 = arith.addf %118, %123 : vector<8x2048xf32>
    %c190_i32_47 = arith.constant 190 : i32
    %125 = tpu.dynamic_rotate %73 by %c190_i32_47 dim 1 : vector<8x2048xf32>, i32 -> vector<8x2048xf32>
    %cst_48 = arith.constant 0.000000e+00 : f32
    %126 = vector.broadcast %cst_48 : f32 to vector<8x2048xf32>
    %127 = arith.select %14, %125, %126 : vector<8x2048xi1>, vector<8x2048xf32>
    %128 = vector.broadcast %20 : f32 to vector<8x2048xf32>
    %129 = arith.mulf %128, %127 : vector<8x2048xf32>
    %130 = arith.addf %124, %129 : vector<8x2048xf32>
    %131 = arith.addf %97, %130 : vector<8x2048xf32>
    %132 = arith.addf %98, %107 : vector<8x2048xf32>
    %c3_i32 = arith.constant 3 : i32
    %c69_i32_49 = arith.constant 69 : i32
    %133 = tpu.dynamic_rotate %130 by %c69_i32_49 dim 1 : vector<8x2048xf32>, i32 -> vector<8x2048xf32>
    %cst_50 = arith.constant 0.000000e+00 : f32
    %134 = vector.broadcast %cst_50 : f32 to vector<8x2048xf32>
    %135 = arith.select %4, %133, %134 : vector<8x2048xi1>, vector<8x2048xf32>
    %c70_i32_51 = arith.constant 70 : i32
    %136 = tpu.dynamic_rotate %130 by %c70_i32_51 dim 1 : vector<8x2048xf32>, i32 -> vector<8x2048xf32>
    %cst_52 = arith.constant 0.000000e+00 : f32
    %137 = vector.broadcast %cst_52 : f32 to vector<8x2048xf32>
    %138 = arith.select %6, %136, %137 : vector<8x2048xi1>, vector<8x2048xf32>
    %139 = arith.addf %135, %138 : vector<8x2048xf32>
    %140 = vector.broadcast %15 : f32 to vector<8x2048xf32>
    %141 = arith.mulf %140, %139 : vector<8x2048xf32>
    %c187_i32_53 = arith.constant 187 : i32
    %142 = tpu.dynamic_rotate %107 by %c187_i32_53 dim 1 : vector<8x2048xf32>, i32 -> vector<8x2048xf32>
    %cst_54 = arith.constant 0.000000e+00 : f32
    %143 = vector.broadcast %cst_54 : f32 to vector<8x2048xf32>
    %144 = arith.select %8, %142, %143 : vector<8x2048xi1>, vector<8x2048xf32>
    %145 = vector.broadcast %17 : f32 to vector<8x2048xf32>
    %146 = arith.mulf %145, %144 : vector<8x2048xf32>
    %c188_i32_55 = arith.constant 188 : i32
    %147 = tpu.dynamic_rotate %107 by %c188_i32_55 dim 1 : vector<8x2048xf32>, i32 -> vector<8x2048xf32>
    %cst_56 = arith.constant 0.000000e+00 : f32
    %148 = vector.broadcast %cst_56 : f32 to vector<8x2048xf32>
    %149 = arith.select %10, %147, %148 : vector<8x2048xi1>, vector<8x2048xf32>
    %150 = vector.broadcast %18 : f32 to vector<8x2048xf32>
    %151 = arith.mulf %150, %149 : vector<8x2048xf32>
    %152 = arith.addf %146, %151 : vector<8x2048xf32>
    %c189_i32_57 = arith.constant 189 : i32
    %153 = tpu.dynamic_rotate %107 by %c189_i32_57 dim 1 : vector<8x2048xf32>, i32 -> vector<8x2048xf32>
    %cst_58 = arith.constant 0.000000e+00 : f32
    %154 = vector.broadcast %cst_58 : f32 to vector<8x2048xf32>
    %155 = arith.select %12, %153, %154 : vector<8x2048xi1>, vector<8x2048xf32>
    %156 = vector.broadcast %19 : f32 to vector<8x2048xf32>
    %157 = arith.mulf %156, %155 : vector<8x2048xf32>
    %158 = arith.addf %152, %157 : vector<8x2048xf32>
    %c190_i32_59 = arith.constant 190 : i32
    %159 = tpu.dynamic_rotate %107 by %c190_i32_59 dim 1 : vector<8x2048xf32>, i32 -> vector<8x2048xf32>
    %cst_60 = arith.constant 0.000000e+00 : f32
    %160 = vector.broadcast %cst_60 : f32 to vector<8x2048xf32>
    %161 = arith.select %14, %159, %160 : vector<8x2048xi1>, vector<8x2048xf32>
    %162 = vector.broadcast %20 : f32 to vector<8x2048xf32>
    %163 = arith.mulf %162, %161 : vector<8x2048xf32>
    %164 = arith.addf %158, %163 : vector<8x2048xf32>
    %165 = arith.addf %131, %164 : vector<8x2048xf32>
    %166 = arith.addf %132, %141 : vector<8x2048xf32>
    %c4_i32 = arith.constant 4 : i32
    %c69_i32_61 = arith.constant 69 : i32
    %167 = tpu.dynamic_rotate %164 by %c69_i32_61 dim 1 : vector<8x2048xf32>, i32 -> vector<8x2048xf32>
    %cst_62 = arith.constant 0.000000e+00 : f32
    %168 = vector.broadcast %cst_62 : f32 to vector<8x2048xf32>
    %169 = arith.select %4, %167, %168 : vector<8x2048xi1>, vector<8x2048xf32>
    %c70_i32_63 = arith.constant 70 : i32
    %170 = tpu.dynamic_rotate %164 by %c70_i32_63 dim 1 : vector<8x2048xf32>, i32 -> vector<8x2048xf32>
    %cst_64 = arith.constant 0.000000e+00 : f32
    %171 = vector.broadcast %cst_64 : f32 to vector<8x2048xf32>
    %172 = arith.select %6, %170, %171 : vector<8x2048xi1>, vector<8x2048xf32>
    %173 = arith.addf %169, %172 : vector<8x2048xf32>
    %174 = vector.broadcast %15 : f32 to vector<8x2048xf32>
    %175 = arith.mulf %174, %173 : vector<8x2048xf32>
    %c187_i32_65 = arith.constant 187 : i32
    %176 = tpu.dynamic_rotate %141 by %c187_i32_65 dim 1 : vector<8x2048xf32>, i32 -> vector<8x2048xf32>
    %cst_66 = arith.constant 0.000000e+00 : f32
    %177 = vector.broadcast %cst_66 : f32 to vector<8x2048xf32>
    %178 = arith.select %8, %176, %177 : vector<8x2048xi1>, vector<8x2048xf32>
    %179 = vector.broadcast %17 : f32 to vector<8x2048xf32>
    %180 = arith.mulf %179, %178 : vector<8x2048xf32>
    %c188_i32_67 = arith.constant 188 : i32
    %181 = tpu.dynamic_rotate %141 by %c188_i32_67 dim 1 : vector<8x2048xf32>, i32 -> vector<8x2048xf32>
    %cst_68 = arith.constant 0.000000e+00 : f32
    %182 = vector.broadcast %cst_68 : f32 to vector<8x2048xf32>
    %183 = arith.select %10, %181, %182 : vector<8x2048xi1>, vector<8x2048xf32>
    %184 = vector.broadcast %18 : f32 to vector<8x2048xf32>
    %185 = arith.mulf %184, %183 : vector<8x2048xf32>
    %186 = arith.addf %180, %185 : vector<8x2048xf32>
    %c189_i32_69 = arith.constant 189 : i32
    %187 = tpu.dynamic_rotate %141 by %c189_i32_69 dim 1 : vector<8x2048xf32>, i32 -> vector<8x2048xf32>
    %cst_70 = arith.constant 0.000000e+00 : f32
    %188 = vector.broadcast %cst_70 : f32 to vector<8x2048xf32>
    %189 = arith.select %12, %187, %188 : vector<8x2048xi1>, vector<8x2048xf32>
    %190 = vector.broadcast %19 : f32 to vector<8x2048xf32>
    %191 = arith.mulf %190, %189 : vector<8x2048xf32>
    %192 = arith.addf %186, %191 : vector<8x2048xf32>
    %c190_i32_71 = arith.constant 190 : i32
    %193 = tpu.dynamic_rotate %141 by %c190_i32_71 dim 1 : vector<8x2048xf32>, i32 -> vector<8x2048xf32>
    %cst_72 = arith.constant 0.000000e+00 : f32
    %194 = vector.broadcast %cst_72 : f32 to vector<8x2048xf32>
    %195 = arith.select %14, %193, %194 : vector<8x2048xi1>, vector<8x2048xf32>
    %196 = vector.broadcast %20 : f32 to vector<8x2048xf32>
    %197 = arith.mulf %196, %195 : vector<8x2048xf32>
    %198 = arith.addf %192, %197 : vector<8x2048xf32>
    %199 = arith.addf %165, %198 : vector<8x2048xf32>
    %200 = arith.addf %166, %175 : vector<8x2048xf32>
    %c5_i32 = arith.constant 5 : i32
    %c69_i32_73 = arith.constant 69 : i32
    %201 = tpu.dynamic_rotate %198 by %c69_i32_73 dim 1 : vector<8x2048xf32>, i32 -> vector<8x2048xf32>
    %cst_74 = arith.constant 0.000000e+00 : f32
    %202 = vector.broadcast %cst_74 : f32 to vector<8x2048xf32>
    %203 = arith.select %4, %201, %202 : vector<8x2048xi1>, vector<8x2048xf32>
    %c70_i32_75 = arith.constant 70 : i32
    %204 = tpu.dynamic_rotate %198 by %c70_i32_75 dim 1 : vector<8x2048xf32>, i32 -> vector<8x2048xf32>
    %cst_76 = arith.constant 0.000000e+00 : f32
    %205 = vector.broadcast %cst_76 : f32 to vector<8x2048xf32>
    %206 = arith.select %6, %204, %205 : vector<8x2048xi1>, vector<8x2048xf32>
    %207 = arith.addf %203, %206 : vector<8x2048xf32>
    %208 = vector.broadcast %15 : f32 to vector<8x2048xf32>
    %209 = arith.mulf %208, %207 : vector<8x2048xf32>
    %c187_i32_77 = arith.constant 187 : i32
    %210 = tpu.dynamic_rotate %175 by %c187_i32_77 dim 1 : vector<8x2048xf32>, i32 -> vector<8x2048xf32>
    %cst_78 = arith.constant 0.000000e+00 : f32
    %211 = vector.broadcast %cst_78 : f32 to vector<8x2048xf32>
    %212 = arith.select %8, %210, %211 : vector<8x2048xi1>, vector<8x2048xf32>
    %213 = vector.broadcast %17 : f32 to vector<8x2048xf32>
    %214 = arith.mulf %213, %212 : vector<8x2048xf32>
    %c188_i32_79 = arith.constant 188 : i32
    %215 = tpu.dynamic_rotate %175 by %c188_i32_79 dim 1 : vector<8x2048xf32>, i32 -> vector<8x2048xf32>
    %cst_80 = arith.constant 0.000000e+00 : f32
    %216 = vector.broadcast %cst_80 : f32 to vector<8x2048xf32>
    %217 = arith.select %10, %215, %216 : vector<8x2048xi1>, vector<8x2048xf32>
    %218 = vector.broadcast %18 : f32 to vector<8x2048xf32>
    %219 = arith.mulf %218, %217 : vector<8x2048xf32>
    %220 = arith.addf %214, %219 : vector<8x2048xf32>
    %c189_i32_81 = arith.constant 189 : i32
    %221 = tpu.dynamic_rotate %175 by %c189_i32_81 dim 1 : vector<8x2048xf32>, i32 -> vector<8x2048xf32>
    %cst_82 = arith.constant 0.000000e+00 : f32
    %222 = vector.broadcast %cst_82 : f32 to vector<8x2048xf32>
    %223 = arith.select %12, %221, %222 : vector<8x2048xi1>, vector<8x2048xf32>
    %224 = vector.broadcast %19 : f32 to vector<8x2048xf32>
    %225 = arith.mulf %224, %223 : vector<8x2048xf32>
    %226 = arith.addf %220, %225 : vector<8x2048xf32>
    %c190_i32_83 = arith.constant 190 : i32
    %227 = tpu.dynamic_rotate %175 by %c190_i32_83 dim 1 : vector<8x2048xf32>, i32 -> vector<8x2048xf32>
    %cst_84 = arith.constant 0.000000e+00 : f32
    %228 = vector.broadcast %cst_84 : f32 to vector<8x2048xf32>
    %229 = arith.select %14, %227, %228 : vector<8x2048xi1>, vector<8x2048xf32>
    %230 = vector.broadcast %20 : f32 to vector<8x2048xf32>
    %231 = arith.mulf %230, %229 : vector<8x2048xf32>
    %232 = arith.addf %226, %231 : vector<8x2048xf32>
    %233 = arith.addf %199, %232 : vector<8x2048xf32>
    %234 = arith.addf %200, %209 : vector<8x2048xf32>
    %c6_i32 = arith.constant 6 : i32
    %c69_i32_85 = arith.constant 69 : i32
    %235 = tpu.dynamic_rotate %232 by %c69_i32_85 dim 1 : vector<8x2048xf32>, i32 -> vector<8x2048xf32>
    %cst_86 = arith.constant 0.000000e+00 : f32
    %236 = vector.broadcast %cst_86 : f32 to vector<8x2048xf32>
    %237 = arith.select %4, %235, %236 : vector<8x2048xi1>, vector<8x2048xf32>
    %c70_i32_87 = arith.constant 70 : i32
    %238 = tpu.dynamic_rotate %232 by %c70_i32_87 dim 1 : vector<8x2048xf32>, i32 -> vector<8x2048xf32>
    %cst_88 = arith.constant 0.000000e+00 : f32
    %239 = vector.broadcast %cst_88 : f32 to vector<8x2048xf32>
    %240 = arith.select %6, %238, %239 : vector<8x2048xi1>, vector<8x2048xf32>
    %241 = arith.addf %237, %240 : vector<8x2048xf32>
    %242 = vector.broadcast %15 : f32 to vector<8x2048xf32>
    %243 = arith.mulf %242, %241 : vector<8x2048xf32>
    %c187_i32_89 = arith.constant 187 : i32
    %244 = tpu.dynamic_rotate %209 by %c187_i32_89 dim 1 : vector<8x2048xf32>, i32 -> vector<8x2048xf32>
    %cst_90 = arith.constant 0.000000e+00 : f32
    %245 = vector.broadcast %cst_90 : f32 to vector<8x2048xf32>
    %246 = arith.select %8, %244, %245 : vector<8x2048xi1>, vector<8x2048xf32>
    %247 = vector.broadcast %17 : f32 to vector<8x2048xf32>
    %248 = arith.mulf %247, %246 : vector<8x2048xf32>
    %c188_i32_91 = arith.constant 188 : i32
    %249 = tpu.dynamic_rotate %209 by %c188_i32_91 dim 1 : vector<8x2048xf32>, i32 -> vector<8x2048xf32>
    %cst_92 = arith.constant 0.000000e+00 : f32
    %250 = vector.broadcast %cst_92 : f32 to vector<8x2048xf32>
    %251 = arith.select %10, %249, %250 : vector<8x2048xi1>, vector<8x2048xf32>
    %252 = vector.broadcast %18 : f32 to vector<8x2048xf32>
    %253 = arith.mulf %252, %251 : vector<8x2048xf32>
    %254 = arith.addf %248, %253 : vector<8x2048xf32>
    %c189_i32_93 = arith.constant 189 : i32
    %255 = tpu.dynamic_rotate %209 by %c189_i32_93 dim 1 : vector<8x2048xf32>, i32 -> vector<8x2048xf32>
    %cst_94 = arith.constant 0.000000e+00 : f32
    %256 = vector.broadcast %cst_94 : f32 to vector<8x2048xf32>
    %257 = arith.select %12, %255, %256 : vector<8x2048xi1>, vector<8x2048xf32>
    %258 = vector.broadcast %19 : f32 to vector<8x2048xf32>
    %259 = arith.mulf %258, %257 : vector<8x2048xf32>
    %260 = arith.addf %254, %259 : vector<8x2048xf32>
    %c190_i32_95 = arith.constant 190 : i32
    %261 = tpu.dynamic_rotate %209 by %c190_i32_95 dim 1 : vector<8x2048xf32>, i32 -> vector<8x2048xf32>
    %cst_96 = arith.constant 0.000000e+00 : f32
    %262 = vector.broadcast %cst_96 : f32 to vector<8x2048xf32>
    %263 = arith.select %14, %261, %262 : vector<8x2048xi1>, vector<8x2048xf32>
    %264 = vector.broadcast %20 : f32 to vector<8x2048xf32>
    %265 = arith.mulf %264, %263 : vector<8x2048xf32>
    %266 = arith.addf %260, %265 : vector<8x2048xf32>
    %267 = arith.addf %233, %266 : vector<8x2048xf32>
    %268 = arith.addf %234, %243 : vector<8x2048xf32>
    %c7_i32 = arith.constant 7 : i32
    %c69_i32_97 = arith.constant 69 : i32
    %269 = tpu.dynamic_rotate %266 by %c69_i32_97 dim 1 : vector<8x2048xf32>, i32 -> vector<8x2048xf32>
    %cst_98 = arith.constant 0.000000e+00 : f32
    %270 = vector.broadcast %cst_98 : f32 to vector<8x2048xf32>
    %271 = arith.select %4, %269, %270 : vector<8x2048xi1>, vector<8x2048xf32>
    %c70_i32_99 = arith.constant 70 : i32
    %272 = tpu.dynamic_rotate %266 by %c70_i32_99 dim 1 : vector<8x2048xf32>, i32 -> vector<8x2048xf32>
    %cst_100 = arith.constant 0.000000e+00 : f32
    %273 = vector.broadcast %cst_100 : f32 to vector<8x2048xf32>
    %274 = arith.select %6, %272, %273 : vector<8x2048xi1>, vector<8x2048xf32>
    %275 = arith.addf %271, %274 : vector<8x2048xf32>
    %276 = vector.broadcast %15 : f32 to vector<8x2048xf32>
    %277 = arith.mulf %276, %275 : vector<8x2048xf32>
    %c187_i32_101 = arith.constant 187 : i32
    %278 = tpu.dynamic_rotate %243 by %c187_i32_101 dim 1 : vector<8x2048xf32>, i32 -> vector<8x2048xf32>
    %cst_102 = arith.constant 0.000000e+00 : f32
    %279 = vector.broadcast %cst_102 : f32 to vector<8x2048xf32>
    %280 = arith.select %8, %278, %279 : vector<8x2048xi1>, vector<8x2048xf32>
    %281 = vector.broadcast %17 : f32 to vector<8x2048xf32>
    %282 = arith.mulf %281, %280 : vector<8x2048xf32>
    %c188_i32_103 = arith.constant 188 : i32
    %283 = tpu.dynamic_rotate %243 by %c188_i32_103 dim 1 : vector<8x2048xf32>, i32 -> vector<8x2048xf32>
    %cst_104 = arith.constant 0.000000e+00 : f32
    %284 = vector.broadcast %cst_104 : f32 to vector<8x2048xf32>
    %285 = arith.select %10, %283, %284 : vector<8x2048xi1>, vector<8x2048xf32>
    %286 = vector.broadcast %18 : f32 to vector<8x2048xf32>
    %287 = arith.mulf %286, %285 : vector<8x2048xf32>
    %288 = arith.addf %282, %287 : vector<8x2048xf32>
    %c189_i32_105 = arith.constant 189 : i32
    %289 = tpu.dynamic_rotate %243 by %c189_i32_105 dim 1 : vector<8x2048xf32>, i32 -> vector<8x2048xf32>
    %cst_106 = arith.constant 0.000000e+00 : f32
    %290 = vector.broadcast %cst_106 : f32 to vector<8x2048xf32>
    %291 = arith.select %12, %289, %290 : vector<8x2048xi1>, vector<8x2048xf32>
    %292 = vector.broadcast %19 : f32 to vector<8x2048xf32>
    %293 = arith.mulf %292, %291 : vector<8x2048xf32>
    %294 = arith.addf %288, %293 : vector<8x2048xf32>
    %c190_i32_107 = arith.constant 190 : i32
    %295 = tpu.dynamic_rotate %243 by %c190_i32_107 dim 1 : vector<8x2048xf32>, i32 -> vector<8x2048xf32>
    %cst_108 = arith.constant 0.000000e+00 : f32
    %296 = vector.broadcast %cst_108 : f32 to vector<8x2048xf32>
    %297 = arith.select %14, %295, %296 : vector<8x2048xi1>, vector<8x2048xf32>
    %298 = vector.broadcast %20 : f32 to vector<8x2048xf32>
    %299 = arith.mulf %298, %297 : vector<8x2048xf32>
    %300 = arith.addf %294, %299 : vector<8x2048xf32>
    %301 = arith.addf %267, %300 : vector<8x2048xf32>
    %302 = arith.addf %268, %277 : vector<8x2048xf32>
    %c0_109 = arith.constant 0 : index
    %c0_110 = arith.constant 0 : index
    %303 = vector.load %arg3[%c0_109, %c0_110] : memref<8x2048xf32, #tpu.memory_space<vmem>>, vector<8x2048xf32>
    tpu.vector_store %arg3[%c0_109, %c0_110], %301 {strides = array<i32>} : memref<8x2048xf32, #tpu.memory_space<vmem>>, vector<8x2048xf32>,
    %c0_111 = arith.constant 0 : index
    %c0_112 = arith.constant 0 : index
    %304 = vector.load %arg4[%c0_111, %c0_112] : memref<8x2048xf32, #tpu.memory_space<vmem>>, vector<8x2048xf32>
    tpu.vector_store %arg4[%c0_111, %c0_112], %302 {strides = array<i32>} : memref<8x2048xf32, #tpu.memory_space<vmem>>, vector<8x2048xf32>,
    return
  }
  func.func @transform_0(%arg0: i32) -> i32 {
    %c0_i32 = arith.constant 0 : i32
    %c0_i32_0 = arith.constant 0 : i32
    return %c0_i32 : i32
  }
  func.func @transform_1(%arg0: i32) -> (i32, i32) {
    %c0_i32 = arith.constant 0 : i32
    %c0_i32_0 = arith.constant 0 : i32
    return %arg0, %c0_i32 : i32, i32
  }
  func.func @transform_2(%arg0: i32) -> (i32, i32) {
    %c0_i32 = arith.constant 0 : i32
    %c0_i32_0 = arith.constant 0 : i32
    return %arg0, %c0_i32 : i32, i32
  }
  func.func @transform_3(%arg0: i32) -> (i32, i32) {
    %c0_i32 = arith.constant 0 : i32
    %c0_i32_0 = arith.constant 0 : i32
    return %arg0, %c0_i32 : i32, i32
  }
}

</mosaic_0001>

<bundles_post_ra>
// kernel: tpu_custom_call.1
= control target key start
LH: loop header
LB: loop body
LE: loop exit
PB: predicated region body
PF: predicated region fallthrough
CT: control target
= control target key end

     0   :  { %s13257_s0 = inlined_call_operand.<no memory space> [shape: f32[1], index: 0, kind: input, shape index: {}]   ;;  %s13258_s1 = inlined_call_operand.hbm [shape: f32[16,2048], index: 1, kind: input, shape index: {}]   ;;  %s13259_s2 = inlined_call_operand.hbm [shape: f32[16,2048], index: 2, kind: output, shape index: {0}]   ;;  %s13260_s3 = inlined_call_operand.hbm [shape: f32[16,2048], index: 3, kind: output, shape index: {1}]  }
   0x1   :  { %9 = sst [smem:[#allocation2]] %s13257_s0 }
   0x2   :  { %10 = vsyncpa [#allocation4], 0 }
   0x3   :  { %12 = vsyncpa [#allocation4 + $0x1], 0 }
   0x4   :  { %13 = vsyncpa [#allocation5], 0 }
   0x5   :  { %15 = vsyncpa [#allocation5 + $0x1], 0 }
   0x6   :  { %16 = vsyncpa [#allocation8], 0 }
   0x7   :  { %18 = vsyncpa [#allocation8 + $0x1], 0  ;;  %s5386_s14 = smov 0   ;;  %s5388_s15 = smov 0  }
   0x8   :  { %s5390_s16 = smov 0   ;;  %s5392_s17 = smov 0  }
   0x9 LB: > { %s5407_s0 = sadd.s32 4294967295, %s5351_s17   ;;  %s5150_s18 = sadd.s32 4294967294, %s5351_s17   ;;  %s5351_s17 = sphi %s5392_s17, %s15023_s17   ;;  %s5347_s16 = sphi %s5390_s16, %s15022_s16   ;;  %s5343_s15 = sphi %s5388_s15, %s15021_s15   ;;  %s5339_s14 = sphi %s5386_s14, %s15020_s14  }
   0xa   : > { %s5411_s19 = sadd.s32 1, %s5351_s17   ;;  %s52_s20 = sadd.s32 1, %s5347_s16 }
   0xb   : > { %s49_s21 = ssub.s32 %s5351_s17, %s5411_s19  ;;  %p59_p0 = scmp.ne.s32.totalorder %s5347_s16, %s5343_s15 }
   0xc   : > { %p50_p1 = scmp.eq.s32.totalorder %s49_s21, 0  ;;  %p60_p2 = scmp.eq.s32.totalorder %s5351_s17, 0 }
   0xd   : > { %p65_p3 = scmp.ne.s32.totalorder %s5343_s15, %s5339_s14  ;;  %p66_p4 = scmp.eq.s32.totalorder %s5407_s0, 0 }
   0xe   : > { %s5423_s22 = scalar_select %p50_p1, %s5347_s16, %s52_s20  }
   0xf   : > { %p5425_p5 = por %p60_p2, %p59_p0  ;;  %p5429_p6 = por %p66_p4, %p65_p3 }
  0x10   : > { %p89_p7 = scmp.eq.s32.totalorder %s5407_s0, 1  ;;  %p95_p8 = scmp.eq.s32.totalorder %s5150_s18, 1 }
  0x11   : > { %s13813_s24 = scalar_select %p5429_p6, 1, 0 }
  0x12   : > { %p5188_p10 = scmp.lt.s32.totalorder %s5351_s17, 2  ;;  %p5436_p11 = por %p89_p7, %p59_p0 }
  0x13   : > { %p5440_p12 = por %p95_p8, %p65_p3  ;;  %s144_s27 = sand.u32 1, %s5347_s16  }
  0x14   : > { %s13814_s25 = scalar_select %p5436_p11, 1, 0 }
  0x15   : > { %s13815_s26 = scalar_select %p5440_p12, 1, 0 }
  0x16   : > { %s5168_s28 = sshll.u32 %s5351_s17, 11  ;;  %s5153_s29 = sshll.u32 %s144_s27, 7 }
  0x17   : > { %s5449_s5 = scalar_lea.hbm %s13258_s1, %s5168_s28  ;;  %s148_s6 = scalar_lea.vmem [#allocation3], %s5153_s29 }
  0x18   : > { %s156_s7 = sshll.u32 %s148_s6, 4  ;;  %p5453_p13 = pnand %p5188_p10, %p5425_p5  ;;  %s5457_s7 = int_to_ptr.vmem [resolvable:$true] %s156_s7 }
  0x19   : > { %s145_s9 = scalar_lea.sflag [#allocation4], %s144_s27  ;;  %s5229_s10 = scalar_lea.hbm %s5449_s5, 2048 }
  0x1a   : > { %p5230_p2 = scmp.ne.s32.totalorder %s5449_s5, %s5229_s10  ;;  %p5231_p3 = pneg %p5453_p13 }
  0x1b   : > { %s5234_s13 = scalar_lea.hbm %s13258_s1, 4096  ;;  %p5235_p5 = scmp.lt.s32.totalorder %s5449_s5, %s13258_s1 }
  0x1c   : > { %p5232_p4 = pnand %p5231_p3, %p5230_p2  ;;  %p5236_p8 = scmp.lt.s32.totalorder %s5234_s13, %s5229_s10 }
  0x1e   : > { %p5233_p7 = pneg %p5232_p4  ;;  %p5237_p10 = por %p5236_p8, %p5235_p5 }
  0x20   : > { %p5238_p9 = pnand %p5237_p10, %p5233_p7 }
  0x22   : > { %5241 = shalt.err (!%p5238_p9)
}
  0x23   : > { %s5242_s21 = scalar_lea.vmem %s5457_s7, 2048  ;;  %s5353_s23 = smov [#allocation3]  }
  0x24   : > { %p5243_p0 = scmp.ne.s32.totalorder %s5457_s7, %s5242_s21  ;;  %s5247_s27 = sshll.u32 %s5353_s23, 4  ;;  %s5248_s27 = int_to_ptr.vmem [resolvable:$false] %s5247_s27 }
  0x25   : > { %s5249_s28 = scalar_lea.vmem %s5248_s27, 4096  ;;  %p5250_p4 = scmp.lt.s32.totalorder %s5457_s7, %s5248_s27 }
  0x26   : > { %p5245_p1 = pnand %p5243_p0, %p5231_p3  ;;  %p5251_p12 = scmp.lt.s32.totalorder %s5249_s28, %s5242_s21 }
  0x28   : > { %p5246_p2 = pneg %p5245_p1  ;;  %p5252_p11 = por %p5251_p12, %p5250_p4 }
  0x2a   : > { %p5253_p6 = pnand %p5252_p11, %p5246_p2 }
  0x2c   : > { %5256 = shalt.err (!%p5253_p6)
}
  0x2d   : > { %5180 = dma.hbm_to_vmem [thread:$0]  (!%p5453_p13), %s5449_s5, 2048, %s5457_s7, %s145_s9  }
  0x2e   : > { %p13817_p9 = scmp.lt.s32.totalorder %s5351_s17, 3  ;;  %p13818_p7 = scmp.ge.s32.totalorder %s5351_s17, 1 }
  0x30   : > { %p162_p0 = pnand %p13818_p7, %p13817_p9 }
  0x32   : > { %165 = sbr.rel (%p162_p0) target bundleno = 2678 (0xa76), region = 28 }
  0x37   : > { %s5484_s29 = sand.u32 1, %s5343_s15   ;;  %p13819_p6 = scmp.ne.s32.totalorder %s13813_s24, 0 }
  0x38   : > { %s5487_s30 = sshll.u32 %s5484_s29, 7  ;;  %s168_s4 = scalar_lea.sflag [#allocation4], %s5484_s29 }
  0x39   : > { %s5491_s6 = scalar_lea.vmem [#allocation3], %s5487_s30 }
  0x3a   : > { %5326 = dma.done.wait (%p13819_p6), %s168_s4, 2048  }
  0x3b   : > { %5328 = vsyncadd (%p13819_p6), %s168_s4, 4294965248  ;;  %v202_v0 = vld [vmem:[%s5491_s6 + $0x10] sm:$0xff]  ;;  %v200_v1 = vld [vmem:[%s5491_s6] sm:$0xff]  ;;  %s5354_s5 = smov 69   ;;  %s5355_s24 = smov 59   ;;  %v216_v16 = vlaneseq }
  0x3c   : > { %337 = vrot.lane.b32.xlu1 %v202_v0, %s5354_s5  ;;  %333 = vrot.lane.b32.xlu0 %v200_v1, %s5354_s5  ;;  %v203_v2 = vld [vmem:[%s5491_s6 + $0x18] sm:$0xff]  ;;  %v201_v3 = vld [vmem:[%s5491_s6 + $0x8] sm:$0xff]  ;;  %s5545_s7 = sld [smem:[#allocation2]]  ;;  %s5356_s11 = smov 70  }
  0x3d   : > { %v205_v4 = vld [vmem:[%s5491_s6 + $0x28] sm:$0xff]  ;;  %v204_v5 = vld [vmem:[%s5491_s6 + $0x20] sm:$0xff]  ;;  %v207_v6 = vld [vmem:[%s5491_s6 + $0x38] sm:$0xff]  ;;  %v5547_v17 = vand.u32 127, %v216_v16  ;;  %s5681_s12 = scalar_lea.vmem [#allocation6], %s5487_s30  ;;  %s5358_s13 = smov 60  }
  0x3e   : > { %v206_v7 = vld [vmem:[%s5491_s6 + $0x30] sm:$0xff]  ;;  %v209_v8 = vld [vmem:[%s5491_s6 + $0x48] sm:$0xff]  ;;  %v208_v9 = vld [vmem:[%s5491_s6 + $0x40] sm:$0xff]  ;;  %s5359_s18 = smov 61   ;;  %s5360_s20 = smov 62  }
  0x3f   : > { %v211_v10 = vld [vmem:[%s5491_s6 + $0x58] sm:$0xff]  ;;  %v210_v11 = vld [vmem:[%s5491_s6 + $0x50] sm:$0xff]  ;;  %v213_v12 = vld [vmem:[%s5491_s6 + $0x68] sm:$0xff]  ;;  %vm365_vm0 = vcmp.lt.s32.totalorder %v5547_v17, 69  ;;  %vm233_vm1 = vcmp.ge.s32.totalorder %v5547_v17, 69  ;;  %vm446_vm2 = vcmp.lt.s32.totalorder %v5547_v17, 59 }
  0x40   : > { %339 = vrot.lane.b32.xlu1 %v203_v2, %s5354_s5  ;;  %335 = vrot.lane.b32.xlu0 %v201_v3, %s5354_s5  ;;  %v212_v13 = vld [vmem:[%s5491_s6 + $0x60] sm:$0xff]  ;;  %v215_v14 = vld [vmem:[%s5491_s6 + $0x78] sm:$0xff]  ;;  %vm770_vm4 = vcmp.lt.s32.totalorder %v5547_v17, 60  ;;  %vm868_vm5 = vcmp.lt.s32.totalorder %v5547_v17, 61  ;;  %vm965_vm6 = vcmp.lt.s32.totalorder %v5547_v17, 62  ;;  %vm591_vm10 = vcmp.lt.s32.totalorder %v5547_v17, 70 }
  0x41   : > { %v214_v15 = vld [vmem:[%s5491_s6 + $0x70] sm:$0xff]  ;;  %vm249_vm11 = vcmp.ge.s32.totalorder %v5547_v17, 70  ;;  %s12556_s23 = scalar_lea.vmem [#allocation7], %s5487_s30  ;;  %s5169_s27 = sshll.u32 %s5407_s0, 11 }
  0x42   : > { %s330_s8 = smul.f32 -0.475, %s5545_s7  ;;  %s12772_s4 = scalar_lea.hbm %s13260_s3, %s5169_s27 }
  0x43   : > { %s329_s21 = smul.f32 -0.4985, %s5545_s7  ;;  %s5048_s6 = sshll.u32 %s12556_s23, 4  ;;  %s5049_s6 = int_to_ptr.vmem [resolvable:$true] %s5048_s6 }
  0x44   : > { %343 = vrot.lane.b32.xlu1 %v205_v4, %s5354_s5  ;;  %341 = vrot.lane.b32.xlu0 %v204_v5, %s5354_s5  ;;  %s331_s9 = smul.f32 0.05, %s330_s8  ;;  %p14949_p12 = scmp.ne.s32.totalorder %s13814_s25, 0 }
  0x45   : > { %s332_s10 = smul.f32 0.95, %s330_s8  ;;  %s5361_s7 = smov [#allocation7]  }
  0x46   : > { %v5586_v38 = vstv %s331_s9  ;;  %s5261_s8 = sshll.u32 %s5361_s7, 4  ;;  %s5262_s8 = int_to_ptr.vmem [resolvable:$false] %s5261_s8 }
  0x47   : > { %13825 = vst [vmem:[#allocation17_spill] sm:$0xff] %v5586_v38  ;;  %v5588_v39 = vstv %s332_s10  ;;  %v722_v46 = vmul.f32 0.0, %v5586_v38  ;;  %s5263_s9 = scalar_lea.vmem %s5262_s8, 4096  ;;  %p5264_p3 = scmp.lt.s32.totalorder %s5049_s6, %s5262_s8 }
  0x48   : > { %347 = vrot.lane.b32.xlu1 %v207_v6, %s5354_s5  ;;  %345 = vrot.lane.b32.xlu0 %v206_v7, %s5354_s5  ;;  %13826 = vst [vmem:[#allocation18_spill] sm:$0xff] %v5588_v39  ;;  %v804_v47 = vmul.f32 0.0, %v5588_v39 }
  0x4a   : > { %v820_v54 = vadd.f32 %v804_v47, %v722_v46 }
  0x4c   : > { %351 = vrot.lane.b32.xlu1 %v209_v8, %s5354_s5  ;;  %349 = vrot.lane.b32.xlu0 %v208_v9, %s5354_s5  ;;  %v917_v61 = vadd.f32 %v820_v54, %v804_v47 }
  0x50   : > { %355 = vrot.lane.b32.xlu1 %v211_v10, %s5354_s5  ;;  %353 = vrot.lane.b32.xlu0 %v210_v11, %s5354_s5 }
  0x54   : > { %359 = vrot.lane.b32.xlu1 %v213_v12, %s5354_s5  ;;  %357 = vrot.lane.b32.xlu0 %v212_v13, %s5354_s5 }
  0x58   : > { %363 = vrot.lane.b32.xlu1 %v215_v14, %s5354_s5  ;;  %361 = vrot.lane.b32.xlu0 %v214_v15, %s5354_s5 }
  0x5c   : > { %414 = vrot.lane.b32.xlu0 %v200_v1, %s5355_s24  ;;  %416 = vrot.lane.b32.xlu1 %v201_v3, %s5355_s24 }
  0x60   : > { %418 = vrot.lane.b32.xlu0 %v202_v0, %s5355_s24  ;;  %420 = vrot.lane.b32.xlu1 %v203_v2, %s5355_s24 }
  0x64   : > { %422 = vrot.lane.b32.xlu0 %v204_v5, %s5355_s24  ;;  %424 = vrot.lane.b32.xlu1 %v205_v4, %s5355_s24  ;;  %v5644_v5 = vadd.f32 %v917_v61, %v722_v46  ;;  %v5357_v46 = vmov 0.0  }
  0x66   : > { %13835 = vst [vmem:[#allocation27_spill] sm:$0xff] %v5644_v5 }
  0x68   : > { %426 = vrot.lane.b32.xlu0 %v206_v7, %s5355_s24  ;;  %428 = vrot.lane.b32.xlu1 %v207_v6, %s5355_s24 }
  0x6c   : > { %430 = vrot.lane.b32.xlu0 %v208_v9, %s5355_s24  ;;  %432 = vrot.lane.b32.xlu1 %v209_v8, %s5355_s24 }
  0x70   : > { %434 = vrot.lane.b32.xlu0 %v210_v11, %s5355_s24  ;;  %436 = vrot.lane.b32.xlu1 %v211_v10, %s5355_s24 }
  0x74   : > { %438 = vrot.lane.b32.xlu0 %v212_v13, %s5355_s24  ;;  %440 = vrot.lane.b32.xlu1 %v213_v12, %s5355_s24 }
  0x78   : > { %442 = vrot.lane.b32.xlu0 %v214_v15, %s5355_s24  ;;  %444 = vrot.lane.b32.xlu1 %v215_v14, %s5355_s24 }
  0xae   : > { %v338_v18 = vpop.permute.xlu1 %337  ;;  %v5549_v19 = vpop.permute.xlu0 %333 }
  0xb2   : > { %v340_v20 = vpop.permute.xlu1 %339  ;;  %v336_v21 = vpop.permute.xlu0 %335 }
  0xb3   : > { %v379_v22 = vsel %vm365_vm0, %v336_v21, %v338_v18  ;;  %v380_v23 = vsel %vm365_vm0, %v5549_v19, %v336_v21  ;;  %v378_v26 = vsel %vm365_vm0, %v338_v18, %v340_v20 }
  0xb4   : > { %v5558_v24 = vmul.f32 0.5, %v380_v23  ;;  %v5560_v25 = vmul.f32 0.5, %v379_v22  ;;  %v5572_v31 = vmul.f32 0.5, %v378_v26 }
  0xb6   : > { %13820 = vst [vmem:[#allocation12_spill] sm:$0xff] %v5558_v24  ;;  %13821 = vst [vmem:[#allocation13_spill] sm:$0xff] %v5560_v25  ;;  %v344_v27 = vpop.permute.xlu1 %343  ;;  %497 = vrot.lane.b32.xlu1 %v5558_v24, %s5354_s5  ;;  %499 = vrot.lane.b32.xlu0 %v5560_v25, %s5354_s5  ;;  %v342_v28 = vpop.permute.xlu0 %341 }
  0xb7   : > { %v376_v29 = vsel %vm365_vm0, %v342_v28, %v344_v27  ;;  %v377_v30 = vsel %vm365_vm0, %v340_v20, %v342_v28  ;;  %13822 = vst [vmem:[#allocation14_spill] sm:$0xff] %v5572_v31 }
  0xb8   : > { %v5574_v32 = vmul.f32 0.5, %v377_v30  ;;  %v5576_v33 = vmul.f32 0.5, %v376_v29  ;;  %v5693_v30 = vadd.s32 128, %v5547_v17 }
  0xba   : > { %13823 = vst [vmem:[#allocation15_spill] sm:$0xff] %v5574_v32  ;;  %13824 = vst [vmem:[#allocation16_spill] sm:$0xff] %v5576_v33  ;;  %v348_v34 = vpop.permute.xlu1 %347  ;;  %501 = vrot.lane.b32.xlu1 %v5572_v31, %s5354_s5  ;;  %503 = vrot.lane.b32.xlu0 %v5574_v32, %s5354_s5  ;;  %v346_v35 = vpop.permute.xlu0 %345  ;;  %vm266_vm3 = vcmp.ge.s32.totalorder %v5693_v30, 187  ;;  %vm282_vm7 = vcmp.ge.s32.totalorder %v5693_v30, 188  ;;  %vm298_vm8 = vcmp.ge.s32.totalorder %v5693_v30, 189  ;;  %vm314_vm9 = vcmp.ge.s32.totalorder %v5693_v30, 190 }
  0xbb   : > { %v374_v36 = vsel %vm365_vm0, %v346_v35, %v348_v34  ;;  %v375_v37 = vsel %vm365_vm0, %v344_v27, %v346_v35  ;;  %13838 = vst [vmem:[#allocation30_spill] sm:$0xff] %v5693_v30 }
  0xbc   : > { %v5590_v40 = vmul.f32 0.5, %v375_v37  ;;  %v5592_v41 = vmul.f32 0.5, %v374_v36 }
  0xbe   : > { %13827 = vst [vmem:[#allocation19_spill] sm:$0xff] %v5590_v40  ;;  %13828 = vst [vmem:[#allocation20_spill] sm:$0xff] %v5592_v41  ;;  %v352_v42 = vpop.permute.xlu1 %351  ;;  %505 = vrot.lane.b32.xlu1 %v5576_v33, %s5354_s5  ;;  %507 = vrot.lane.b32.xlu0 %v5590_v40, %s5354_s5  ;;  %v350_v43 = vpop.permute.xlu0 %349 }
  0xbf   : > { %v372_v44 = vsel %vm365_vm0, %v350_v43, %v352_v42  ;;  %v373_v45 = vsel %vm365_vm0, %v348_v34, %v350_v43 }
  0xc0   : > { %v5604_v48 = vmul.f32 0.5, %v373_v45  ;;  %v5606_v49 = vmul.f32 0.5, %v372_v44 }
  0xc2   : > { %13829 = vst [vmem:[#allocation21_spill] sm:$0xff] %v5604_v48  ;;  %13830 = vst [vmem:[#allocation22_spill] sm:$0xff] %v5606_v49  ;;  %v356_v50 = vpop.permute.xlu1 %355  ;;  %509 = vrot.lane.b32.xlu1 %v5592_v41, %s5354_s5  ;;  %511 = vrot.lane.b32.xlu0 %v5604_v48, %s5354_s5  ;;  %v354_v51 = vpop.permute.xlu0 %353 }
  0xc3   : > { %v370_v52 = vsel %vm365_vm0, %v354_v51, %v356_v50  ;;  %v371_v53 = vsel %vm365_vm0, %v352_v42, %v354_v51 }
  0xc4   : > { %v5616_v55 = vmul.f32 0.5, %v371_v53  ;;  %v5618_v56 = vmul.f32 0.5, %v370_v52 }
  0xc6   : > { %13831 = vst [vmem:[#allocation23_spill] sm:$0xff] %v5616_v55  ;;  %13832 = vst [vmem:[#allocation24_spill] sm:$0xff] %v5618_v56  ;;  %v360_v57 = vpop.permute.xlu1 %359  ;;  %513 = vrot.lane.b32.xlu1 %v5606_v49, %s5354_s5  ;;  %515 = vrot.lane.b32.xlu0 %v5616_v55, %s5354_s5  ;;  %v358_v58 = vpop.permute.xlu0 %357 }
  0xc7   : > { %v368_v59 = vsel %vm365_vm0, %v358_v58, %v360_v57  ;;  %v369_v60 = vsel %vm365_vm0, %v356_v50, %v358_v58 }
  0xc8   : > { %v5628_v62 = vmul.f32 0.5, %v369_v60  ;;  %v5631_v63 = vmul.f32 0.5, %v368_v59 }
  0xca   : > { %13833 = vst [vmem:[#allocation25_spill] sm:$0xff] %v5628_v62  ;;  %13834 = vst [vmem:[#allocation26_spill] sm:$0xff] %v5631_v63  ;;  %v364_v0 = vpop.permute.xlu1 %363  ;;  %517 = vrot.lane.b32.xlu1 %v5618_v56, %s5354_s5  ;;  %519 = vrot.lane.b32.xlu0 %v5628_v62, %s5354_s5  ;;  %v362_v1 = vpop.permute.xlu0 %361 }
  0xcb   : > { %v381_v2 = vsel %vm365_vm0, %v364_v0, %v5549_v19  ;;  %v366_v3 = vsel %vm365_vm0, %v362_v1, %v364_v0  ;;  %v367_v4 = vsel %vm365_vm0, %v360_v57, %v362_v1 }
  0xcc   : > { %v5646_v6 = vmul.f32 0.5, %v367_v4  ;;  %v382_v7 = vsel %vm233_vm1, %v381_v2, 0.0  ;;  %v5650_v9 = vmul.f32 0.5, %v366_v3 }
  0xcd   : > { %v398_v8 = vmul.f32 0.5, %v382_v7 }
  0xce   : > { %13836 = vst [vmem:[#allocation28_spill] sm:$0xff] %v5646_v6  ;;  %13837 = vst [vmem:[#allocation29_spill] sm:$0xff] %v5650_v9  ;;  %521 = vrot.lane.b32.xlu1 %v5631_v63, %s5354_s5  ;;  %523 = vrot.lane.b32.xlu0 %v5646_v6, %s5354_s5  ;;  %v417_v10 = vpop.permute.xlu1 %416  ;;  %v415_v26 = vpop.permute.xlu0 %414 }
  0xcf   : > { %v1030_v11 = vadd.f32 %v5644_v5, %v398_v8  ;;  %v461_v44 = vsel %vm446_vm2, %v415_v26, %v417_v10 }
  0xd0   : > { %v5721_v47 = vmul.f32 0.5, %v461_v44 }
  0xd1   : > { %v1590_v12 = vadd.f32 %v1030_v11, %v5644_v5 }
  0xd2   : > { %563 = vrot.lane.b32.xlu0 %v5560_v25, %s5356_s11  ;;  %525 = vrot.lane.b32.xlu1 %v5650_v9, %s5354_s5  ;;  %v421_v13 = vpop.permute.xlu1 %420  ;;  %v419_v28 = vpop.permute.xlu0 %418  ;;  %13840 = vst [vmem:[#allocation32_spill] sm:$0xff] %v5721_v47 }
  0xd3   : > { %v2150_v14 = vadd.f32 %v1590_v12, %v5644_v5  ;;  %v460_v45 = vsel %vm446_vm2, %v417_v10, %v419_v28  ;;  %v459_v52 = vsel %vm446_vm2, %v419_v28, %v421_v13 }
  0xd4   : > { %v5723_v50 = vmul.f32 0.5, %v460_v45  ;;  %v5733_v54 = vmul.f32 0.5, %v459_v52 }
  0xd5   : > { %v2710_v15 = vadd.f32 %v2150_v14, %v5644_v5 }
  0xd6   : > { %567 = vrot.lane.b32.xlu0 %v5574_v32, %s5356_s11  ;;  %561 = vrot.lane.b32.xlu1 %v5558_v24, %s5356_s11  ;;  %v425_v16 = vpop.permute.xlu1 %424  ;;  %v423_v35 = vpop.permute.xlu0 %422  ;;  %13841 = vst [vmem:[#allocation33_spill] sm:$0xff] %v5723_v50  ;;  %13842 = vst [vmem:[#allocation34_spill] sm:$0xff] %v5733_v54 }
  0xd7   : > { %v3270_v18 = vadd.f32 %v2710_v15, %v5644_v5  ;;  %v458_v53 = vsel %vm446_vm2, %v421_v13, %v423_v35  ;;  %v457_v58 = vsel %vm446_vm2, %v423_v35, %v425_v16 }
  0xd8   : > { %v5735_v57 = vmul.f32 0.5, %v458_v53  ;;  %v5745_v61 = vmul.f32 0.5, %v457_v58 }
  0xd9   : > { %v3830_v19 = vadd.f32 %v3270_v18, %v5644_v5 }
  0xda   : > { %571 = vrot.lane.b32.xlu0 %v5590_v40, %s5356_s11  ;;  %565 = vrot.lane.b32.xlu1 %v5572_v31, %s5356_s11  ;;  %v429_v20 = vpop.permute.xlu1 %428  ;;  %v427_v42 = vpop.permute.xlu0 %426  ;;  %13843 = vst [vmem:[#allocation35_spill] sm:$0xff] %v5735_v57  ;;  %13844 = vst [vmem:[#allocation36_spill] sm:$0xff] %v5745_v61 }
  0xdb   : > { %v4390_v21 = vadd.f32 %v3830_v19, %v5644_v5  ;;  %v456_v59 = vsel %vm446_vm2, %v425_v16, %v427_v42  ;;  %v455_v1 = vsel %vm446_vm2, %v427_v42, %v429_v20 }
  0xdc   : > { %v5747_v0 = vmul.f32 0.5, %v456_v59  ;;  %v5757_v3 = vmul.f32 0.5, %v455_v1 }
  0xdd   : > { %v4950_v22 = vadd.f32 %v4390_v21, %v5644_v5 }
  0xde   : > { %575 = vrot.lane.b32.xlu0 %v5604_v48, %s5356_s11  ;;  %569 = vrot.lane.b32.xlu1 %v5576_v33, %s5356_s11  ;;  %v433_v23 = vpop.permute.xlu1 %432  ;;  %v431_v51 = vpop.permute.xlu0 %430  ;;  %13845 = vst [vmem:[#allocation37_spill] sm:$0xff] %v5747_v0  ;;  %13846 = vst [vmem:[#allocation38_spill] sm:$0xff] %v5757_v3 }
  0xdf   : > { %4982 = vst [vmem:[%s5681_s12] sm:$0xff] %v4950_v22  ;;  %v454_v2 = vsel %vm446_vm2, %v429_v20, %v431_v51 }
  0xe0   : > { %v5759_v4 = vmul.f32 0.5, %v454_v2 }
  0xe2   : > { %579 = vrot.lane.b32.xlu0 %v5616_v55, %s5356_s11  ;;  %573 = vrot.lane.b32.xlu1 %v5592_v41, %s5356_s11  ;;  %v437_v27 = vpop.permute.xlu1 %436  ;;  %v435_v60 = vpop.permute.xlu0 %434  ;;  %13847 = vst [vmem:[#allocation39_spill] sm:$0xff] %v5759_v4 }
  0xe3   : > { %v452_v10 = vsel %vm446_vm2, %v433_v23, %v435_v60  ;;  %v451_v13 = vsel %vm446_vm2, %v435_v60, %v437_v27 }
  0xe4   : > { %v5771_v12 = vmul.f32 0.5, %v452_v10  ;;  %v5781_v16 = vmul.f32 0.5, %v451_v13 }
  0xe6   : > { %583 = vrot.lane.b32.xlu0 %v5628_v62, %s5356_s11  ;;  %577 = vrot.lane.b32.xlu1 %v5606_v49, %s5356_s11  ;;  %v441_v29 = vpop.permute.xlu1 %440  ;;  %v439_v7 = vpop.permute.xlu0 %438  ;;  %13849 = vst [vmem:[#allocation41_spill] sm:$0xff] %v5771_v12  ;;  %13850 = vst [vmem:[#allocation42_spill] sm:$0xff] %v5781_v16 }
  0xe7   : > { %v450_v14 = vsel %vm446_vm2, %v437_v27, %v439_v7  ;;  %v449_v19 = vsel %vm446_vm2, %v439_v7, %v441_v29 }
  0xe8   : > { %v5783_v18 = vmul.f32 0.5, %v450_v14  ;;  %v5793_v21 = vmul.f32 0.5, %v449_v19 }
  0xea   : > { %587 = vrot.lane.b32.xlu0 %v5646_v6, %s5356_s11  ;;  %581 = vrot.lane.b32.xlu1 %v5618_v56, %s5356_s11  ;;  %v445_v34 = vpop.permute.xlu1 %444  ;;  %v443_v15 = vpop.permute.xlu0 %442  ;;  %13851 = vst [vmem:[#allocation43_spill] sm:$0xff] %v5783_v18  ;;  %13852 = vst [vmem:[#allocation44_spill] sm:$0xff] %v5793_v21 }
  0xeb   : > { %v462_v36 = vsel %vm446_vm2, %v445_v34, %v415_v26  ;;  %v448_v20 = vsel %vm446_vm2, %v441_v29, %v443_v15 }
  0xec   : > { %v464_v37 = vsel %vm266_vm3, %v462_v36, 0.0  ;;  %v5795_v22 = vmul.f32 0.5, %v448_v20 }
  0xed   : > { %v5708_v43 = vmul.f32 0.5, %v464_v37 }
  0xee   : > { %495 = vrot.lane.b32.xlu0 %v398_v8, %s5354_s5  ;;  %585 = vrot.lane.b32.xlu1 %v5631_v63, %s5356_s11  ;;  %13853 = vst [vmem:[#allocation45_spill] sm:$0xff] %v5795_v22 }
  0xef   : > { %13839 = vst [vmem:[#allocation31_spill] sm:$0xff] %v5708_v43 }
  0xf1   : > { %v14845_v30 = vld [vmem:[#allocation44_spill] sm:$0xff] }
  0xf2   : > { %559 = vrot.lane.b32.xlu0 %v398_v8, %s5356_s11  ;;  %589 = vrot.lane.b32.xlu1 %v5650_v9, %s5356_s11  ;;  %v453_v8 = vsel %vm446_vm2, %v431_v51, %v433_v23 }
  0xf3   : > { %v5769_v11 = vmul.f32 0.5, %v453_v8 }
  0xf5   : > { %13848 = vst [vmem:[#allocation40_spill] sm:$0xff] %v5769_v11 }
  0xf6   : > { %657 = vrot.lane.b32.xlu0 %v5357_v46, %s5355_s24  ;;  %659 = vrot.lane.b32.xlu1 %v5708_v43, %s5355_s24 }
  0xfa   : > { %661 = vrot.lane.b32.xlu0 %v5721_v47, %s5355_s24  ;;  %663 = vrot.lane.b32.xlu1 %v5723_v50, %s5355_s24 }
  0xfe   : > { %665 = vrot.lane.b32.xlu0 %v5733_v54, %s5355_s24  ;;  %667 = vrot.lane.b32.xlu1 %v5735_v57, %s5355_s24 }
 0x102   : > { %669 = vrot.lane.b32.xlu0 %v5745_v61, %s5355_s24  ;;  %671 = vrot.lane.b32.xlu1 %v5747_v0, %s5355_s24 }
 0x106   : > { %673 = vrot.lane.b32.xlu0 %v5757_v3, %s5355_s24  ;;  %675 = vrot.lane.b32.xlu1 %v5759_v4, %s5355_s24 }
 0x10a   : > { %677 = vrot.lane.b32.xlu0 %v5769_v11, %s5355_s24  ;;  %679 = vrot.lane.b32.xlu1 %v5771_v12, %s5355_s24 }
 0x10e   : > { %681 = vrot.lane.b32.xlu0 %v5781_v16, %s5355_s24  ;;  %683 = vrot.lane.b32.xlu1 %v5783_v18, %s5355_s24 }
 0x112   : > { %685 = vrot.lane.b32.xlu0 %v5793_v21, %s5355_s24  ;;  %687 = vrot.lane.b32.xlu1 %v5795_v22, %s5355_s24 }
 0x116   : > { %738 = vrot.lane.b32.xlu0 %v5357_v46, %s5358_s13  ;;  %740 = vrot.lane.b32.xlu1 %v5708_v43, %s5358_s13 }
 0x11a   : > { %742 = vrot.lane.b32.xlu0 %v5721_v47, %s5358_s13  ;;  %744 = vrot.lane.b32.xlu1 %v5723_v50, %s5358_s13 }
 0x11e   : > { %746 = vrot.lane.b32.xlu0 %v5733_v54, %s5358_s13  ;;  %748 = vrot.lane.b32.xlu1 %v5735_v57, %s5358_s13 }
 0x122   : > { %750 = vrot.lane.b32.xlu0 %v5745_v61, %s5358_s13  ;;  %752 = vrot.lane.b32.xlu1 %v5747_v0, %s5358_s13 }
 0x126   : > { %754 = vrot.lane.b32.xlu0 %v5757_v3, %s5358_s13  ;;  %756 = vrot.lane.b32.xlu1 %v5759_v4, %s5358_s13 }
 0x128   : > { %v5821_v23 = vpop.permute.xlu1 %497  ;;  %v5823_v26 = vpop.permute.xlu0 %499 }
 0x129   : > { %13854 = vst [vmem:[#allocation46_spill] sm:$0xff] %v5821_v23  ;;  %13855 = vst [vmem:[#allocation47_spill] sm:$0xff] %v5823_v26 }
 0x12a   : > { %758 = vrot.lane.b32.xlu0 %v5769_v11, %s5358_s13  ;;  %760 = vrot.lane.b32.xlu1 %v5771_v12, %s5358_s13 }
 0x12c   : > { %v5829_v27 = vpop.permute.xlu1 %501  ;;  %v5831_v28 = vpop.permute.xlu0 %503 }
 0x12d   : > { %13856 = vst [vmem:[#allocation48_spill] sm:$0xff] %v5829_v27  ;;  %13857 = vst [vmem:[#allocation49_spill] sm:$0xff] %v5831_v28 }
 0x12e   : > { %762 = vrot.lane.b32.xlu0 %v5781_v16, %s5358_s13  ;;  %764 = vrot.lane.b32.xlu1 %v5783_v18, %s5358_s13 }
 0x130   : > { %v5837_v29 = vpop.permute.xlu1 %505  ;;  %v5839_v34 = vpop.permute.xlu0 %507 }
 0x131   : > { %13858 = vst [vmem:[#allocation50_spill] sm:$0xff] %v5837_v29  ;;  %13859 = vst [vmem:[#allocation51_spill] sm:$0xff] %v5839_v34 }
 0x132   : > { %766 = vrot.lane.b32.xlu0 %v5793_v21, %s5358_s13  ;;  %768 = vrot.lane.b32.xlu1 %v5795_v22, %s5358_s13 }
 0x134   : > { %v5845_v35 = vpop.permute.xlu1 %509  ;;  %v5847_v36 = vpop.permute.xlu0 %511 }
 0x135   : > { %13860 = vst [vmem:[#allocation52_spill] sm:$0xff] %v5845_v35  ;;  %13861 = vst [vmem:[#allocation53_spill] sm:$0xff] %v5847_v36 }
 0x136   : > { %836 = vrot.lane.b32.xlu0 %v5357_v46, %s5359_s18  ;;  %838 = vrot.lane.b32.xlu1 %v5708_v43, %s5359_s18 }
 0x138   : > { %v5853_v37 = vpop.permute.xlu1 %513  ;;  %v5855_v42 = vpop.permute.xlu0 %515 }
 0x139   : > { %13862 = vst [vmem:[#allocation54_spill] sm:$0xff] %v5853_v37  ;;  %13863 = vst [vmem:[#allocation55_spill] sm:$0xff] %v5855_v42 }
 0x13a   : > { %840 = vrot.lane.b32.xlu0 %v5721_v47, %s5359_s18  ;;  %842 = vrot.lane.b32.xlu1 %v5723_v50, %s5359_s18 }
 0x13c   : > { %v5861_v44 = vpop.permute.xlu1 %517  ;;  %v5863_v45 = vpop.permute.xlu0 %519 }
 0x13d   : > { %13864 = vst [vmem:[#allocation56_spill] sm:$0xff] %v5861_v44  ;;  %13865 = vst [vmem:[#allocation57_spill] sm:$0xff] %v5863_v45 }
 0x13e   : > { %844 = vrot.lane.b32.xlu0 %v5733_v54, %s5359_s18  ;;  %846 = vrot.lane.b32.xlu1 %v5735_v57, %s5359_s18 }
 0x140   : > { %v5869_v51 = vpop.permute.xlu1 %521  ;;  %v5871_v52 = vpop.permute.xlu0 %523 }
 0x141   : > { %13866 = vst [vmem:[#allocation58_spill] sm:$0xff] %v5869_v51  ;;  %13867 = vst [vmem:[#allocation59_spill] sm:$0xff] %v5871_v52 }
 0x142   : > { %848 = vrot.lane.b32.xlu0 %v5745_v61, %s5359_s18  ;;  %850 = vrot.lane.b32.xlu1 %v5747_v0, %s5359_s18 }
 0x144   : > { %v5877_v53 = vpop.permute.xlu1 %525  ;;  %v5879_v58 = vpop.permute.xlu0 %563 }
 0x145   : > { %13868 = vst [vmem:[#allocation60_spill] sm:$0xff] %v5877_v53  ;;  %13869 = vst [vmem:[#allocation61_spill] sm:$0xff] %v5879_v58 }
 0x146   : > { %852 = vrot.lane.b32.xlu0 %v5757_v3, %s5359_s18  ;;  %854 = vrot.lane.b32.xlu1 %v5759_v4, %s5359_s18 }
 0x148   : > { %v5885_v59 = vpop.permute.xlu1 %561  ;;  %v5887_v60 = vpop.permute.xlu0 %567 }
 0x149   : > { %13870 = vst [vmem:[#allocation62_spill] sm:$0xff] %v5885_v59  ;;  %13871 = vst [vmem:[#allocation63_spill] sm:$0xff] %v5887_v60 }
 0x14a   : > { %856 = vrot.lane.b32.xlu0 %v5769_v11, %s5359_s18  ;;  %858 = vrot.lane.b32.xlu1 %v5771_v12, %s5359_s18 }
 0x14c   : > { %v5893_v1 = vpop.permute.xlu1 %565  ;;  %v5895_v2 = vpop.permute.xlu0 %571 }
 0x14d   : > { %13872 = vst [vmem:[#allocation64_spill] sm:$0xff] %v5893_v1  ;;  %13873 = vst [vmem:[#allocation65_spill] sm:$0xff] %v5895_v2 }
 0x14e   : > { %860 = vrot.lane.b32.xlu0 %v5781_v16, %s5359_s18  ;;  %862 = vrot.lane.b32.xlu1 %v5783_v18, %s5359_s18 }
 0x150   : > { %v5901_v7 = vpop.permute.xlu1 %569  ;;  %v5903_v8 = vpop.permute.xlu0 %575 }
 0x151   : > { %13874 = vst [vmem:[#allocation66_spill] sm:$0xff] %v5901_v7  ;;  %13875 = vst [vmem:[#allocation67_spill] sm:$0xff] %v5903_v8 }
 0x152   : > { %864 = vrot.lane.b32.xlu0 %v5793_v21, %s5359_s18  ;;  %866 = vrot.lane.b32.xlu1 %v5795_v22, %s5359_s18 }
 0x154   : > { %v5909_v10 = vpop.permute.xlu1 %573  ;;  %v5911_v13 = vpop.permute.xlu0 %579 }
 0x155   : > { %13876 = vst [vmem:[#allocation68_spill] sm:$0xff] %v5909_v10  ;;  %13877 = vst [vmem:[#allocation69_spill] sm:$0xff] %v5911_v13 }
 0x156   : > { %933 = vrot.lane.b32.xlu0 %v5357_v46, %s5360_s20  ;;  %935 = vrot.lane.b32.xlu1 %v5708_v43, %s5360_s20 }
 0x158   : > { %v5917_v14 = vpop.permute.xlu1 %577  ;;  %v5919_v15 = vpop.permute.xlu0 %583 }
 0x159   : > { %13878 = vst [vmem:[#allocation70_spill] sm:$0xff] %v5917_v14  ;;  %13879 = vst [vmem:[#allocation71_spill] sm:$0xff] %v5919_v15 }
 0x15a   : > { %937 = vrot.lane.b32.xlu0 %v5721_v47, %s5360_s20  ;;  %939 = vrot.lane.b32.xlu1 %v5723_v50, %s5360_s20 }
 0x15c   : > { %v5925_v19 = vpop.permute.xlu1 %581  ;;  %v5927_v20 = vpop.permute.xlu0 %587 }
 0x15d   : > { %13880 = vst [vmem:[#allocation72_spill] sm:$0xff] %v5925_v19  ;;  %13881 = vst [vmem:[#allocation73_spill] sm:$0xff] %v5927_v20 }
 0x15e   : > { %941 = vrot.lane.b32.xlu0 %v5733_v54, %s5360_s20  ;;  %943 = vrot.lane.b32.xlu1 %v5735_v57, %s5360_s20 }
 0x160   : > { %v5933_v46 = vpop.permute.xlu1 %585  ;;  %v5935_v9 = vpop.permute.xlu0 %495 }
 0x161   : > { %13882 = vst [vmem:[#allocation74_spill] sm:$0xff] %v5933_v46  ;;  %13883 = vst [vmem:[#allocation75_spill] sm:$0xff] %v5935_v9 }
 0x162   : > { %945 = vrot.lane.b32.xlu0 %v5745_v61, %s5360_s20  ;;  %947 = vrot.lane.b32.xlu1 %v5747_v0, %s5360_s20 }
 0x164   : > { %v5941_v63 = vpop.permute.xlu1 %589  ;;  %v5943_v56 = vpop.permute.xlu0 %559 }
 0x165   : > { %13884 = vst [vmem:[#allocation76_spill] sm:$0xff] %v5941_v63  ;;  %13885 = vst [vmem:[#allocation77_spill] sm:$0xff] %v5943_v56 }
 0x166   : > { %949 = vrot.lane.b32.xlu0 %v5757_v3, %s5360_s20  ;;  %951 = vrot.lane.b32.xlu1 %v5759_v4, %s5360_s20 }
 0x168   : > { %v5949_v49 = vpop.permute.xlu1 %659  ;;  %v5951_v41 = vpop.permute.xlu0 %657 }
 0x169   : > { %v703_v27 = vsel %vm446_vm2, %v5951_v41, %v5949_v49 }
 0x16a   : > { %953 = vrot.lane.b32.xlu0 %v5769_v11, %s5360_s20  ;;  %955 = vrot.lane.b32.xlu1 %v5771_v12, %s5360_s20  ;;  %v724_v59 = vmul.f32 %v5586_v38, %v703_v27 }
 0x16c   : > { %v5957_v33 = vpop.permute.xlu1 %663  ;;  %v5959_v31 = vpop.permute.xlu0 %661 }
 0x16d   : > { %13886 = vst [vmem:[#allocation78_spill] sm:$0xff] %v5957_v33  ;;  %v701_v58 = vsel %vm446_vm2, %v5959_v31, %v5957_v33 }
 0x16e   : > { %957 = vrot.lane.b32.xlu0 %v5781_v16, %s5360_s20  ;;  %959 = vrot.lane.b32.xlu1 %v5783_v18, %s5360_s20 }
 0x170   : > { %v5965_v43 = vpop.permute.xlu1 %667  ;;  %v5967_v4 = vpop.permute.xlu0 %665 }
 0x172   : > { %961 = vrot.lane.b32.xlu0 %v5793_v21, %s5360_s20  ;;  %963 = vrot.lane.b32.xlu1 %v5795_v22, %s5360_s20 }
 0x174   : > { %v5973_v12 = vpop.permute.xlu1 %671  ;;  %v5975_v11 = vpop.permute.xlu0 %669 }
 0x175   : > { %13887 = vst [vmem:[#allocation79_spill] sm:$0xff] %v5973_v12 }
 0x176   : > { %1062 = vrot.lane.b32.xlu0 %v5644_v5, %s5354_s5 }
 0x178   : > { %v5979_v16 = vpop.permute.xlu1 %675  ;;  %v5981_v18 = vpop.permute.xlu0 %673 }
 0x179   : > { %13888 = vst [vmem:[#allocation80_spill] sm:$0xff] %v5979_v16 }
 0x17c   : > { %v5983_v3 = vpop.permute.xlu1 %679  ;;  %v5985_v0 = vpop.permute.xlu0 %677 }
 0x180   : > { %v5987_v61 = vpop.permute.xlu1 %683  ;;  %v5989_v21 = vpop.permute.xlu0 %681 }
 0x181   : > { %13889 = vst [vmem:[#allocation81_spill] sm:$0xff] %v5987_v61 }
 0x184   : > { %v5991_v22 = vpop.permute.xlu1 %687  ;;  %v5993_v57 = vpop.permute.xlu0 %685 }
 0x185   : > { %13890 = vst [vmem:[#allocation82_spill] sm:$0xff] %v5993_v57 }
 0x188   : > { %v5995_v54 = vpop.permute.xlu1 %740  ;;  %v5997_v50 = vpop.permute.xlu0 %738 }
 0x189   : > { %v785_v2 = vsel %vm770_vm4, %v5997_v50, %v5995_v54 }
 0x18a   : > { %v806_v60 = vmul.f32 %v5588_v39, %v785_v2 }
 0x18c   : > { %v5999_v47 = vpop.permute.xlu1 %744  ;;  %v6001_v24 = vpop.permute.xlu0 %742  ;;  %v822_v63 = vadd.f32 %v806_v60, %v724_v59  ;;  %v699_v59 = vsel %vm446_vm2, %v5967_v4, %v5965_v43 }
 0x18d   : > { %v783_v26 = vsel %vm770_vm4, %v6001_v24, %v5999_v47 }
 0x18e   : > { %v808_v56 = vmul.f32 %v5588_v39, %v783_v26 }
 0x190   : > { %v6003_v6 = vpop.permute.xlu1 %748  ;;  %v6005_v62 = vpop.permute.xlu0 %746 }
 0x191   : > { %13891 = vst [vmem:[#allocation83_spill] sm:$0xff] %v6003_v6 }
 0x194   : > { %v6007_v55 = vpop.permute.xlu1 %752  ;;  %v6009_v48 = vpop.permute.xlu0 %750 }
 0x195   : > { %13892 = vst [vmem:[#allocation84_spill] sm:$0xff] %v6007_v55 }
 0x198   : > { %v6011_v40 = vpop.permute.xlu1 %756  ;;  %v6013_v32 = vpop.permute.xlu0 %754 }
 0x199   : > { %13893 = vst [vmem:[#allocation85_spill] sm:$0xff] %v6011_v40 }
 0x19c   : > { %v6015_v25 = vpop.permute.xlu1 %760  ;;  %v6017_v51 = vpop.permute.xlu0 %758 }
 0x19d   : > { %13894 = vst [vmem:[#allocation86_spill] sm:$0xff] %v6015_v25 }
 0x1a0   : > { %v6019_v52 = vpop.permute.xlu1 %764  ;;  %v6021_v46 = vpop.permute.xlu0 %762 }
 0x1a4   : > { %v6023_v20 = vpop.permute.xlu1 %768  ;;  %v6025_v44 = vpop.permute.xlu0 %766 }
 0x1a5   : > { %13895 = vst [vmem:[#allocation87_spill] sm:$0xff] %v6025_v44 }
 0x1a8   : > { %v6027_v45 = vpop.permute.xlu1 %838  ;;  %v6029_v19 = vpop.permute.xlu0 %836 }
 0x1a9   : > { %v883_v28 = vsel %vm868_vm5, %v6029_v19, %v6027_v45 }
 0x1aa   : > { %v903_v53 = vmul.f32 %v883_v28, %v5588_v39  ;;  %v781_v28 = vsel %vm770_vm4, %v6005_v62, %v6003_v6 }
 0x1ac   : > { %v6031_v15 = vpop.permute.xlu1 %842  ;;  %v6033_v37 = vpop.permute.xlu0 %840  ;;  %v919_v26 = vadd.f32 %v903_v53, %v822_v63  ;;  %v728_v63 = vmul.f32 %v5586_v38, %v699_v59 }
 0x1ad   : > { %13896 = vst [vmem:[#allocation88_spill] sm:$0xff] %v6031_v15  ;;  %v881_v2 = vsel %vm868_vm5, %v6033_v37, %v6031_v15  ;;  %v810_v15 = vmul.f32 %v5588_v39, %v781_v28 }
 0x1ae   : > { %v905_v60 = vmul.f32 %v881_v2, %v5588_v39 }
 0x1b0   : > { %v6035_v42 = vpop.permute.xlu1 %846  ;;  %v6037_v14 = vpop.permute.xlu0 %844 }
 0x1b1   : > { %13897 = vst [vmem:[#allocation89_spill] sm:$0xff] %v6035_v42  ;;  %v879_v44 = vsel %vm868_vm5, %v6037_v14, %v6035_v42 }
 0x1b2   : > { %v907_v2 = vmul.f32 %v879_v44, %v5588_v39 }
 0x1b4   : > { %v6039_v13 = vpop.permute.xlu1 %850  ;;  %v6041_v35 = vpop.permute.xlu0 %848 }
 0x1b5   : > { %13898 = vst [vmem:[#allocation90_spill] sm:$0xff] %v6039_v13  ;;  %v877_v59 = vsel %vm868_vm5, %v6041_v35, %v6039_v13 }
 0x1b8   : > { %v6043_v36 = vpop.permute.xlu1 %854  ;;  %v6045_v10 = vpop.permute.xlu0 %852 }
 0x1b9   : > { %13899 = vst [vmem:[#allocation91_spill] sm:$0xff] %v6043_v36 }
 0x1bc   : > { %v6047_v8 = vpop.permute.xlu1 %858  ;;  %v6049_v29 = vpop.permute.xlu0 %856 }
 0x1c0   : > { %v6052_v34 = vpop.permute.xlu1 %862  ;;  %v6054_v7 = vpop.permute.xlu0 %860 }
 0x1c4   : > { %v6069_v1 = vpop.permute.xlu0 %864  ;;  %v6072_v23 = vpop.permute.xlu1 %866 }
 0x1c5   : > { %13900 = vst [vmem:[#allocation92_spill] sm:$0xff] %v6069_v1  ;;  %v726_v1 = vmul.f32 %v5586_v38, %v701_v58 }
 0x1c7   : > { %v824_v6 = vadd.f32 %v808_v56, %v726_v1  ;;  %v697_v56 = vsel %vm446_vm2, %v5975_v11, %v5973_v12 }
 0x1c8   : > { %v6089_v9 = vpop.permute.xlu0 %933  ;;  %v6092_v27 = vpop.permute.xlu1 %935  ;;  %v730_v44 = vmul.f32 %v5586_v38, %v697_v56 }
 0x1c9   : > { %13901 = vst [vmem:[#allocation93_spill] sm:$0xff] %v6092_v27  ;;  %v980_v57 = vsel %vm965_vm6, %v6089_v9, %v6092_v27  ;;  %v921_v1 = vadd.f32 %v905_v60, %v824_v6  ;;  %v777_v60 = vsel %vm770_vm4, %v6013_v32, %v6011_v40 }
 0x1ca   : > { %v1000_v58 = vmul.f32 %v980_v57, %v5586_v38  ;;  %v779_v57 = vsel %vm770_vm4, %v6009_v48, %v6007_v55  ;;  %v814_v13 = vmul.f32 %v5588_v39, %v777_v60 }
 0x1cb   : > { %v812_v55 = vmul.f32 %v5588_v39, %v779_v57  ;;  %v909_v57 = vmul.f32 %v877_v59, %v5588_v39 }
 0x1cc   : > { %v6113_v5 = vpop.permute.xlu0 %937  ;;  %v6116_v33 = vadd.f32 %v1000_v58, %v919_v26  ;;  %v6118_v27 = vpop.permute.xlu1 %939  ;;  %v826_v58 = vadd.f32 %v810_v15, %v728_v63  ;;  %v695_v15 = vsel %vm446_vm2, %v5981_v18, %v5979_v16 }
 0x1cd   : > { %v978_v53 = vsel %vm965_vm6, %v6113_v5, %v6118_v27  ;;  %v828_v40 = vadd.f32 %v812_v55, %v730_v44  ;;  %v732_v59 = vmul.f32 %v5586_v38, %v695_v15  ;;  %v693_v55 = vsel %vm446_vm2, %v5985_v0, %v5983_v3 }
 0x1ce   : > { %v1002_v28 = vmul.f32 %v978_v53, %v5586_v38  ;;  %1066 = vrot.lane.b32.xlu0 %v6116_v33, %s5354_s5  ;;  %v923_v63 = vadd.f32 %v907_v2, %v826_v58  ;;  %v775_v58 = vsel %vm770_vm4, %v6017_v51, %v6015_v25 }
 0x1cf   : > { %v925_v44 = vadd.f32 %v909_v57, %v828_v40  ;;  %v830_v25 = vadd.f32 %v814_v13, %v732_v59  ;;  %v734_v57 = vmul.f32 %v5586_v38, %v693_v55  ;;  %v691_v13 = vsel %vm446_vm2, %v5989_v21, %v5987_v61 }
 0x1d0   : > { %v6141_v26 = vpop.permute.xlu0 %941  ;;  %v6144_v42 = vadd.f32 %v1002_v28, %v921_v1  ;;  %v6146_v6 = vpop.permute.xlu1 %943  ;;  %v875_v1 = vsel %vm868_vm5, %v6045_v10, %v6043_v36  ;;  %v816_v36 = vmul.f32 %v5588_v39, %v775_v58 }
 0x1d1   : > { %v976_v53 = vsel %vm965_vm6, %v6141_v26, %v6146_v6  ;;  %v911_v60 = vmul.f32 %v875_v1, %v5588_v39  ;;  %v773_v1 = vsel %vm770_vm4, %v6021_v46, %v6019_v52 }
 0x1d2   : > { %v1004_v56 = vmul.f32 %v976_v53, %v5586_v38  ;;  %1070 = vrot.lane.b32.xlu0 %v6144_v42, %s5354_s5 }
 0x1d3   : > { %v927_v59 = vadd.f32 %v911_v60, %v830_v25  ;;  %v832_v60 = vadd.f32 %v816_v36, %v734_v57  ;;  %v884_v36 = vsel %vm868_vm5, %v6072_v23, %v6029_v19 }
 0x1d4   : > { %v6169_v28 = vpop.permute.xlu0 %945  ;;  %v6172_v12 = vadd.f32 %v1004_v56, %v923_v63  ;;  %v6174_v2 = vpop.permute.xlu1 %947  ;;  %v873_v63 = vsel %vm868_vm5, %v6049_v29, %v6047_v8  ;;  %v886_v19 = vsel %vm298_vm8, %v884_v36, 0.0 }
 0x1d5   : > { %v974_v53 = vsel %vm965_vm6, %v6169_v28, %v6174_v2  ;;  %v913_v58 = vmul.f32 %v873_v63, %v5588_v39  ;;  %v818_v63 = vmul.f32 %v5588_v39, %v773_v1  ;;  %v902_v36 = vmul.f32 %v886_v19, %v5588_v39 }
 0x1d6   : > { %v1006_v15 = vmul.f32 %v974_v53, %v5586_v38  ;;  %1074 = vrot.lane.b32.xlu0 %v6172_v12, %s5354_s5 }
 0x1d7   : > { %v929_v1 = vadd.f32 %v913_v58, %v832_v60  ;;  %v784_v60 = vsel %vm770_vm4, %v5995_v54, %v6001_v24  ;;  %v882_v24 = vsel %vm868_vm5, %v6027_v45, %v6033_v37 }
 0x1d8   : > { %v6197_v56 = vpop.permute.xlu0 %949  ;;  %v6200_v16 = vadd.f32 %v1006_v15, %v925_v44  ;;  %v6202_v40 = vpop.permute.xlu1 %951  ;;  %v786_v44 = vsel %vm770_vm4, %v6023_v20, %v5997_v50  ;;  %v871_v15 = vsel %vm868_vm5, %v6054_v7, %v6052_v34  ;;  %v704_v50 = vsel %vm446_vm2, %v5991_v22, %v5951_v41 }
 0x1d9   : > { %v972_v53 = vsel %vm965_vm6, %v6197_v56, %v6202_v40  ;;  %v788_v57 = vsel %vm282_vm7, %v786_v44, 0.0  ;;  %v706_v22 = vsel %vm266_vm3, %v704_v50, 0.0 }
 0x1da   : > { %13902 = vst [vmem:[#allocation94_spill] sm:$0xff] %v6200_v16  ;;  %v1008_v55 = vmul.f32 %v972_v53, %v5586_v38  ;;  %1078 = vrot.lane.b32.xlu0 %v6200_v16, %s5354_s5  ;;  %v736_v16 = vmul.f32 %v5586_v38, %v691_v13  ;;  %v915_v13 = vmul.f32 %v871_v15, %v5588_v39 }
 0x1db   : > { %v805_v58 = vmul.f32 %v5588_v39, %v788_v57  ;;  %v723_v50 = vmul.f32 %v5586_v38, %v706_v22 }
 0x1dc   : > { %v6230_v25 = vpop.permute.xlu0 %953  ;;  %v6234_v53 = vadd.f32 %v1008_v55, %v927_v59  ;;  %v6236_v61 = vpop.permute.xlu1 %955  ;;  %v834_v23 = vadd.f32 %v818_v63, %v736_v16 }
 0x1dd   : > { %v970_v20 = vsel %vm965_vm6, %v6230_v25, %v6236_v61 }
 0x1de   : > { %v1010_v59 = vmul.f32 %v970_v20, %v5586_v38  ;;  %1082 = vrot.lane.b32.xlu0 %v6234_v53, %s5354_s5  ;;  %v931_v16 = vadd.f32 %v915_v13, %v834_v23  ;;  %v702_v20 = vsel %vm446_vm2, %v5949_v49, %v5959_v31  ;;  %v821_v13 = vadd.f32 %v805_v58, %v723_v50  ;;  %v13905_v49 = vld [vmem:[#allocation93_spill] sm:$0xff]  ;;  %v13909_v50 = vld [vmem:[#allocation83_spill] sm:$0xff] }
 0x1df   : > { %v782_v31 = vsel %vm770_vm4, %v5999_v47, %v6005_v62  ;;  %v979_v37 = vsel %vm965_vm6, %v13905_v49, %v6113_v5  ;;  %v725_v22 = vmul.f32 %v5586_v38, %v702_v20  ;;  %v13906_v62 = vld [vmem:[#allocation78_spill] sm:$0xff]  ;;  %v13907_v5 = vld [vmem:[#allocation88_spill] sm:$0xff]  ;;  %v13910_v20 = vld [vmem:[#allocation27_spill] sm:$0xff] }
 0x1e0   : > { %v6257_v41 = vpop.permute.xlu0 %957  ;;  %v6263_v55 = vadd.f32 %v1010_v59, %v929_v1  ;;  %v6265_v44 = vpop.permute.xlu1 %959  ;;  %v807_v1 = vmul.f32 %v5588_v39, %v784_v60  ;;  %v918_v23 = vadd.f32 %v902_v36, %v821_v13  ;;  %v700_v47 = vsel %vm446_vm2, %v13906_v62, %v5967_v4  ;;  %v13913_v49 = vld [vmem:[#allocation84_spill] sm:$0xff] }
 0x1e1   : > { %v968_v15 = vsel %vm965_vm6, %v6257_v41, %v6265_v44  ;;  %v880_v58 = vsel %vm868_vm5, %v13907_v5, %v6037_v14  ;;  %v809_v60 = vmul.f32 %v5588_v39, %v782_v31  ;;  %v780_v36 = vsel %vm770_vm4, %v13909_v50, %v6009_v48 }
 0x1e2   : > { %13903 = vst [vmem:[#allocation95_spill] sm:$0xff] %v6263_v55  ;;  %v1012_v63 = vmul.f32 %v968_v15, %v5586_v38  ;;  %1086 = vrot.lane.b32.xlu0 %v6263_v55, %s5354_s5  ;;  %v823_v15 = vadd.f32 %v807_v1, %v725_v22  ;;  %v977_v4 = vsel %vm965_vm6, %v6118_v27, %v6141_v26  ;;  %v13911_v1 = vld [vmem:[#allocation89_spill] sm:$0xff]  ;;  %v13914_v22 = vld [vmem:[#allocation79_spill] sm:$0xff] }
 0x1e3   : > { %v727_v14 = vmul.f32 %v5586_v38, %v700_v47  ;;  %v698_v48 = vsel %vm446_vm2, %v5965_v43, %v5975_v11  ;;  %v878_v27 = vsel %vm868_vm5, %v13911_v1, %v6041_v35  ;;  %v811_v13 = vmul.f32 %v5588_v39, %v780_v36  ;;  %v13917_v47 = vld [vmem:[#allocation85_spill] sm:$0xff] }
 0x1e4   : > { %v6290_v54 = vadd.f32 %v1012_v63, %v931_v16  ;;  %v964_v57 = vpop.permute.xlu1 %963  ;;  %v1001_v16 = vmul.f32 %v979_v37, %v5586_v38  ;;  %v1003_v31 = vmul.f32 %v977_v4, %v5586_v38  ;;  %v778_v37 = vsel %vm770_vm4, %v13913_v49, %v6013_v32 }
 0x1e5   : > { %v981_v59 = vsel %vm965_vm6, %v964_v57, %v6089_v9  ;;  %v904_v9 = vmul.f32 %v882_v24, %v5588_v39  ;;  %v906_v57 = vmul.f32 %v880_v58, %v5588_v39  ;;  %v825_v26 = vadd.f32 %v809_v60, %v727_v14  ;;  %v13918_v60 = vld [vmem:[#allocation80_spill] sm:$0xff]  ;;  %v13921_v14 = vld [vmem:[#allocation86_spill] sm:$0xff] }
 0x1e6   : > { %13904 = vst [vmem:[#allocation96_spill] sm:$0xff] %v6290_v54  ;;  %v983_v45 = vsel %vm314_vm9, %v981_v59, 0.0  ;;  %1090 = vrot.lane.b32.xlu0 %v6290_v54, %s5354_s5  ;;  %v975_v43 = vsel %vm965_vm6, %v6146_v6, %v6169_v28  ;;  %v729_v11 = vmul.f32 %v5586_v38, %v698_v48  ;;  %v696_v32 = vsel %vm446_vm2, %v13914_v22, %v5981_v18 }
 0x1e7   : > { %v999_v19 = vmul.f32 %v983_v45, %v5586_v38  ;;  %v920_v24 = vadd.f32 %v904_v9, %v823_v15  ;;  %v922_v35 = vadd.f32 %v906_v57, %v825_v26  ;;  %v908_v45 = vmul.f32 %v878_v27, %v5588_v39  ;;  %v13915_v9 = vld [vmem:[#allocation90_spill] sm:$0xff] }
 0x1e8   : > { %v876_v6 = vsel %vm868_vm5, %v13915_v9, %v6045_v10  ;;  %v827_v28 = vadd.f32 %v811_v13, %v729_v11  ;;  %v1005_v62 = vmul.f32 %v975_v43, %v5586_v38  ;;  %v776_v5 = vsel %vm770_vm4, %v13917_v47, %v6017_v51  ;;  %v13923_v13 = vld [vmem:[#allocation87_spill] sm:$0xff]  ;;  %v13926_v43 = vld [vmem:[#allocation81_spill] sm:$0xff] }
 0x1e9   : > { %v6321_v63 = vadd.f32 %v999_v19, %v918_v23  ;;  %v6346_v59 = vadd.f32 %v1001_v16, %v920_v24  ;;  %v813_v23 = vmul.f32 %v5588_v39, %v778_v37  ;;  %v6372_v19 = vadd.f32 %v1003_v31, %v922_v35  ;;  %v13919_v16 = vld [vmem:[#allocation91_spill] sm:$0xff]  ;;  %v962_v37 = vpop.permute.xlu0 %961  ;;  %v13929_v9 = vld [vmem:[#allocation77_spill] sm:$0xff] }
 0x1ea   : > { %1126 = vrot.lane.b32.xlu0 %v13910_v20, %s5356_s11  ;;  %v973_v18 = vsel %vm965_vm6, %v6174_v2, %v6197_v56  ;;  %v731_v10 = vmul.f32 %v5586_v38, %v696_v32  ;;  %v924_v58 = vadd.f32 %v908_v45, %v827_v28  ;;  %v910_v15 = vmul.f32 %v876_v6, %v5588_v39  ;;  %v13930_v6 = vld [vmem:[#allocation76_spill] sm:$0xff] }
 0x1eb   : > { %13908 = vst [vmem:[#allocation93_spill] sm:$0xff] %v6321_v63  ;;  %1064 = vrot.lane.b32.xlu1 %v6321_v63, %s5354_s5  ;;  %13912 = vst [vmem:[#allocation78_spill] sm:$0xff] %v6346_v59  ;;  %v694_v51 = vsel %vm446_vm2, %v13918_v60, %v5985_v0  ;;  %v874_v2 = vsel %vm868_vm5, %v13919_v16, %v6049_v29  ;;  %v815_v50 = vmul.f32 %v5588_v39, %v776_v5  ;;  %v13931_v5 = vld [vmem:[#allocation75_spill] sm:$0xff] }
 0x1ec   : > { %13916 = vst [vmem:[#allocation88_spill] sm:$0xff] %v6372_v19  ;;  %v829_v56 = vadd.f32 %v813_v23, %v731_v10  ;;  %v6398_v36 = vadd.f32 %v1005_v62, %v924_v58  ;;  %v1007_v4 = vmul.f32 %v973_v18, %v5586_v38  ;;  %v774_v24 = vsel %vm770_vm4, %v13921_v14, %v6021_v46  ;;  %v13932_v18 = vld [vmem:[#allocation60_spill] sm:$0xff] }
 0x1ed   : > { %v971_v0 = vsel %vm965_vm6, %v6202_v40, %v6230_v25  ;;  %v733_v29 = vmul.f32 %v5586_v38, %v694_v51  ;;  %v912_v48 = vmul.f32 %v874_v2, %v5588_v39  ;;  %v692_v46 = vsel %vm446_vm2, %v5983_v3, %v5989_v21  ;;  %v13924_v21 = vld [vmem:[#allocation94_spill] sm:$0xff] }
 0x1ee   : > { %1130 = vrot.lane.b32.xlu0 %v6116_v33, %s5356_s11  ;;  %13920 = vst [vmem:[#allocation83_spill] sm:$0xff] %v6398_v36  ;;  %v926_v57 = vadd.f32 %v910_v15, %v829_v56  ;;  %v872_v40 = vsel %vm868_vm5, %v6047_v8, %v6054_v7  ;;  %v817_v1 = vmul.f32 %v5588_v39, %v774_v24  ;;  %v13934_v56 = vld [vmem:[#allocation61_spill] sm:$0xff]  ;;  %v6492_v24 = vstv %s329_s21 }
 0x1ef   : > { %1068 = vrot.lane.b32.xlu1 %v6346_v59, %s5354_s5  ;;  %v831_v25 = vadd.f32 %v815_v50, %v733_v29  ;;  %v1009_v26 = vmul.f32 %v971_v0, %v5586_v38  ;;  %v772_v31 = vsel %vm770_vm4, %v6019_v52, %v13923_v13  ;;  %v969_v3 = vsel %vm965_vm6, %v6236_v61, %v6257_v41  ;;  %v13925_v52 = vld [vmem:[#allocation82_spill] sm:$0xff]  ;;  %v13927_v61 = vld [vmem:[#allocation92_spill] sm:$0xff]  ;;  %v13938_v0 = vld [vmem:[#allocation47_spill] sm:$0xff] }
 0x1f0   : > { %v6424_v27 = vadd.f32 %v1007_v4, %v926_v57  ;;  %v735_v7 = vmul.f32 %v5586_v38, %v692_v46  ;;  %v914_v49 = vmul.f32 %v872_v40, %v5588_v39  ;;  %v690_v11 = vsel %vm446_vm2, %v13926_v43, %v13925_v52  ;;  %v13935_v50 = vld [vmem:[#allocation62_spill] sm:$0xff]  ;;  %13937 = vst [vmem:[#allocation85_spill] sm:$0xff] %v6492_v24  ;;  %v13941_v40 = vld [vmem:[#allocation63_spill] sm:$0xff]  ;;  %v13944_v13 = vld [vmem:[#allocation48_spill] sm:$0xff] }
 0x1f1   : > { %v928_v8 = vadd.f32 %v912_v48, %v831_v25  ;;  %v870_v41 = vsel %vm868_vm5, %v6052_v34, %v13927_v61  ;;  %v819_v45 = vmul.f32 %v5588_v39, %v772_v31  ;;  %v1011_v32 = vmul.f32 %v969_v3, %v5586_v38  ;;  %v13939_v29 = vld [vmem:[#allocation46_spill] sm:$0xff]  ;;  %v13942_v25 = vld [vmem:[#allocation64_spill] sm:$0xff]  ;;  %v13948_v52 = vld [vmem:[#allocation51_spill] sm:$0xff] }
 0x1f2   : > { %1134 = vrot.lane.b32.xlu0 %v6144_v42, %s5356_s11  ;;  %13922 = vst [vmem:[#allocation89_spill] sm:$0xff] %v6424_v27  ;;  %v833_v35 = vadd.f32 %v817_v1, %v735_v7  ;;  %v607_v28 = vsel %vm591_vm10, %v13930_v6, %v13929_v9  ;;  %v967_v23 = vsel %vm965_vm6, %v6265_v44, %v962_v37  ;;  %v13949_v43 = vld [vmem:[#allocation50_spill] sm:$0xff] }
 0x1f3   : > { %1072 = vrot.lane.b32.xlu1 %v6372_v19, %s5354_s5  ;;  %v6451_v22 = vadd.f32 %v1009_v26, %v928_v8  ;;  %v737_v34 = vmul.f32 %v5586_v38, %v690_v11  ;;  %v916_v47 = vmul.f32 %v870_v41, %v5588_v39  ;;  %v542_v10 = vsel %vm365_vm0, %v13932_v18, %v13931_v5  ;;  %v13943_v26 = vld [vmem:[#allocation49_spill] sm:$0xff] }
 0x1f4   : > { %v930_v62 = vadd.f32 %v914_v49, %v833_v35  ;;  %v608_v58 = vsel %vm249_vm11, %v607_v28, 0.0  ;;  %v1013_v60 = vmul.f32 %v967_v23, %v5586_v38  ;;  %v543_v51 = vsel %vm233_vm1, %v542_v10, 0.0  ;;  %v13946_v8 = vld [vmem:[#allocation65_spill] sm:$0xff]  ;;  %v13947_v49 = vld [vmem:[#allocation66_spill] sm:$0xff]  ;;  %v13951_v35 = vld [vmem:[#allocation67_spill] sm:$0xff] }
 0x1f5   : > { %13928 = vst [vmem:[#allocation84_spill] sm:$0xff] %v6451_v22  ;;  %v835_v44 = vadd.f32 %v819_v45, %v737_v34  ;;  %v624_v2 = vadd.f32 %v608_v58, %v543_v51  ;;  %v605_v4 = vsel %vm591_vm10, %v13935_v50, %v13934_v56  ;;  %v540_v57 = vsel %vm365_vm0, %v13939_v29, %v13938_v0  ;;  %v13952_v45 = vld [vmem:[#allocation68_spill] sm:$0xff]  ;;  %v13953_v28 = vld [vmem:[#allocation53_spill] sm:$0xff]  ;;  %v13957_v58 = vld [vmem:[#allocation70_spill] sm:$0xff] }
 0x1f6   : > { %1138 = vrot.lane.b32.xlu0 %v6172_v12, %s5356_s11  ;;  %v6474_v15 = vadd.f32 %v1011_v32, %v930_v62  ;;  %v626_v48 = vadd.f32 %v605_v4, %v540_v57  ;;  %v603_v1 = vsel %vm591_vm10, %v13942_v25, %v13941_v40  ;;  %v538_v31 = vsel %vm365_vm0, %v13944_v13, %v13943_v26  ;;  %v13954_v23 = vld [vmem:[#allocation52_spill] sm:$0xff]  ;;  %v13956_v10 = vld [vmem:[#allocation69_spill] sm:$0xff]  ;;  %v13959_v51 = vld [vmem:[#allocation54_spill] sm:$0xff] }
 0x1f7   : > { %1076 = vrot.lane.b32.xlu1 %v6398_v36, %s5354_s5  ;;  %v932_v16 = vadd.f32 %v916_v47, %v835_v44  ;;  %v6501_v46 = vmul.f32 %v6492_v24, %v624_v2  ;;  %v628_v7 = vadd.f32 %v603_v1, %v538_v31  ;;  %v601_v37 = vsel %vm591_vm10, %v13947_v49, %v13946_v8  ;;  %v13961_v57 = vld [vmem:[#allocation71_spill] sm:$0xff]  ;;  %v13963_v31 = vld [vmem:[#allocation57_spill] sm:$0xff] }
 0x1f8   : > { %13933 = vst [vmem:[#allocation79_spill] sm:$0xff] %v6474_v15  ;;  %v6516_v3 = vmul.f32 %v6492_v24, %v626_v48  ;;  %v536_v11 = vsel %vm365_vm0, %v13949_v43, %v13948_v52  ;;  %v599_v32 = vsel %vm591_vm10, %v13952_v45, %v13951_v35  ;;  %v534_v34 = vsel %vm365_vm0, %v13954_v23, %v13953_v28  ;;  %v13962_v48 = vld [vmem:[#allocation72_spill] sm:$0xff] }
 0x1f9   : > { %v6488_v14 = vadd.f32 %v1013_v60, %v932_v16  ;;  %13940 = vst [vmem:[#allocation80_spill] sm:$0xff] %v6501_v46  ;;  %v6531_v61 = vmul.f32 %v6492_v24, %v628_v7  ;;  %v630_v41 = vadd.f32 %v601_v37, %v536_v11  ;;  %v632_v47 = vadd.f32 %v599_v32, %v534_v34  ;;  %v13958_v60 = vld [vmem:[#allocation55_spill] sm:$0xff]  ;;  %v13964_v7 = vld [vmem:[#allocation56_spill] sm:$0xff]  ;;  %v13966_v32 = vld [vmem:[#allocation73_spill] sm:$0xff] }
 0x1fa   : > { %1142 = vrot.lane.b32.xlu0 %v13924_v21, %s5356_s11  ;;  %13945 = vst [vmem:[#allocation91_spill] sm:$0xff] %v6516_v3  ;;  %v597_v44 = vsel %vm591_vm10, %v13957_v58, %v13956_v10  ;;  %v532_v16 = vsel %vm365_vm0, %v13959_v51, %v13958_v60  ;;  %v595_v1 = vsel %vm591_vm10, %v13962_v48, %v13961_v57  ;;  %v13967_v34 = vld [vmem:[#allocation74_spill] sm:$0xff] }
 0x1fb   : > { %1080 = vrot.lane.b32.xlu1 %v6424_v27, %s5354_s5  ;;  %13936 = vst [vmem:[#allocation90_spill] sm:$0xff] %v6488_v14  ;;  %13950 = vst [vmem:[#allocation86_spill] sm:$0xff] %v6531_v61  ;;  %v6546_v62 = vmul.f32 %v6492_v24, %v630_v41  ;;  %v6561_v2 = vmul.f32 %v6492_v24, %v632_v47  ;;  %v634_v4 = vadd.f32 %v597_v44, %v532_v16  ;;  %v13968_v44 = vld [vmem:[#allocation59_spill] sm:$0xff]  ;;  %v13969_v16 = vld [vmem:[#allocation58_spill] sm:$0xff] }
 0x1fc   : > { %v530_v37 = vsel %vm365_vm0, %v13964_v7, %v13963_v31  ;;  %v593_v47 = vsel %vm591_vm10, %v13967_v34, %v13966_v32 }
 0x1fd   : > { %13955 = vst [vmem:[#allocation87_spill] sm:$0xff] %v6546_v62  ;;  %13960 = vst [vmem:[#allocation94_spill] sm:$0xff] %v6561_v2  ;;  %v6576_v11 = vmul.f32 %v6492_v24, %v634_v4  ;;  %v636_v41 = vadd.f32 %v595_v1, %v530_v37  ;;  %v606_v37 = vsel %vm591_vm10, %v13929_v9, %v13935_v50 }
 0x1fe   : > { %1146 = vrot.lane.b32.xlu0 %v6234_v53, %s5356_s11  ;;  %v604_v9 = vsel %vm591_vm10, %v13934_v56, %v13942_v25  ;;  %v539_v50 = vsel %vm365_vm0, %v13938_v0, %v13944_v13  ;;  %v602_v56 = vsel %vm591_vm10, %v13941_v40, %v13947_v49  ;;  %v537_v0 = vsel %vm365_vm0, %v13943_v26, %v13949_v43 }
 0x1ff   : > { %1084 = vrot.lane.b32.xlu1 %v6451_v22, %s5354_s5  ;;  %13965 = vst [vmem:[#allocation82_spill] sm:$0xff] %v6576_v11  ;;  %v6591_v4 = vmul.f32 %v6492_v24, %v636_v41  ;;  %v541_v41 = vsel %vm365_vm0, %v13931_v5, %v13939_v29  ;;  %v629_v25 = vadd.f32 %v602_v56, %v537_v0 }
 0x200   : > { %v600_v40 = vsel %vm591_vm10, %v13946_v8, %v13952_v45  ;;  %v535_v26 = vsel %vm365_vm0, %v13948_v52, %v13954_v23  ;;  %v598_v8 = vsel %vm591_vm10, %v13951_v35, %v13957_v58  ;;  %v533_v52 = vsel %vm365_vm0, %v13953_v28, %v13959_v51  ;;  %v6689_v51 = vpop.permute.xlu0 %1062 }
 0x201   : > { %13970 = vst [vmem:[#allocation81_spill] sm:$0xff] %v6591_v4  ;;  %v6651_v13 = vmul.f32 %v6492_v24, %v629_v25  ;;  %v631_v49 = vadd.f32 %v600_v40, %v535_v26  ;;  %v633_v45 = vadd.f32 %v598_v8, %v533_v52  ;;  %v596_v35 = vsel %vm591_vm10, %v13956_v10, %v13962_v48 }
 0x202   : > { %1150 = vrot.lane.b32.xlu0 %v6263_v55, %s5356_s11  ;;  %v531_v28 = vsel %vm365_vm0, %v13958_v60, %v13964_v7  ;;  %v594_v10 = vsel %vm591_vm10, %v13961_v57, %v13967_v34  ;;  %13977 = vst [vmem:[#allocation62_spill] sm:$0xff] %v6689_v51  ;;  %v529_v60 = vsel %vm365_vm0, %v13963_v31, %v13969_v16 }
 0x203   : > { %1088 = vrot.lane.b32.xlu1 %v6474_v15, %s5354_s5  ;;  %13974 = vst [vmem:[#allocation75_spill] sm:$0xff] %v6651_v13  ;;  %v6666_v43 = vmul.f32 %v6492_v24, %v631_v49  ;;  %v6681_v23 = vmul.f32 %v6492_v24, %v633_v45  ;;  %v635_v58 = vadd.f32 %v596_v35, %v531_v28 }
 0x204   : > { %v637_v7 = vadd.f32 %v594_v10, %v529_v60  ;;  %v592_v57 = vsel %vm591_vm10, %v13966_v32, %v13930_v6  ;;  %v527_v31 = vsel %vm365_vm0, %v13968_v44, %v13932_v18 }
 0x205   : > { %13975 = vst [vmem:[#allocation60_spill] sm:$0xff] %v6666_v43  ;;  %13976 = vst [vmem:[#allocation61_spill] sm:$0xff] %v6681_v23  ;;  %v6698_v48 = vmul.f32 %v6492_v24, %v635_v58 }
 0x206   : > { %1154 = vrot.lane.b32.xlu0 %v6290_v54, %s5356_s11 }
 0x207   : > { %1092 = vrot.lane.b32.xlu1 %v6488_v14, %s5354_s5  ;;  %13978 = vst [vmem:[#allocation47_spill] sm:$0xff] %v6698_v48 }
 0x20a   : > { %1222 = vrot.lane.b32.xlu0 %v6501_v46, %s5355_s24 }
 0x20b   : > { %1128 = vrot.lane.b32.xlu1 %v6321_v63, %s5356_s11 }
 0x20e   : > { %1226 = vrot.lane.b32.xlu0 %v6516_v3, %s5355_s24 }
 0x20f   : > { %1132 = vrot.lane.b32.xlu1 %v6346_v59, %s5356_s11 }
 0x212   : > { %1230 = vrot.lane.b32.xlu0 %v6531_v61, %s5355_s24 }
 0x213   : > { %1136 = vrot.lane.b32.xlu1 %v6372_v19, %s5356_s11 }
 0x216   : > { %1234 = vrot.lane.b32.xlu0 %v6546_v62, %s5355_s24 }
 0x217   : > { %1140 = vrot.lane.b32.xlu1 %v6398_v36, %s5356_s11  ;;  %v528_v36 = vsel %vm365_vm0, %v13969_v16, %v13968_v44  ;;  %v6715_v16 = vmul.f32 %v6492_v24, %v637_v7 }
 0x218   : > { %v638_v1 = vadd.f32 %v593_v47, %v528_v36  ;;  %v625_v36 = vadd.f32 %v606_v37, %v541_v41  ;;  %v627_v47 = vadd.f32 %v604_v9, %v539_v50 }
 0x219   : > { %13980 = vst [vmem:[#allocation63_spill] sm:$0xff] %v6715_v16 }
 0x21a   : > { %1238 = vrot.lane.b32.xlu0 %v6561_v2, %s5355_s24  ;;  %v6621_v5 = vmul.f32 %v6492_v24, %v625_v36  ;;  %v6636_v29 = vmul.f32 %v6492_v24, %v627_v47 }
 0x21b   : > { %1144 = vrot.lane.b32.xlu1 %v6424_v27, %s5356_s11  ;;  %v6602_v27 = vmul.f32 %v6492_v24, %v638_v1  ;;  %v639_v1 = vadd.f32 %v592_v57, %v527_v31 }
 0x21c   : > { %13972 = vst [vmem:[#allocation77_spill] sm:$0xff] %v6621_v5  ;;  %13973 = vst [vmem:[#allocation76_spill] sm:$0xff] %v6636_v29 }
 0x21d   : > { %13971 = vst [vmem:[#allocation92_spill] sm:$0xff] %v6602_v27  ;;  %v6724_v32 = vmul.f32 %v6492_v24, %v639_v1 }
 0x21e   : > { %1242 = vrot.lane.b32.xlu0 %v6576_v11, %s5355_s24 }
 0x21f   : > { %1148 = vrot.lane.b32.xlu1 %v6451_v22, %s5356_s11  ;;  %13982 = vst [vmem:[#allocation49_spill] sm:$0xff] %v6724_v32 }
 0x222   : > { %1246 = vrot.lane.b32.xlu0 %v6591_v4, %s5355_s24 }
 0x223   : > { %1152 = vrot.lane.b32.xlu1 %v6474_v15, %s5356_s11 }
 0x226   : > { %1250 = vrot.lane.b32.xlu0 %v6602_v27, %s5355_s24 }
 0x227   : > { %1156 = vrot.lane.b32.xlu1 %v6488_v14, %s5356_s11 }
 0x22a   : > { %1302 = vrot.lane.b32.xlu0 %v6501_v46, %s5358_s13 }
 0x22b   : > { %1224 = vrot.lane.b32.xlu1 %v6621_v5, %s5355_s24 }
 0x22e   : > { %1306 = vrot.lane.b32.xlu0 %v6516_v3, %s5358_s13 }
 0x22f   : > { %1228 = vrot.lane.b32.xlu1 %v6636_v29, %s5355_s24 }
 0x232   : > { %1310 = vrot.lane.b32.xlu0 %v6531_v61, %s5358_s13 }
 0x233   : > { %1232 = vrot.lane.b32.xlu1 %v6651_v13, %s5355_s24 }
 0x236   : > { %1314 = vrot.lane.b32.xlu0 %v6546_v62, %s5358_s13 }
 0x237   : > { %1236 = vrot.lane.b32.xlu1 %v6666_v43, %s5355_s24 }
 0x23a   : > { %1318 = vrot.lane.b32.xlu0 %v6561_v2, %s5358_s13 }
 0x23b   : > { %1240 = vrot.lane.b32.xlu1 %v6681_v23, %s5355_s24 }
 0x23e   : > { %1322 = vrot.lane.b32.xlu0 %v6576_v11, %s5358_s13 }
 0x23f   : > { %1244 = vrot.lane.b32.xlu1 %v6698_v48, %s5355_s24 }
 0x240   : > { %v6712_v34 = vpop.permute.xlu0 %1066 }
 0x241   : > { %13979 = vst [vmem:[#allocation46_spill] sm:$0xff] %v6712_v34 }
 0x242   : > { %1326 = vrot.lane.b32.xlu0 %v6591_v4, %s5358_s13 }
 0x243   : > { %1248 = vrot.lane.b32.xlu1 %v6715_v16, %s5355_s24 }
 0x244   : > { %v6721_v6 = vpop.permute.xlu0 %1070 }
 0x245   : > { %13981 = vst [vmem:[#allocation64_spill] sm:$0xff] %v6721_v6 }
 0x246   : > { %1330 = vrot.lane.b32.xlu0 %v6602_v27, %s5358_s13 }
 0x247   : > { %1252 = vrot.lane.b32.xlu1 %v6724_v32, %s5355_s24 }
 0x248   : > { %v6730_v18 = vpop.permute.xlu0 %1074 }
 0x249   : > { %13983 = vst [vmem:[#allocation48_spill] sm:$0xff] %v6730_v18 }
 0x24a   : > { %1398 = vrot.lane.b32.xlu0 %v6501_v46, %s5359_s18 }
 0x24b   : > { %1304 = vrot.lane.b32.xlu1 %v6621_v5, %s5358_s13 }
 0x24c   : > { %v6736_v44 = vpop.permute.xlu0 %1078 }
 0x24d   : > { %13984 = vst [vmem:[#allocation65_spill] sm:$0xff] %v6736_v44 }
 0x24e   : > { %1402 = vrot.lane.b32.xlu0 %v6516_v3, %s5359_s18 }
 0x24f   : > { %1308 = vrot.lane.b32.xlu1 %v6636_v29, %s5358_s13 }
 0x250   : > { %v6742_v37 = vpop.permute.xlu0 %1082 }
 0x251   : > { %13985 = vst [vmem:[#allocation66_spill] sm:$0xff] %v6742_v37 }
 0x252   : > { %1406 = vrot.lane.b32.xlu0 %v6531_v61, %s5359_s18 }
 0x253   : > { %1312 = vrot.lane.b32.xlu1 %v6651_v13, %s5358_s13 }
 0x254   : > { %v6748_v41 = vpop.permute.xlu0 %1086 }
 0x255   : > { %13986 = vst [vmem:[#allocation51_spill] sm:$0xff] %v6748_v41 }
 0x256   : > { %1410 = vrot.lane.b32.xlu0 %v6546_v62, %s5359_s18 }
 0x257   : > { %1316 = vrot.lane.b32.xlu1 %v6666_v43, %s5358_s13 }
 0x258   : > { %v6754_v36 = vpop.permute.xlu0 %1090 }
 0x259   : > { %13987 = vst [vmem:[#allocation50_spill] sm:$0xff] %v6754_v36 }
 0x25a   : > { %1414 = vrot.lane.b32.xlu0 %v6561_v2, %s5359_s18 }
 0x25b   : > { %1320 = vrot.lane.b32.xlu1 %v6681_v23, %s5358_s13 }
 0x25c   : > { %v6760_v9 = vpop.permute.xlu0 %1126 }
 0x25d   : > { %13988 = vst [vmem:[#allocation67_spill] sm:$0xff] %v6760_v9  ;;  %v6762_v50 = vpop.permute.xlu1 %1064 }
 0x25e   : > { %13989 = vst [vmem:[#allocation68_spill] sm:$0xff] %v6762_v50  ;;  %1418 = vrot.lane.b32.xlu0 %v6576_v11, %s5359_s18 }
 0x25f   : > { %1324 = vrot.lane.b32.xlu1 %v6698_v48, %s5358_s13 }
 0x260   : > { %v6768_v47 = vpop.permute.xlu0 %1130 }
 0x261   : > { %13990 = vst [vmem:[#allocation53_spill] sm:$0xff] %v6768_v47  ;;  %v6770_v56 = vpop.permute.xlu1 %1068 }
 0x262   : > { %13991 = vst [vmem:[#allocation52_spill] sm:$0xff] %v6770_v56  ;;  %1422 = vrot.lane.b32.xlu0 %v6591_v4, %s5359_s18 }
 0x263   : > { %1328 = vrot.lane.b32.xlu1 %v6715_v16, %s5358_s13 }
 0x264   : > { %v6776_v0 = vpop.permute.xlu0 %1134 }
 0x265   : > { %13992 = vst [vmem:[#allocation69_spill] sm:$0xff] %v6776_v0  ;;  %v6778_v25 = vpop.permute.xlu1 %1072 }
 0x266   : > { %13993 = vst [vmem:[#allocation70_spill] sm:$0xff] %v6778_v25  ;;  %1426 = vrot.lane.b32.xlu0 %v6602_v27, %s5359_s18 }
 0x267   : > { %1332 = vrot.lane.b32.xlu1 %v6724_v32, %s5358_s13 }
 0x268   : > { %v6784_v40 = vpop.permute.xlu0 %1138 }
 0x269   : > { %13994 = vst [vmem:[#allocation55_spill] sm:$0xff] %v6784_v40  ;;  %v6786_v26 = vpop.permute.xlu1 %1076 }
 0x26a   : > { %13995 = vst [vmem:[#allocation54_spill] sm:$0xff] %v6786_v26  ;;  %1494 = vrot.lane.b32.xlu0 %v6501_v46, %s5360_s20 }
 0x26b   : > { %1400 = vrot.lane.b32.xlu1 %v6621_v5, %s5359_s18 }
 0x26c   : > { %v6792_v49 = vpop.permute.xlu0 %1142 }
 0x26d   : > { %13996 = vst [vmem:[#allocation71_spill] sm:$0xff] %v6792_v49  ;;  %v6794_v8 = vpop.permute.xlu1 %1080 }
 0x26e   : > { %13997 = vst [vmem:[#allocation72_spill] sm:$0xff] %v6794_v8  ;;  %1498 = vrot.lane.b32.xlu0 %v6516_v3, %s5360_s20 }
 0x26f   : > { %1404 = vrot.lane.b32.xlu1 %v6636_v29, %s5359_s18 }
 0x270   : > { %v6800_v52 = vpop.permute.xlu0 %1146 }
 0x271   : > { %13998 = vst [vmem:[#allocation57_spill] sm:$0xff] %v6800_v52  ;;  %v6802_v45 = vpop.permute.xlu1 %1084 }
 0x272   : > { %13999 = vst [vmem:[#allocation56_spill] sm:$0xff] %v6802_v45  ;;  %1502 = vrot.lane.b32.xlu0 %v6531_v61, %s5360_s20 }
 0x273   : > { %1408 = vrot.lane.b32.xlu1 %v6651_v13, %s5359_s18 }
 0x274   : > { %v6808_v35 = vpop.permute.xlu0 %1150 }
 0x275   : > { %14000 = vst [vmem:[#allocation73_spill] sm:$0xff] %v6808_v35  ;;  %v6810_v28 = vpop.permute.xlu1 %1088 }
 0x276   : > { %14001 = vst [vmem:[#allocation74_spill] sm:$0xff] %v6810_v28  ;;  %1506 = vrot.lane.b32.xlu0 %v6546_v62, %s5360_s20 }
 0x277   : > { %1412 = vrot.lane.b32.xlu1 %v6666_v43, %s5359_s18 }
 0x278   : > { %v6816_v58 = vpop.permute.xlu0 %1154 }
 0x279   : > { %14002 = vst [vmem:[#allocation59_spill] sm:$0xff] %v6816_v58  ;;  %v6818_v10 = vpop.permute.xlu1 %1092 }
 0x27a   : > { %14003 = vst [vmem:[#allocation58_spill] sm:$0xff] %v6818_v10  ;;  %1510 = vrot.lane.b32.xlu0 %v6561_v2, %s5360_s20 }
 0x27b   : > { %1416 = vrot.lane.b32.xlu1 %v6681_v23, %s5359_s18 }
 0x27c   : > { %v6824_v60 = vpop.permute.xlu0 %1222 }
 0x27d   : > { %v6826_v7 = vpop.permute.xlu1 %1128 }
 0x27e   : > { %14004 = vst [vmem:[#allocation97_spill] sm:$0xff] %v6826_v7  ;;  %1514 = vrot.lane.b32.xlu0 %v6576_v11, %s5360_s20 }
 0x27f   : > { %1420 = vrot.lane.b32.xlu1 %v6698_v48, %s5359_s18 }
 0x280   : > { %v6832_v57 = vpop.permute.xlu0 %1226 }
 0x281   : > { %14005 = vst [vmem:[#allocation98_spill] sm:$0xff] %v6832_v57  ;;  %v6834_v31 = vpop.permute.xlu1 %1132 }
 0x282   : > { %14006 = vst [vmem:[#allocation99_spill] sm:$0xff] %v6834_v31  ;;  %1518 = vrot.lane.b32.xlu0 %v6591_v4, %s5360_s20 }
 0x283   : > { %1424 = vrot.lane.b32.xlu1 %v6715_v16, %s5359_s18 }
 0x284   : > { %v6840_v1 = vpop.permute.xlu0 %1230 }
 0x285   : > { %v6842_v14 = vpop.permute.xlu1 %1136 }
 0x286   : > { %14007 = vst [vmem:[#allocation100_spill] sm:$0xff] %v6842_v14  ;;  %1522 = vrot.lane.b32.xlu0 %v6602_v27, %s5360_s20 }
 0x287   : > { %1428 = vrot.lane.b32.xlu1 %v6724_v32, %s5359_s18 }
 0x288   : > { %v6848_v15 = vpop.permute.xlu0 %1234 }
 0x289   : > { %v6850_v22 = vpop.permute.xlu1 %1140 }
 0x28a   : > { %14008 = vst [vmem:[#allocation101_spill] sm:$0xff] %v6850_v22  ;;  %1622 = vrot.lane.b32.xlu0 %v13910_v20, %s5354_s5 }
 0x28b   : > { %1496 = vrot.lane.b32.xlu1 %v6621_v5, %s5360_s20 }
 0x28c   : > { %v6856_v19 = vpop.permute.xlu0 %1238 }
 0x28d   : > { %v6858_v59 = vpop.permute.xlu1 %1144 }
 0x28e   : > { %14009 = vst [vmem:[#allocation102_spill] sm:$0xff] %v6858_v59 }
 0x28f   : > { %1500 = vrot.lane.b32.xlu1 %v6636_v29, %s5360_s20 }
 0x290   : > { %v6862_v46 = vpop.permute.xlu0 %1242 }
 0x291   : > { %v6864_v27 = vpop.permute.xlu1 %1148 }
 0x292   : > { %14010 = vst [vmem:[#allocation103_spill] sm:$0xff] %v6864_v27 }
 0x293   : > { %1504 = vrot.lane.b32.xlu1 %v6651_v13, %s5360_s20 }
 0x294   : > { %v6868_v4 = vpop.permute.xlu0 %1246 }
 0x295   : > { %v6870_v11 = vpop.permute.xlu1 %1152 }
 0x296   : > { %14011 = vst [vmem:[#allocation104_spill] sm:$0xff] %v6870_v11 }
 0x297   : > { %1508 = vrot.lane.b32.xlu1 %v6666_v43, %s5360_s20 }
 0x298   : > { %v6874_v5 = vpop.permute.xlu0 %1250 }
 0x299   : > { %14012 = vst [vmem:[#allocation105_spill] sm:$0xff] %v6874_v5  ;;  %v6876_v2 = vpop.permute.xlu1 %1156 }
 0x29a   : > { %14013 = vst [vmem:[#allocation106_spill] sm:$0xff] %v6876_v2 }
 0x29b   : > { %1512 = vrot.lane.b32.xlu1 %v6681_v23, %s5360_s20 }
 0x29c   : > { %v6880_v62 = vpop.permute.xlu0 %1302 }
 0x29d   : > { %v6882_v61 = vpop.permute.xlu1 %1224 }
 0x29e   : > { %14014 = vst [vmem:[#allocation107_spill] sm:$0xff] %v6882_v61  ;;  %v1268_v9 = vsel %vm446_vm2, %v6824_v60, %v6882_v61 }
 0x29f   : > { %1516 = vrot.lane.b32.xlu1 %v6698_v48, %s5360_s20  ;;  %v1288_v63 = vmul.f32 %v1268_v9, %v5586_v38 }
 0x2a0   : > { %v6886_v13 = vpop.permute.xlu0 %1306 }
 0x2a1   : > { %v6888_v29 = vpop.permute.xlu1 %1228 }
 0x2a2   : > { %14015 = vst [vmem:[#allocation108_spill] sm:$0xff] %v6888_v29  ;;  %v1266_v61 = vsel %vm446_vm2, %v6832_v57, %v6888_v29 }
 0x2a3   : > { %1520 = vrot.lane.b32.xlu1 %v6715_v16, %s5360_s20  ;;  %v1290_v9 = vmul.f32 %v1266_v61, %v5586_v38 }
 0x2a4   : > { %v6892_v43 = vpop.permute.xlu0 %1310 }
 0x2a5   : > { %14016 = vst [vmem:[#allocation109_spill] sm:$0xff] %v6892_v43  ;;  %v6894_v3 = vpop.permute.xlu1 %1232 }
 0x2a7   : > { %1524 = vrot.lane.b32.xlu1 %v6724_v32, %s5360_s20 }
 0x2a8   : > { %v6898_v23 = vpop.permute.xlu0 %1314 }
 0x2a9   : > { %v6900_v28 = vpop.permute.xlu1 %1236 }
 0x2ac   : > { %v6902_v36 = vpop.permute.xlu0 %1318 }
 0x2ad   : > { %v6904_v48 = vpop.permute.xlu1 %1240 }
 0x2ae   : > { %14017 = vst [vmem:[#allocation110_spill] sm:$0xff] %v6904_v48 }
 0x2b0   : > { %v6906_v11 = vpop.permute.xlu0 %1322 }
 0x2b1   : > { %v6908_v58 = vpop.permute.xlu1 %1244 }
 0x2b2   : > { %14018 = vst [vmem:[#allocation111_spill] sm:$0xff] %v6908_v58 }
 0x2b4   : > { %v6910_v16 = vpop.permute.xlu0 %1326 }
 0x2b5   : > { %v6912_v45 = vpop.permute.xlu1 %1248 }
 0x2b6   : > { %14019 = vst [vmem:[#allocation112_spill] sm:$0xff] %v6912_v45 }
 0x2b8   : > { %v6916_v27 = vpop.permute.xlu0 %1330 }
 0x2b9   : > { %v6914_v41 = vpop.permute.xlu1 %1252  ;;  %14020 = vst [vmem:[#allocation113_spill] sm:$0xff] %v6916_v27 }
 0x2bc   : > { %v6920_v35 = vpop.permute.xlu0 %1398 }
 0x2bd   : > { %v6918_v32 = vpop.permute.xlu1 %1304 }
 0x2be   : > { %14021 = vst [vmem:[#allocation114_spill] sm:$0xff] %v6918_v32  ;;  %v1348_v51 = vsel %vm770_vm4, %v6880_v62, %v6918_v32 }
 0x2bf   : > { %v1368_v5 = vmul.f32 %v1348_v51, %v5588_v39 }
 0x2c0   : > { %v6926_v59 = vpop.permute.xlu0 %1402 }
 0x2c1   : > { %v6922_v8 = vpop.permute.xlu1 %1308  ;;  %14024 = vst [vmem:[#allocation117_spill] sm:$0xff] %v6926_v59 }
 0x2c2   : > { %14022 = vst [vmem:[#allocation115_spill] sm:$0xff] %v6922_v8  ;;  %v1346_v20 = vsel %vm770_vm4, %v6886_v13, %v6922_v8 }
 0x2c3   : > { %v1370_v32 = vmul.f32 %v1346_v20, %v5588_v39 }
 0x2c4   : > { %v6930_v26 = vpop.permute.xlu0 %1406 }
 0x2c5   : > { %v6924_v37 = vpop.permute.xlu1 %1312 }
 0x2c6   : > { %14023 = vst [vmem:[#allocation116_spill] sm:$0xff] %v6924_v37  ;;  %v1344_v29 = vsel %vm770_vm4, %v6892_v43, %v6924_v37 }
 0x2c8   : > { %v6936_v49 = vpop.permute.xlu0 %1410 }
 0x2c9   : > { %v6928_v52 = vpop.permute.xlu1 %1316 }
 0x2cc   : > { %v6940_v18 = vpop.permute.xlu0 %1414 }
 0x2cd   : > { %v6932_v44 = vpop.permute.xlu1 %1320 }
 0x2d0   : > { %v6946_v56 = vpop.permute.xlu0 %1418 }
 0x2d1   : > { %v6934_v22 = vpop.permute.xlu1 %1324 }
 0x2d4   : > { %v6950_v31 = vpop.permute.xlu0 %1422 }
 0x2d5   : > { %v6938_v25 = vpop.permute.xlu1 %1328 }
 0x2d8   : > { %v6956_v50 = vpop.permute.xlu0 %1426 }
 0x2d9   : > { %v6942_v14 = vpop.permute.xlu1 %1332  ;;  %14028 = vst [vmem:[#allocation121_spill] sm:$0xff] %v6956_v50 }
 0x2dc   : > { %v6960_v7 = vpop.permute.xlu0 %1494 }
 0x2dd   : > { %v6944_v40 = vpop.permute.xlu1 %1400  ;;  %14029 = vst [vmem:[#allocation122_spill] sm:$0xff] %v6960_v7 }
 0x2de   : > { %14025 = vst [vmem:[#allocation118_spill] sm:$0xff] %v6944_v40  ;;  %v1444_v50 = vsel %vm868_vm5, %v6920_v35, %v6944_v40  ;;  %v1384_v40 = vadd.f32 %v1368_v5, %v1288_v63  ;;  %v1264_v63 = vsel %vm446_vm2, %v6840_v1, %v6894_v3 }
 0x2df   : > { %v1464_v54 = vmul.f32 %v1444_v50, %v5588_v39 }
 0x2e0   : > { %v6970_v2 = vpop.permute.xlu0 %1498 }
 0x2e1   : > { %v6948_v6 = vpop.permute.xlu1 %1404  ;;  %v1480_v20 = vadd.f32 %v1464_v54, %v1384_v40  ;;  %v1292_v54 = vmul.f32 %v1264_v63, %v5586_v38  ;;  %v1262_v40 = vsel %vm446_vm2, %v6848_v15, %v6900_v28 }
 0x2e2   : > { %14026 = vst [vmem:[#allocation119_spill] sm:$0xff] %v6948_v6  ;;  %v1442_v51 = vsel %vm868_vm5, %v6926_v59, %v6948_v6  ;;  %v14031_v6 = vld [vmem:[#allocation13_spill] sm:$0xff]  ;;  %v1386_v59 = vadd.f32 %v1370_v32, %v1290_v9 }
 0x2e3   : > { %v1466_v5 = vmul.f32 %v1442_v51, %v5588_v39  ;;  %v1032_v43 = vadd.f32 %v6116_v33, %v14031_v6  ;;  %v1342_v51 = vsel %vm770_vm4, %v6898_v23, %v6928_v52 }
 0x2e4   : > { %v6998_v55 = vpop.permute.xlu0 %1502 }
 0x2e5   : > { %v6952_v0 = vpop.permute.xlu1 %1408 }
 0x2e6   : > { %v1440_v37 = vsel %vm868_vm5, %v6930_v26, %v6952_v0 }
 0x2e7   : > { %v1468_v6 = vmul.f32 %v1440_v37, %v5588_v39  ;;  %v1374_v37 = vmul.f32 %v1342_v51, %v5588_v39 }
 0x2e8   : > { %v7042_v32 = vpop.permute.xlu0 %1506 }
 0x2e9   : > { %v6954_v24 = vpop.permute.xlu1 %1412 }
 0x2ea   : > { %14027 = vst [vmem:[#allocation120_spill] sm:$0xff] %v6954_v24  ;;  %v1438_v63 = vsel %vm868_vm5, %v6936_v49, %v6954_v24  ;;  %v1340_v24 = vsel %vm770_vm4, %v6902_v36, %v6932_v44 }
 0x2ed   : > { %v6958_v34 = vpop.permute.xlu1 %1416 }
 0x2f1   : > { %v6962_v47 = vpop.permute.xlu1 %1420 }
 0x2f5   : > { %v6964_v10 = vpop.permute.xlu1 %1424 }
 0x2f9   : > { %v6981_v27 = vpop.permute.xlu1 %1428 }
 0x2fd   : > { %v7000_v8 = vpop.permute.xlu1 %1496 }
 0x2fe   : > { %14030 = vst [vmem:[#allocation123_spill] sm:$0xff] %v7000_v8  ;;  %v1540_v50 = vsel %vm965_vm6, %v6960_v7, %v7000_v8  ;;  %v1372_v8 = vmul.f32 %v1344_v29, %v5588_v39  ;;  %v1482_v29 = vadd.f32 %v1466_v5, %v1386_v59 }
 0x2ff   : > { %v1560_v61 = vmul.f32 %v1540_v50, %v5586_v38 }
 0x300   : > { %v1388_v5 = vadd.f32 %v1372_v8, %v1292_v54  ;;  %v1470_v54 = vmul.f32 %v1438_v63, %v5588_v39  ;;  %v7088_v63 = vpop.permute.xlu0 %1510 }
 0x301   : > { %v7024_v7 = vadd.f32 %v1560_v61, %v1480_v20  ;;  %v7026_v57 = vpop.permute.xlu1 %1500  ;;  %v14033_v20 = vld [vmem:[#allocation15_spill] sm:$0xff] }
 0x302   : > { %v1538_v33 = vsel %vm965_vm6, %v6970_v2, %v7026_v57  ;;  %v1034_v59 = vadd.f32 %v6144_v42, %v14033_v20  ;;  %v1484_v8 = vadd.f32 %v1468_v6, %v1388_v5  ;;  %v1376_v6 = vmul.f32 %v1340_v24, %v5588_v39 }
 0x303   : > { %v7045_v9 = vadd.f32 %v7024_v7, %v1032_v43  ;;  %v1562_v50 = vmul.f32 %v1538_v33, %v5586_v38  ;;  %1626 = vrot.lane.b32.xlu0 %v7024_v7, %s5354_s5  ;;  %v1294_v33 = vmul.f32 %v1262_v40, %v5586_v38 }
 0x305   : > { %14032 = vst [vmem:[#allocation13_spill] sm:$0xff] %v7045_v9  ;;  %v7057_v61 = vadd.f32 %v1562_v50, %v1482_v29  ;;  %v7059_v43 = vpop.permute.xlu1 %1504  ;;  %v1260_v9 = vsel %vm446_vm2, %v6856_v19, %v6904_v48  ;;  %v1436_v29 = vsel %vm868_vm5, %v6940_v18, %v6958_v34  ;;  %v14035_v50 = vld [vmem:[#allocation19_spill] sm:$0xff]  ;;  %v1390_v48 = vadd.f32 %v1374_v37, %v1294_v33 }
 0x306   : > { %v1536_v42 = vsel %vm965_vm6, %v6998_v55, %v7059_v43  ;;  %v1036_v20 = vadd.f32 %v6172_v12, %v14035_v50  ;;  %v1338_v12 = vsel %vm770_vm4, %v6906_v11, %v6934_v22  ;;  %v1472_v33 = vmul.f32 %v1436_v29, %v5588_v39 }
 0x307   : > { %v7076_v40 = vadd.f32 %v7057_v61, %v1034_v59  ;;  %v1564_v51 = vmul.f32 %v1536_v42, %v5586_v38  ;;  %1630 = vrot.lane.b32.xlu0 %v7057_v61, %s5354_s5  ;;  %v1296_v42 = vmul.f32 %v1260_v9, %v5586_v38  ;;  %v1486_v37 = vadd.f32 %v1470_v54, %v1390_v48 }
 0x308   : > { %v1378_v29 = vmul.f32 %v1338_v12, %v5588_v39  ;;  %v7142_v12 = vpop.permute.xlu0 %1514 }
 0x309   : > { %14034 = vst [vmem:[#allocation15_spill] sm:$0xff] %v7076_v40  ;;  %v7090_v59 = vadd.f32 %v1564_v51, %v1484_v8  ;;  %v7092_v5 = vpop.permute.xlu1 %1508  ;;  %v1258_v40 = vsel %vm446_vm2, %v6862_v46, %v6908_v58  ;;  %v14037_v51 = vld [vmem:[#allocation21_spill] sm:$0xff]  ;;  %v1434_v58 = vsel %vm868_vm5, %v6946_v56, %v6962_v47  ;;  %v1392_v54 = vadd.f32 %v1376_v6, %v1296_v42 }
 0x30a   : > { %v1534_v24 = vsel %vm965_vm6, %v7042_v32, %v7092_v5  ;;  %v1038_v50 = vadd.f32 %v13924_v21, %v14037_v51  ;;  %v1298_v48 = vmul.f32 %v1258_v40, %v5586_v38  ;;  %v1336_v21 = vsel %vm770_vm4, %v6910_v16, %v6938_v25 }
 0x30b   : > { %v7109_v9 = vadd.f32 %v7090_v59, %v1036_v20  ;;  %v1566_v8 = vmul.f32 %v1534_v24, %v5586_v38  ;;  %1634 = vrot.lane.b32.xlu0 %v7090_v59, %s5354_s5  ;;  %v1256_v24 = vsel %vm446_vm2, %v6868_v4, %v6912_v45  ;;  %v1349_v40 = vsel %vm770_vm4, %v6942_v14, %v6880_v62  ;;  %v14039_v45 = vld [vmem:[#allocation23_spill] sm:$0xff] }
 0x30c   : > { %v1488_v42 = vadd.f32 %v1472_v33, %v1392_v54  ;;  %v1040_v14 = vadd.f32 %v6234_v53, %v14039_v45  ;;  %v1432_v62 = vsel %vm868_vm5, %v6950_v31, %v6964_v10  ;;  %v1300_v33 = vmul.f32 %v1256_v24, %v5586_v38 }
 0x30d   : > { %14036 = vst [vmem:[#allocation19_spill] sm:$0xff] %v7109_v9  ;;  %v7122_v20 = vadd.f32 %v1566_v8, %v1486_v37  ;;  %v7124_v9 = vpop.permute.xlu1 %1512  ;;  %v1474_v37 = vmul.f32 %v1434_v58, %v5588_v39  ;;  %v1394_v54 = vadd.f32 %v1378_v29, %v1298_v48  ;;  %v1380_v58 = vmul.f32 %v1336_v21, %v5588_v39 }
 0x30e   : > { %v1532_v6 = vsel %vm965_vm6, %v7088_v63, %v7124_v9  ;;  %v1351_v53 = vsel %vm282_vm7, %v1349_v40, 0.0  ;;  %v1445_v45 = vsel %vm868_vm5, %v6981_v27, %v6920_v35  ;;  %v1476_v24 = vmul.f32 %v1432_v62, %v5588_v39  ;;  %v14043_v40 = vld [vmem:[#allocation95_spill] sm:$0xff] }
 0x30f   : > { %v7146_v8 = vadd.f32 %v7122_v20, %v1038_v50  ;;  %v1568_v51 = vmul.f32 %v1532_v6, %v5586_v38  ;;  %1638 = vrot.lane.b32.xlu0 %v7122_v20, %s5354_s5  ;;  %v1269_v6 = vsel %vm446_vm2, %v6914_v41, %v6824_v60  ;;  %v1490_v29 = vadd.f32 %v1474_v37, %v1394_v54  ;;  %v14042_v60 = vld [vmem:[#allocation25_spill] sm:$0xff] }
 0x310   : > { %v1271_v27 = vsel %vm266_vm3, %v1269_v6, 0.0  ;;  %v1396_v35 = vadd.f32 %v1380_v58, %v1300_v33  ;;  %v1447_v37 = vsel %vm298_vm8, %v1445_v45, 0.0  ;;  %v1367_v54 = vmul.f32 %v1351_v53, %v5588_v39 }
 0x311   : > { %14038 = vst [vmem:[#allocation21_spill] sm:$0xff] %v7146_v8  ;;  %v7159_v50 = vadd.f32 %v1568_v51, %v1488_v42  ;;  %v7161_v8 = vpop.permute.xlu1 %1516  ;;  %v1042_v42 = vadd.f32 %v14043_v40, %v14042_v60  ;;  %v7188_v51 = vpop.permute.xlu0 %1518  ;;  %v14046_v60 = vld [vmem:[#allocation114_spill] sm:$0xff]  ;;  %v1287_v53 = vmul.f32 %v1271_v27, %v5586_v38  ;;  %v14049_v40 = vld [vmem:[#allocation96_spill] sm:$0xff] }
 0x312   : > { %v1530_v48 = vsel %vm965_vm6, %v7142_v12, %v7161_v8  ;;  %v1347_v33 = vsel %vm770_vm4, %v14046_v60, %v6886_v13  ;;  %v1492_v58 = vadd.f32 %v1476_v24, %v1396_v35  ;;  %v14052_v24 = vld [vmem:[#allocation117_spill] sm:$0xff] }
 0x313   : > { %14040 = vst [vmem:[#allocation23_spill] sm:$0xff] %v7159_v50  ;;  %v7179_v21 = vadd.f32 %v7159_v50, %v1040_v14  ;;  %v1570_v41 = vmul.f32 %v1530_v48, %v5586_v38  ;;  %1642 = vrot.lane.b32.xlu0 %v7159_v50, %s5354_s5  ;;  %v14050_v50 = vld [vmem:[#allocation98_spill] sm:$0xff]  ;;  %v1369_v27 = vmul.f32 %v1347_v33, %v5588_v39 }
 0x315   : > { %14041 = vst [vmem:[#allocation124_spill] sm:$0xff] %v7179_v21  ;;  %v7192_v62 = vadd.f32 %v1570_v41, %v1490_v29  ;;  %v7194_v14 = vpop.permute.xlu1 %1520  ;;  %v1463_v29 = vmul.f32 %v1447_v37, %v5588_v39  ;;  %v14048_v41 = vld [vmem:[#allocation28_spill] sm:$0xff]  ;;  %v14054_v37 = vld [vmem:[#allocation122_spill] sm:$0xff] }
 0x316   : > { %14045 = vst [vmem:[#allocation95_spill] sm:$0xff] %v7194_v14  ;;  %v1528_v48 = vsel %vm965_vm6, %v7188_v51, %v7194_v14  ;;  %v1044_v21 = vadd.f32 %v14049_v40, %v14048_v41  ;;  %v14051_v14 = vld [vmem:[#allocation107_spill] sm:$0xff]  ;;  %v14055_v40 = vld [vmem:[#allocation109_spill] sm:$0xff] }
 0x317   : > { %14044 = vst [vmem:[#allocation25_spill] sm:$0xff] %v7192_v62  ;;  %v7206_v6 = vadd.f32 %v7192_v62, %v1042_v42  ;;  %v1572_v45 = vmul.f32 %v1528_v48, %v5586_v38  ;;  %1646 = vrot.lane.b32.xlu0 %v7192_v62, %s5354_s5  ;;  %v1267_v13 = vsel %vm446_vm2, %v14051_v14, %v14050_v50  ;;  %v14053_v42 = vld [vmem:[#allocation118_spill] sm:$0xff]  ;;  %v14056_v62 = vld [vmem:[#allocation115_spill] sm:$0xff] }
 0x318   : > { %v1443_v35 = vsel %vm868_vm5, %v14053_v42, %v14052_v24  ;;  %v1345_v50 = vsel %vm770_vm4, %v14056_v62, %v14055_v40  ;;  %v14057_v14 = vld [vmem:[#allocation123_spill] sm:$0xff]  ;;  %v1289_v33 = vmul.f32 %v1267_v13, %v5586_v38  ;;  %v14059_v42 = vld [vmem:[#allocation12_spill] sm:$0xff] }
 0x319   : > { %14047 = vst [vmem:[#allocation114_spill] sm:$0xff] %v7206_v6  ;;  %v7223_v48 = vadd.f32 %v1572_v45, %v1492_v58  ;;  %v1525_v60 = vpop.permute.xlu1 %1524  ;;  %v1383_v6 = vadd.f32 %v1367_v54, %v1287_v53  ;;  %v1539_v24 = vsel %vm965_vm6, %v14057_v14, %v6970_v2  ;;  %v1465_v45 = vmul.f32 %v1443_v35, %v5588_v39  ;;  %v14061_v2 = vld [vmem:[#allocation108_spill] sm:$0xff] }
 0x31a   : > { %v1541_v41 = vsel %vm965_vm6, %v1525_v60, %v14054_v37  ;;  %v14060_v60 = vld [vmem:[#allocation93_spill] sm:$0xff]  ;;  %v1385_v14 = vadd.f32 %v1369_v27, %v1289_v33  ;;  %v1371_v13 = vmul.f32 %v1345_v50, %v5588_v39  ;;  %v14063_v35 = vld [vmem:[#allocation116_spill] sm:$0xff] }
 0x31b   : > { %v7238_v58 = vadd.f32 %v7223_v48, %v1044_v21  ;;  %v1543_v54 = vsel %vm314_vm9, %v1541_v41, 0.0  ;;  %1650 = vrot.lane.b32.xlu0 %v7223_v48, %s5354_s5  ;;  %v1479_v53 = vadd.f32 %v1463_v29, %v1383_v6  ;;  %v1031_v37 = vadd.f32 %v14060_v60, %v14059_v42  ;;  %v14062_v41 = vld [vmem:[#allocation119_spill] sm:$0xff] }
 0x31c   : > { %v1559_v62 = vmul.f32 %v1543_v54, %v5586_v38  ;;  %v1265_v21 = vsel %vm446_vm2, %v14061_v2, %v6840_v1  ;;  %v1441_v40 = vsel %vm868_vm5, %v14062_v41, %v6930_v26  ;;  %v1561_v6 = vmul.f32 %v1539_v24, %v5586_v38  ;;  %v14064_v42 = vld [vmem:[#allocation27_spill] sm:$0xff]  ;;  %v14069_v41 = vld [vmem:[#allocation110_spill] sm:$0xff] }
 0x31d   : > { %14058 = vst [vmem:[#allocation28_spill] sm:$0xff] %v7238_v58  ;;  %v1343_v54 = vsel %vm770_vm4, %v14063_v35, %v6898_v23  ;;  %v1537_v1 = vsel %vm965_vm6, %v7026_v57, %v6998_v55  ;;  %v1291_v26 = vmul.f32 %v1265_v21, %v5586_v38  ;;  %v1481_v27 = vadd.f32 %v1465_v45, %v1385_v14 }
 0x31e   : > { %v7259_v29 = vadd.f32 %v1559_v62, %v1479_v53  ;;  %v1467_v50 = vmul.f32 %v1441_v40, %v5588_v39  ;;  %v1263_v23 = vsel %vm446_vm2, %v6894_v3, %v6848_v15  ;;  %v1439_v55 = vsel %vm868_vm5, %v6952_v0, %v6936_v49 }
 0x31f   : > { %1686 = vrot.lane.b32.xlu0 %v14064_v42, %s5356_s11  ;;  %v1387_v57 = vadd.f32 %v1371_v13, %v1291_v26  ;;  %v1373_v33 = vmul.f32 %v1343_v54, %v5588_v39  ;;  %v7287_v45 = vadd.f32 %v1561_v6, %v1481_v27  ;;  %v1563_v53 = vmul.f32 %v1537_v1, %v5586_v38  ;;  %v14071_v6 = vld [vmem:[#allocation111_spill] sm:$0xff]  ;;  %v14073_v54 = vld [vmem:[#allocation113_spill] sm:$0xff] }
 0x320   : > { %v7274_v24 = vadd.f32 %v7259_v29, %v1031_v37  ;;  %1624 = vrot.lane.b32.xlu1 %v7259_v29, %s5354_s5  ;;  %v1341_v62 = vsel %vm770_vm4, %v6928_v52, %v6902_v36  ;;  %v1535_v15 = vsel %vm965_vm6, %v7059_v43, %v7042_v32  ;;  %v1293_v3 = vmul.f32 %v1263_v23, %v5586_v38  ;;  %v14067_v52 = vld [vmem:[#allocation120_spill] sm:$0xff]  ;;  %v14074_v27 = vld [vmem:[#allocation105_spill] sm:$0xff] }
 0x321   : > { %14066 = vst [vmem:[#allocation98_spill] sm:$0xff] %v7287_v45  ;;  %v1483_v0 = vadd.f32 %v1467_v50, %v1387_v57  ;;  %v1469_v49 = vmul.f32 %v1439_v55, %v5588_v39  ;;  %v1261_v36 = vsel %vm446_vm2, %v6900_v28, %v6856_v19  ;;  %v1437_v32 = vsel %vm868_vm5, %v14067_v52, %v6940_v18  ;;  %v14075_v50 = vld [vmem:[#allocation112_spill] sm:$0xff]  ;;  %v14076_v23 = vld [vmem:[#allocation121_spill] sm:$0xff]  ;;  %v1523_v55 = vpop.permute.xlu0 %1522 }
 0x322   : > { %14065 = vst [vmem:[#allocation96_spill] sm:$0xff] %v7274_v24  ;;  %v1389_v43 = vadd.f32 %v1373_v33, %v1293_v3  ;;  %v1565_v37 = vmul.f32 %v1535_v15, %v5586_v38  ;;  %v1339_v2 = vsel %vm770_vm4, %v6932_v44, %v6906_v11  ;;  %v1533_v19 = vsel %vm965_vm6, %v7092_v5, %v7088_v63  ;;  %v14080_v3 = vld [vmem:[#allocation95_spill] sm:$0xff] }
 0x323   : > { %1690 = vrot.lane.b32.xlu0 %v7024_v7, %s5356_s11  ;;  %v1375_v7 = vmul.f32 %v1341_v62, %v5588_v39  ;;  %v7313_v60 = vadd.f32 %v1563_v53, %v1483_v0  ;;  %v1295_v18 = vmul.f32 %v1261_v36, %v5586_v38  ;;  %v1471_v21 = vmul.f32 %v1437_v32, %v5588_v39  ;;  %v14078_v53 = vld [vmem:[#allocation67_spill] sm:$0xff]  ;;  %v14079_v62 = vld [vmem:[#allocation106_spill] sm:$0xff] }
 0x324   : > { %1628 = vrot.lane.b32.xlu1 %v7287_v45, %s5354_s5  ;;  %v1485_v28 = vadd.f32 %v1469_v49, %v1389_v43  ;;  %v1259_v11 = vsel %vm446_vm2, %v14069_v41, %v6862_v46  ;;  %v1435_v44 = vsel %vm868_vm5, %v6958_v34, %v6946_v56  ;;  %v1567_v40 = vmul.f32 %v1533_v19, %v5586_v38  ;;  %v14081_v49 = vld [vmem:[#allocation23_spill] sm:$0xff]  ;;  %v14082_v32 = vld [vmem:[#allocation62_spill] sm:$0xff] }
 0x325   : > { %14068 = vst [vmem:[#allocation107_spill] sm:$0xff] %v7313_v60  ;;  %v1391_v63 = vadd.f32 %v1375_v7, %v1295_v18  ;;  %v1337_v14 = vsel %vm770_vm4, %v6934_v22, %v6910_v16  ;;  %v1531_v46 = vsel %vm965_vm6, %v7124_v9, %v7142_v12  ;;  %v1297_v34 = vmul.f32 %v1259_v11, %v5586_v38  ;;  %v14083_v43 = vld [vmem:[#allocation58_spill] sm:$0xff] }
 0x326   : > { %v7339_v5 = vadd.f32 %v1565_v37, %v1485_v28  ;;  %v1473_v13 = vmul.f32 %v1435_v44, %v5588_v39  ;;  %v1257_v22 = vsel %vm446_vm2, %v14071_v6, %v6868_v4  ;;  %v1433_v16 = vsel %vm868_vm5, %v6962_v47, %v6950_v31  ;;  %v14085_v28 = vld [vmem:[#allocation25_spill] sm:$0xff] }
 0x327   : > { %1694 = vrot.lane.b32.xlu0 %v7057_v61, %s5356_s11  ;;  %v1377_v61 = vmul.f32 %v1339_v2, %v5588_v39  ;;  %v1487_v56 = vadd.f32 %v1471_v21, %v1391_v63  ;;  %v1569_v35 = vmul.f32 %v1531_v46, %v5586_v38  ;;  %v1335_v1 = vsel %vm770_vm4, %v6938_v25, %v14073_v54  ;;  %v14086_v44 = vld [vmem:[#allocation53_spill] sm:$0xff]  ;;  %v14090_v46 = vld [vmem:[#allocation68_spill] sm:$0xff] }
 0x328   : > { %1632 = vrot.lane.b32.xlu1 %v7313_v60, %s5354_s5  ;;  %14070 = vst [vmem:[#allocation117_spill] sm:$0xff] %v7339_v5  ;;  %v1529_v4 = vsel %vm965_vm6, %v7161_v8, %v7188_v51  ;;  %v1299_v47 = vmul.f32 %v1257_v22, %v5586_v38  ;;  %v1475_v26 = vmul.f32 %v1433_v16, %v5588_v39  ;;  %v14087_v63 = vld [vmem:[#allocation97_spill] sm:$0xff]  ;;  %v14094_v16 = vld [vmem:[#allocation99_spill] sm:$0xff] }
 0x329   : > { %v1393_v9 = vadd.f32 %v1377_v61, %v1297_v34  ;;  %v7365_v12 = vadd.f32 %v1567_v40, %v1487_v56  ;;  %v1255_v25 = vsel %vm446_vm2, %v14075_v50, %v14074_v27  ;;  %v1431_v8 = vsel %vm868_vm5, %v6964_v10, %v14076_v23  ;;  %v14093_v22 = vld [vmem:[#allocation69_spill] sm:$0xff]  ;;  %v14101_v27 = vld [vmem:[#allocation70_spill] sm:$0xff]  ;;  %v14103_v23 = vld [vmem:[#allocation71_spill] sm:$0xff] }
 0x32a   : > { %v1571_v33 = vmul.f32 %v1529_v4, %v5586_v38  ;;  %v1173_v15 = vsel %vm591_vm10, %v14079_v62, %v14078_v53  ;;  %v1527_v0 = vsel %vm965_vm6, %v14080_v3, %v1523_v55  ;;  %v1301_v10 = vmul.f32 %v1255_v25, %v5586_v38  ;;  %v14098_v4 = vld [vmem:[#allocation55_spill] sm:$0xff]  ;;  %v14106_v55 = vld [vmem:[#allocation54_spill] sm:$0xff] }
 0x32b   : > { %1698 = vrot.lane.b32.xlu0 %v7090_v59, %s5356_s11  ;;  %v1379_v59 = vmul.f32 %v1337_v14, %v5588_v39  ;;  %14072 = vst [vmem:[#allocation118_spill] sm:$0xff] %v7365_v12  ;;  %v1489_v31 = vadd.f32 %v1473_v13, %v1393_v9  ;;  %v1477_v52 = vmul.f32 %v1431_v8, %v5588_v39  ;;  %v1174_v37 = vsel %vm249_vm11, %v1173_v15, 0.0  ;;  %v14089_v14 = vld [vmem:[#allocation46_spill] sm:$0xff]  ;;  %v14091_v13 = vld [vmem:[#allocation85_spill] sm:$0xff] }
 0x32c   : > { %1636 = vrot.lane.b32.xlu1 %v7339_v5, %s5354_s5  ;;  %v1109_v7 = vsel %vm365_vm0, %v14083_v43, %v14082_v32  ;;  %v1573_v18 = vmul.f32 %v1527_v0, %v5586_v38  ;;  %v1171_v61 = vsel %vm591_vm10, %v14087_v63, %v14086_v44  ;;  %v1107_v34 = vsel %vm365_vm0, %v14090_v46, %v14089_v14  ;;  %v14104_v8 = vld [vmem:[#allocation101_spill] sm:$0xff] }
 0x32d   : > { %v1395_v51 = vadd.f32 %v1379_v59, %v1299_v47  ;;  %v7391_v57 = vadd.f32 %v1569_v35, %v1489_v31  ;;  %v1110_v21 = vsel %vm233_vm1, %v1109_v7, 0.0  ;;  %v1192_v56 = vadd.f32 %v1171_v61, %v1107_v34  ;;  %v14096_v59 = vld [vmem:[#allocation52_spill] sm:$0xff]  ;;  %v14108_v0 = vld [vmem:[#allocation57_spill] sm:$0xff] }
 0x32e   : > { %v1190_v11 = vadd.f32 %v1174_v37, %v1110_v21  ;;  %v1169_v9 = vsel %vm591_vm10, %v14094_v16, %v14093_v22  ;;  %v14099_v47 = vld [vmem:[#allocation100_spill] sm:$0xff] }
 0x32f   : > { %1702 = vrot.lane.b32.xlu0 %v7122_v20, %s5356_s11  ;;  %v1381_v20 = vmul.f32 %v1335_v1, %v5588_v39  ;;  %14077 = vst [vmem:[#allocation122_spill] sm:$0xff] %v7391_v57  ;;  %v1491_v36 = vadd.f32 %v1475_v26, %v1395_v51  ;;  %v7452_v54 = vmul.f32 %v1192_v56, %v14091_v13  ;;  %v14100_v26 = vld [vmem:[#allocation48_spill] sm:$0xff] }
 0x330   : > { %1640 = vrot.lane.b32.xlu1 %v7365_v12, %s5354_s5  ;;  %v7437_v6 = vmul.f32 %v1190_v11, %v14091_v13  ;;  %v1167_v31 = vsel %vm591_vm10, %v14099_v47, %v14098_v4  ;;  %v1103_v50 = vsel %vm365_vm0, %v14101_v27, %v14100_v26  ;;  %v1165_v51 = vsel %vm591_vm10, %v14104_v8, %v14103_v23  ;;  %v14116_v11 = vld [vmem:[#allocation56_spill] sm:$0xff] }
 0x331   : > { %v1397_v2 = vadd.f32 %v1381_v20, %v1301_v10  ;;  %v7413_v19 = vadd.f32 %v1571_v33, %v1491_v36  ;;  %14097 = vst [vmem:[#allocation12_spill] sm:$0xff] %v7452_v54  ;;  %v1196_v25 = vadd.f32 %v1167_v31, %v1103_v50  ;;  %v14105_v20 = vld [vmem:[#allocation65_spill] sm:$0xff]  ;;  %v14110_v36 = vld [vmem:[#allocation66_spill] sm:$0xff] }
 0x332   : > { %14092 = vst [vmem:[#allocation123_spill] sm:$0xff] %v7437_v6  ;;  %v1101_v33 = vsel %vm365_vm0, %v14106_v55, %v14105_v20  ;;  %v14120_v31 = vld [vmem:[#allocation50_spill] sm:$0xff] }
 0x333   : > { %1706 = vrot.lane.b32.xlu0 %v14081_v49, %s5356_s11  ;;  %14084 = vst [vmem:[#allocation109_spill] sm:$0xff] %v7413_v19  ;;  %v1493_v41 = vadd.f32 %v1477_v52, %v1397_v2  ;;  %v7482_v15 = vmul.f32 %v1196_v25, %v14091_v13  ;;  %v1198_v3 = vadd.f32 %v1165_v51, %v1101_v33  ;;  %v14109_v49 = vld [vmem:[#allocation102_spill] sm:$0xff]  ;;  %v14111_v52 = vld [vmem:[#allocation72_spill] sm:$0xff] }
 0x334   : > { %1644 = vrot.lane.b32.xlu1 %v7391_v57, %s5354_s5  ;;  %v1163_v10 = vsel %vm591_vm10, %v14109_v49, %v14108_v0  ;;  %v1099_v7 = vsel %vm365_vm0, %v14111_v52, %v14110_v36  ;;  %v14121_v50 = vld [vmem:[#allocation74_spill] sm:$0xff] }
 0x335   : > { %v7426_v40 = vadd.f32 %v1573_v18, %v1493_v41  ;;  %14107 = vst [vmem:[#allocation108_spill] sm:$0xff] %v7482_v15  ;;  %v7497_v37 = vmul.f32 %v1198_v3, %v14091_v13  ;;  %v1200_v2 = vadd.f32 %v1163_v10, %v1099_v7  ;;  %v14113_v18 = vld [vmem:[#allocation73_spill] sm:$0xff]  ;;  %v14115_v41 = vld [vmem:[#allocation51_spill] sm:$0xff]  ;;  %v1095_v25 = vsel %vm365_vm0, %v14121_v50, %v14120_v31 }
 0x336   : > { %v1097_v61 = vsel %vm365_vm0, %v14116_v11, %v14115_v41  ;;  %v1172_v3 = vsel %vm591_vm10, %v14078_v53, %v14087_v63  ;;  %v1108_v10 = vsel %vm365_vm0, %v14082_v32, %v14090_v46  ;;  %v1170_v53 = vsel %vm591_vm10, %v14086_v44, %v14094_v16 }
 0x337   : > { %1710 = vrot.lane.b32.xlu0 %v14085_v28, %s5356_s11  ;;  %14088 = vst [vmem:[#allocation115_spill] sm:$0xff] %v7426_v40  ;;  %14112 = vst [vmem:[#allocation119_spill] sm:$0xff] %v7497_v37  ;;  %v14114_v28 = vld [vmem:[#allocation103_spill] sm:$0xff]  ;;  %v7512_v34 = vmul.f32 %v1200_v2, %v14091_v13  ;;  %v1191_v2 = vadd.f32 %v1172_v3, %v1108_v10  ;;  %v1106_v32 = vsel %vm365_vm0, %v14089_v14, %v14096_v59 }
 0x338   : > { %1648 = vrot.lane.b32.xlu1 %v7413_v19, %s5354_s5  ;;  %v1161_v21 = vsel %vm591_vm10, %v14114_v28, %v14113_v18  ;;  %v1193_v46 = vadd.f32 %v1170_v53, %v1106_v32  ;;  %v1168_v44 = vsel %vm591_vm10, %v14093_v22, %v14099_v47  ;;  %v1166_v22 = vsel %vm591_vm10, %v14098_v4, %v14104_v8 }
 0x339   : > { %14117 = vst [vmem:[#allocation116_spill] sm:$0xff] %v7512_v34  ;;  %v1202_v56 = vadd.f32 %v1161_v21, %v1097_v61  ;;  %v7557_v63 = vmul.f32 %v1191_v2, %v14091_v13  ;;  %v1164_v4 = vsel %vm591_vm10, %v14103_v23, %v14109_v49  ;;  %v1162_v23 = vsel %vm591_vm10, %v14108_v0, %v14114_v28  ;;  %v7625_v28 = vpop.permute.xlu0 %1622 }
 0x33a   : > { %v7572_v16 = vmul.f32 %v1193_v46, %v14091_v13  ;;  %14129 = vst [vmem:[#allocation67_spill] sm:$0xff] %v7625_v28 }
 0x33b   : > { %1714 = vrot.lane.b32.xlu0 %v7223_v48, %s5356_s11  ;;  %v14095_v48 = vld [vmem:[#allocation64_spill] sm:$0xff]  ;;  %v7527_v51 = vmul.f32 %v1202_v56, %v14091_v13  ;;  %14124 = vst [vmem:[#allocation111_spill] sm:$0xff] %v7557_v63 }
 0x33c   : > { %1652 = vrot.lane.b32.xlu1 %v7426_v40, %s5354_s5  ;;  %v1105_v35 = vsel %vm365_vm0, %v14096_v59, %v14095_v48  ;;  %v1104_v14 = vsel %vm365_vm0, %v14095_v48, %v14101_v27  ;;  %14125 = vst [vmem:[#allocation113_spill] sm:$0xff] %v7572_v16  ;;  %v1102_v48 = vsel %vm365_vm0, %v14100_v26, %v14106_v55 }
 0x33d   : > { %v1194_v1 = vadd.f32 %v1169_v9, %v1105_v35  ;;  %v14118_v9 = vld [vmem:[#allocation59_spill] sm:$0xff]  ;;  %v14119_v35 = vld [vmem:[#allocation104_spill] sm:$0xff]  ;;  %14122 = vst [vmem:[#allocation120_spill] sm:$0xff] %v7527_v51  ;;  %v1195_v59 = vadd.f32 %v1168_v44, %v1104_v14  ;;  %v1197_v27 = vadd.f32 %v1166_v22, %v1102_v48  ;;  %v1100_v26 = vsel %vm365_vm0, %v14105_v20, %v14111_v52 }
 0x33e   : > { %v1199_v55 = vadd.f32 %v1164_v4, %v1100_v26  ;;  %v1098_v20 = vsel %vm365_vm0, %v14110_v36, %v14116_v11  ;;  %v1160_v0 = vsel %vm591_vm10, %v14113_v18, %v14119_v35  ;;  %v1096_v36 = vsel %vm365_vm0, %v14115_v41, %v14121_v50 }
 0x33f   : > { %1782 = vrot.lane.b32.xlu0 %v7437_v6, %s5355_s24  ;;  %v7587_v47 = vmul.f32 %v1195_v59, %v14091_v13  ;;  %v7602_v8 = vmul.f32 %v1197_v27, %v14091_v13  ;;  %v1201_v52 = vadd.f32 %v1162_v23, %v1098_v20  ;;  %v1203_v11 = vadd.f32 %v1160_v0, %v1096_v36 }
 0x340   : > { %1688 = vrot.lane.b32.xlu1 %v7259_v29, %s5356_s11  ;;  %v7467_v29 = vmul.f32 %v1194_v1, %v14091_v13  ;;  %v1159_v1 = vsel %vm591_vm10, %v14119_v35, %v14118_v9  ;;  %v7617_v49 = vmul.f32 %v1199_v55, %v14091_v13  ;;  %v1158_v18 = vsel %vm591_vm10, %v14118_v9, %v14079_v62 }
 0x341   : > { %v1204_v33 = vadd.f32 %v1159_v1, %v1095_v25  ;;  %14126 = vst [vmem:[#allocation105_spill] sm:$0xff] %v7587_v47  ;;  %14127 = vst [vmem:[#allocation112_spill] sm:$0xff] %v7602_v8  ;;  %v7634_v21 = vmul.f32 %v1201_v52, %v14091_v13  ;;  %v1094_v41 = vsel %vm365_vm0, %v14120_v31, %v14083_v43 }
 0x342   : > { %14102 = vst [vmem:[#allocation93_spill] sm:$0xff] %v7467_v29  ;;  %14128 = vst [vmem:[#allocation121_spill] sm:$0xff] %v7617_v49  ;;  %v7651_v56 = vmul.f32 %v1203_v11, %v14091_v13  ;;  %v1205_v35 = vadd.f32 %v1158_v18, %v1094_v41 }
 0x343   : > { %1786 = vrot.lane.b32.xlu0 %v7452_v54, %s5355_s24  ;;  %v7542_v7 = vmul.f32 %v1204_v33, %v14091_v13  ;;  %14130 = vst [vmem:[#allocation106_spill] sm:$0xff] %v7634_v21 }
 0x344   : > { %1692 = vrot.lane.b32.xlu1 %v7287_v45, %s5356_s11  ;;  %14132 = vst [vmem:[#allocation23_spill] sm:$0xff] %v7651_v56  ;;  %v7660_v9 = vmul.f32 %v1205_v35, %v14091_v13 }
 0x345   : > { %14123 = vst [vmem:[#allocation110_spill] sm:$0xff] %v7542_v7 }
 0x346   : > { %14134 = vst [vmem:[#allocation58_spill] sm:$0xff] %v7660_v9 }
 0x347   : > { %1790 = vrot.lane.b32.xlu0 %v7467_v29, %s5355_s24 }
 0x348   : > { %1696 = vrot.lane.b32.xlu1 %v7313_v60, %s5356_s11 }
 0x34b   : > { %1794 = vrot.lane.b32.xlu0 %v7482_v15, %s5355_s24 }
 0x34c   : > { %1700 = vrot.lane.b32.xlu1 %v7339_v5, %s5356_s11 }
 0x34f   : > { %1798 = vrot.lane.b32.xlu0 %v7497_v37, %s5355_s24 }
 0x350   : > { %1704 = vrot.lane.b32.xlu1 %v7365_v12, %s5356_s11 }
 0x353   : > { %1802 = vrot.lane.b32.xlu0 %v7512_v34, %s5355_s24 }
 0x354   : > { %1708 = vrot.lane.b32.xlu1 %v7391_v57, %s5356_s11 }
 0x357   : > { %1806 = vrot.lane.b32.xlu0 %v7527_v51, %s5355_s24 }
 0x358   : > { %1712 = vrot.lane.b32.xlu1 %v7413_v19, %s5356_s11 }
 0x35b   : > { %1810 = vrot.lane.b32.xlu0 %v7542_v7, %s5355_s24 }
 0x35c   : > { %1716 = vrot.lane.b32.xlu1 %v7426_v40, %s5356_s11 }
 0x35f   : > { %1862 = vrot.lane.b32.xlu0 %v7437_v6, %s5358_s13 }
 0x360   : > { %1784 = vrot.lane.b32.xlu1 %v7557_v63, %s5355_s24 }
 0x363   : > { %1866 = vrot.lane.b32.xlu0 %v7452_v54, %s5358_s13 }
 0x364   : > { %1788 = vrot.lane.b32.xlu1 %v7572_v16, %s5355_s24 }
 0x367   : > { %1870 = vrot.lane.b32.xlu0 %v7467_v29, %s5358_s13 }
 0x368   : > { %1792 = vrot.lane.b32.xlu1 %v7587_v47, %s5355_s24 }
 0x36b   : > { %1874 = vrot.lane.b32.xlu0 %v7482_v15, %s5358_s13 }
 0x36c   : > { %1796 = vrot.lane.b32.xlu1 %v7602_v8, %s5355_s24 }
 0x36f   : > { %1878 = vrot.lane.b32.xlu0 %v7497_v37, %s5358_s13 }
 0x370   : > { %1800 = vrot.lane.b32.xlu1 %v7617_v49, %s5355_s24 }
 0x373   : > { %1882 = vrot.lane.b32.xlu0 %v7512_v34, %s5358_s13 }
 0x374   : > { %1804 = vrot.lane.b32.xlu1 %v7634_v21, %s5355_s24 }
 0x375   : > { %v7648_v61 = vpop.permute.xlu0 %1626 }
 0x376   : > { %14131 = vst [vmem:[#allocation95_spill] sm:$0xff] %v7648_v61 }
 0x377   : > { %1886 = vrot.lane.b32.xlu0 %v7527_v51, %s5358_s13 }
 0x378   : > { %1808 = vrot.lane.b32.xlu1 %v7651_v56, %s5355_s24 }
 0x379   : > { %v7657_v62 = vpop.permute.xlu0 %1630 }
 0x37a   : > { %14133 = vst [vmem:[#allocation62_spill] sm:$0xff] %v7657_v62 }
 0x37b   : > { %1890 = vrot.lane.b32.xlu0 %v7542_v7, %s5358_s13 }
 0x37c   : > { %1812 = vrot.lane.b32.xlu1 %v7660_v9, %s5355_s24 }
 0x37d   : > { %v7666_v43 = vpop.permute.xlu0 %1634 }
 0x37e   : > { %14135 = vst [vmem:[#allocation25_spill] sm:$0xff] %v7666_v43 }
 0x37f   : > { %1958 = vrot.lane.b32.xlu0 %v7437_v6, %s5359_s18 }
 0x380   : > { %1864 = vrot.lane.b32.xlu1 %v7557_v63, %s5358_s13 }
 0x381   : > { %v7672_v1 = vpop.permute.xlu0 %1638 }
 0x382   : > { %14136 = vst [vmem:[#allocation53_spill] sm:$0xff] %v7672_v1 }
 0x383   : > { %1962 = vrot.lane.b32.xlu0 %v7452_v54, %s5359_s18 }
 0x384   : > { %1868 = vrot.lane.b32.xlu1 %v7572_v16, %s5358_s13 }
 0x385   : > { %v7678_v31 = vpop.permute.xlu0 %1642 }
 0x386   : > { %14137 = vst [vmem:[#allocation97_spill] sm:$0xff] %v7678_v31 }
 0x387   : > { %1966 = vrot.lane.b32.xlu0 %v7467_v29, %s5359_s18 }
 0x388   : > { %1872 = vrot.lane.b32.xlu1 %v7587_v47, %s5358_s13 }
 0x389   : > { %v7684_v50 = vpop.permute.xlu0 %1646 }
 0x38a   : > { %14138 = vst [vmem:[#allocation46_spill] sm:$0xff] %v7684_v50 }
 0x38b   : > { %1970 = vrot.lane.b32.xlu0 %v7482_v15, %s5359_s18 }
 0x38c   : > { %1876 = vrot.lane.b32.xlu1 %v7602_v8, %s5358_s13 }
 0x38d   : > { %v7690_v25 = vpop.permute.xlu0 %1650 }
 0x38e   : > { %14139 = vst [vmem:[#allocation68_spill] sm:$0xff] %v7690_v25 }
 0x38f   : > { %1974 = vrot.lane.b32.xlu0 %v7497_v37, %s5359_s18 }
 0x390   : > { %1880 = vrot.lane.b32.xlu1 %v7617_v49, %s5358_s13 }
 0x391   : > { %v7696_v33 = vpop.permute.xlu0 %1686 }
 0x392   : > { %14140 = vst [vmem:[#allocation69_spill] sm:$0xff] %v7696_v33  ;;  %v7698_v3 = vpop.permute.xlu1 %1624 }
 0x393   : > { %14141 = vst [vmem:[#allocation99_spill] sm:$0xff] %v7698_v3  ;;  %1978 = vrot.lane.b32.xlu0 %v7512_v34, %s5359_s18 }
 0x394   : > { %1884 = vrot.lane.b32.xlu1 %v7634_v21, %s5358_s13 }
 0x395   : > { %v7704_v10 = vpop.permute.xlu0 %1690 }
 0x396   : > { %14142 = vst [vmem:[#allocation64_spill] sm:$0xff] %v7704_v10  ;;  %v7706_v2 = vpop.permute.xlu1 %1628 }
 0x397   : > { %14143 = vst [vmem:[#allocation52_spill] sm:$0xff] %v7706_v2  ;;  %1982 = vrot.lane.b32.xlu0 %v7527_v51, %s5359_s18 }
 0x398   : > { %1888 = vrot.lane.b32.xlu1 %v7651_v56, %s5358_s13 }
 0x399   : > { %v7712_v53 = vpop.permute.xlu0 %1694 }
 0x39a   : > { %14144 = vst [vmem:[#allocation55_spill] sm:$0xff] %v7712_v53  ;;  %v7714_v32 = vpop.permute.xlu1 %1632 }
 0x39b   : > { %14145 = vst [vmem:[#allocation100_spill] sm:$0xff] %v7714_v32  ;;  %1986 = vrot.lane.b32.xlu0 %v7542_v7, %s5359_s18 }
 0x39c   : > { %1892 = vrot.lane.b32.xlu1 %v7660_v9, %s5358_s13 }
 0x39d   : > { %v7720_v46 = vpop.permute.xlu0 %1698 }
 0x39e   : > { %14146 = vst [vmem:[#allocation48_spill] sm:$0xff] %v7720_v46  ;;  %v7722_v44 = vpop.permute.xlu1 %1636 }
 0x39f   : > { %14147 = vst [vmem:[#allocation70_spill] sm:$0xff] %v7722_v44  ;;  %2054 = vrot.lane.b32.xlu0 %v7437_v6, %s5360_s20 }
 0x3a0   : > { %1960 = vrot.lane.b32.xlu1 %v7557_v63, %s5359_s18 }
 0x3a1   : > { %v7728_v14 = vpop.permute.xlu0 %1702 }
 0x3a2   : > { %14148 = vst [vmem:[#allocation71_spill] sm:$0xff] %v7728_v14  ;;  %v7730_v59 = vpop.permute.xlu1 %1640 }
 0x3a3   : > { %14149 = vst [vmem:[#allocation101_spill] sm:$0xff] %v7730_v59  ;;  %2058 = vrot.lane.b32.xlu0 %v7452_v54, %s5360_s20 }
 0x3a4   : > { %1964 = vrot.lane.b32.xlu1 %v7572_v16, %s5359_s18 }
 0x3a5   : > { %v7736_v22 = vpop.permute.xlu0 %1706 }
 0x3a6   : > { %14150 = vst [vmem:[#allocation65_spill] sm:$0xff] %v7736_v22  ;;  %v7738_v48 = vpop.permute.xlu1 %1644 }
 0x3a7   : > { %14151 = vst [vmem:[#allocation54_spill] sm:$0xff] %v7738_v48  ;;  %2062 = vrot.lane.b32.xlu0 %v7467_v29, %s5360_s20 }
 0x3a8   : > { %1968 = vrot.lane.b32.xlu1 %v7587_v47, %s5359_s18 }
 0x3a9   : > { %v7744_v27 = vpop.permute.xlu0 %1710 }
 0x3aa   : > { %14152 = vst [vmem:[#allocation57_spill] sm:$0xff] %v7744_v27  ;;  %v7746_v4 = vpop.permute.xlu1 %1648 }
 0x3ab   : > { %14153 = vst [vmem:[#allocation102_spill] sm:$0xff] %v7746_v4  ;;  %2066 = vrot.lane.b32.xlu0 %v7482_v15, %s5360_s20 }
 0x3ac   : > { %1972 = vrot.lane.b32.xlu1 %v7602_v8, %s5359_s18 }
 0x3ad   : > { %v7752_v26 = vpop.permute.xlu0 %1714 }
 0x3ae   : > { %14154 = vst [vmem:[#allocation66_spill] sm:$0xff] %v7752_v26  ;;  %v7754_v55 = vpop.permute.xlu1 %1652 }
 0x3af   : > { %14155 = vst [vmem:[#allocation72_spill] sm:$0xff] %v7754_v55  ;;  %2070 = vrot.lane.b32.xlu0 %v7497_v37, %s5360_s20 }
 0x3b0   : > { %1976 = vrot.lane.b32.xlu1 %v7617_v49, %s5359_s18 }
 0x3b1   : > { %v7760_v23 = vpop.permute.xlu0 %1782 }
 0x3b2   : > { %v7762_v20 = vpop.permute.xlu1 %1688 }
 0x3b3   : > { %14156 = vst [vmem:[#allocation73_spill] sm:$0xff] %v7762_v20  ;;  %2074 = vrot.lane.b32.xlu0 %v7512_v34, %s5360_s20 }
 0x3b4   : > { %1980 = vrot.lane.b32.xlu1 %v7634_v21, %s5359_s18 }
 0x3b5   : > { %v7768_v52 = vpop.permute.xlu0 %1786 }
 0x3b6   : > { %v7770_v0 = vpop.permute.xlu1 %1692 }
 0x3b7   : > { %14157 = vst [vmem:[#allocation103_spill] sm:$0xff] %v7770_v0  ;;  %2078 = vrot.lane.b32.xlu0 %v7527_v51, %s5360_s20 }
 0x3b8   : > { %1984 = vrot.lane.b32.xlu1 %v7651_v56, %s5359_s18 }
 0x3b9   : > { %v7776_v36 = vpop.permute.xlu0 %1790 }
 0x3ba   : > { %v7778_v11 = vpop.permute.xlu1 %1696 }
 0x3bb   : > { %14158 = vst [vmem:[#allocation51_spill] sm:$0xff] %v7778_v11  ;;  %2082 = vrot.lane.b32.xlu0 %v7542_v7, %s5360_s20 }
 0x3bc   : > { %1988 = vrot.lane.b32.xlu1 %v7660_v9, %s5359_s18 }
 0x3bd   : > { %v7784_v18 = vpop.permute.xlu0 %1794 }
 0x3be   : > { %v7786_v41 = vpop.permute.xlu1 %1700 }
 0x3bf   : > { %14159 = vst [vmem:[#allocation56_spill] sm:$0xff] %v7786_v41  ;;  %2182 = vrot.lane.b32.xlu0 %v14064_v42, %s5354_s5 }
 0x3c0   : > { %2056 = vrot.lane.b32.xlu1 %v7557_v63, %s5360_s20 }
 0x3c1   : > { %v7792_v35 = vpop.permute.xlu0 %1798 }
 0x3c2   : > { %v7794_v40 = vpop.permute.xlu1 %1704 }
 0x3c3   : > { %14160 = vst [vmem:[#allocation59_spill] sm:$0xff] %v7794_v40 }
 0x3c4   : > { %2060 = vrot.lane.b32.xlu1 %v7572_v16, %s5360_s20 }
 0x3c5   : > { %v7798_v19 = vpop.permute.xlu0 %1802 }
 0x3c6   : > { %v7800_v57 = vpop.permute.xlu1 %1708 }
 0x3c7   : > { %14161 = vst [vmem:[#allocation104_spill] sm:$0xff] %v7800_v57 }
 0x3c8   : > { %2064 = vrot.lane.b32.xlu1 %v7587_v47, %s5360_s20 }
 0x3c9   : > { %v7804_v12 = vpop.permute.xlu0 %1806 }
 0x3ca   : > { %v7806_v5 = vpop.permute.xlu1 %1712 }
 0x3cb   : > { %14162 = vst [vmem:[#allocation50_spill] sm:$0xff] %v7806_v5 }
 0x3cc   : > { %2068 = vrot.lane.b32.xlu1 %v7602_v8, %s5360_s20 }
 0x3cd   : > { %v7810_v60 = vpop.permute.xlu0 %1810 }
 0x3ce   : > { %14163 = vst [vmem:[#allocation74_spill] sm:$0xff] %v7810_v60  ;;  %v7812_v45 = vpop.permute.xlu1 %1716 }
 0x3cf   : > { %14164 = vst [vmem:[#allocation125_spill] sm:$0xff] %v7812_v45 }
 0x3d0   : > { %2072 = vrot.lane.b32.xlu1 %v7617_v49, %s5360_s20 }
 0x3d1   : > { %v7816_v6 = vpop.permute.xlu0 %1862 }
 0x3d2   : > { %v7818_v7 = vpop.permute.xlu1 %1784 }
 0x3d3   : > { %v1828_v61 = vsel %vm446_vm2, %v7760_v23, %v7818_v7 }
 0x3d4   : > { %2076 = vrot.lane.b32.xlu1 %v7634_v21, %s5360_s20  ;;  %v1848_v45 = vmul.f32 %v1828_v61, %v5586_v38 }
 0x3d5   : > { %v7822_v51 = vpop.permute.xlu0 %1866 }
 0x3d6   : > { %v7824_v34 = vpop.permute.xlu1 %1788 }
 0x3d7   : > { %14165 = vst [vmem:[#allocation126_spill] sm:$0xff] %v7824_v34  ;;  %v1826_v33 = vsel %vm446_vm2, %v7768_v52, %v7824_v34 }
 0x3d8   : > { %2080 = vrot.lane.b32.xlu1 %v7651_v56, %s5360_s20  ;;  %v1850_v61 = vmul.f32 %v1826_v33, %v5586_v38 }
 0x3d9   : > { %v7828_v37 = vpop.permute.xlu0 %1870 }
 0x3da   : > { %14166 = vst [vmem:[#allocation127_spill] sm:$0xff] %v7828_v37  ;;  %v7830_v8 = vpop.permute.xlu1 %1792 }
 0x3dc   : > { %2084 = vrot.lane.b32.xlu1 %v7660_v9, %s5360_s20 }
 0x3dd   : > { %v7834_v49 = vpop.permute.xlu0 %1874 }
 0x3de   : > { %v7836_v15 = vpop.permute.xlu1 %1796 }
 0x3df   : > { %14167 = vst [vmem:[#allocation128_spill] sm:$0xff] %v7836_v15 }
 0x3e1   : > { %v7838_v47 = vpop.permute.xlu0 %1878 }
 0x3e2   : > { %v7840_v21 = vpop.permute.xlu1 %1800 }
 0x3e3   : > { %14168 = vst [vmem:[#allocation129_spill] sm:$0xff] %v7840_v21 }
 0x3e5   : > { %v7842_v29 = vpop.permute.xlu0 %1882 }
 0x3e6   : > { %v7844_v16 = vpop.permute.xlu1 %1804 }
 0x3e7   : > { %14169 = vst [vmem:[#allocation130_spill] sm:$0xff] %v7844_v16 }
 0x3e9   : > { %v7846_v56 = vpop.permute.xlu0 %1886 }
 0x3ea   : > { %v7848_v54 = vpop.permute.xlu1 %1808 }
 0x3eb   : > { %14170 = vst [vmem:[#allocation131_spill] sm:$0xff] %v7848_v54 }
 0x3ed   : > { %v7852_v4 = vpop.permute.xlu0 %1890 }
 0x3ee   : > { %v7850_v63 = vpop.permute.xlu1 %1812  ;;  %14171 = vst [vmem:[#allocation132_spill] sm:$0xff] %v7852_v4 }
 0x3f1   : > { %v7856_v25 = vpop.permute.xlu0 %1958 }
 0x3f2   : > { %v7854_v9 = vpop.permute.xlu1 %1864 }
 0x3f3   : > { %v1908_v13 = vsel %vm770_vm4, %v7816_v6, %v7854_v9 }
 0x3f4   : > { %v1928_v10 = vmul.f32 %v1908_v13, %v5588_v39 }
 0x3f5   : > { %v7862_v48 = vpop.permute.xlu0 %1962 }
 0x3f6   : > { %v7858_v5 = vpop.permute.xlu1 %1868  ;;  %v1944_v60 = vadd.f32 %v1928_v10, %v1848_v45  ;;  %v1824_v45 = vsel %vm446_vm2, %v7776_v36, %v7830_v8 }
 0x3f7   : > { %14172 = vst [vmem:[#allocation133_spill] sm:$0xff] %v7858_v5  ;;  %v1906_v28 = vsel %vm770_vm4, %v7822_v51, %v7858_v5 }
 0x3f8   : > { %v1930_v4 = vmul.f32 %v1906_v28, %v5588_v39 }
 0x3f9   : > { %v7866_v57 = vpop.permute.xlu0 %1966 }
 0x3fa   : > { %v7860_v26 = vpop.permute.xlu1 %1872 }
 0x3fb   : > { %14173 = vst [vmem:[#allocation134_spill] sm:$0xff] %v7860_v26  ;;  %v1904_v34 = vsel %vm770_vm4, %v7828_v37, %v7860_v26  ;;  %v1852_v37 = vmul.f32 %v1824_v45, %v5586_v38 }
 0x3fc   : > { %v1932_v58 = vmul.f32 %v1904_v34, %v5588_v39 }
 0x3fd   : > { %v7872_v31 = vpop.permute.xlu0 %1970 }
 0x3fe   : > { %v7864_v50 = vpop.permute.xlu1 %1876 }
 0x401   : > { %v7876_v22 = vpop.permute.xlu0 %1974 }
 0x402   : > { %v7868_v27 = vpop.permute.xlu1 %1880 }
 0x403   : > { %14174 = vst [vmem:[#allocation135_spill] sm:$0xff] %v7868_v27 }
 0x405   : > { %v7882_v41 = vpop.permute.xlu0 %1978 }
 0x406   : > { %v7870_v59 = vpop.permute.xlu1 %1884 }
 0x407   : > { %14175 = vst [vmem:[#allocation136_spill] sm:$0xff] %v7870_v59 }
 0x409   : > { %v7886_v32 = vpop.permute.xlu0 %1982 }
 0x40a   : > { %v7874_v40 = vpop.permute.xlu1 %1888 }
 0x40b   : > { %14176 = vst [vmem:[#allocation137_spill] sm:$0xff] %v7874_v40 }
 0x40d   : > { %v7892_v46 = vpop.permute.xlu0 %1986 }
 0x40e   : > { %v7878_v44 = vpop.permute.xlu1 %1892  ;;  %14179 = vst [vmem:[#allocation140_spill] sm:$0xff] %v7892_v46 }
 0x411   : > { %v7896_v62 = vpop.permute.xlu0 %2054 }
 0x412   : > { %v7880_v1 = vpop.permute.xlu1 %1960 }
 0x413   : > { %v2004_v20 = vsel %vm868_vm5, %v7856_v25, %v7880_v1 }
 0x414   : > { %v2024_v46 = vmul.f32 %v2004_v20, %v5588_v39 }
 0x415   : > { %v7906_v3 = vpop.permute.xlu0 %2058 }
 0x416   : > { %v7884_v14 = vpop.permute.xlu1 %1964  ;;  %v2040_v28 = vadd.f32 %v2024_v46, %v1944_v60  ;;  %v1822_v60 = vsel %vm446_vm2, %v7784_v18, %v7836_v15  ;;  %v1902_v46 = vsel %vm770_vm4, %v7834_v49, %v7864_v50  ;;  %v1948_v15 = vadd.f32 %v1932_v58, %v1852_v37 }
 0x417   : > { %14177 = vst [vmem:[#allocation138_spill] sm:$0xff] %v7884_v14  ;;  %v2002_v13 = vsel %vm868_vm5, %v7862_v48, %v7884_v14  ;;  %v1946_v14 = vadd.f32 %v1930_v4, %v1850_v61 }
 0x418   : > { %v2026_v10 = vmul.f32 %v2002_v13, %v5588_v39 }
 0x419   : > { %v7934_v24 = vpop.permute.xlu0 %2062 }
 0x41a   : > { %v7888_v43 = vpop.permute.xlu1 %1968  ;;  %v2042_v4 = vadd.f32 %v2026_v10, %v1946_v14  ;;  %v1934_v14 = vmul.f32 %v1902_v46, %v5588_v39 }
 0x41b   : > { %v2000_v26 = vsel %vm868_vm5, %v7866_v57, %v7888_v43 }
 0x41c   : > { %v2028_v13 = vmul.f32 %v2000_v26, %v5588_v39 }
 0x41d   : > { %v7976_v61 = vpop.permute.xlu0 %2066 }
 0x41e   : > { %v7890_v11 = vpop.permute.xlu1 %1972  ;;  %v2044_v37 = vadd.f32 %v2028_v13, %v1948_v15 }
 0x41f   : > { %14178 = vst [vmem:[#allocation139_spill] sm:$0xff] %v7890_v11 }
 0x421   : > { %v8020_v15 = vpop.permute.xlu0 %2070 }
 0x422   : > { %v7894_v2 = vpop.permute.xlu1 %1976 }
 0x423   : > { %14180 = vst [vmem:[#allocation141_spill] sm:$0xff] %v7894_v2 }
 0x426   : > { %v7898_v0 = vpop.permute.xlu1 %1980 }
 0x42a   : > { %v7900_v53 = vpop.permute.xlu1 %1984 }
 0x42e   : > { %v7917_v55 = vpop.permute.xlu1 %1988 }
 0x432   : > { %v7936_v42 = vpop.permute.xlu1 %2056 }
 0x433   : > { %14181 = vst [vmem:[#allocation142_spill] sm:$0xff] %v7936_v42  ;;  %v2100_v20 = vsel %vm965_vm6, %v7896_v62, %v7936_v42 }
 0x434   : > { %v2120_v33 = vmul.f32 %v2100_v20, %v5586_v38  ;;  %v14182_v20 = vld [vmem:[#allocation13_spill] sm:$0xff] }
 0x436   : > { %v7958_v5 = vadd.f32 %v2120_v33, %v2040_v28  ;;  %v7960_v42 = vpop.permute.xlu1 %2060  ;;  %v1998_v33 = vsel %vm868_vm5, %v7872_v31, %v7890_v11 }
 0x437   : > { %v2098_v34 = vsel %vm965_vm6, %v7906_v3, %v7960_v42  ;;  %v2030_v46 = vmul.f32 %v1998_v33, %v5588_v39 }
 0x438   : > { %v7980_v45 = vadd.f32 %v7958_v5, %v14182_v20  ;;  %v2122_v28 = vmul.f32 %v2098_v34, %v5586_v38  ;;  %2186 = vrot.lane.b32.xlu0 %v7958_v5, %s5354_s5  ;;  %v1854_v20 = vmul.f32 %v1822_v60, %v5586_v38  ;;  %v1820_v34 = vsel %vm446_vm2, %v7792_v35, %v7840_v21 }
 0x439   : > { %v1996_v21 = vsel %vm868_vm5, %v7876_v22, %v7894_v2 }
 0x43a   : > { %14183 = vst [vmem:[#allocation13_spill] sm:$0xff] %v7980_v45  ;;  %v7990_v26 = vadd.f32 %v2122_v28, %v2042_v4  ;;  %v7992_v10 = vpop.permute.xlu1 %2064  ;;  %v1900_v45 = vsel %vm770_vm4, %v7838_v47, %v7868_v27  ;;  %v14184_v4 = vld [vmem:[#allocation15_spill] sm:$0xff]  ;;  %v1950_v27 = vadd.f32 %v1934_v14, %v1854_v20  ;;  %v1898_v14 = vsel %vm770_vm4, %v7842_v29, %v7870_v59 }
 0x43b   : > { %v2096_v58 = vsel %vm965_vm6, %v7934_v24, %v7992_v10  ;;  %v1936_v11 = vmul.f32 %v1900_v45, %v5588_v39 }
 0x43c   : > { %v8010_v60 = vadd.f32 %v7990_v26, %v14184_v4  ;;  %v2124_v28 = vmul.f32 %v2096_v58, %v5586_v38  ;;  %2190 = vrot.lane.b32.xlu0 %v7990_v26, %s5354_s5  ;;  %v1856_v4 = vmul.f32 %v1820_v34, %v5586_v38  ;;  %v1818_v58 = vsel %vm446_vm2, %v7798_v19, %v7844_v16 }
 0x43d   : > { %v2046_v20 = vadd.f32 %v2030_v46, %v1950_v27  ;;  %v1994_v16 = vsel %vm868_vm5, %v7882_v41, %v7898_v0  ;;  %v1858_v59 = vmul.f32 %v1818_v58, %v5586_v38  ;;  %v1938_v27 = vmul.f32 %v1898_v14, %v5588_v39  ;;  %v8073_v58 = vpop.permute.xlu0 %2074 }
 0x43e   : > { %14185 = vst [vmem:[#allocation15_spill] sm:$0xff] %v8010_v60  ;;  %v8022_v13 = vadd.f32 %v2124_v28, %v2044_v37  ;;  %v8024_v33 = vpop.permute.xlu1 %2068  ;;  %v2032_v37 = vmul.f32 %v1996_v21, %v5588_v39  ;;  %v14186_v28 = vld [vmem:[#allocation19_spill] sm:$0xff]  ;;  %v1952_v2 = vadd.f32 %v1936_v11, %v1856_v4  ;;  %v1909_v11 = vsel %vm770_vm4, %v7878_v44, %v7816_v6 }
 0x43f   : > { %v2094_v45 = vsel %vm965_vm6, %v7976_v61, %v8024_v33  ;;  %v2034_v14 = vmul.f32 %v1994_v16, %v5588_v39  ;;  %v1992_v6 = vsel %vm868_vm5, %v7886_v32, %v7900_v53  ;;  %v1954_v44 = vadd.f32 %v1938_v27, %v1858_v59 }
 0x440   : > { %v8042_v34 = vadd.f32 %v8022_v13, %v14186_v28  ;;  %v2126_v60 = vmul.f32 %v2094_v45, %v5586_v38  ;;  %2194 = vrot.lane.b32.xlu0 %v8022_v13, %s5354_s5  ;;  %v1816_v45 = vsel %vm446_vm2, %v7804_v12, %v7848_v54  ;;  %v1896_v28 = vsel %vm770_vm4, %v7846_v56, %v7874_v40 }
 0x441   : > { %v2048_v4 = vadd.f32 %v2032_v37, %v1952_v2  ;;  %v1860_v2 = vmul.f32 %v1816_v45, %v5586_v38  ;;  %v1940_v37 = vmul.f32 %v1896_v28, %v5588_v39  ;;  %v2005_v45 = vsel %vm868_vm5, %v7917_v55, %v7856_v25  ;;  %v14189_v28 = vld [vmem:[#allocation124_spill] sm:$0xff] }
 0x442   : > { %14187 = vst [vmem:[#allocation19_spill] sm:$0xff] %v8042_v34  ;;  %v8053_v21 = vadd.f32 %v2126_v60, %v2046_v20  ;;  %v8055_v46 = vpop.permute.xlu1 %2072  ;;  %v14188_v20 = vld [vmem:[#allocation21_spill] sm:$0xff]  ;;  %v2050_v59 = vadd.f32 %v2034_v14, %v1954_v44  ;;  %v2036_v27 = vmul.f32 %v1992_v6, %v5588_v39 }
 0x443   : > { %v2092_v60 = vsel %vm965_vm6, %v8020_v15, %v8055_v46  ;;  %v1956_v55 = vadd.f32 %v1940_v37, %v1860_v2  ;;  %v1907_v2 = vsel %vm770_vm4, %v7854_v9, %v7822_v51  ;;  %v2003_v51 = vsel %vm868_vm5, %v7880_v1, %v7862_v48  ;;  %v14194_v48 = vld [vmem:[#allocation28_spill] sm:$0xff] }
 0x444   : > { %v8078_v34 = vadd.f32 %v8053_v21, %v14188_v20  ;;  %v2128_v54 = vmul.f32 %v2092_v60, %v5586_v38  ;;  %2198 = vrot.lane.b32.xlu0 %v8053_v21, %s5354_s5  ;;  %v1829_v60 = vsel %vm446_vm2, %v7850_v63, %v7760_v23  ;;  %v1911_v20 = vsel %vm282_vm7, %v1909_v11, 0.0  ;;  %v8117_v23 = vpop.permute.xlu0 %2078 }
 0x445   : > { %v1831_v25 = vsel %vm266_vm3, %v1829_v60, 0.0  ;;  %v2007_v11 = vsel %vm298_vm8, %v2005_v45, 0.0  ;;  %v1927_v44 = vmul.f32 %v1911_v20, %v5588_v39  ;;  %v2052_v37 = vadd.f32 %v2036_v27, %v1956_v55  ;;  %v14190_v60 = vld [vmem:[#allocation114_spill] sm:$0xff] }
 0x446   : > { %v8089_v16 = vadd.f32 %v2128_v54, %v2048_v4  ;;  %v8091_v40 = vpop.permute.xlu1 %2076  ;;  %v1847_v20 = vmul.f32 %v1831_v25, %v5586_v38  ;;  %v1929_v55 = vmul.f32 %v1907_v2, %v5588_v39  ;;  %v2025_v2 = vmul.f32 %v2003_v51, %v5588_v39 }
 0x447   : > { %v2090_v54 = vsel %vm965_vm6, %v8073_v58, %v8091_v40 }
 0x448   : > { %v8110_v4 = vadd.f32 %v8089_v16, %v14189_v28  ;;  %v2130_v63 = vmul.f32 %v2090_v54, %v5586_v38  ;;  %2202 = vrot.lane.b32.xlu0 %v8089_v16, %s5354_s5  ;;  %v2023_v28 = vmul.f32 %v2007_v11, %v5588_v39  ;;  %v14191_v11 = vld [vmem:[#allocation127_spill] sm:$0xff] }
 0x44a   : > { %v8121_v14 = vadd.f32 %v2130_v63, %v2050_v59  ;;  %v8123_v6 = vpop.permute.xlu1 %2080  ;;  %v1827_v63 = vsel %vm446_vm2, %v7818_v7, %v7768_v52  ;;  %v14193_v52 = vld [vmem:[#allocation142_spill] sm:$0xff] }
 0x44b   : > { %v2088_v54 = vsel %vm965_vm6, %v8117_v23, %v8123_v6  ;;  %v2099_v1 = vsel %vm965_vm6, %v14193_v52, %v7906_v3 }
 0x44c   : > { %v8136_v45 = vadd.f32 %v8121_v14, %v14190_v60  ;;  %v2132_v59 = vmul.f32 %v2088_v54, %v5586_v38  ;;  %2206 = vrot.lane.b32.xlu0 %v8121_v14, %s5354_s5  ;;  %v1943_v54 = vadd.f32 %v1927_v44, %v1847_v20  ;;  %v14192_v60 = vld [vmem:[#allocation133_spill] sm:$0xff] }
 0x44d   : > { %v1905_v7 = vsel %vm770_vm4, %v14192_v60, %v14191_v11  ;;  %v14197_v11 = vld [vmem:[#allocation138_spill] sm:$0xff] }
 0x44e   : > { %v8151_v9 = vadd.f32 %v2132_v59, %v2052_v37  ;;  %v2085_v27 = vpop.permute.xlu1 %2084  ;;  %v2039_v59 = vadd.f32 %v2023_v28, %v1943_v54  ;;  %v1931_v52 = vmul.f32 %v1905_v7, %v5588_v39  ;;  %v14198_v28 = vld [vmem:[#allocation134_spill] sm:$0xff]  ;;  %v14199_v54 = vld [vmem:[#allocation27_spill] sm:$0xff] }
 0x44f   : > { %v2101_v25 = vsel %vm965_vm6, %v2085_v27, %v7896_v62  ;;  %v1849_v62 = vmul.f32 %v1827_v63, %v5586_v38  ;;  %v14196_v27 = vld [vmem:[#allocation126_spill] sm:$0xff]  ;;  %v2121_v63 = vmul.f32 %v2099_v1, %v5586_v38  ;;  %v1903_v51 = vsel %vm770_vm4, %v14198_v28, %v7834_v49  ;;  %v14200_v1 = vld [vmem:[#allocation96_spill] sm:$0xff]  ;;  %v14207_v28 = vld [vmem:[#allocation129_spill] sm:$0xff] }
 0x450   : > { %v8167_v37 = vadd.f32 %v8151_v9, %v14194_v48  ;;  %v2103_v44 = vsel %vm314_vm9, %v2101_v25, 0.0  ;;  %2210 = vrot.lane.b32.xlu0 %v8151_v9, %s5354_s5  ;;  %v1825_v3 = vsel %vm446_vm2, %v14196_v27, %v7776_v36  ;;  %v2001_v25 = vsel %vm868_vm5, %v14197_v11, %v7866_v57  ;;  %v14203_v27 = vld [vmem:[#allocation128_spill] sm:$0xff] }
 0x451   : > { %v2119_v20 = vmul.f32 %v2103_v44, %v5586_v38  ;;  %v1945_v60 = vadd.f32 %v1929_v55, %v1849_v62  ;;  %v2097_v36 = vsel %vm965_vm6, %v7960_v42, %v7934_v24  ;;  %v1851_v57 = vmul.f32 %v1825_v3, %v5586_v38 }
 0x452   : > { %14195 = vst [vmem:[#allocation21_spill] sm:$0xff] %v8167_v37  ;;  %v2027_v7 = vmul.f32 %v2001_v25, %v5588_v39  ;;  %v1823_v42 = vsel %vm446_vm2, %v7830_v8, %v7784_v18  ;;  %v1999_v24 = vsel %vm868_vm5, %v7888_v43, %v7872_v31  ;;  %v1933_v62 = vmul.f32 %v1903_v51, %v5588_v39  ;;  %v14206_v25 = vld [vmem:[#allocation135_spill] sm:$0xff]  ;;  %v14208_v51 = vld [vmem:[#allocation141_spill] sm:$0xff] }
 0x453   : > { %v8186_v48 = vadd.f32 %v2119_v20, %v2039_v59  ;;  %v2041_v55 = vadd.f32 %v2025_v2, %v1945_v60  ;;  %v1947_v49 = vadd.f32 %v1931_v52, %v1851_v57  ;;  %v2123_v59 = vmul.f32 %v2097_v36, %v5586_v38 }
 0x454   : > { %2246 = vrot.lane.b32.xlu0 %v14199_v54, %s5356_s11  ;;  %v1901_v20 = vsel %vm770_vm4, %v7864_v50, %v7838_v47  ;;  %v2095_v8 = vsel %vm965_vm6, %v7992_v10, %v7976_v61  ;;  %v1853_v43 = vmul.f32 %v1823_v42, %v5586_v38  ;;  %v2029_v18 = vmul.f32 %v1999_v24, %v5588_v39  ;;  %v14204_v50 = vld [vmem:[#allocation139_spill] sm:$0xff]  ;;  %v14211_v24 = vld [vmem:[#allocation130_spill] sm:$0xff] }
 0x455   : > { %v8202_v44 = vadd.f32 %v8186_v48, %v14200_v1  ;;  %2184 = vrot.lane.b32.xlu1 %v8186_v48, %s5354_s5  ;;  %v8215_v2 = vadd.f32 %v2121_v63, %v2041_v55  ;;  %v2043_v31 = vadd.f32 %v2027_v7, %v1947_v49  ;;  %v1821_v47 = vsel %vm446_vm2, %v14203_v27, %v7792_v35  ;;  %v14210_v55 = vld [vmem:[#allocation136_spill] sm:$0xff] }
 0x456   : > { %v1997_v61 = vsel %vm868_vm5, %v14204_v50, %v7876_v22  ;;  %v1949_v10 = vadd.f32 %v1933_v62, %v1853_v43  ;;  %v2125_v11 = vmul.f32 %v2095_v8, %v5586_v38  ;;  %v1899_v60 = vsel %vm770_vm4, %v14206_v25, %v7842_v29  ;;  %v2083_v50 = vpop.permute.xlu0 %2082 }
 0x457   : > { %14201 = vst [vmem:[#allocation124_spill] sm:$0xff] %v8202_v44  ;;  %14202 = vst [vmem:[#allocation114_spill] sm:$0xff] %v8215_v2  ;;  %v8241_v3 = vadd.f32 %v2123_v59, %v2043_v31  ;;  %v2093_v35 = vsel %vm965_vm6, %v8024_v33, %v8020_v15  ;;  %v1855_v22 = vmul.f32 %v1821_v47, %v5586_v38  ;;  %v14213_v59 = vld [vmem:[#allocation132_spill] sm:$0xff]  ;;  %v14215_v31 = vld [vmem:[#allocation74_spill] sm:$0xff] }
 0x458   : > { %2250 = vrot.lane.b32.xlu0 %v7958_v5, %s5356_s11  ;;  %v1935_v5 = vmul.f32 %v1901_v20, %v5588_v39  ;;  %v2045_v52 = vadd.f32 %v2029_v18, %v1949_v10  ;;  %v2031_v63 = vmul.f32 %v1997_v61, %v5588_v39  ;;  %v1819_v29 = vsel %vm446_vm2, %v14207_v28, %v7798_v19  ;;  %v14214_v20 = vld [vmem:[#allocation137_spill] sm:$0xff]  ;;  %v14216_v18 = vld [vmem:[#allocation131_spill] sm:$0xff]  ;;  %v14217_v47 = vld [vmem:[#allocation140_spill] sm:$0xff] }
 0x459   : > { %2188 = vrot.lane.b32.xlu1 %v8215_v2, %s5354_s5  ;;  %14205 = vst [vmem:[#allocation127_spill] sm:$0xff] %v8241_v3  ;;  %v1995_v15 = vsel %vm868_vm5, %v14208_v51, %v7882_v41  ;;  %v2127_v57 = vmul.f32 %v2093_v35, %v5586_v38  ;;  %v1897_v7 = vsel %vm770_vm4, %v14210_v55, %v7846_v56  ;;  %v14225_v55 = vld [vmem:[#allocation73_spill] sm:$0xff] }
 0x45a   : > { %v1951_v33 = vadd.f32 %v1935_v5, %v1855_v22  ;;  %v8267_v36 = vadd.f32 %v2125_v11, %v2045_v52  ;;  %v2091_v19 = vsel %vm965_vm6, %v8055_v46, %v8073_v58  ;;  %v1857_v41 = vmul.f32 %v1819_v29, %v5586_v38  ;;  %v14219_v5 = vld [vmem:[#allocation69_spill] sm:$0xff]  ;;  %v14221_v52 = vld [vmem:[#allocation67_spill] sm:$0xff] }
 0x45b   : > { %v2033_v42 = vmul.f32 %v1995_v15, %v5588_v39  ;;  %v1817_v56 = vsel %vm446_vm2, %v14211_v24, %v7804_v12  ;;  %v1993_v46 = vsel %vm868_vm5, %v7898_v0, %v7886_v32  ;;  %v2129_v62 = vmul.f32 %v2091_v19, %v5586_v38  ;;  %v14220_v11 = vld [vmem:[#allocation125_spill] sm:$0xff] }
 0x45c   : > { %2254 = vrot.lane.b32.xlu0 %v7990_v26, %s5356_s11  ;;  %v1937_v26 = vmul.f32 %v1899_v60, %v5588_v39  ;;  %14209 = vst [vmem:[#allocation133_spill] sm:$0xff] %v8267_v36  ;;  %v2047_v1 = vadd.f32 %v2031_v63, %v1951_v33  ;;  %v1895_v8 = vsel %vm770_vm4, %v14214_v20, %v14213_v59  ;;  %v14222_v63 = vld [vmem:[#allocation72_spill] sm:$0xff]  ;;  %v14229_v24 = vld [vmem:[#allocation85_spill] sm:$0xff] }
 0x45d   : > { %2192 = vrot.lane.b32.xlu1 %v8241_v3, %s5354_s5  ;;  %v2089_v12 = vsel %vm965_vm6, %v8091_v40, %v8117_v23  ;;  %v1859_v32 = vmul.f32 %v1817_v56, %v5586_v38  ;;  %v2035_v43 = vmul.f32 %v1993_v46, %v5588_v39  ;;  %v1815_v27 = vsel %vm446_vm2, %v14216_v18, %v14215_v31  ;;  %v14231_v46 = vld [vmem:[#allocation55_spill] sm:$0xff]  ;;  %v14239_v31 = vld [vmem:[#allocation100_spill] sm:$0xff] }
 0x45e   : > { %v1953_v58 = vadd.f32 %v1937_v26, %v1857_v41  ;;  %v8293_v49 = vadd.f32 %v2127_v57, %v2047_v1  ;;  %v1991_v40 = vsel %vm868_vm5, %v7900_v53, %v14217_v47  ;;  %v2131_v10 = vmul.f32 %v2089_v12, %v5586_v38  ;;  %v14224_v57 = vld [vmem:[#allocation64_spill] sm:$0xff]  ;;  %v14227_v41 = vld [vmem:[#allocation95_spill] sm:$0xff] }
 0x45f   : > { %v1733_v25 = vsel %vm591_vm10, %v14220_v11, %v14219_v5  ;;  %v2087_v60 = vsel %vm965_vm6, %v8123_v6, %v2083_v50  ;;  %v1861_v53 = vmul.f32 %v1815_v27, %v5586_v38  ;;  %v2037_v22 = vmul.f32 %v1991_v40, %v5588_v39  ;;  %v14236_v12 = vld [vmem:[#allocation48_spill] sm:$0xff]  ;;  %v14241_v47 = vld [vmem:[#allocation71_spill] sm:$0xff]  ;;  %v14244_v50 = vld [vmem:[#allocation70_spill] sm:$0xff] }
 0x460   : > { %2258 = vrot.lane.b32.xlu0 %v8022_v13, %s5356_s11  ;;  %v1939_v13 = vmul.f32 %v1897_v7, %v5588_v39  ;;  %14212 = vst [vmem:[#allocation142_spill] sm:$0xff] %v8293_v49  ;;  %v2049_v0 = vadd.f32 %v2033_v42, %v1953_v58  ;;  %v1669_v28 = vsel %vm365_vm0, %v14222_v63, %v14221_v52  ;;  %v1734_v29 = vsel %vm249_vm11, %v1733_v25, 0.0  ;;  %v14232_v58 = vld [vmem:[#allocation103_spill] sm:$0xff]  ;;  %v14242_v40 = vld [vmem:[#allocation56_spill] sm:$0xff] }
 0x461   : > { %2196 = vrot.lane.b32.xlu1 %v8267_v36, %s5354_s5  ;;  %v1670_v15 = vsel %vm233_vm1, %v1669_v28, 0.0  ;;  %v1731_v7 = vsel %vm591_vm10, %v14225_v55, %v14224_v57  ;;  %v14248_v28 = vld [vmem:[#allocation97_spill] sm:$0xff] }
 0x462   : > { %v1955_v23 = vadd.f32 %v1939_v13, %v1859_v32  ;;  %v8319_v61 = vadd.f32 %v2129_v62, %v2049_v0  ;;  %v1750_v26 = vadd.f32 %v1734_v29, %v1670_v15  ;;  %v1729_v13 = vsel %vm591_vm10, %v14232_v58, %v14231_v46  ;;  %v14234_v62 = vld [vmem:[#allocation52_spill] sm:$0xff]  ;;  %v14237_v32 = vld [vmem:[#allocation51_spill] sm:$0xff]  ;;  %v14249_v29 = vld [vmem:[#allocation101_spill] sm:$0xff] }
 0x463   : > { %v1727_v0 = vsel %vm591_vm10, %v14237_v32, %v14236_v12 }
 0x464   : > { %2262 = vrot.lane.b32.xlu0 %v8053_v21, %s5356_s11  ;;  %v1941_v21 = vmul.f32 %v1895_v8, %v5588_v39  ;;  %14218 = vst [vmem:[#allocation28_spill] sm:$0xff] %v8319_v61  ;;  %v2051_v35 = vadd.f32 %v2035_v43, %v1955_v23  ;;  %v8365_v56 = vmul.f32 %v1750_v26, %v14229_v24  ;;  %v14238_v43 = vld [vmem:[#allocation25_spill] sm:$0xff]  ;;  %v14252_v26 = vld [vmem:[#allocation104_spill] sm:$0xff] }
 0x465   : > { %2200 = vrot.lane.b32.xlu1 %v8293_v49, %s5354_s5  ;;  %v1663_v18 = vsel %vm365_vm0, %v14239_v31, %v14238_v43  ;;  %v1725_v23 = vsel %vm591_vm10, %v14242_v40, %v14241_v47 }
 0x466   : > { %v1957_v6 = vadd.f32 %v1941_v21, %v1861_v53  ;;  %v8341_v51 = vadd.f32 %v2131_v10, %v2051_v35  ;;  %14230 = vst [vmem:[#allocation134_spill] sm:$0xff] %v8365_v56  ;;  %v1756_v27 = vadd.f32 %v1727_v0, %v1663_v18  ;;  %v14243_v21 = vld [vmem:[#allocation53_spill] sm:$0xff]  ;;  %v14247_v35 = vld [vmem:[#allocation59_spill] sm:$0xff]  ;;  %v14256_v0 = vld [vmem:[#allocation66_spill] sm:$0xff] }
 0x467   : > { %v1661_v10 = vsel %vm365_vm0, %v14244_v50, %v14243_v21  ;;  %v14246_v53 = vld [vmem:[#allocation65_spill] sm:$0xff]  ;;  %v14257_v18 = vld [vmem:[#allocation50_spill] sm:$0xff] }
 0x468   : > { %2266 = vrot.lane.b32.xlu0 %v8089_v16, %s5356_s11  ;;  %14223 = vst [vmem:[#allocation126_spill] sm:$0xff] %v8341_v51  ;;  %v2133_v16 = vmul.f32 %v2087_v60, %v5586_v38  ;;  %v2053_v33 = vadd.f32 %v2037_v22, %v1957_v6  ;;  %v8410_v25 = vmul.f32 %v1756_v27, %v14229_v24 }
 0x469   : > { %2204 = vrot.lane.b32.xlu1 %v8319_v61, %s5354_s5  ;;  %v1758_v60 = vadd.f32 %v1725_v23, %v1661_v10  ;;  %v1723_v22 = vsel %vm591_vm10, %v14247_v35, %v14246_v53  ;;  %v1659_v6 = vsel %vm365_vm0, %v14249_v29, %v14248_v28  ;;  %v1719_v27 = vsel %vm591_vm10, %v14257_v18, %v14256_v0  ;;  %v14258_v23 = vld [vmem:[#allocation68_spill] sm:$0xff]  ;;  %v14259_v10 = vld [vmem:[#allocation102_spill] sm:$0xff] }
 0x46a   : > { %v8354_v19 = vadd.f32 %v2133_v16, %v2053_v33  ;;  %14245 = vst [vmem:[#allocation139_spill] sm:$0xff] %v8410_v25  ;;  %v1760_v15 = vadd.f32 %v1723_v22, %v1659_v6  ;;  %v14251_v33 = vld [vmem:[#allocation57_spill] sm:$0xff] }
 0x46b   : > { %v8425_v16 = vmul.f32 %v1758_v60, %v14229_v24  ;;  %v1655_v60 = vsel %vm365_vm0, %v14259_v10, %v14258_v23 }
 0x46c   : > { %2270 = vrot.lane.b32.xlu0 %v8121_v14, %s5356_s11  ;;  %14226 = vst [vmem:[#allocation138_spill] sm:$0xff] %v8354_v19  ;;  %v14228_v14 = vld [vmem:[#allocation99_spill] sm:$0xff]  ;;  %v1764_v6 = vadd.f32 %v1719_v27, %v1655_v60 }
 0x46d   : > { %2208 = vrot.lane.b32.xlu1 %v8341_v51, %s5354_s5  ;;  %v1667_v1 = vsel %vm365_vm0, %v14228_v14, %v14227_v41  ;;  %14250 = vst [vmem:[#allocation135_spill] sm:$0xff] %v8425_v16 }
 0x46e   : > { %v1752_v42 = vadd.f32 %v1731_v7, %v1667_v1  ;;  %v1721_v7 = vsel %vm591_vm10, %v14252_v26, %v14251_v33  ;;  %v14253_v1 = vld [vmem:[#allocation46_spill] sm:$0xff] }
 0x470   : > { %2274 = vrot.lane.b32.xlu0 %v8151_v9, %s5356_s11  ;;  %v14233_v9 = vld [vmem:[#allocation62_spill] sm:$0xff]  ;;  %v8380_v20 = vmul.f32 %v1752_v42, %v14229_v24 }
 0x471   : > { %2212 = vrot.lane.b32.xlu1 %v8354_v19, %s5354_s5  ;;  %v1665_v59 = vsel %vm365_vm0, %v14234_v62, %v14233_v9  ;;  %v14254_v42 = vld [vmem:[#allocation54_spill] sm:$0xff] }
 0x472   : > { %14235 = vst [vmem:[#allocation96_spill] sm:$0xff] %v8380_v20  ;;  %v1754_v8 = vadd.f32 %v1729_v13, %v1665_v59  ;;  %v1657_v13 = vsel %vm365_vm0, %v14254_v42, %v14253_v1  ;;  %v8440_v59 = vmul.f32 %v1760_v15, %v14229_v24  ;;  %v1732_v15 = vsel %vm591_vm10, %v14219_v5, %v14225_v55 }
 0x473   : > { %v1730_v5 = vsel %vm591_vm10, %v14224_v57, %v14232_v58  ;;  %v1728_v57 = vsel %vm591_vm10, %v14231_v46, %v14237_v32  ;;  %v1726_v46 = vsel %vm591_vm10, %v14236_v12, %v14242_v40  ;;  %v1724_v12 = vsel %vm591_vm10, %v14241_v47, %v14247_v35 }
 0x474   : > { %2342 = vrot.lane.b32.xlu0 %v8365_v56, %s5355_s24  ;;  %14255 = vst [vmem:[#allocation129_spill] sm:$0xff] %v8440_v59  ;;  %v1722_v47 = vsel %vm591_vm10, %v14246_v53, %v14252_v26  ;;  %v1720_v53 = vsel %vm591_vm10, %v14251_v33, %v14257_v18  ;;  %v8553_v26 = vpop.permute.xlu0 %2182  ;;  %v1718_v33 = vsel %vm591_vm10, %v14256_v0, %v14220_v11 }
 0x475   : > { %2248 = vrot.lane.b32.xlu1 %v8186_v48, %s5356_s11  ;;  %v8395_v48 = vmul.f32 %v1754_v8, %v14229_v24  ;;  %v1762_v8 = vadd.f32 %v1721_v7, %v1657_v13  ;;  %v1668_v7 = vsel %vm365_vm0, %v14221_v52, %v14228_v14  ;;  %v8470_v13 = vmul.f32 %v1764_v6, %v14229_v24 }
 0x476   : > { %v1666_v52 = vsel %vm365_vm0, %v14227_v41, %v14234_v62  ;;  %v1664_v41 = vsel %vm365_vm0, %v14233_v9, %v14239_v31  ;;  %v1662_v9 = vsel %vm365_vm0, %v14238_v43, %v14244_v50  ;;  %v1660_v43 = vsel %vm365_vm0, %v14243_v21, %v14249_v29  ;;  %14267 = vst [vmem:[#allocation140_spill] sm:$0xff] %v8553_v26 }
 0x477   : > { %14240 = vst [vmem:[#allocation128_spill] sm:$0xff] %v8395_v48  ;;  %v8455_v22 = vmul.f32 %v1762_v8, %v14229_v24  ;;  %14261 = vst [vmem:[#allocation136_spill] sm:$0xff] %v8470_v13  ;;  %v1751_v8 = vadd.f32 %v1732_v15, %v1668_v7  ;;  %v1753_v14 = vadd.f32 %v1730_v5, %v1666_v52 }
 0x478   : > { %2346 = vrot.lane.b32.xlu0 %v8380_v20, %s5355_s24  ;;  %v1755_v62 = vadd.f32 %v1728_v57, %v1664_v41  ;;  %v1757_v31 = vadd.f32 %v1726_v46, %v1662_v9  ;;  %v1759_v50 = vadd.f32 %v1724_v12, %v1660_v43  ;;  %v1658_v21 = vsel %vm365_vm0, %v14248_v28, %v14254_v42 }
 0x479   : > { %2252 = vrot.lane.b32.xlu1 %v8215_v2, %s5356_s11  ;;  %14260 = vst [vmem:[#allocation141_spill] sm:$0xff] %v8455_v22  ;;  %v8485_v55 = vmul.f32 %v1751_v8, %v14229_v24  ;;  %v8500_v58 = vmul.f32 %v1753_v14, %v14229_v24  ;;  %v1761_v29 = vadd.f32 %v1722_v47, %v1658_v21 }
 0x47a   : > { %v8515_v32 = vmul.f32 %v1755_v62, %v14229_v24  ;;  %v8530_v40 = vmul.f32 %v1757_v31, %v14229_v24  ;;  %v8545_v35 = vmul.f32 %v1759_v50, %v14229_v24  ;;  %v1656_v28 = vsel %vm365_vm0, %v14253_v1, %v14259_v10 }
 0x47b   : > { %14262 = vst [vmem:[#allocation130_spill] sm:$0xff] %v8485_v55  ;;  %14263 = vst [vmem:[#allocation132_spill] sm:$0xff] %v8500_v58  ;;  %v8562_v42 = vmul.f32 %v1761_v29, %v14229_v24  ;;  %v1763_v27 = vadd.f32 %v1720_v53, %v1656_v28  ;;  %v1654_v1 = vsel %vm365_vm0, %v14258_v23, %v14222_v63 }
 0x47c   : > { %2350 = vrot.lane.b32.xlu0 %v8395_v48, %s5355_s24  ;;  %14264 = vst [vmem:[#allocation137_spill] sm:$0xff] %v8515_v32  ;;  %14265 = vst [vmem:[#allocation74_spill] sm:$0xff] %v8530_v40  ;;  %v1765_v60 = vadd.f32 %v1718_v33, %v1654_v1 }
 0x47d   : > { %2256 = vrot.lane.b32.xlu1 %v8241_v3, %s5356_s11  ;;  %14266 = vst [vmem:[#allocation131_spill] sm:$0xff] %v8545_v35  ;;  %14268 = vst [vmem:[#allocation69_spill] sm:$0xff] %v8562_v42  ;;  %v8579_v10 = vmul.f32 %v1763_v27, %v14229_v24 }
 0x47e   : > { %v8588_v0 = vmul.f32 %v1765_v60, %v14229_v24 }
 0x47f   : > { %14270 = vst [vmem:[#allocation67_spill] sm:$0xff] %v8579_v10 }
 0x480   : > { %2354 = vrot.lane.b32.xlu0 %v8410_v25, %s5355_s24  ;;  %14272 = vst [vmem:[#allocation64_spill] sm:$0xff] %v8588_v0 }
 0x481   : > { %2260 = vrot.lane.b32.xlu1 %v8267_v36, %s5356_s11 }
 0x484   : > { %2358 = vrot.lane.b32.xlu0 %v8425_v16, %s5355_s24 }
 0x485   : > { %2264 = vrot.lane.b32.xlu1 %v8293_v49, %s5356_s11 }
 0x488   : > { %2362 = vrot.lane.b32.xlu0 %v8440_v59, %s5355_s24 }
 0x489   : > { %2268 = vrot.lane.b32.xlu1 %v8319_v61, %s5356_s11 }
 0x48c   : > { %2366 = vrot.lane.b32.xlu0 %v8455_v22, %s5355_s24 }
 0x48d   : > { %2272 = vrot.lane.b32.xlu1 %v8341_v51, %s5356_s11 }
 0x490   : > { %2370 = vrot.lane.b32.xlu0 %v8470_v13, %s5355_s24 }
 0x491   : > { %2276 = vrot.lane.b32.xlu1 %v8354_v19, %s5356_s11 }
 0x494   : > { %2422 = vrot.lane.b32.xlu0 %v8365_v56, %s5358_s13 }
 0x495   : > { %2344 = vrot.lane.b32.xlu1 %v8485_v55, %s5355_s24 }
 0x498   : > { %2426 = vrot.lane.b32.xlu0 %v8380_v20, %s5358_s13 }
 0x499   : > { %2348 = vrot.lane.b32.xlu1 %v8500_v58, %s5355_s24 }
 0x49c   : > { %2430 = vrot.lane.b32.xlu0 %v8395_v48, %s5358_s13 }
 0x49d   : > { %2352 = vrot.lane.b32.xlu1 %v8515_v32, %s5355_s24 }
 0x4a0   : > { %2434 = vrot.lane.b32.xlu0 %v8410_v25, %s5358_s13 }
 0x4a1   : > { %2356 = vrot.lane.b32.xlu1 %v8530_v40, %s5355_s24 }
 0x4a4   : > { %2438 = vrot.lane.b32.xlu0 %v8425_v16, %s5358_s13 }
 0x4a5   : > { %2360 = vrot.lane.b32.xlu1 %v8545_v35, %s5355_s24 }
 0x4a8   : > { %2442 = vrot.lane.b32.xlu0 %v8440_v59, %s5358_s13 }
 0x4a9   : > { %2364 = vrot.lane.b32.xlu1 %v8562_v42, %s5355_s24 }
 0x4aa   : > { %v8576_v18 = vpop.permute.xlu0 %2186 }
 0x4ab   : > { %14269 = vst [vmem:[#allocation125_spill] sm:$0xff] %v8576_v18 }
 0x4ac   : > { %2446 = vrot.lane.b32.xlu0 %v8455_v22, %s5358_s13 }
 0x4ad   : > { %2368 = vrot.lane.b32.xlu1 %v8579_v10, %s5355_s24 }
 0x4ae   : > { %v8585_v11 = vpop.permute.xlu0 %2190 }
 0x4af   : > { %14271 = vst [vmem:[#allocation72_spill] sm:$0xff] %v8585_v11 }
 0x4b0   : > { %2450 = vrot.lane.b32.xlu0 %v8470_v13, %s5358_s13 }
 0x4b1   : > { %2372 = vrot.lane.b32.xlu1 %v8588_v0, %s5355_s24 }
 0x4b2   : > { %v8594_v63 = vpop.permute.xlu0 %2194 }
 0x4b3   : > { %14273 = vst [vmem:[#allocation73_spill] sm:$0xff] %v8594_v63 }
 0x4b4   : > { %2518 = vrot.lane.b32.xlu0 %v8365_v56, %s5359_s18 }
 0x4b5   : > { %2424 = vrot.lane.b32.xlu1 %v8485_v55, %s5358_s13 }
 0x4b6   : > { %v8600_v23 = vpop.permute.xlu0 %2198 }
 0x4b7   : > { %14274 = vst [vmem:[#allocation95_spill] sm:$0xff] %v8600_v23 }
 0x4b8   : > { %2522 = vrot.lane.b32.xlu0 %v8380_v20, %s5359_s18 }
 0x4b9   : > { %2428 = vrot.lane.b32.xlu1 %v8500_v58, %s5358_s13 }
 0x4ba   : > { %v8606_v6 = vpop.permute.xlu0 %2202 }
 0x4bb   : > { %14275 = vst [vmem:[#allocation99_spill] sm:$0xff] %v8606_v6 }
 0x4bc   : > { %2526 = vrot.lane.b32.xlu0 %v8395_v48, %s5359_s18 }
 0x4bd   : > { %2432 = vrot.lane.b32.xlu1 %v8515_v32, %s5358_s13 }
 0x4be   : > { %v8612_v15 = vpop.permute.xlu0 %2206 }
 0x4bf   : > { %14276 = vst [vmem:[#allocation55_spill] sm:$0xff] %v8612_v15 }
 0x4c0   : > { %2530 = vrot.lane.b32.xlu0 %v8410_v25, %s5359_s18 }
 0x4c1   : > { %2436 = vrot.lane.b32.xlu1 %v8530_v40, %s5358_s13 }
 0x4c2   : > { %v8618_v7 = vpop.permute.xlu0 %2210 }
 0x4c3   : > { %14277 = vst [vmem:[#allocation103_spill] sm:$0xff] %v8618_v7 }
 0x4c4   : > { %2534 = vrot.lane.b32.xlu0 %v8425_v16, %s5359_s18 }
 0x4c5   : > { %2440 = vrot.lane.b32.xlu1 %v8545_v35, %s5358_s13 }
 0x4c6   : > { %v8624_v8 = vpop.permute.xlu0 %2246 }
 0x4c7   : > { %14278 = vst [vmem:[#allocation62_spill] sm:$0xff] %v8624_v8  ;;  %v8626_v5 = vpop.permute.xlu1 %2184 }
 0x4c8   : > { %14279 = vst [vmem:[#allocation52_spill] sm:$0xff] %v8626_v5  ;;  %2538 = vrot.lane.b32.xlu0 %v8440_v59, %s5359_s18 }
 0x4c9   : > { %2444 = vrot.lane.b32.xlu1 %v8562_v42, %s5358_s13 }
 0x4ca   : > { %v8632_v52 = vpop.permute.xlu0 %2250 }
 0x4cb   : > { %14280 = vst [vmem:[#allocation48_spill] sm:$0xff] %v8632_v52  ;;  %v8634_v14 = vpop.permute.xlu1 %2188 }
 0x4cc   : > { %14281 = vst [vmem:[#allocation51_spill] sm:$0xff] %v8634_v14  ;;  %2542 = vrot.lane.b32.xlu0 %v8455_v22, %s5359_s18 }
 0x4cd   : > { %2448 = vrot.lane.b32.xlu1 %v8579_v10, %s5358_s13 }
 0x4ce   : > { %v8640_v57 = vpop.permute.xlu0 %2254 }
 0x4cf   : > { %14282 = vst [vmem:[#allocation25_spill] sm:$0xff] %v8640_v57  ;;  %v8642_v41 = vpop.permute.xlu1 %2192 }
 0x4d0   : > { %14283 = vst [vmem:[#allocation100_spill] sm:$0xff] %v8642_v41  ;;  %2546 = vrot.lane.b32.xlu0 %v8470_v13, %s5359_s18 }
 0x4d1   : > { %2452 = vrot.lane.b32.xlu1 %v8588_v0, %s5358_s13 }
 0x4d2   : > { %v8648_v62 = vpop.permute.xlu0 %2258 }
 0x4d3   : > { %14284 = vst [vmem:[#allocation71_spill] sm:$0xff] %v8648_v62  ;;  %v8650_v46 = vpop.permute.xlu1 %2196 }
 0x4d4   : > { %14285 = vst [vmem:[#allocation56_spill] sm:$0xff] %v8650_v46  ;;  %2614 = vrot.lane.b32.xlu0 %v8365_v56, %s5360_s20 }
 0x4d5   : > { %2520 = vrot.lane.b32.xlu1 %v8485_v55, %s5359_s18 }
 0x4d6   : > { %v8656_v9 = vpop.permute.xlu0 %2262 }
 0x4d7   : > { %14286 = vst [vmem:[#allocation53_spill] sm:$0xff] %v8656_v9  ;;  %v8658_v31 = vpop.permute.xlu1 %2200 }
 0x4d8   : > { %14287 = vst [vmem:[#allocation70_spill] sm:$0xff] %v8658_v31  ;;  %2618 = vrot.lane.b32.xlu0 %v8380_v20, %s5360_s20 }
 0x4d9   : > { %2524 = vrot.lane.b32.xlu1 %v8500_v58, %s5359_s18 }
 0x4da   : > { %v8664_v12 = vpop.permute.xlu0 %2266 }
 0x4db   : > { %14288 = vst [vmem:[#allocation65_spill] sm:$0xff] %v8664_v12  ;;  %v8666_v43 = vpop.permute.xlu1 %2204 }
 0x4dc   : > { %14289 = vst [vmem:[#allocation59_spill] sm:$0xff] %v8666_v43  ;;  %2622 = vrot.lane.b32.xlu0 %v8395_v48, %s5360_s20 }
 0x4dd   : > { %2528 = vrot.lane.b32.xlu1 %v8515_v32, %s5359_s18 }
 0x4de   : > { %v8672_v50 = vpop.permute.xlu0 %2270 }
 0x4df   : > { %14290 = vst [vmem:[#allocation97_spill] sm:$0xff] %v8672_v50  ;;  %v8674_v47 = vpop.permute.xlu1 %2208 }
 0x4e0   : > { %14291 = vst [vmem:[#allocation101_spill] sm:$0xff] %v8674_v47  ;;  %2626 = vrot.lane.b32.xlu0 %v8410_v25, %s5360_s20 }
 0x4e1   : > { %2532 = vrot.lane.b32.xlu1 %v8530_v40, %s5359_s18 }
 0x4e2   : > { %v8680_v21 = vpop.permute.xlu0 %2274 }
 0x4e3   : > { %14292 = vst [vmem:[#allocation57_spill] sm:$0xff] %v8680_v21  ;;  %v8682_v29 = vpop.permute.xlu1 %2212 }
 0x4e4   : > { %14293 = vst [vmem:[#allocation104_spill] sm:$0xff] %v8682_v29  ;;  %2630 = vrot.lane.b32.xlu0 %v8425_v16, %s5360_s20 }
 0x4e5   : > { %2536 = vrot.lane.b32.xlu1 %v8545_v35, %s5359_s18 }
 0x4e6   : > { %v8688_v53 = vpop.permute.xlu0 %2342 }
 0x4e7   : > { %v8690_v28 = vpop.permute.xlu1 %2248 }
 0x4e8   : > { %14294 = vst [vmem:[#allocation46_spill] sm:$0xff] %v8690_v28  ;;  %2634 = vrot.lane.b32.xlu0 %v8440_v59, %s5360_s20 }
 0x4e9   : > { %2540 = vrot.lane.b32.xlu1 %v8562_v42, %s5359_s18 }
 0x4ea   : > { %v8696_v27 = vpop.permute.xlu0 %2346 }
 0x4eb   : > { %v8698_v33 = vpop.permute.xlu1 %2252 }
 0x4ec   : > { %14295 = vst [vmem:[#allocation54_spill] sm:$0xff] %v8698_v33  ;;  %2638 = vrot.lane.b32.xlu0 %v8455_v22, %s5360_s20 }
 0x4ed   : > { %2544 = vrot.lane.b32.xlu1 %v8579_v10, %s5359_s18 }
 0x4ee   : > { %v8704_v1 = vpop.permute.xlu0 %2350 }
 0x4ef   : > { %v8706_v60 = vpop.permute.xlu1 %2256 }
 0x4f0   : > { %14296 = vst [vmem:[#allocation66_spill] sm:$0xff] %v8706_v60  ;;  %2642 = vrot.lane.b32.xlu0 %v8470_v13, %s5360_s20 }
 0x4f1   : > { %2548 = vrot.lane.b32.xlu1 %v8588_v0, %s5359_s18 }
 0x4f2   : > { %v8712_v19 = vpop.permute.xlu0 %2354 }
 0x4f3   : > { %v8714_v51 = vpop.permute.xlu1 %2260 }
 0x4f4   : > { %14297 = vst [vmem:[#allocation50_spill] sm:$0xff] %v8714_v51  ;;  %2742 = vrot.lane.b32.xlu0 %v14199_v54, %s5354_s5 }
 0x4f5   : > { %2616 = vrot.lane.b32.xlu1 %v8485_v55, %s5360_s20 }
 0x4f6   : > { %v8720_v61 = vpop.permute.xlu0 %2358 }
 0x4f7   : > { %v8722_v49 = vpop.permute.xlu1 %2264 }
 0x4f8   : > { %14298 = vst [vmem:[#allocation68_spill] sm:$0xff] %v8722_v49 }
 0x4f9   : > { %2620 = vrot.lane.b32.xlu1 %v8500_v58, %s5360_s20 }
 0x4fa   : > { %v8726_v36 = vpop.permute.xlu0 %2362 }
 0x4fb   : > { %v8728_v3 = vpop.permute.xlu1 %2268 }
 0x4fc   : > { %14299 = vst [vmem:[#allocation102_spill] sm:$0xff] %v8728_v3 }
 0x4fd   : > { %2624 = vrot.lane.b32.xlu1 %v8515_v32, %s5360_s20 }
 0x4fe   : > { %v8732_v2 = vpop.permute.xlu0 %2366 }
 0x4ff   : > { %v8734_v56 = vpop.permute.xlu1 %2272 }
 0x500   : > { %14300 = vst [vmem:[#allocation143_spill] sm:$0xff] %v8734_v56 }
 0x501   : > { %2628 = vrot.lane.b32.xlu1 %v8530_v40, %s5360_s20 }
 0x502   : > { %v8738_v13 = vpop.permute.xlu0 %2370 }
 0x503   : > { %14301 = vst [vmem:[#allocation144_spill] sm:$0xff] %v8738_v13  ;;  %v8740_v22 = vpop.permute.xlu1 %2276 }
 0x504   : > { %14302 = vst [vmem:[#allocation145_spill] sm:$0xff] %v8740_v22 }
 0x505   : > { %2632 = vrot.lane.b32.xlu1 %v8545_v35, %s5360_s20 }
 0x506   : > { %v8744_v59 = vpop.permute.xlu0 %2422 }
 0x507   : > { %v8746_v16 = vpop.permute.xlu1 %2344 }
 0x508   : > { %v2388_v29 = vsel %vm446_vm2, %v8688_v53, %v8746_v16 }
 0x509   : > { %2636 = vrot.lane.b32.xlu1 %v8562_v42, %s5360_s20  ;;  %v2408_v13 = vmul.f32 %v2388_v29, %v5586_v38 }
 0x50a   : > { %v8750_v25 = vpop.permute.xlu0 %2426 }
 0x50b   : > { %v8752_v32 = vpop.permute.xlu1 %2348 }
 0x50c   : > { %14303 = vst [vmem:[#allocation146_spill] sm:$0xff] %v8752_v32 }
 0x50d   : > { %2640 = vrot.lane.b32.xlu1 %v8579_v10, %s5360_s20 }
 0x50e   : > { %v8756_v40 = vpop.permute.xlu0 %2430 }
 0x50f   : > { %14304 = vst [vmem:[#allocation147_spill] sm:$0xff] %v8756_v40  ;;  %v8758_v48 = vpop.permute.xlu1 %2352 }
 0x511   : > { %2644 = vrot.lane.b32.xlu1 %v8588_v0, %s5360_s20 }
 0x512   : > { %v8762_v35 = vpop.permute.xlu0 %2434 }
 0x513   : > { %v8764_v58 = vpop.permute.xlu1 %2356 }
 0x514   : > { %14305 = vst [vmem:[#allocation148_spill] sm:$0xff] %v8764_v58 }
 0x516   : > { %v8766_v20 = vpop.permute.xlu0 %2438 }
 0x517   : > { %v8768_v42 = vpop.permute.xlu1 %2360 }
 0x518   : > { %14306 = vst [vmem:[#allocation149_spill] sm:$0xff] %v8768_v42 }
 0x51a   : > { %v8770_v55 = vpop.permute.xlu0 %2442 }
 0x51b   : > { %v8772_v47 = vpop.permute.xlu1 %2364 }
 0x51c   : > { %14307 = vst [vmem:[#allocation150_spill] sm:$0xff] %v8772_v47 }
 0x51e   : > { %v8774_v10 = vpop.permute.xlu0 %2446 }
 0x51f   : > { %v8776_v7 = vpop.permute.xlu1 %2368 }
 0x520   : > { %14308 = vst [vmem:[#allocation151_spill] sm:$0xff] %v8776_v7 }
 0x522   : > { %v8780_v21 = vpop.permute.xlu0 %2450 }
 0x523   : > { %v8778_v56 = vpop.permute.xlu1 %2372  ;;  %14309 = vst [vmem:[#allocation152_spill] sm:$0xff] %v8780_v21  ;;  %v2386_v21 = vsel %vm446_vm2, %v8696_v27, %v8752_v32 }
 0x524   : > { %v2410_v29 = vmul.f32 %v2386_v21, %v5586_v38 }
 0x526   : > { %v8784_v43 = vpop.permute.xlu0 %2518 }
 0x527   : > { %v8782_v0 = vpop.permute.xlu1 %2424 }
 0x528   : > { %v2468_v28 = vsel %vm770_vm4, %v8744_v59, %v8782_v0 }
 0x529   : > { %v2488_v22 = vmul.f32 %v2468_v28, %v5588_v39 }
 0x52a   : > { %v8790_v50 = vpop.permute.xlu0 %2522 }
 0x52b   : > { %v8786_v15 = vpop.permute.xlu1 %2428  ;;  %14312 = vst [vmem:[#allocation155_spill] sm:$0xff] %v8790_v50  ;;  %v2504_v54 = vadd.f32 %v2488_v22, %v2408_v13  ;;  %v2384_v22 = vsel %vm446_vm2, %v8704_v1, %v8758_v48 }
 0x52c   : > { %14310 = vst [vmem:[#allocation153_spill] sm:$0xff] %v8786_v15 }
 0x52e   : > { %v8794_v6 = vpop.permute.xlu0 %2526 }
 0x52f   : > { %v8788_v3 = vpop.permute.xlu1 %2432 }
 0x530   : > { %14311 = vst [vmem:[#allocation154_spill] sm:$0xff] %v8788_v3  ;;  %v2464_v32 = vsel %vm770_vm4, %v8756_v40, %v8788_v3 }
 0x531   : > { %v2492_v40 = vmul.f32 %v2464_v32, %v5588_v39 }
 0x532   : > { %v8800_v46 = vpop.permute.xlu0 %2530 }
 0x533   : > { %v8792_v31 = vpop.permute.xlu1 %2436 }
 0x536   : > { %v8804_v51 = vpop.permute.xlu0 %2534 }
 0x537   : > { %v8796_v49 = vpop.permute.xlu1 %2440 }
 0x538   : > { %14313 = vst [vmem:[#allocation156_spill] sm:$0xff] %v8796_v49 }
 0x53a   : > { %v8810_v63 = vpop.permute.xlu0 %2538 }
 0x53b   : > { %v8798_v12 = vpop.permute.xlu1 %2444 }
 0x53c   : > { %14314 = vst [vmem:[#allocation157_spill] sm:$0xff] %v8798_v12 }
 0x53e   : > { %v8814_v62 = vpop.permute.xlu0 %2542 }
 0x53f   : > { %v8802_v23 = vpop.permute.xlu1 %2448 }
 0x542   : > { %v8820_v33 = vpop.permute.xlu0 %2546 }
 0x543   : > { %v8806_v9 = vpop.permute.xlu1 %2452  ;;  %14318 = vst [vmem:[#allocation161_spill] sm:$0xff] %v8820_v33  ;;  %v2466_v33 = vsel %vm770_vm4, %v8750_v25, %v8786_v15 }
 0x544   : > { %v2490_v37 = vmul.f32 %v2466_v33, %v5588_v39 }
 0x546   : > { %v8824_v24 = vpop.permute.xlu0 %2614 }
 0x547   : > { %v8808_v41 = vpop.permute.xlu1 %2520  ;;  %14320 = vst [vmem:[#allocation163_spill] sm:$0xff] %v8824_v24 }
 0x548   : > { %14315 = vst [vmem:[#allocation158_spill] sm:$0xff] %v8808_v41  ;;  %v2564_v26 = vsel %vm868_vm5, %v8784_v43, %v8808_v41 }
 0x549   : > { %v2584_v44 = vmul.f32 %v2564_v26, %v5588_v39 }
 0x54a   : > { %v8834_v52 = vpop.permute.xlu0 %2618 }
 0x54b   : > { %v8812_v60 = vpop.permute.xlu1 %2524  ;;  %v2600_v13 = vadd.f32 %v2584_v44, %v2504_v54  ;;  %v2382_v54 = vsel %vm446_vm2, %v8712_v19, %v8764_v58  ;;  %v2462_v44 = vsel %vm770_vm4, %v8762_v35, %v8792_v31 }
 0x54c   : > { %14316 = vst [vmem:[#allocation159_spill] sm:$0xff] %v8812_v60  ;;  %v2562_v28 = vsel %vm868_vm5, %v8790_v50, %v8812_v60  ;;  %v2506_v60 = vadd.f32 %v2490_v37, %v2410_v29 }
 0x54d   : > { %v2586_v33 = vmul.f32 %v2562_v28, %v5588_v39 }
 0x54e   : > { %v8862_v41 = vpop.permute.xlu0 %2622 }
 0x54f   : > { %v8816_v14 = vpop.permute.xlu1 %2528  ;;  %v2602_v32 = vadd.f32 %v2586_v33, %v2506_v60  ;;  %v2494_v60 = vmul.f32 %v2462_v44, %v5588_v39 }
 0x550   : > { %v2560_v3 = vsel %vm868_vm5, %v8794_v6, %v8816_v14 }
 0x551   : > { %v2588_v28 = vmul.f32 %v2560_v3, %v5588_v39 }
 0x552   : > { %v8904_v29 = vpop.permute.xlu0 %2626 }
 0x553   : > { %v8818_v11 = vpop.permute.xlu1 %2532 }
 0x554   : > { %14317 = vst [vmem:[#allocation160_spill] sm:$0xff] %v8818_v11 }
 0x557   : > { %v8822_v57 = vpop.permute.xlu1 %2536 }
 0x558   : > { %14319 = vst [vmem:[#allocation162_spill] sm:$0xff] %v8822_v57 }
 0x55b   : > { %v8826_v5 = vpop.permute.xlu1 %2540 }
 0x55f   : > { %v8828_v18 = vpop.permute.xlu1 %2544 }
 0x563   : > { %v8845_v8 = vpop.permute.xlu1 %2548 }
 0x567   : > { %v8864_v15 = vpop.permute.xlu1 %2616 }
 0x568   : > { %14321 = vst [vmem:[#allocation164_spill] sm:$0xff] %v8864_v15  ;;  %v2660_v26 = vsel %vm965_vm6, %v8824_v24, %v8864_v15  ;;  %v2412_v24 = vmul.f32 %v2384_v22, %v5586_v38 }
 0x569   : > { %v2680_v21 = vmul.f32 %v2660_v26, %v5586_v38  ;;  %v14322_v26 = vld [vmem:[#allocation13_spill] sm:$0xff] }
 0x56a   : > { %v2508_v58 = vadd.f32 %v2492_v40, %v2412_v24 }
 0x56b   : > { %v8886_v50 = vadd.f32 %v2680_v21, %v2600_v13  ;;  %v8888_v15 = vpop.permute.xlu1 %2620  ;;  %v2558_v21 = vsel %vm868_vm5, %v8800_v46, %v8818_v11 }
 0x56c   : > { %v2658_v37 = vsel %vm965_vm6, %v8834_v52, %v8888_v15  ;;  %v2604_v40 = vadd.f32 %v2588_v28, %v2508_v58  ;;  %v2590_v44 = vmul.f32 %v2558_v21, %v5588_v39  ;;  %v8948_v58 = vpop.permute.xlu0 %2630 }
 0x56d   : > { %v8908_v22 = vadd.f32 %v8886_v50, %v14322_v26  ;;  %v2682_v13 = vmul.f32 %v2658_v37, %v5586_v38  ;;  %2746 = vrot.lane.b32.xlu0 %v8886_v50, %s5354_s5  ;;  %v2414_v26 = vmul.f32 %v2382_v54, %v5586_v38  ;;  %v2380_v37 = vsel %vm446_vm2, %v8720_v61, %v8768_v42 }
 0x56e   : > { %v2556_v42 = vsel %vm868_vm5, %v8804_v51, %v8822_v57 }
 0x56f   : > { %14323 = vst [vmem:[#allocation13_spill] sm:$0xff] %v8908_v22  ;;  %v8918_v3 = vadd.f32 %v2682_v13, %v2602_v32  ;;  %v8920_v33 = vpop.permute.xlu1 %2624  ;;  %v2460_v22 = vsel %vm770_vm4, %v8766_v20, %v8796_v49  ;;  %v14324_v32 = vld [vmem:[#allocation15_spill] sm:$0xff]  ;;  %v2510_v49 = vadd.f32 %v2494_v60, %v2414_v26  ;;  %v2458_v60 = vsel %vm770_vm4, %v8770_v55, %v8798_v12 }
 0x570   : > { %v2656_v24 = vsel %vm965_vm6, %v8862_v41, %v8920_v33  ;;  %v2496_v11 = vmul.f32 %v2460_v22, %v5588_v39 }
 0x571   : > { %v8938_v54 = vadd.f32 %v8918_v3, %v14324_v32  ;;  %v2684_v13 = vmul.f32 %v2656_v24, %v5586_v38  ;;  %2750 = vrot.lane.b32.xlu0 %v8918_v3, %s5354_s5  ;;  %v2416_v32 = vmul.f32 %v2380_v37, %v5586_v38  ;;  %v2378_v24 = vsel %vm446_vm2, %v8726_v36, %v8772_v47 }
 0x572   : > { %v2606_v26 = vadd.f32 %v2590_v44, %v2510_v49  ;;  %v2554_v47 = vsel %vm868_vm5, %v8810_v63, %v8826_v5  ;;  %v2418_v12 = vmul.f32 %v2378_v24, %v5586_v38  ;;  %v2498_v49 = vmul.f32 %v2458_v60, %v5588_v39  ;;  %v9001_v24 = vpop.permute.xlu0 %2634 }
 0x573   : > { %14325 = vst [vmem:[#allocation15_spill] sm:$0xff] %v8938_v54  ;;  %v8950_v28 = vadd.f32 %v2684_v13, %v2604_v40  ;;  %v8952_v21 = vpop.permute.xlu1 %2628  ;;  %v2592_v40 = vmul.f32 %v2556_v42, %v5588_v39  ;;  %v14326_v13 = vld [vmem:[#allocation19_spill] sm:$0xff]  ;;  %v2512_v57 = vadd.f32 %v2496_v11, %v2416_v32  ;;  %v2469_v11 = vsel %vm770_vm4, %v8806_v9, %v8744_v59 }
 0x574   : > { %v2654_v22 = vsel %vm965_vm6, %v8904_v29, %v8952_v21  ;;  %v2594_v60 = vmul.f32 %v2554_v47, %v5588_v39  ;;  %v2552_v59 = vsel %vm868_vm5, %v8814_v62, %v8828_v18  ;;  %v2514_v9 = vadd.f32 %v2498_v49, %v2418_v12 }
 0x575   : > { %v8970_v37 = vadd.f32 %v8950_v28, %v14326_v13  ;;  %v2686_v54 = vmul.f32 %v2654_v22, %v5586_v38  ;;  %2754 = vrot.lane.b32.xlu0 %v8950_v28, %s5354_s5  ;;  %v2376_v22 = vsel %vm446_vm2, %v8732_v2, %v8776_v7  ;;  %v2456_v13 = vsel %vm770_vm4, %v8774_v10, %v8802_v23 }
 0x576   : > { %v2608_v32 = vadd.f32 %v2592_v40, %v2512_v57  ;;  %v2420_v57 = vmul.f32 %v2376_v22, %v5586_v38  ;;  %v2500_v40 = vmul.f32 %v2456_v13, %v5588_v39  ;;  %v2565_v22 = vsel %vm868_vm5, %v8845_v8, %v8784_v43 }
 0x577   : > { %14327 = vst [vmem:[#allocation19_spill] sm:$0xff] %v8970_v37  ;;  %v8981_v42 = vadd.f32 %v2686_v54, %v2606_v26  ;;  %v8983_v44 = vpop.permute.xlu1 %2632  ;;  %v2596_v49 = vmul.f32 %v2552_v59, %v5588_v39 }
 0x578   : > { %v2652_v54 = vsel %vm965_vm6, %v8948_v58, %v8983_v44  ;;  %v2516_v43 = vadd.f32 %v2500_v40, %v2420_v57  ;;  %v2467_v57 = vsel %vm770_vm4, %v8782_v0, %v8750_v25  ;;  %v14329_v25 = vld [vmem:[#allocation155_spill] sm:$0xff]  ;;  %v14330_v0 = vld [vmem:[#allocation158_spill] sm:$0xff] }
 0x579   : > { %v9006_v26 = vadd.f32 %v8981_v42, %v8078_v34  ;;  %v2688_v37 = vmul.f32 %v2652_v54, %v5586_v38  ;;  %2758 = vrot.lane.b32.xlu0 %v8981_v42, %s5354_s5  ;;  %v2389_v34 = vsel %vm446_vm2, %v8778_v56, %v8688_v53  ;;  %v2471_v54 = vsel %vm282_vm7, %v2469_v11, 0.0  ;;  %v9045_v53 = vpop.permute.xlu0 %2638 }
 0x57a   : > { %v2391_v8 = vsel %vm266_vm3, %v2389_v34, 0.0  ;;  %v2567_v11 = vsel %vm298_vm8, %v2565_v22, 0.0 }
 0x57b   : > { %v9017_v47 = vadd.f32 %v2688_v37, %v2608_v32  ;;  %v9019_v7 = vpop.permute.xlu1 %2636  ;;  %v2610_v37 = vadd.f32 %v2594_v60, %v2514_v9  ;;  %v2612_v9 = vadd.f32 %v2596_v49, %v2516_v43  ;;  %v2583_v22 = vmul.f32 %v2567_v11, %v5588_v39  ;;  %v14332_v11 = vld [vmem:[#allocation147_spill] sm:$0xff] }
 0x57c   : > { %v2650_v12 = vsel %vm965_vm6, %v9001_v24, %v9019_v7 }
 0x57d   : > { %v9038_v13 = vadd.f32 %v9017_v47, %v8110_v4  ;;  %v2690_v56 = vmul.f32 %v2650_v12, %v5586_v38  ;;  %2762 = vrot.lane.b32.xlu0 %v9017_v47, %s5354_s5  ;;  %v2487_v4 = vmul.f32 %v2471_v54, %v5588_v39  ;;  %v2407_v54 = vmul.f32 %v2391_v8, %v5586_v38 }
 0x57e   : > { %v2387_v12 = vsel %vm446_vm2, %v8746_v16, %v8696_v27  ;;  %v14334_v27 = vld [vmem:[#allocation164_spill] sm:$0xff] }
 0x57f   : > { %v9049_v32 = vadd.f32 %v2690_v56, %v2610_v37  ;;  %v9051_v60 = vpop.permute.xlu1 %2640  ;;  %v2489_v56 = vmul.f32 %v2467_v57, %v5588_v39  ;;  %v2503_v43 = vadd.f32 %v2487_v4, %v2407_v54  ;;  %v2409_v57 = vmul.f32 %v2387_v12, %v5586_v38 }
 0x580   : > { %v2648_v59 = vsel %vm965_vm6, %v9045_v53, %v9051_v60 }
 0x581   : > { %v9064_v40 = vadd.f32 %v9049_v32, %v8136_v45  ;;  %v2692_v34 = vmul.f32 %v2648_v59, %v5586_v38  ;;  %2766 = vrot.lane.b32.xlu0 %v9049_v32, %s5354_s5  ;;  %v2563_v45 = vsel %vm868_vm5, %v14330_v0, %v14329_v25  ;;  %v14331_v59 = vld [vmem:[#allocation163_spill] sm:$0xff]  ;;  %v2659_v25 = vsel %vm965_vm6, %v14334_v27, %v8834_v52 }
 0x582   : > { %v2585_v54 = vmul.f32 %v2563_v45, %v5588_v39  ;;  %v2681_v12 = vmul.f32 %v2659_v25, %v5586_v38  ;;  %v14341_v25 = vld [vmem:[#allocation124_spill] sm:$0xff] }
 0x583   : > { %14328 = vst [vmem:[#allocation165_spill] sm:$0xff] %v9064_v40  ;;  %v9079_v37 = vadd.f32 %v2692_v34, %v2612_v9  ;;  %v2645_v49 = vpop.permute.xlu1 %2644  ;;  %v14333_v40 = vld [vmem:[#allocation153_spill] sm:$0xff] }
 0x584   : > { %v2661_v8 = vsel %vm965_vm6, %v2645_v49, %v14331_v59  ;;  %v2465_v16 = vsel %vm770_vm4, %v14333_v40, %v14332_v11  ;;  %v14335_v9 = vld [vmem:[#allocation21_spill] sm:$0xff]  ;;  %v2599_v40 = vadd.f32 %v2583_v22, %v2503_v43  ;;  %v14337_v49 = vld [vmem:[#allocation146_spill] sm:$0xff]  ;;  %v14338_v59 = vld [vmem:[#allocation159_spill] sm:$0xff]  ;;  %v2505_v11 = vadd.f32 %v2489_v56, %v2409_v57 }
 0x585   : > { %v9095_v34 = vadd.f32 %v9079_v37, %v14335_v9  ;;  %v2663_v4 = vsel %vm314_vm9, %v2661_v8, 0.0  ;;  %2770 = vrot.lane.b32.xlu0 %v9079_v37, %s5354_s5  ;;  %v2385_v52 = vsel %vm446_vm2, %v14337_v49, %v8704_v1  ;;  %v2561_v8 = vsel %vm868_vm5, %v14338_v59, %v8794_v6  ;;  %v14339_v22 = vld [vmem:[#allocation154_spill] sm:$0xff]  ;;  %v14340_v43 = vld [vmem:[#allocation27_spill] sm:$0xff]  ;;  %v14344_v49 = vld [vmem:[#allocation148_spill] sm:$0xff] }
 0x586   : > { %v2679_v0 = vmul.f32 %v2663_v4, %v5586_v38  ;;  %v2491_v27 = vmul.f32 %v2465_v16, %v5588_v39  ;;  %v2463_v45 = vsel %vm770_vm4, %v14339_v22, %v8762_v35  ;;  %v2657_v1 = vsel %vm965_vm6, %v8888_v15, %v8862_v41  ;;  %v14348_v22 = vld [vmem:[#allocation149_spill] sm:$0xff] }
 0x587   : > { %14336 = vst [vmem:[#allocation155_spill] sm:$0xff] %v9095_v34  ;;  %v2411_v6 = vmul.f32 %v2385_v52, %v5586_v38  ;;  %v2601_v56 = vadd.f32 %v2585_v54, %v2505_v11  ;;  %v2587_v16 = vmul.f32 %v2561_v8, %v5588_v39  ;;  %v2383_v35 = vsel %vm446_vm2, %v8758_v48, %v8712_v19  ;;  %v14347_v8 = vld [vmem:[#allocation156_spill] sm:$0xff] }
 0x588   : > { %v9114_v9 = vadd.f32 %v2679_v0, %v2599_v40  ;;  %v2559_v15 = vsel %vm868_vm5, %v8816_v14, %v8800_v46  ;;  %v2493_v57 = vmul.f32 %v2463_v45, %v5588_v39  ;;  %v2683_v40 = vmul.f32 %v2657_v1, %v5586_v38  ;;  %v14349_v45 = vld [vmem:[#allocation162_spill] sm:$0xff] }
 0x589   : > { %2806 = vrot.lane.b32.xlu0 %v14340_v43, %s5356_s11  ;;  %v2507_v41 = vadd.f32 %v2491_v27, %v2411_v6  ;;  %v9143_v54 = vadd.f32 %v2681_v12, %v2601_v56  ;;  %v2461_v0 = vsel %vm770_vm4, %v8792_v31, %v8766_v20  ;;  %v2655_v19 = vsel %vm965_vm6, %v8920_v33, %v8904_v29  ;;  %v14345_v31 = vld [vmem:[#allocation160_spill] sm:$0xff]  ;;  %v14351_v56 = vld [vmem:[#allocation157_spill] sm:$0xff] }
 0x58a   : > { %v9130_v4 = vadd.f32 %v9114_v9, %v14341_v25  ;;  %2744 = vrot.lane.b32.xlu1 %v9114_v9, %s5354_s5  ;;  %v2413_v48 = vmul.f32 %v2383_v35, %v5586_v38  ;;  %v2589_v46 = vmul.f32 %v2559_v15, %v5588_v39  ;;  %v2381_v20 = vsel %vm446_vm2, %v14344_v49, %v8720_v61  ;;  %v14352_v15 = vld [vmem:[#allocation150_spill] sm:$0xff]  ;;  %v2643_v49 = vpop.permute.xlu0 %2642 }
 0x58b   : > { %14343 = vst [vmem:[#allocation163_spill] sm:$0xff] %v9143_v54  ;;  %v2603_v14 = vadd.f32 %v2587_v16, %v2507_v41  ;;  %v2557_v29 = vsel %vm868_vm5, %v14345_v31, %v8804_v51  ;;  %v2685_v59 = vmul.f32 %v2655_v19, %v5586_v38  ;;  %v2459_v11 = vsel %vm770_vm4, %v14347_v8, %v8770_v55 }
 0x58c   : > { %14342 = vst [vmem:[#allocation158_spill] sm:$0xff] %v9130_v4  ;;  %v2509_v33 = vadd.f32 %v2493_v57, %v2413_v48  ;;  %v2653_v61 = vsel %vm965_vm6, %v8952_v21, %v8948_v58  ;;  %v2415_v51 = vmul.f32 %v2381_v20, %v5586_v38  ;;  %v2591_v12 = vmul.f32 %v2557_v29, %v5588_v39  ;;  %v14355_v48 = vld [vmem:[#allocation144_spill] sm:$0xff]  ;;  %v14359_v29 = vld [vmem:[#allocation62_spill] sm:$0xff] }
 0x58d   : > { %2810 = vrot.lane.b32.xlu0 %v8886_v50, %s5356_s11  ;;  %v2495_v50 = vmul.f32 %v2461_v0, %v5588_v39  ;;  %v9169_v52 = vadd.f32 %v2683_v40, %v2603_v14  ;;  %v2379_v55 = vsel %vm446_vm2, %v14348_v22, %v8726_v36  ;;  %v2555_v58 = vsel %vm868_vm5, %v14349_v45, %v8810_v63  ;;  %v14354_v40 = vld [vmem:[#allocation152_spill] sm:$0xff]  ;;  %v14356_v14 = vld [vmem:[#allocation151_spill] sm:$0xff] }
 0x58e   : > { %2748 = vrot.lane.b32.xlu1 %v9143_v54, %s5354_s5  ;;  %v2605_v27 = vadd.f32 %v2589_v46, %v2509_v33  ;;  %v2687_v6 = vmul.f32 %v2653_v61, %v5586_v38  ;;  %v2457_v16 = vsel %vm770_vm4, %v14351_v56, %v8774_v10  ;;  %v2651_v36 = vsel %vm965_vm6, %v8983_v44, %v9001_v24  ;;  %v14357_v46 = vld [vmem:[#allocation161_spill] sm:$0xff]  ;;  %v14361_v61 = vld [vmem:[#allocation140_spill] sm:$0xff] }
 0x58f   : > { %14346 = vst [vmem:[#allocation147_spill] sm:$0xff] %v9169_v52  ;;  %v2511_v21 = vadd.f32 %v2495_v50, %v2415_v51  ;;  %v2417_v63 = vmul.f32 %v2379_v55, %v5586_v38  ;;  %v2593_v35 = vmul.f32 %v2555_v58, %v5588_v39  ;;  %v2377_v10 = vsel %vm446_vm2, %v14352_v15, %v8732_v2  ;;  %v14360_v33 = vld [vmem:[#allocation145_spill] sm:$0xff]  ;;  %v14362_v51 = vld [vmem:[#allocation104_spill] sm:$0xff] }
 0x590   : > { %v9195_v1 = vadd.f32 %v2685_v59, %v2605_v27  ;;  %v2553_v44 = vsel %vm868_vm5, %v8826_v5, %v8814_v62  ;;  %v2689_v57 = vmul.f32 %v2651_v36, %v5586_v38  ;;  %v2455_v0 = vsel %vm770_vm4, %v8802_v23, %v14354_v40  ;;  %v14371_v15 = vld [vmem:[#allocation25_spill] sm:$0xff] }
 0x591   : > { %2814 = vrot.lane.b32.xlu0 %v8918_v3, %s5356_s11  ;;  %v2497_v3 = vmul.f32 %v2459_v11, %v5588_v39  ;;  %v2607_v25 = vadd.f32 %v2591_v12, %v2511_v21  ;;  %v2649_v2 = vsel %vm965_vm6, %v9019_v7, %v9045_v53  ;;  %v2419_v5 = vmul.f32 %v2377_v10, %v5586_v38  ;;  %v14364_v21 = vld [vmem:[#allocation48_spill] sm:$0xff]  ;;  %v14372_v10 = vld [vmem:[#allocation54_spill] sm:$0xff] }
 0x592   : > { %2752 = vrot.lane.b32.xlu1 %v9169_v52, %s5354_s5  ;;  %14350 = vst [vmem:[#allocation153_spill] sm:$0xff] %v9195_v1  ;;  %v2595_v19 = vmul.f32 %v2553_v44, %v5588_v39  ;;  %v2375_v23 = vsel %vm446_vm2, %v14356_v14, %v14355_v48  ;;  %v2551_v7 = vsel %vm868_vm5, %v8828_v18, %v14357_v46  ;;  %v14382_v46 = vld [vmem:[#allocation50_spill] sm:$0xff] }
 0x593   : > { %v2513_v24 = vadd.f32 %v2497_v3, %v2417_v63  ;;  %v9221_v41 = vadd.f32 %v2687_v6, %v2607_v25  ;;  %v2691_v31 = vmul.f32 %v2649_v2, %v5586_v38  ;;  %v2293_v50 = vsel %vm591_vm10, %v14360_v33, %v14359_v29  ;;  %v14365_v3 = vld [vmem:[#allocation46_spill] sm:$0xff]  ;;  %v14369_v25 = vld [vmem:[#allocation85_spill] sm:$0xff] }
 0x594   : > { %v2647_v59 = vsel %vm965_vm6, %v9051_v60, %v2643_v49  ;;  %v2421_v18 = vmul.f32 %v2375_v23, %v5586_v38  ;;  %v2597_v11 = vmul.f32 %v2551_v7, %v5588_v39  ;;  %v2229_v27 = vsel %vm365_vm0, %v14362_v51, %v14361_v61  ;;  %v14377_v2 = vld [vmem:[#allocation66_spill] sm:$0xff]  ;;  %v14381_v23 = vld [vmem:[#allocation53_spill] sm:$0xff] }
 0x595   : > { %2818 = vrot.lane.b32.xlu0 %v8950_v28, %s5356_s11  ;;  %v2499_v28 = vmul.f32 %v2457_v16, %v5588_v39  ;;  %14353 = vst [vmem:[#allocation164_spill] sm:$0xff] %v9221_v41  ;;  %v2609_v62 = vadd.f32 %v2593_v35, %v2513_v24  ;;  %v2294_v12 = vsel %vm249_vm11, %v2293_v50, 0.0  ;;  %v2230_v55 = vsel %vm233_vm1, %v2229_v27, 0.0  ;;  %v14367_v16 = vld [vmem:[#allocation125_spill] sm:$0xff]  ;;  %v14374_v24 = vld [vmem:[#allocation51_spill] sm:$0xff]  ;;  %v14389_v27 = vld [vmem:[#allocation70_spill] sm:$0xff] }
 0x596   : > { %2756 = vrot.lane.b32.xlu1 %v9195_v1, %s5354_s5  ;;  %v2310_v58 = vadd.f32 %v2294_v12, %v2230_v55  ;;  %v2291_v6 = vsel %vm591_vm10, %v14365_v3, %v14364_v21  ;;  %v2289_v44 = vsel %vm591_vm10, %v14372_v10, %v14371_v15  ;;  %v2285_v7 = vsel %vm591_vm10, %v14382_v46, %v14381_v23  ;;  %v14391_v55 = vld [vmem:[#allocation97_spill] sm:$0xff] }
 0x597   : > { %v2515_v53 = vadd.f32 %v2499_v28, %v2419_v5  ;;  %v9247_v20 = vadd.f32 %v2689_v57, %v2609_v62  ;;  %v14378_v62 = vld [vmem:[#allocation73_spill] sm:$0xff] }
 0x598   : > { %v9293_v35 = vmul.f32 %v2310_v58, %v14369_v25 }
 0x599   : > { %2822 = vrot.lane.b32.xlu0 %v8981_v42, %s5356_s11  ;;  %v2501_v42 = vmul.f32 %v2455_v0, %v5588_v39  ;;  %14358 = vst [vmem:[#allocation21_spill] sm:$0xff] %v9247_v20  ;;  %v2611_v8 = vadd.f32 %v2595_v19, %v2515_v53  ;;  %v14376_v0 = vld [vmem:[#allocation71_spill] sm:$0xff]  ;;  %v14379_v19 = vld [vmem:[#allocation100_spill] sm:$0xff] }
 0x59a   : > { %2760 = vrot.lane.b32.xlu1 %v9221_v41, %s5354_s5  ;;  %14370 = vst [vmem:[#allocation154_spill] sm:$0xff] %v9293_v35  ;;  %v2287_v5 = vsel %vm591_vm10, %v14377_v2, %v14376_v0  ;;  %v2223_v48 = vsel %vm365_vm0, %v14379_v19, %v14378_v62  ;;  %v14383_v53 = vld [vmem:[#allocation95_spill] sm:$0xff] }
 0x59b   : > { %v2517_v60 = vadd.f32 %v2501_v42, %v2421_v18  ;;  %v9269_v22 = vadd.f32 %v2691_v31, %v2611_v8  ;;  %v2316_v14 = vadd.f32 %v2287_v5, %v2223_v48  ;;  %v14384_v42 = vld [vmem:[#allocation56_spill] sm:$0xff]  ;;  %v14397_v5 = vld [vmem:[#allocation143_spill] sm:$0xff] }
 0x59c   : > { %v2221_v49 = vsel %vm365_vm0, %v14384_v42, %v14383_v53  ;;  %v14387_v18 = vld [vmem:[#allocation68_spill] sm:$0xff] }
 0x59d   : > { %2826 = vrot.lane.b32.xlu0 %v9017_v47, %s5356_s11  ;;  %14363 = vst [vmem:[#allocation146_spill] sm:$0xff] %v9269_v22  ;;  %v2693_v47 = vmul.f32 %v2647_v59, %v5586_v38  ;;  %v2613_v45 = vadd.f32 %v2597_v11, %v2517_v60  ;;  %v9338_v31 = vmul.f32 %v2316_v14, %v14369_v25  ;;  %v14386_v59 = vld [vmem:[#allocation65_spill] sm:$0xff]  ;;  %v14388_v11 = vld [vmem:[#allocation99_spill] sm:$0xff] }
 0x59e   : > { %2764 = vrot.lane.b32.xlu1 %v9247_v20, %s5354_s5  ;;  %v2318_v50 = vadd.f32 %v2285_v7, %v2221_v49  ;;  %v2283_v8 = vsel %vm591_vm10, %v14387_v18, %v14386_v59  ;;  %v2219_v12 = vsel %vm365_vm0, %v14389_v27, %v14388_v11  ;;  %v14398_v14 = vld [vmem:[#allocation103_spill] sm:$0xff]  ;;  %v14399_v7 = vld [vmem:[#allocation101_spill] sm:$0xff] }
 0x59f   : > { %v9282_v56 = vadd.f32 %v2693_v47, %v2613_v45  ;;  %14385 = vst [vmem:[#allocation160_spill] sm:$0xff] %v9338_v31  ;;  %v2320_v47 = vadd.f32 %v2283_v8, %v2219_v12  ;;  %v14392_v45 = vld [vmem:[#allocation102_spill] sm:$0xff]  ;;  %v2215_v49 = vsel %vm365_vm0, %v14399_v7, %v14398_v14  ;;  %v2292_v12 = vsel %vm591_vm10, %v14359_v29, %v14365_v3 }
 0x5a0   : > { %v9353_v60 = vmul.f32 %v2318_v50, %v14369_v25  ;;  %v2281_v58 = vsel %vm591_vm10, %v14392_v45, %v14391_v55  ;;  %v2290_v29 = vsel %vm591_vm10, %v14364_v21, %v14372_v10  ;;  %v2288_v21 = vsel %vm591_vm10, %v14371_v15, %v14377_v2 }
 0x5a1   : > { %2830 = vrot.lane.b32.xlu0 %v9049_v32, %s5356_s11  ;;  %14366 = vst [vmem:[#allocation159_spill] sm:$0xff] %v9282_v56  ;;  %v14368_v32 = vld [vmem:[#allocation52_spill] sm:$0xff]  ;;  %v2286_v15 = vsel %vm591_vm10, %v14376_v0, %v14382_v46  ;;  %v2284_v0 = vsel %vm591_vm10, %v14381_v23, %v14387_v18  ;;  %v2282_v23 = vsel %vm591_vm10, %v14386_v59, %v14392_v45  ;;  %v9481_v45 = vpop.permute.xlu0 %2742 }
 0x5a2   : > { %2768 = vrot.lane.b32.xlu1 %v9269_v22, %s5354_s5  ;;  %v2227_v36 = vsel %vm365_vm0, %v14368_v32, %v14367_v16  ;;  %14390 = vst [vmem:[#allocation156_spill] sm:$0xff] %v9353_v60  ;;  %v2280_v59 = vsel %vm591_vm10, %v14391_v55, %v14397_v5  ;;  %14407 = vst [vmem:[#allocation62_spill] sm:$0xff] %v9481_v45 }
 0x5a3   : > { %v2312_v63 = vadd.f32 %v2291_v6, %v2227_v36  ;;  %v14393_v6 = vld [vmem:[#allocation55_spill] sm:$0xff] }
 0x5a4   : > { %v14394_v36 = vld [vmem:[#allocation59_spill] sm:$0xff] }
 0x5a5   : > { %2834 = vrot.lane.b32.xlu0 %v9079_v37, %s5356_s11  ;;  %v14373_v37 = vld [vmem:[#allocation72_spill] sm:$0xff]  ;;  %v9308_v57 = vmul.f32 %v2312_v63, %v14369_v25  ;;  %v2217_v63 = vsel %vm365_vm0, %v14394_v36, %v14393_v6 }
 0x5a6   : > { %2772 = vrot.lane.b32.xlu1 %v9282_v56, %s5354_s5  ;;  %v2225_v28 = vsel %vm365_vm0, %v14374_v24, %v14373_v37 }
 0x5a7   : > { %14375 = vst [vmem:[#allocation124_spill] sm:$0xff] %v9308_v57  ;;  %v2314_v40 = vadd.f32 %v2289_v44, %v2225_v28  ;;  %v9368_v44 = vmul.f32 %v2320_v47, %v14369_v25  ;;  %v2322_v28 = vadd.f32 %v2281_v58, %v2217_v63  ;;  %v2228_v47 = vsel %vm365_vm0, %v14361_v61, %v14368_v32 }
 0x5a8   : > { %v2311_v63 = vadd.f32 %v2292_v12, %v2228_v47  ;;  %v2226_v61 = vsel %vm365_vm0, %v14367_v16, %v14374_v24  ;;  %v2224_v16 = vsel %vm365_vm0, %v14373_v37, %v14379_v19  ;;  %v2222_v37 = vsel %vm365_vm0, %v14378_v62, %v14384_v42 }
 0x5a9   : > { %2902 = vrot.lane.b32.xlu0 %v9293_v35, %s5355_s24  ;;  %14395 = vst [vmem:[#allocation149_spill] sm:$0xff] %v9368_v44  ;;  %v9383_v50 = vmul.f32 %v2322_v28, %v14369_v25  ;;  %v2313_v32 = vadd.f32 %v2290_v29, %v2226_v61  ;;  %v2315_v24 = vadd.f32 %v2288_v21, %v2224_v16 }
 0x5aa   : > { %2808 = vrot.lane.b32.xlu1 %v9114_v9, %s5356_s11  ;;  %v9323_v9 = vmul.f32 %v2314_v40, %v14369_v25  ;;  %v14396_v40 = vld [vmem:[#allocation57_spill] sm:$0xff]  ;;  %v9413_v3 = vmul.f32 %v2311_v63, %v14369_v25  ;;  %v2317_v19 = vadd.f32 %v2286_v15, %v2222_v37  ;;  %v2220_v62 = vsel %vm365_vm0, %v14383_v53, %v14389_v27 }
 0x5ab   : > { %v2279_v48 = vsel %vm591_vm10, %v14397_v5, %v14396_v40  ;;  %14400 = vst [vmem:[#allocation162_spill] sm:$0xff] %v9383_v50  ;;  %v9428_v10 = vmul.f32 %v2313_v32, %v14369_v25  ;;  %v9443_v2 = vmul.f32 %v2315_v24, %v14369_v25  ;;  %v2319_v42 = vadd.f32 %v2284_v0, %v2220_v62 }
 0x5ac   : > { %14380 = vst [vmem:[#allocation148_spill] sm:$0xff] %v9323_v9  ;;  %v2324_v8 = vadd.f32 %v2279_v48, %v2215_v49  ;;  %14402 = vst [vmem:[#allocation150_spill] sm:$0xff] %v9413_v3  ;;  %v9458_v46 = vmul.f32 %v2317_v19, %v14369_v25  ;;  %v2218_v53 = vsel %vm365_vm0, %v14388_v11, %v14394_v36 }
 0x5ad   : > { %2906 = vrot.lane.b32.xlu0 %v9308_v57, %s5355_s24  ;;  %14403 = vst [vmem:[#allocation152_spill] sm:$0xff] %v9428_v10  ;;  %14404 = vst [vmem:[#allocation144_spill] sm:$0xff] %v9443_v2  ;;  %v9473_v18 = vmul.f32 %v2319_v42, %v14369_v25  ;;  %v2321_v27 = vadd.f32 %v2282_v23, %v2218_v53  ;;  %v2216_v11 = vsel %vm365_vm0, %v14393_v6, %v14399_v7 }
 0x5ae   : > { %2812 = vrot.lane.b32.xlu1 %v9143_v54, %s5356_s11  ;;  %v9398_v58 = vmul.f32 %v2324_v8, %v14369_v25  ;;  %14405 = vst [vmem:[#allocation151_spill] sm:$0xff] %v9458_v46  ;;  %v2323_v28 = vadd.f32 %v2280_v59, %v2216_v11  ;;  %v2278_v55 = vsel %vm591_vm10, %v14396_v40, %v14360_v33 }
 0x5af   : > { %14406 = vst [vmem:[#allocation161_spill] sm:$0xff] %v9473_v18  ;;  %v9490_v36 = vmul.f32 %v2321_v27, %v14369_v25  ;;  %v2214_v6 = vsel %vm365_vm0, %v14398_v14, %v14362_v51 }
 0x5b0   : > { %14401 = vst [vmem:[#allocation157_spill] sm:$0xff] %v9398_v58  ;;  %v9507_v48 = vmul.f32 %v2323_v28, %v14369_v25  ;;  %v2325_v7 = vadd.f32 %v2278_v55, %v2214_v6 }
 0x5b1   : > { %2910 = vrot.lane.b32.xlu0 %v9323_v9, %s5355_s24  ;;  %14408 = vst [vmem:[#allocation145_spill] sm:$0xff] %v9490_v36 }
 0x5b2   : > { %2816 = vrot.lane.b32.xlu1 %v9169_v52, %s5356_s11  ;;  %14410 = vst [vmem:[#allocation104_spill] sm:$0xff] %v9507_v48  ;;  %v9516_v40 = vmul.f32 %v2325_v7, %v14369_v25 }
 0x5b4   : > { %14412 = vst [vmem:[#allocation46_spill] sm:$0xff] %v9516_v40 }
 0x5b5   : > { %2914 = vrot.lane.b32.xlu0 %v9338_v31, %s5355_s24 }
 0x5b6   : > { %2820 = vrot.lane.b32.xlu1 %v9195_v1, %s5356_s11 }
 0x5b9   : > { %2918 = vrot.lane.b32.xlu0 %v9353_v60, %s5355_s24 }
 0x5ba   : > { %2824 = vrot.lane.b32.xlu1 %v9221_v41, %s5356_s11 }
 0x5bd   : > { %2922 = vrot.lane.b32.xlu0 %v9368_v44, %s5355_s24 }
 0x5be   : > { %2828 = vrot.lane.b32.xlu1 %v9247_v20, %s5356_s11 }
 0x5c1   : > { %2926 = vrot.lane.b32.xlu0 %v9383_v50, %s5355_s24 }
 0x5c2   : > { %2832 = vrot.lane.b32.xlu1 %v9269_v22, %s5356_s11 }
 0x5c5   : > { %2930 = vrot.lane.b32.xlu0 %v9398_v58, %s5355_s24 }
 0x5c6   : > { %2836 = vrot.lane.b32.xlu1 %v9282_v56, %s5356_s11 }
 0x5c9   : > { %2982 = vrot.lane.b32.xlu0 %v9293_v35, %s5358_s13 }
 0x5ca   : > { %2904 = vrot.lane.b32.xlu1 %v9413_v3, %s5355_s24 }
 0x5cd   : > { %2986 = vrot.lane.b32.xlu0 %v9308_v57, %s5358_s13 }
 0x5ce   : > { %2908 = vrot.lane.b32.xlu1 %v9428_v10, %s5355_s24 }
 0x5d1   : > { %2990 = vrot.lane.b32.xlu0 %v9323_v9, %s5358_s13 }
 0x5d2   : > { %2912 = vrot.lane.b32.xlu1 %v9443_v2, %s5355_s24 }
 0x5d5   : > { %2994 = vrot.lane.b32.xlu0 %v9338_v31, %s5358_s13 }
 0x5d6   : > { %2916 = vrot.lane.b32.xlu1 %v9458_v46, %s5355_s24 }
 0x5d9   : > { %2998 = vrot.lane.b32.xlu0 %v9353_v60, %s5358_s13 }
 0x5da   : > { %2920 = vrot.lane.b32.xlu1 %v9473_v18, %s5355_s24 }
 0x5dd   : > { %3002 = vrot.lane.b32.xlu0 %v9368_v44, %s5358_s13 }
 0x5de   : > { %2924 = vrot.lane.b32.xlu1 %v9490_v36, %s5355_s24 }
 0x5df   : > { %v9504_v5 = vpop.permute.xlu0 %2746 }
 0x5e0   : > { %14409 = vst [vmem:[#allocation140_spill] sm:$0xff] %v9504_v5 }
 0x5e1   : > { %3006 = vrot.lane.b32.xlu0 %v9383_v50, %s5358_s13 }
 0x5e2   : > { %2928 = vrot.lane.b32.xlu1 %v9507_v48, %s5355_s24 }
 0x5e3   : > { %v9513_v33 = vpop.permute.xlu0 %2750 }
 0x5e4   : > { %14411 = vst [vmem:[#allocation48_spill] sm:$0xff] %v9513_v33 }
 0x5e5   : > { %3010 = vrot.lane.b32.xlu0 %v9398_v58, %s5358_s13 }
 0x5e6   : > { %2932 = vrot.lane.b32.xlu1 %v9516_v40, %s5355_s24 }
 0x5e7   : > { %v9522_v51 = vpop.permute.xlu0 %2754 }
 0x5e8   : > { %14413 = vst [vmem:[#allocation125_spill] sm:$0xff] %v9522_v51 }
 0x5e9   : > { %3078 = vrot.lane.b32.xlu0 %v9293_v35, %s5359_s18 }
 0x5ea   : > { %2984 = vrot.lane.b32.xlu1 %v9413_v3, %s5358_s13 }
 0x5eb   : > { %v9528_v14 = vpop.permute.xlu0 %2758 }
 0x5ec   : > { %14414 = vst [vmem:[#allocation52_spill] sm:$0xff] %v9528_v14 }
 0x5ed   : > { %3082 = vrot.lane.b32.xlu0 %v9308_v57, %s5359_s18 }
 0x5ee   : > { %2988 = vrot.lane.b32.xlu1 %v9428_v10, %s5358_s13 }
 0x5ef   : > { %v9534_v49 = vpop.permute.xlu0 %2762 }
 0x5f0   : > { %14415 = vst [vmem:[#allocation25_spill] sm:$0xff] %v9534_v49 }
 0x5f1   : > { %3086 = vrot.lane.b32.xlu0 %v9323_v9, %s5359_s18 }
 0x5f2   : > { %2992 = vrot.lane.b32.xlu1 %v9443_v2, %s5358_s13 }
 0x5f3   : > { %v9540_v8 = vpop.permute.xlu0 %2766 }
 0x5f4   : > { %14416 = vst [vmem:[#allocation54_spill] sm:$0xff] %v9540_v8 }
 0x5f5   : > { %3090 = vrot.lane.b32.xlu0 %v9338_v31, %s5359_s18 }
 0x5f6   : > { %2996 = vrot.lane.b32.xlu1 %v9458_v46, %s5358_s13 }
 0x5f7   : > { %v9546_v12 = vpop.permute.xlu0 %2770 }
 0x5f8   : > { %14417 = vst [vmem:[#allocation72_spill] sm:$0xff] %v9546_v12 }
 0x5f9   : > { %3094 = vrot.lane.b32.xlu0 %v9353_v60, %s5359_s18 }
 0x5fa   : > { %3000 = vrot.lane.b32.xlu1 %v9473_v18, %s5358_s13 }
 0x5fb   : > { %v9552_v47 = vpop.permute.xlu0 %2806 }
 0x5fc   : > { %14418 = vst [vmem:[#allocation51_spill] sm:$0xff] %v9552_v47  ;;  %v9554_v63 = vpop.permute.xlu1 %2744 }
 0x5fd   : > { %14419 = vst [vmem:[#allocation71_spill] sm:$0xff] %v9554_v63  ;;  %3098 = vrot.lane.b32.xlu0 %v9368_v44, %s5359_s18 }
 0x5fe   : > { %3004 = vrot.lane.b32.xlu1 %v9490_v36, %s5358_s13 }
 0x5ff   : > { %v9560_v29 = vpop.permute.xlu0 %2810 }
 0x600   : > { %14420 = vst [vmem:[#allocation66_spill] sm:$0xff] %v9560_v29  ;;  %v9562_v61 = vpop.permute.xlu1 %2748 }
 0x601   : > { %14421 = vst [vmem:[#allocation73_spill] sm:$0xff] %v9562_v61  ;;  %3102 = vrot.lane.b32.xlu0 %v9383_v50, %s5359_s18 }
 0x602   : > { %3008 = vrot.lane.b32.xlu1 %v9507_v48, %s5358_s13 }
 0x603   : > { %v9568_v32 = vpop.permute.xlu0 %2814 }
 0x604   : > { %14422 = vst [vmem:[#allocation100_spill] sm:$0xff] %v9568_v32  ;;  %v9570_v21 = vpop.permute.xlu1 %2752 }
 0x605   : > { %14423 = vst [vmem:[#allocation53_spill] sm:$0xff] %v9570_v21  ;;  %3106 = vrot.lane.b32.xlu0 %v9398_v58, %s5359_s18 }
 0x606   : > { %3012 = vrot.lane.b32.xlu1 %v9516_v40, %s5358_s13 }
 0x607   : > { %v9576_v16 = vpop.permute.xlu0 %2818 }
 0x608   : > { %14424 = vst [vmem:[#allocation50_spill] sm:$0xff] %v9576_v16  ;;  %v9578_v24 = vpop.permute.xlu1 %2756 }
 0x609   : > { %14425 = vst [vmem:[#allocation95_spill] sm:$0xff] %v9578_v24  ;;  %3174 = vrot.lane.b32.xlu0 %v9293_v35, %s5360_s20 }
 0x60a   : > { %3080 = vrot.lane.b32.xlu1 %v9413_v3, %s5359_s18 }
 0x60b   : > { %v9584_v15 = vpop.permute.xlu0 %2822 }
 0x60c   : > { %14426 = vst [vmem:[#allocation56_spill] sm:$0xff] %v9584_v15  ;;  %v9586_v37 = vpop.permute.xlu1 %2760 }
 0x60d   : > { %14427 = vst [vmem:[#allocation65_spill] sm:$0xff] %v9586_v37  ;;  %3178 = vrot.lane.b32.xlu0 %v9308_v57, %s5360_s20 }
 0x60e   : > { %3084 = vrot.lane.b32.xlu1 %v9428_v10, %s5359_s18 }
 0x60f   : > { %v9592_v19 = vpop.permute.xlu0 %2826 }
 0x610   : > { %14428 = vst [vmem:[#allocation68_spill] sm:$0xff] %v9592_v19  ;;  %v9594_v0 = vpop.permute.xlu1 %2764 }
 0x611   : > { %14429 = vst [vmem:[#allocation99_spill] sm:$0xff] %v9594_v0  ;;  %3182 = vrot.lane.b32.xlu0 %v9323_v9, %s5360_s20 }
 0x612   : > { %3088 = vrot.lane.b32.xlu1 %v9443_v2, %s5359_s18 }
 0x613   : > { %v9600_v62 = vpop.permute.xlu0 %2830 }
 0x614   : > { %14430 = vst [vmem:[#allocation70_spill] sm:$0xff] %v9600_v62  ;;  %v9602_v42 = vpop.permute.xlu1 %2768 }
 0x615   : > { %14431 = vst [vmem:[#allocation97_spill] sm:$0xff] %v9602_v42  ;;  %3186 = vrot.lane.b32.xlu0 %v9338_v31, %s5360_s20 }
 0x616   : > { %3092 = vrot.lane.b32.xlu1 %v9458_v46, %s5359_s18 }
 0x617   : > { %v9608_v23 = vpop.permute.xlu0 %2834 }
 0x618   : > { %14432 = vst [vmem:[#allocation102_spill] sm:$0xff] %v9608_v23  ;;  %v9610_v53 = vpop.permute.xlu1 %2772 }
 0x619   : > { %14433 = vst [vmem:[#allocation55_spill] sm:$0xff] %v9610_v53  ;;  %3190 = vrot.lane.b32.xlu0 %v9353_v60, %s5360_s20 }
 0x61a   : > { %3096 = vrot.lane.b32.xlu1 %v9473_v18, %s5359_s18 }
 0x61b   : > { %v9616_v27 = vpop.permute.xlu0 %2902 }
 0x61c   : > { %v9618_v59 = vpop.permute.xlu1 %2808 }
 0x61d   : > { %14434 = vst [vmem:[#allocation59_spill] sm:$0xff] %v9618_v59  ;;  %3194 = vrot.lane.b32.xlu0 %v9368_v44, %s5360_s20 }
 0x61e   : > { %3100 = vrot.lane.b32.xlu1 %v9490_v36, %s5359_s18 }
 0x61f   : > { %v9624_v11 = vpop.permute.xlu0 %2906 }
 0x620   : > { %v9626_v28 = vpop.permute.xlu1 %2812 }
 0x621   : > { %14435 = vst [vmem:[#allocation57_spill] sm:$0xff] %v9626_v28  ;;  %3198 = vrot.lane.b32.xlu0 %v9383_v50, %s5360_s20 }
 0x622   : > { %3104 = vrot.lane.b32.xlu1 %v9507_v48, %s5359_s18 }
 0x623   : > { %v9632_v55 = vpop.permute.xlu0 %2910 }
 0x624   : > { %v9634_v6 = vpop.permute.xlu1 %2816 }
 0x625   : > { %14436 = vst [vmem:[#allocation143_spill] sm:$0xff] %v9634_v6  ;;  %3202 = vrot.lane.b32.xlu0 %v9398_v58, %s5360_s20 }
 0x626   : > { %3108 = vrot.lane.b32.xlu1 %v9516_v40, %s5359_s18 }
 0x627   : > { %v9640_v7 = vpop.permute.xlu0 %2914 }
 0x628   : > { %v9642_v56 = vpop.permute.xlu1 %2820 }
 0x629   : > { %14437 = vst [vmem:[#allocation103_spill] sm:$0xff] %v9642_v56  ;;  %3302 = vrot.lane.b32.xlu0 %v14340_v43, %s5354_s5 }
 0x62a   : > { %3176 = vrot.lane.b32.xlu1 %v9413_v3, %s5360_s20 }
 0x62b   : > { %v9648_v22 = vpop.permute.xlu0 %2918 }
 0x62c   : > { %v9650_v20 = vpop.permute.xlu1 %2824 }
 0x62d   : > { %14438 = vst [vmem:[#allocation101_spill] sm:$0xff] %v9650_v20 }
 0x62e   : > { %3180 = vrot.lane.b32.xlu1 %v9428_v10, %s5360_s20 }
 0x62f   : > { %v9654_v41 = vpop.permute.xlu0 %2922 }
 0x630   : > { %v9656_v1 = vpop.permute.xlu1 %2828 }
 0x631   : > { %14439 = vst [vmem:[#allocation166_spill] sm:$0xff] %v9656_v1 }
 0x632   : > { %3184 = vrot.lane.b32.xlu1 %v9443_v2, %s5360_s20 }
 0x633   : > { %v9660_v52 = vpop.permute.xlu0 %2926 }
 0x634   : > { %v9662_v54 = vpop.permute.xlu1 %2832 }
 0x635   : > { %14440 = vst [vmem:[#allocation167_spill] sm:$0xff] %v9662_v54 }
 0x636   : > { %3188 = vrot.lane.b32.xlu1 %v9458_v46, %s5360_s20 }
 0x637   : > { %v9666_v35 = vpop.permute.xlu0 %2930 }
 0x638   : > { %14441 = vst [vmem:[#allocation168_spill] sm:$0xff] %v9666_v35  ;;  %v9668_v58 = vpop.permute.xlu1 %2836 }
 0x639   : > { %14442 = vst [vmem:[#allocation169_spill] sm:$0xff] %v9668_v58 }
 0x63a   : > { %3192 = vrot.lane.b32.xlu1 %v9473_v18, %s5360_s20 }
 0x63b   : > { %v9672_v50 = vpop.permute.xlu0 %2982 }
 0x63c   : > { %v9674_v44 = vpop.permute.xlu1 %2904 }
 0x63d   : > { %v2948_v29 = vsel %vm446_vm2, %v9616_v27, %v9674_v44 }
 0x63e   : > { %3196 = vrot.lane.b32.xlu1 %v9490_v36, %s5360_s20 }
 0x63f   : > { %v9678_v60 = vpop.permute.xlu0 %2986 }
 0x640   : > { %v9680_v31 = vpop.permute.xlu1 %2908 }
 0x641   : > { %14443 = vst [vmem:[#allocation170_spill] sm:$0xff] %v9680_v31  ;;  %v2946_v35 = vsel %vm446_vm2, %v9624_v11, %v9680_v31 }
 0x642   : > { %3200 = vrot.lane.b32.xlu1 %v9507_v48, %s5360_s20 }
 0x643   : > { %v9684_v46 = vpop.permute.xlu0 %2990 }
 0x644   : > { %14444 = vst [vmem:[#allocation171_spill] sm:$0xff] %v9684_v46  ;;  %v9686_v2 = vpop.permute.xlu1 %2912 }
 0x646   : > { %3204 = vrot.lane.b32.xlu1 %v9516_v40, %s5360_s20 }
 0x647   : > { %v9690_v18 = vpop.permute.xlu0 %2994 }
 0x648   : > { %v9692_v9 = vpop.permute.xlu1 %2916 }
 0x649   : > { %14445 = vst [vmem:[#allocation172_spill] sm:$0xff] %v9692_v9 }
 0x64b   : > { %v9694_v10 = vpop.permute.xlu0 %2998 }
 0x64c   : > { %v9696_v36 = vpop.permute.xlu1 %2920 }
 0x64d   : > { %14446 = vst [vmem:[#allocation173_spill] sm:$0xff] %v9696_v36 }
 0x64f   : > { %v9698_v57 = vpop.permute.xlu0 %3002 }
 0x650   : > { %v9700_v3 = vpop.permute.xlu1 %2924 }
 0x651   : > { %14447 = vst [vmem:[#allocation174_spill] sm:$0xff] %v9700_v3 }
 0x653   : > { %v9702_v48 = vpop.permute.xlu0 %3006 }
 0x654   : > { %v9704_v42 = vpop.permute.xlu1 %2928 }
 0x655   : > { %14448 = vst [vmem:[#allocation175_spill] sm:$0xff] %v9704_v42 }
 0x657   : > { %v9708_v54 = vpop.permute.xlu0 %3010 }
 0x658   : > { %v9706_v12 = vpop.permute.xlu1 %2932  ;;  %14449 = vst [vmem:[#allocation176_spill] sm:$0xff] %v9708_v54 }
 0x65b   : > { %v9712_v23 = vpop.permute.xlu0 %3078 }
 0x65c   : > { %v9710_v40 = vpop.permute.xlu1 %2984 }
 0x65d   : > { %v3028_v5 = vsel %vm770_vm4, %v9672_v50, %v9710_v40 }
 0x65e   : > { %v3048_v45 = vmul.f32 %v3028_v5, %v5588_v39 }
 0x65f   : > { %v9718_v1 = vpop.permute.xlu0 %3082 }
 0x660   : > { %v9714_v0 = vpop.permute.xlu1 %2988 }
 0x661   : > { %14450 = vst [vmem:[#allocation177_spill] sm:$0xff] %v9714_v0  ;;  %v3026_v47 = vsel %vm770_vm4, %v9678_v60, %v9714_v0 }
 0x662   : > { %v3050_v43 = vmul.f32 %v3026_v47, %v5588_v39 }
 0x663   : > { %v9722_v37 = vpop.permute.xlu0 %3086 }
 0x664   : > { %v9716_v8 = vpop.permute.xlu1 %2992 }
 0x665   : > { %14451 = vst [vmem:[#allocation178_spill] sm:$0xff] %v9716_v8  ;;  %v3024_v31 = vsel %vm770_vm4, %v9684_v46, %v9716_v8 }
 0x666   : > { %v3052_v46 = vmul.f32 %v3024_v31, %v5588_v39 }
 0x667   : > { %v9728_v19 = vpop.permute.xlu0 %3090 }
 0x668   : > { %v9720_v62 = vpop.permute.xlu1 %2996 }
 0x66b   : > { %v9732_v14 = vpop.permute.xlu0 %3094 }
 0x66c   : > { %v9724_v49 = vpop.permute.xlu1 %3000 }
 0x66d   : > { %14452 = vst [vmem:[#allocation179_spill] sm:$0xff] %v9724_v49 }
 0x66f   : > { %v9738_v21 = vpop.permute.xlu0 %3098 }
 0x670   : > { %v9726_v20 = vpop.permute.xlu1 %3004 }
 0x671   : > { %14453 = vst [vmem:[#allocation180_spill] sm:$0xff] %v9726_v20 }
 0x673   : > { %v9742_v6 = vpop.permute.xlu0 %3102 }
 0x674   : > { %v9730_v24 = vpop.permute.xlu1 %3008 }
 0x677   : > { %v9748_v33 = vpop.permute.xlu0 %3106 }
 0x678   : > { %v9734_v56 = vpop.permute.xlu1 %3012  ;;  %14457 = vst [vmem:[#allocation184_spill] sm:$0xff] %v9748_v33  ;;  %v2968_v33 = vmul.f32 %v2948_v29, %v5586_v38  ;;  %v2970_v29 = vmul.f32 %v2946_v35, %v5586_v38 }
 0x67a   : > { %v3064_v4 = vadd.f32 %v3048_v45, %v2968_v33  ;;  %v2944_v45 = vsel %vm446_vm2, %v9632_v55, %v9686_v2 }
 0x67b   : > { %v9752_v32 = vpop.permute.xlu0 %3174 }
 0x67c   : > { %v9736_v15 = vpop.permute.xlu1 %3080  ;;  %14459 = vst [vmem:[#allocation186_spill] sm:$0xff] %v9752_v32 }
 0x67d   : > { %14454 = vst [vmem:[#allocation181_spill] sm:$0xff] %v9736_v15  ;;  %v3124_v53 = vsel %vm868_vm5, %v9712_v23, %v9736_v15 }
 0x67e   : > { %v3144_v54 = vmul.f32 %v3124_v53, %v5588_v39 }
 0x67f   : > { %v9762_v59 = vpop.permute.xlu0 %3178 }
 0x680   : > { %v9740_v51 = vpop.permute.xlu1 %3084  ;;  %v3160_v33 = vadd.f32 %v3144_v54, %v3064_v4  ;;  %v2942_v4 = vsel %vm446_vm2, %v9640_v7, %v9692_v9  ;;  %v3022_v54 = vsel %vm770_vm4, %v9690_v18, %v9720_v62 }
 0x681   : > { %14455 = vst [vmem:[#allocation182_spill] sm:$0xff] %v9740_v51  ;;  %v3122_v5 = vsel %vm868_vm5, %v9718_v1, %v9740_v51  ;;  %v3066_v51 = vadd.f32 %v3050_v43, %v2970_v29 }
 0x682   : > { %v3146_v47 = vmul.f32 %v3122_v5, %v5588_v39 }
 0x683   : > { %v9790_v34 = vpop.permute.xlu0 %3182 }
 0x684   : > { %v9744_v16 = vpop.permute.xlu1 %3088  ;;  %v3162_v31 = vadd.f32 %v3146_v47, %v3066_v51  ;;  %v3054_v51 = vmul.f32 %v3022_v54, %v5588_v39 }
 0x685   : > { %v3120_v8 = vsel %vm868_vm5, %v9722_v37, %v9744_v16 }
 0x686   : > { %v3148_v5 = vmul.f32 %v3120_v8, %v5588_v39 }
 0x687   : > { %v9832_v29 = vpop.permute.xlu0 %3186 }
 0x688   : > { %v9746_v61 = vpop.permute.xlu1 %3092 }
 0x689   : > { %14456 = vst [vmem:[#allocation183_spill] sm:$0xff] %v9746_v61 }
 0x68c   : > { %v9750_v28 = vpop.permute.xlu1 %3096 }
 0x68d   : > { %14458 = vst [vmem:[#allocation185_spill] sm:$0xff] %v9750_v28 }
 0x690   : > { %v9754_v25 = vpop.permute.xlu1 %3100 }
 0x694   : > { %v9756_v63 = vpop.permute.xlu1 %3104 }
 0x698   : > { %v9773_v58 = vpop.permute.xlu1 %3108 }
 0x69c   : > { %v9792_v0 = vpop.permute.xlu1 %3176 }
 0x69d   : > { %14460 = vst [vmem:[#allocation187_spill] sm:$0xff] %v9792_v0  ;;  %v3220_v53 = vsel %vm965_vm6, %v9752_v32, %v9792_v0  ;;  %v2972_v32 = vmul.f32 %v2944_v45, %v5586_v38 }
 0x69e   : > { %v3240_v35 = vmul.f32 %v3220_v53, %v5586_v38  ;;  %v14461_v53 = vld [vmem:[#allocation13_spill] sm:$0xff] }
 0x69f   : > { %v3068_v9 = vadd.f32 %v3052_v46, %v2972_v32 }
 0x6a0   : > { %v9814_v15 = vadd.f32 %v3240_v35, %v3160_v33  ;;  %v9816_v0 = vpop.permute.xlu1 %3180  ;;  %v3118_v35 = vsel %vm868_vm5, %v9728_v19, %v9746_v61 }
 0x6a1   : > { %v3218_v43 = vsel %vm965_vm6, %v9762_v59, %v9816_v0  ;;  %v3164_v32 = vadd.f32 %v3148_v5, %v3068_v9  ;;  %v3150_v54 = vmul.f32 %v3118_v35, %v5588_v39  ;;  %v9876_v9 = vpop.permute.xlu0 %3190 }
 0x6a2   : > { %v9836_v45 = vadd.f32 %v9814_v15, %v14461_v53  ;;  %v3242_v33 = vmul.f32 %v3218_v43, %v5586_v38  ;;  %3306 = vrot.lane.b32.xlu0 %v9814_v15, %s5354_s5  ;;  %v2974_v53 = vmul.f32 %v2942_v4, %v5586_v38  ;;  %v2940_v43 = vsel %vm446_vm2, %v9648_v22, %v9696_v36 }
 0x6a3   : > { %v3116_v36 = vsel %vm868_vm5, %v9732_v14, %v9750_v28 }
 0x6a4   : > { %14462 = vst [vmem:[#allocation13_spill] sm:$0xff] %v9836_v45  ;;  %v9846_v8 = vadd.f32 %v3242_v33, %v3162_v31  ;;  %v9848_v47 = vpop.permute.xlu1 %3184  ;;  %v3020_v45 = vsel %vm770_vm4, %v9694_v10, %v9724_v49  ;;  %v14463_v31 = vld [vmem:[#allocation15_spill] sm:$0xff]  ;;  %v3070_v49 = vadd.f32 %v3054_v51, %v2974_v53  ;;  %v3018_v51 = vsel %vm770_vm4, %v9698_v57, %v9726_v20 }
 0x6a5   : > { %v3216_v46 = vsel %vm965_vm6, %v9790_v34, %v9848_v47  ;;  %v3056_v61 = vmul.f32 %v3020_v45, %v5588_v39 }
 0x6a6   : > { %v9866_v4 = vadd.f32 %v9846_v8, %v14463_v31  ;;  %v3244_v33 = vmul.f32 %v3216_v46, %v5586_v38  ;;  %3310 = vrot.lane.b32.xlu0 %v9846_v8, %s5354_s5  ;;  %v2976_v31 = vmul.f32 %v2940_v43, %v5586_v38  ;;  %v2938_v46 = vsel %vm446_vm2, %v9654_v41, %v9700_v3 }
 0x6a7   : > { %v3166_v53 = vadd.f32 %v3150_v54, %v3070_v49  ;;  %v3114_v3 = vsel %vm868_vm5, %v9738_v21, %v9754_v25  ;;  %v2978_v20 = vmul.f32 %v2938_v46, %v5586_v38  ;;  %v3058_v49 = vmul.f32 %v3018_v51, %v5588_v39  ;;  %v9929_v46 = vpop.permute.xlu0 %3194 }
 0x6a8   : > { %14464 = vst [vmem:[#allocation15_spill] sm:$0xff] %v9866_v4  ;;  %v9878_v5 = vadd.f32 %v3244_v33, %v3164_v32  ;;  %v9880_v35 = vpop.permute.xlu1 %3188  ;;  %v3152_v32 = vmul.f32 %v3116_v36, %v5588_v39  ;;  %v14465_v33 = vld [vmem:[#allocation19_spill] sm:$0xff]  ;;  %v3072_v28 = vadd.f32 %v3056_v61, %v2976_v31  ;;  %v3029_v61 = vsel %vm770_vm4, %v9734_v56, %v9672_v50 }
 0x6a9   : > { %v3214_v45 = vsel %vm965_vm6, %v9832_v29, %v9880_v35  ;;  %v3154_v51 = vmul.f32 %v3114_v3, %v5588_v39  ;;  %v3112_v56 = vsel %vm868_vm5, %v9742_v6, %v9756_v63 }
 0x6aa   : > { %v9898_v43 = vadd.f32 %v9878_v5, %v14465_v33  ;;  %v3246_v4 = vmul.f32 %v3214_v45, %v5586_v38  ;;  %3314 = vrot.lane.b32.xlu0 %v9878_v5, %s5354_s5  ;;  %v2936_v45 = vsel %vm446_vm2, %v9660_v52, %v9704_v42  ;;  %v3016_v33 = vsel %vm770_vm4, %v9702_v48, %v9730_v24 }
 0x6ab   : > { %v3168_v31 = vadd.f32 %v3152_v32, %v3072_v28  ;;  %v2980_v50 = vmul.f32 %v2936_v45, %v5586_v38  ;;  %v3074_v28 = vadd.f32 %v3058_v49, %v2978_v20  ;;  %v3060_v32 = vmul.f32 %v3016_v33, %v5588_v39 }
 0x6ac   : > { %14466 = vst [vmem:[#allocation19_spill] sm:$0xff] %v9898_v43  ;;  %v9909_v36 = vadd.f32 %v3246_v4, %v3166_v53  ;;  %v9911_v54 = vpop.permute.xlu1 %3192  ;;  %v3125_v45 = vsel %vm868_vm5, %v9773_v58, %v9712_v23  ;;  %v3156_v49 = vmul.f32 %v3112_v56, %v5588_v39 }
 0x6ad   : > { %v3212_v4 = vsel %vm965_vm6, %v9876_v9, %v9911_v54  ;;  %v3076_v23 = vadd.f32 %v3060_v32, %v2980_v50  ;;  %v3027_v50 = vsel %vm770_vm4, %v9710_v40, %v9678_v60  ;;  %v14467_v32 = vld [vmem:[#allocation165_spill] sm:$0xff] }
 0x6ae   : > { %v9934_v53 = vadd.f32 %v9909_v36, %v9006_v26  ;;  %v3248_v43 = vmul.f32 %v3212_v4, %v5586_v38  ;;  %3318 = vrot.lane.b32.xlu0 %v9909_v36, %s5354_s5  ;;  %v2949_v26 = vsel %vm446_vm2, %v9706_v12, %v9616_v27  ;;  %v3031_v4 = vsel %vm282_vm7, %v3029_v61, 0.0  ;;  %v9973_v27 = vpop.permute.xlu0 %3198  ;;  %v14469_v60 = vld [vmem:[#allocation181_spill] sm:$0xff] }
 0x6af   : > { %v2951_v58 = vsel %vm266_vm3, %v2949_v26, 0.0  ;;  %v3127_v61 = vsel %vm298_vm8, %v3125_v45, 0.0  ;;  %v3123_v40 = vsel %vm868_vm5, %v14469_v60, %v9718_v1 }
 0x6b0   : > { %v9945_v3 = vadd.f32 %v3248_v43, %v3168_v31  ;;  %v9947_v42 = vpop.permute.xlu1 %3196  ;;  %v3170_v43 = vadd.f32 %v3154_v51, %v3074_v28  ;;  %v3172_v28 = vadd.f32 %v3156_v49, %v3076_v23  ;;  %v3049_v23 = vmul.f32 %v3027_v50, %v5588_v39 }
 0x6b1   : > { %v3210_v20 = vsel %vm965_vm6, %v9929_v46, %v9947_v42 }
 0x6b2   : > { %v9966_v33 = vadd.f32 %v9945_v3, %v9038_v13  ;;  %v3250_v12 = vmul.f32 %v3210_v20, %v5586_v38  ;;  %3322 = vrot.lane.b32.xlu0 %v9945_v3, %s5354_s5  ;;  %v3047_v13 = vmul.f32 %v3031_v4, %v5588_v39  ;;  %v2967_v4 = vmul.f32 %v2951_v58, %v5586_v38 }
 0x6b3   : > { %v3143_v20 = vmul.f32 %v3127_v61, %v5588_v39  ;;  %v14471_v61 = vld [vmem:[#allocation171_spill] sm:$0xff] }
 0x6b4   : > { %v9977_v31 = vadd.f32 %v3250_v12, %v3170_v43  ;;  %v9979_v51 = vpop.permute.xlu1 %3200  ;;  %v2947_v43 = vsel %vm446_vm2, %v9674_v44, %v9624_v11  ;;  %v14473_v11 = vld [vmem:[#allocation187_spill] sm:$0xff] }
 0x6b5   : > { %v3208_v56 = vsel %vm965_vm6, %v9973_v27, %v9979_v51  ;;  %v3219_v1 = vsel %vm965_vm6, %v14473_v11, %v9762_v59  ;;  %v2969_v50 = vmul.f32 %v2947_v43, %v5586_v38 }
 0x6b6   : > { %v9992_v26 = vadd.f32 %v9977_v31, %v14467_v32  ;;  %v3252_v45 = vmul.f32 %v3208_v56, %v5586_v38  ;;  %3326 = vrot.lane.b32.xlu0 %v9977_v31, %s5354_s5  ;;  %v3063_v56 = vadd.f32 %v3047_v13, %v2967_v4  ;;  %v14470_v32 = vld [vmem:[#allocation186_spill] sm:$0xff]  ;;  %v3145_v4 = vmul.f32 %v3123_v40, %v5588_v39 }
 0x6b7   : > { %v3241_v43 = vmul.f32 %v3219_v1, %v5586_v38  ;;  %v14480_v1 = vld [vmem:[#allocation158_spill] sm:$0xff] }
 0x6b8   : > { %14468 = vst [vmem:[#allocation165_spill] sm:$0xff] %v9992_v26  ;;  %v10007_v49 = vadd.f32 %v3252_v45, %v3172_v28  ;;  %v3205_v12 = vpop.permute.xlu1 %3204  ;;  %v14472_v26 = vld [vmem:[#allocation177_spill] sm:$0xff]  ;;  %v14474_v28 = vld [vmem:[#allocation155_spill] sm:$0xff] }
 0x6b9   : > { %v3221_v58 = vsel %vm965_vm6, %v3205_v12, %v14470_v32  ;;  %v3025_v44 = vsel %vm770_vm4, %v14472_v26, %v14471_v61  ;;  %v3159_v26 = vadd.f32 %v3143_v20, %v3063_v56  ;;  %v14476_v12 = vld [vmem:[#allocation170_spill] sm:$0xff]  ;;  %v3065_v61 = vadd.f32 %v3049_v23, %v2969_v50  ;;  %v14479_v56 = vld [vmem:[#allocation27_spill] sm:$0xff] }
 0x6ba   : > { %v10023_v45 = vadd.f32 %v10007_v49, %v14474_v28  ;;  %v3223_v13 = vsel %vm314_vm9, %v3221_v58, 0.0  ;;  %3330 = vrot.lane.b32.xlu0 %v10007_v49, %s5354_s5  ;;  %v2945_v59 = vsel %vm446_vm2, %v14476_v12, %v9632_v55  ;;  %v14477_v32 = vld [vmem:[#allocation182_spill] sm:$0xff]  ;;  %v3051_v11 = vmul.f32 %v3025_v44, %v5588_v39  ;;  %v14483_v12 = vld [vmem:[#allocation172_spill] sm:$0xff] }
 0x6bb   : > { %v3239_v60 = vmul.f32 %v3223_v13, %v5586_v38  ;;  %v3121_v58 = vsel %vm868_vm5, %v14477_v32, %v9722_v37  ;;  %v14478_v20 = vld [vmem:[#allocation178_spill] sm:$0xff]  ;;  %v3217_v55 = vsel %vm965_vm6, %v9816_v0, %v9790_v34  ;;  %v2971_v37 = vmul.f32 %v2945_v59, %v5586_v38 }
 0x6bc   : > { %14475 = vst [vmem:[#allocation181_spill] sm:$0xff] %v10023_v45  ;;  %v3023_v40 = vsel %vm770_vm4, %v14478_v20, %v9690_v18  ;;  %v3161_v23 = vadd.f32 %v3145_v4, %v3065_v61  ;;  %v3147_v44 = vmul.f32 %v3121_v58, %v5588_v39  ;;  %v2943_v34 = vsel %vm446_vm2, %v9686_v2, %v9640_v7  ;;  %v14486_v58 = vld [vmem:[#allocation179_spill] sm:$0xff]  ;;  %v14487_v20 = vld [vmem:[#allocation173_spill] sm:$0xff] }
 0x6bd   : > { %v10042_v28 = vadd.f32 %v3239_v60, %v3159_v26  ;;  %v3119_v18 = vsel %vm868_vm5, %v9744_v16, %v9728_v19  ;;  %v3067_v0 = vadd.f32 %v3051_v11, %v2971_v37  ;;  %v3053_v50 = vmul.f32 %v3023_v40, %v5588_v39  ;;  %v14488_v40 = vld [vmem:[#allocation185_spill] sm:$0xff] }
 0x6be   : > { %3366 = vrot.lane.b32.xlu0 %v14479_v56, %s5356_s11  ;;  %v10071_v4 = vadd.f32 %v3241_v43, %v3161_v23  ;;  %v3243_v26 = vmul.f32 %v3217_v55, %v5586_v38  ;;  %v3021_v60 = vsel %vm770_vm4, %v9720_v62, %v9694_v10  ;;  %v3215_v2 = vsel %vm965_vm6, %v9848_v47, %v9832_v29  ;;  %v14484_v62 = vld [vmem:[#allocation183_spill] sm:$0xff]  ;;  %v14490_v23 = vld [vmem:[#allocation180_spill] sm:$0xff] }
 0x6bf   : > { %v10058_v13 = vadd.f32 %v10042_v28, %v14480_v1  ;;  %3304 = vrot.lane.b32.xlu1 %v10042_v28, %s5354_s5  ;;  %v2973_v16 = vmul.f32 %v2943_v34, %v5586_v38  ;;  %v3163_v19 = vadd.f32 %v3147_v44, %v3067_v0  ;;  %v3149_v7 = vmul.f32 %v3119_v18, %v5588_v39  ;;  %v14491_v18 = vld [vmem:[#allocation174_spill] sm:$0xff] }
 0x6c0   : > { %14482 = vst [vmem:[#allocation171_spill] sm:$0xff] %v10071_v4  ;;  %v2941_v10 = vsel %vm446_vm2, %v14483_v12, %v9648_v22  ;;  %v3117_v29 = vsel %vm868_vm5, %v14484_v62, %v9732_v14  ;;  %v3245_v32 = vmul.f32 %v3215_v2, %v5586_v38  ;;  %v3019_v61 = vsel %vm770_vm4, %v14486_v58, %v9698_v57  ;;  %v3203_v12 = vpop.permute.xlu0 %3202 }
 0x6c1   : > { %14481 = vst [vmem:[#allocation186_spill] sm:$0xff] %v10058_v13  ;;  %v3069_v47 = vadd.f32 %v3053_v50, %v2973_v16  ;;  %v10097_v59 = vadd.f32 %v3243_v26, %v3163_v19  ;;  %v3213_v22 = vsel %vm965_vm6, %v9880_v35, %v9876_v9  ;;  %v2975_v14 = vmul.f32 %v2941_v10, %v5586_v38  ;;  %v14493_v26 = vld [vmem:[#allocation176_spill] sm:$0xff]  ;;  %v14495_v19 = vld [vmem:[#allocation175_spill] sm:$0xff] }
 0x6c2   : > { %3370 = vrot.lane.b32.xlu0 %v9814_v15, %s5356_s11  ;;  %v3055_v15 = vmul.f32 %v3021_v60, %v5588_v39  ;;  %v3151_v43 = vmul.f32 %v3117_v29, %v5588_v39  ;;  %v2939_v57 = vsel %vm446_vm2, %v14487_v20, %v9654_v41  ;;  %v3115_v9 = vsel %vm868_vm5, %v14488_v40, %v9738_v21  ;;  %v14494_v16 = vld [vmem:[#allocation168_spill] sm:$0xff]  ;;  %v14498_v29 = vld [vmem:[#allocation51_spill] sm:$0xff] }
 0x6c3   : > { %3308 = vrot.lane.b32.xlu1 %v10071_v4, %s5354_s5  ;;  %14485 = vst [vmem:[#allocation177_spill] sm:$0xff] %v10097_v59  ;;  %v3165_v11 = vadd.f32 %v3149_v7, %v3069_v47  ;;  %v3247_v37 = vmul.f32 %v3213_v22, %v5586_v38  ;;  %v3017_v44 = vsel %vm770_vm4, %v14490_v23, %v9702_v48  ;;  %v14496_v7 = vld [vmem:[#allocation184_spill] sm:$0xff]  ;;  %v14499_v47 = vld [vmem:[#allocation169_spill] sm:$0xff]  ;;  %v14500_v22 = vld [vmem:[#allocation62_spill] sm:$0xff] }
 0x6c4   : > { %v3071_v35 = vadd.f32 %v3055_v15, %v2975_v14  ;;  %v3211_v41 = vsel %vm965_vm6, %v9911_v54, %v9929_v46  ;;  %v2977_v21 = vmul.f32 %v2939_v57, %v5586_v38  ;;  %v3153_v34 = vmul.f32 %v3115_v9, %v5588_v39  ;;  %v14501_v14 = vld [vmem:[#allocation55_spill] sm:$0xff] }
 0x6c5   : > { %v10123_v55 = vadd.f32 %v3245_v32, %v3165_v11  ;;  %v2937_v48 = vsel %vm446_vm2, %v14491_v18, %v9660_v52  ;;  %v3113_v54 = vsel %vm868_vm5, %v9754_v25, %v9742_v6  ;;  %v3249_v50 = vmul.f32 %v3211_v41, %v5586_v38  ;;  %v14510_v18 = vld [vmem:[#allocation100_spill] sm:$0xff] }
 0x6c6   : > { %3374 = vrot.lane.b32.xlu0 %v9846_v8, %s5356_s11  ;;  %v3057_v8 = vmul.f32 %v3019_v61, %v5588_v39  ;;  %v3167_v1 = vadd.f32 %v3151_v43, %v3071_v35  ;;  %v3015_v60 = vsel %vm770_vm4, %v9730_v24, %v14493_v26  ;;  %v3209_v52 = vsel %vm965_vm6, %v9947_v42, %v9973_v27  ;;  %v14503_v35 = vld [vmem:[#allocation66_spill] sm:$0xff] }
 0x6c7   : > { %3312 = vrot.lane.b32.xlu1 %v10097_v59, %s5354_s5  ;;  %14489 = vst [vmem:[#allocation187_spill] sm:$0xff] %v10123_v55  ;;  %v2979_v25 = vmul.f32 %v2937_v48, %v5586_v38  ;;  %v3155_v2 = vmul.f32 %v3113_v54, %v5588_v39  ;;  %v2935_v24 = vsel %vm446_vm2, %v14495_v19, %v14494_v16  ;;  %v14511_v48 = vld [vmem:[#allocation57_spill] sm:$0xff] }
 0x6c8   : > { %v3073_v46 = vadd.f32 %v3057_v8, %v2977_v21  ;;  %v10149_v0 = vadd.f32 %v3247_v37, %v3167_v1  ;;  %v3111_v42 = vsel %vm868_vm5, %v9756_v63, %v14496_v7  ;;  %v3251_v62 = vmul.f32 %v3209_v52, %v5586_v38  ;;  %v14504_v8 = vld [vmem:[#allocation59_spill] sm:$0xff]  ;;  %v14508_v1 = vld [vmem:[#allocation85_spill] sm:$0xff] }
 0x6c9   : > { %v2853_v15 = vsel %vm591_vm10, %v14499_v47, %v14498_v29  ;;  %v3207_v32 = vsel %vm965_vm6, %v9979_v51, %v3203_v12  ;;  %v2981_v63 = vmul.f32 %v2935_v24, %v5586_v38  ;;  %v3157_v61 = vmul.f32 %v3111_v42, %v5588_v39  ;;  %v14516_v52 = vld [vmem:[#allocation143_spill] sm:$0xff]  ;;  %v14520_v24 = vld [vmem:[#allocation56_spill] sm:$0xff] }
 0x6ca   : > { %3378 = vrot.lane.b32.xlu0 %v9878_v5, %s5356_s11  ;;  %v3059_v5 = vmul.f32 %v3017_v44, %v5588_v39  ;;  %14492 = vst [vmem:[#allocation155_spill] sm:$0xff] %v10149_v0  ;;  %v3169_v6 = vadd.f32 %v3153_v34, %v3073_v46  ;;  %v2789_v11 = vsel %vm365_vm0, %v14501_v14, %v14500_v22  ;;  %v2854_v43 = vsel %vm249_vm11, %v2853_v15, 0.0  ;;  %v14506_v44 = vld [vmem:[#allocation140_spill] sm:$0xff]  ;;  %v14513_v46 = vld [vmem:[#allocation73_spill] sm:$0xff]  ;;  %v14521_v7 = vld [vmem:[#allocation103_spill] sm:$0xff] }
 0x6cb   : > { %3316 = vrot.lane.b32.xlu1 %v10123_v55, %s5354_s5  ;;  %v2790_v57 = vsel %vm233_vm1, %v2789_v11, 0.0  ;;  %v2851_v37 = vsel %vm591_vm10, %v14504_v8, %v14503_v35  ;;  %v2849_v54 = vsel %vm591_vm10, %v14511_v48, %v14510_v18  ;;  %v2845_v42 = vsel %vm591_vm10, %v14521_v7, %v14520_v24  ;;  %v14528_v11 = vld [vmem:[#allocation65_spill] sm:$0xff] }
 0x6cc   : > { %v3075_v27 = vadd.f32 %v3059_v5, %v2979_v25  ;;  %v10175_v10 = vadd.f32 %v3249_v50, %v3169_v6  ;;  %v2870_v9 = vadd.f32 %v2854_v43, %v2790_v57  ;;  %v14517_v6 = vld [vmem:[#allocation125_spill] sm:$0xff]  ;;  %v14530_v57 = vld [vmem:[#allocation70_spill] sm:$0xff] }
 0x6ce   : > { %3382 = vrot.lane.b32.xlu0 %v9909_v36, %s5356_s11  ;;  %v3061_v36 = vmul.f32 %v3015_v60, %v5588_v39  ;;  %14497 = vst [vmem:[#allocation170_spill] sm:$0xff] %v10175_v10  ;;  %v3171_v58 = vadd.f32 %v3155_v2, %v3075_v27  ;;  %v10221_v34 = vmul.f32 %v2870_v9, %v14508_v1  ;;  %v14515_v60 = vld [vmem:[#allocation50_spill] sm:$0xff]  ;;  %v14518_v2 = vld [vmem:[#allocation53_spill] sm:$0xff]  ;;  %v14522_v27 = vld [vmem:[#allocation52_spill] sm:$0xff] }
 0x6cf   : > { %3320 = vrot.lane.b32.xlu1 %v10149_v0, %s5354_s5  ;;  %v2847_v25 = vsel %vm591_vm10, %v14516_v52, %v14515_v60  ;;  %v2783_v16 = vsel %vm365_vm0, %v14518_v2, %v14517_v6 }
 0x6d0   : > { %v3077_v51 = vadd.f32 %v3061_v36, %v2981_v63  ;;  %v10197_v20 = vadd.f32 %v3251_v62, %v3171_v58  ;;  %14509 = vst [vmem:[#allocation158_spill] sm:$0xff] %v10221_v34  ;;  %v2876_v19 = vadd.f32 %v2847_v25, %v2783_v16  ;;  %v14523_v36 = vld [vmem:[#allocation95_spill] sm:$0xff]  ;;  %v14526_v63 = vld [vmem:[#allocation101_spill] sm:$0xff] }
 0x6d1   : > { %v2781_v12 = vsel %vm365_vm0, %v14523_v36, %v14522_v27  ;;  %v14536_v25 = vld [vmem:[#allocation167_spill] sm:$0xff] }
 0x6d2   : > { %3386 = vrot.lane.b32.xlu0 %v9945_v3, %s5356_s11  ;;  %14502 = vst [vmem:[#allocation182_spill] sm:$0xff] %v10197_v20  ;;  %v3253_v3 = vmul.f32 %v3207_v32, %v5586_v38  ;;  %v3173_v40 = vadd.f32 %v3157_v61, %v3077_v51  ;;  %v10266_v62 = vmul.f32 %v2876_v19, %v14508_v1  ;;  %v14525_v32 = vld [vmem:[#allocation68_spill] sm:$0xff]  ;;  %v14527_v61 = vld [vmem:[#allocation25_spill] sm:$0xff] }
 0x6d3   : > { %3324 = vrot.lane.b32.xlu1 %v10175_v10, %s5354_s5  ;;  %v2878_v15 = vadd.f32 %v2845_v42, %v2781_v12  ;;  %v2843_v58 = vsel %vm591_vm10, %v14526_v63, %v14525_v32  ;;  %v2779_v43 = vsel %vm365_vm0, %v14528_v11, %v14527_v61  ;;  %v14537_v19 = vld [vmem:[#allocation72_spill] sm:$0xff]  ;;  %v14538_v42 = vld [vmem:[#allocation97_spill] sm:$0xff] }
 0x6d4   : > { %v10210_v23 = vadd.f32 %v3253_v3, %v3173_v40  ;;  %14524 = vst [vmem:[#allocation179_spill] sm:$0xff] %v10266_v62  ;;  %v2880_v3 = vadd.f32 %v2843_v58, %v2779_v43  ;;  %v14531_v40 = vld [vmem:[#allocation166_spill] sm:$0xff]  ;;  %v2775_v12 = vsel %vm365_vm0, %v14538_v42, %v14537_v19  ;;  %v2852_v43 = vsel %vm591_vm10, %v14498_v29, %v14504_v8 }
 0x6d5   : > { %v10281_v51 = vmul.f32 %v2878_v15, %v14508_v1  ;;  %v2841_v9 = vsel %vm591_vm10, %v14531_v40, %v14530_v57  ;;  %v2850_v29 = vsel %vm591_vm10, %v14503_v35, %v14511_v48  ;;  %v2848_v35 = vsel %vm591_vm10, %v14510_v18, %v14516_v52 }
 0x6d6   : > { %3390 = vrot.lane.b32.xlu0 %v9977_v31, %s5356_s11  ;;  %14505 = vst [vmem:[#allocation178_spill] sm:$0xff] %v10210_v23  ;;  %v14507_v31 = vld [vmem:[#allocation71_spill] sm:$0xff]  ;;  %v2846_v18 = vsel %vm591_vm10, %v14515_v60, %v14521_v7  ;;  %v2844_v60 = vsel %vm591_vm10, %v14520_v24, %v14526_v63  ;;  %v2842_v24 = vsel %vm591_vm10, %v14525_v32, %v14531_v40  ;;  %v10409_v40 = vpop.permute.xlu0 %3302 }
 0x6d7   : > { %3328 = vrot.lane.b32.xlu1 %v10197_v20, %s5354_s5  ;;  %v2787_v41 = vsel %vm365_vm0, %v14507_v31, %v14506_v44  ;;  %14529 = vst [vmem:[#allocation173_spill] sm:$0xff] %v10281_v51  ;;  %v2840_v32 = vsel %vm591_vm10, %v14530_v57, %v14536_v25  ;;  %14546 = vst [vmem:[#allocation169_spill] sm:$0xff] %v10409_v40 }
 0x6d8   : > { %v2872_v21 = vadd.f32 %v2851_v37, %v2787_v41  ;;  %v14532_v37 = vld [vmem:[#allocation54_spill] sm:$0xff]  ;;  %v14533_v41 = vld [vmem:[#allocation99_spill] sm:$0xff] }
 0x6da   : > { %3394 = vrot.lane.b32.xlu0 %v10007_v49, %s5356_s11  ;;  %v14512_v49 = vld [vmem:[#allocation48_spill] sm:$0xff]  ;;  %v10236_v50 = vmul.f32 %v2872_v21, %v14508_v1  ;;  %v2777_v21 = vsel %vm365_vm0, %v14533_v41, %v14532_v37 }
 0x6db   : > { %3332 = vrot.lane.b32.xlu1 %v10210_v23, %s5354_s5  ;;  %v2785_v5 = vsel %vm365_vm0, %v14513_v46, %v14512_v49 }
 0x6dc   : > { %14514 = vst [vmem:[#allocation172_spill] sm:$0xff] %v10236_v50  ;;  %v2874_v26 = vadd.f32 %v2849_v54, %v2785_v5  ;;  %v10296_v54 = vmul.f32 %v2880_v3, %v14508_v1  ;;  %v2882_v5 = vadd.f32 %v2841_v9, %v2777_v21  ;;  %v2788_v3 = vsel %vm365_vm0, %v14500_v22, %v14507_v31 }
 0x6dd   : > { %v2871_v21 = vadd.f32 %v2852_v43, %v2788_v3  ;;  %v2786_v22 = vsel %vm365_vm0, %v14506_v44, %v14513_v46  ;;  %v2784_v44 = vsel %vm365_vm0, %v14512_v49, %v14518_v2  ;;  %v2782_v49 = vsel %vm365_vm0, %v14517_v6, %v14523_v36 }
 0x6de   : > { %3462 = vrot.lane.b32.xlu0 %v10221_v34, %s5355_s24  ;;  %14534 = vst [vmem:[#allocation185_spill] sm:$0xff] %v10296_v54  ;;  %v10311_v15 = vmul.f32 %v2882_v5, %v14508_v1  ;;  %v2873_v31 = vadd.f32 %v2850_v29, %v2786_v22  ;;  %v2875_v46 = vadd.f32 %v2848_v35, %v2784_v44 }
 0x6df   : > { %3368 = vrot.lane.b32.xlu1 %v10042_v28, %s5356_s11  ;;  %v10251_v28 = vmul.f32 %v2874_v26, %v14508_v1  ;;  %v14535_v26 = vld [vmem:[#allocation102_spill] sm:$0xff]  ;;  %v10341_v8 = vmul.f32 %v2871_v21, %v14508_v1  ;;  %v2877_v2 = vadd.f32 %v2846_v18, %v2782_v49  ;;  %v2780_v6 = vsel %vm365_vm0, %v14522_v27, %v14528_v11 }
 0x6e0   : > { %v2839_v16 = vsel %vm591_vm10, %v14536_v25, %v14535_v26  ;;  %14539 = vst [vmem:[#allocation180_spill] sm:$0xff] %v10311_v15  ;;  %v10356_v48 = vmul.f32 %v2873_v31, %v14508_v1  ;;  %v10371_v52 = vmul.f32 %v2875_v46, %v14508_v1  ;;  %v2879_v36 = vadd.f32 %v2844_v60, %v2780_v6 }
 0x6e1   : > { %14519 = vst [vmem:[#allocation183_spill] sm:$0xff] %v10251_v28  ;;  %v2884_v58 = vadd.f32 %v2839_v16, %v2775_v12  ;;  %14541 = vst [vmem:[#allocation176_spill] sm:$0xff] %v10341_v8  ;;  %v10386_v7 = vmul.f32 %v2877_v2, %v14508_v1  ;;  %v2778_v27 = vsel %vm365_vm0, %v14527_v61, %v14533_v41 }
 0x6e2   : > { %3466 = vrot.lane.b32.xlu0 %v10236_v50, %s5355_s24  ;;  %14542 = vst [vmem:[#allocation168_spill] sm:$0xff] %v10356_v48  ;;  %14543 = vst [vmem:[#allocation175_spill] sm:$0xff] %v10371_v52  ;;  %v10401_v63 = vmul.f32 %v2879_v36, %v14508_v1  ;;  %v2881_v11 = vadd.f32 %v2842_v24, %v2778_v27  ;;  %v2776_v61 = vsel %vm365_vm0, %v14532_v37, %v14538_v42 }
 0x6e3   : > { %3372 = vrot.lane.b32.xlu1 %v10071_v4, %s5356_s11  ;;  %v10326_v9 = vmul.f32 %v2884_v58, %v14508_v1  ;;  %14544 = vst [vmem:[#allocation184_spill] sm:$0xff] %v10386_v7  ;;  %v2883_v5 = vadd.f32 %v2840_v32, %v2776_v61  ;;  %v2838_v57 = vsel %vm591_vm10, %v14535_v26, %v14499_v47 }
 0x6e4   : > { %14545 = vst [vmem:[#allocation51_spill] sm:$0xff] %v10401_v63  ;;  %v10418_v41 = vmul.f32 %v2881_v11, %v14508_v1  ;;  %v2774_v37 = vsel %vm365_vm0, %v14537_v19, %v14501_v14 }
 0x6e5   : > { %14540 = vst [vmem:[#allocation174_spill] sm:$0xff] %v10326_v9  ;;  %v10435_v16 = vmul.f32 %v2883_v5, %v14508_v1  ;;  %v2885_v42 = vadd.f32 %v2838_v57, %v2774_v37 }
 0x6e6   : > { %3470 = vrot.lane.b32.xlu0 %v10251_v28, %s5355_s24  ;;  %14547 = vst [vmem:[#allocation62_spill] sm:$0xff] %v10418_v41 }
 0x6e7   : > { %3376 = vrot.lane.b32.xlu1 %v10097_v59, %s5356_s11  ;;  %14549 = vst [vmem:[#allocation66_spill] sm:$0xff] %v10435_v16  ;;  %v10444_v26 = vmul.f32 %v2885_v42, %v14508_v1 }
 0x6e9   : > { %14551 = vst [vmem:[#allocation140_spill] sm:$0xff] %v10444_v26 }
 0x6ea   : > { %3474 = vrot.lane.b32.xlu0 %v10266_v62, %s5355_s24 }
 0x6eb   : > { %3380 = vrot.lane.b32.xlu1 %v10123_v55, %s5356_s11 }
 0x6ee   : > { %3478 = vrot.lane.b32.xlu0 %v10281_v51, %s5355_s24 }
 0x6ef   : > { %3384 = vrot.lane.b32.xlu1 %v10149_v0, %s5356_s11 }
 0x6f2   : > { %3482 = vrot.lane.b32.xlu0 %v10296_v54, %s5355_s24 }
 0x6f3   : > { %3388 = vrot.lane.b32.xlu1 %v10175_v10, %s5356_s11 }
 0x6f6   : > { %3486 = vrot.lane.b32.xlu0 %v10311_v15, %s5355_s24 }
 0x6f7   : > { %3392 = vrot.lane.b32.xlu1 %v10197_v20, %s5356_s11 }
 0x6fa   : > { %3490 = vrot.lane.b32.xlu0 %v10326_v9, %s5355_s24 }
 0x6fb   : > { %3396 = vrot.lane.b32.xlu1 %v10210_v23, %s5356_s11 }
 0x6fe   : > { %3542 = vrot.lane.b32.xlu0 %v10221_v34, %s5358_s13 }
 0x6ff   : > { %3464 = vrot.lane.b32.xlu1 %v10341_v8, %s5355_s24 }
 0x702   : > { %3546 = vrot.lane.b32.xlu0 %v10236_v50, %s5358_s13 }
 0x703   : > { %3468 = vrot.lane.b32.xlu1 %v10356_v48, %s5355_s24 }
 0x706   : > { %3550 = vrot.lane.b32.xlu0 %v10251_v28, %s5358_s13 }
 0x707   : > { %3472 = vrot.lane.b32.xlu1 %v10371_v52, %s5355_s24 }
 0x70a   : > { %3554 = vrot.lane.b32.xlu0 %v10266_v62, %s5358_s13 }
 0x70b   : > { %3476 = vrot.lane.b32.xlu1 %v10386_v7, %s5355_s24 }
 0x70e   : > { %3558 = vrot.lane.b32.xlu0 %v10281_v51, %s5358_s13 }
 0x70f   : > { %3480 = vrot.lane.b32.xlu1 %v10401_v63, %s5355_s24 }
 0x712   : > { %3562 = vrot.lane.b32.xlu0 %v10296_v54, %s5358_s13 }
 0x713   : > { %3484 = vrot.lane.b32.xlu1 %v10418_v41, %s5355_s24 }
 0x714   : > { %v10432_v25 = vpop.permute.xlu0 %3306 }
 0x715   : > { %14548 = vst [vmem:[#allocation55_spill] sm:$0xff] %v10432_v25 }
 0x716   : > { %3566 = vrot.lane.b32.xlu0 %v10311_v15, %s5358_s13 }
 0x717   : > { %3488 = vrot.lane.b32.xlu1 %v10435_v16, %s5355_s24 }
 0x718   : > { %v10441_v47 = vpop.permute.xlu0 %3310 }
 0x719   : > { %14550 = vst [vmem:[#allocation59_spill] sm:$0xff] %v10441_v47 }
 0x71a   : > { %3570 = vrot.lane.b32.xlu0 %v10326_v9, %s5358_s13 }
 0x71b   : > { %3492 = vrot.lane.b32.xlu1 %v10444_v26, %s5355_s24 }
 0x71c   : > { %v10450_v14 = vpop.permute.xlu0 %3314 }
 0x71d   : > { %14552 = vst [vmem:[#allocation71_spill] sm:$0xff] %v10450_v14 }
 0x71e   : > { %3638 = vrot.lane.b32.xlu0 %v10221_v34, %s5359_s18 }
 0x71f   : > { %3544 = vrot.lane.b32.xlu1 %v10341_v8, %s5358_s13 }
 0x720   : > { %v10456_v19 = vpop.permute.xlu0 %3318 }
 0x721   : > { %14553 = vst [vmem:[#allocation100_spill] sm:$0xff] %v10456_v19 }
 0x722   : > { %3642 = vrot.lane.b32.xlu0 %v10236_v50, %s5359_s18 }
 0x723   : > { %3548 = vrot.lane.b32.xlu1 %v10356_v48, %s5358_s13 }
 0x724   : > { %v10462_v12 = vpop.permute.xlu0 %3322 }
 0x725   : > { %14554 = vst [vmem:[#allocation57_spill] sm:$0xff] %v10462_v12 }
 0x726   : > { %3646 = vrot.lane.b32.xlu0 %v10251_v28, %s5359_s18 }
 0x727   : > { %3552 = vrot.lane.b32.xlu1 %v10371_v52, %s5358_s13 }
 0x728   : > { %v10468_v58 = vpop.permute.xlu0 %3326 }
 0x729   : > { %14555 = vst [vmem:[#allocation48_spill] sm:$0xff] %v10468_v58 }
 0x72a   : > { %3650 = vrot.lane.b32.xlu0 %v10266_v62, %s5359_s18 }
 0x72b   : > { %3556 = vrot.lane.b32.xlu1 %v10386_v7, %s5358_s13 }
 0x72c   : > { %v10474_v43 = vpop.permute.xlu0 %3330 }
 0x72d   : > { %14556 = vst [vmem:[#allocation73_spill] sm:$0xff] %v10474_v43 }
 0x72e   : > { %3654 = vrot.lane.b32.xlu0 %v10281_v51, %s5359_s18 }
 0x72f   : > { %3560 = vrot.lane.b32.xlu1 %v10401_v63, %s5358_s13 }
 0x730   : > { %v10480_v3 = vpop.permute.xlu0 %3366 }
 0x731   : > { %14557 = vst [vmem:[#allocation50_spill] sm:$0xff] %v10480_v3  ;;  %v10482_v21 = vpop.permute.xlu1 %3304 }
 0x732   : > { %14558 = vst [vmem:[#allocation143_spill] sm:$0xff] %v10482_v21  ;;  %3658 = vrot.lane.b32.xlu0 %v10296_v54, %s5359_s18 }
 0x733   : > { %3564 = vrot.lane.b32.xlu1 %v10418_v41, %s5358_s13 }
 0x734   : > { %v10488_v29 = vpop.permute.xlu0 %3370 }
 0x735   : > { %14559 = vst [vmem:[#allocation125_spill] sm:$0xff] %v10488_v29  ;;  %v10490_v22 = vpop.permute.xlu1 %3308 }
 0x736   : > { %14560 = vst [vmem:[#allocation53_spill] sm:$0xff] %v10490_v22  ;;  %3662 = vrot.lane.b32.xlu0 %v10311_v15, %s5359_s18 }
 0x737   : > { %3568 = vrot.lane.b32.xlu1 %v10435_v16, %s5358_s13 }
 0x738   : > { %v10496_v31 = vpop.permute.xlu0 %3374 }
 0x739   : > { %14561 = vst [vmem:[#allocation56_spill] sm:$0xff] %v10496_v31  ;;  %v10498_v35 = vpop.permute.xlu1 %3312 }
 0x73a   : > { %14562 = vst [vmem:[#allocation103_spill] sm:$0xff] %v10498_v35  ;;  %3666 = vrot.lane.b32.xlu0 %v10326_v9, %s5359_s18 }
 0x73b   : > { %3572 = vrot.lane.b32.xlu1 %v10444_v26, %s5358_s13 }
 0x73c   : > { %v10504_v44 = vpop.permute.xlu0 %3378 }
 0x73d   : > { %14563 = vst [vmem:[#allocation52_spill] sm:$0xff] %v10504_v44  ;;  %v10506_v46 = vpop.permute.xlu1 %3316 }
 0x73e   : > { %14564 = vst [vmem:[#allocation95_spill] sm:$0xff] %v10506_v46  ;;  %3734 = vrot.lane.b32.xlu0 %v10221_v34, %s5360_s20 }
 0x73f   : > { %3640 = vrot.lane.b32.xlu1 %v10341_v8, %s5359_s18 }
 0x740   : > { %v10512_v18 = vpop.permute.xlu0 %3382 }
 0x741   : > { %14565 = vst [vmem:[#allocation68_spill] sm:$0xff] %v10512_v18  ;;  %v10514_v49 = vpop.permute.xlu1 %3320 }
 0x742   : > { %14566 = vst [vmem:[#allocation101_spill] sm:$0xff] %v10514_v49  ;;  %3738 = vrot.lane.b32.xlu0 %v10236_v50, %s5360_s20 }
 0x743   : > { %3644 = vrot.lane.b32.xlu1 %v10356_v48, %s5359_s18 }
 0x744   : > { %v10520_v2 = vpop.permute.xlu0 %3386 }
 0x745   : > { %14567 = vst [vmem:[#allocation25_spill] sm:$0xff] %v10520_v2  ;;  %v10522_v60 = vpop.permute.xlu1 %3324 }
 0x746   : > { %14568 = vst [vmem:[#allocation65_spill] sm:$0xff] %v10522_v60  ;;  %3742 = vrot.lane.b32.xlu0 %v10251_v28, %s5360_s20 }
 0x747   : > { %3648 = vrot.lane.b32.xlu1 %v10371_v52, %s5359_s18 }
 0x748   : > { %v10528_v6 = vpop.permute.xlu0 %3390 }
 0x749   : > { %14569 = vst [vmem:[#allocation70_spill] sm:$0xff] %v10528_v6  ;;  %v10530_v36 = vpop.permute.xlu1 %3328 }
 0x74a   : > { %14570 = vst [vmem:[#allocation166_spill] sm:$0xff] %v10530_v36  ;;  %3746 = vrot.lane.b32.xlu0 %v10266_v62, %s5360_s20 }
 0x74b   : > { %3652 = vrot.lane.b32.xlu1 %v10386_v7, %s5359_s18 }
 0x74c   : > { %v10536_v24 = vpop.permute.xlu0 %3394 }
 0x74d   : > { %14571 = vst [vmem:[#allocation54_spill] sm:$0xff] %v10536_v24  ;;  %v10538_v27 = vpop.permute.xlu1 %3332 }
 0x74e   : > { %14572 = vst [vmem:[#allocation99_spill] sm:$0xff] %v10538_v27  ;;  %3750 = vrot.lane.b32.xlu0 %v10281_v51, %s5360_s20 }
 0x74f   : > { %3656 = vrot.lane.b32.xlu1 %v10401_v63, %s5359_s18 }
 0x750   : > { %v10544_v11 = vpop.permute.xlu0 %3462 }
 0x751   : > { %v10546_v32 = vpop.permute.xlu1 %3368 }
 0x752   : > { %14573 = vst [vmem:[#allocation102_spill] sm:$0xff] %v10546_v32  ;;  %3754 = vrot.lane.b32.xlu0 %v10296_v54, %s5360_s20 }
 0x753   : > { %3660 = vrot.lane.b32.xlu1 %v10418_v41, %s5359_s18 }
 0x754   : > { %v10552_v61 = vpop.permute.xlu0 %3466 }
 0x755   : > { %v10554_v5 = vpop.permute.xlu1 %3372 }
 0x756   : > { %14574 = vst [vmem:[#allocation167_spill] sm:$0xff] %v10554_v5  ;;  %3758 = vrot.lane.b32.xlu0 %v10311_v15, %s5360_s20 }
 0x757   : > { %3664 = vrot.lane.b32.xlu1 %v10435_v16, %s5359_s18 }
 0x758   : > { %v10560_v57 = vpop.permute.xlu0 %3470 }
 0x759   : > { %v10562_v37 = vpop.permute.xlu1 %3376 }
 0x75a   : > { %14575 = vst [vmem:[#allocation72_spill] sm:$0xff] %v10562_v37  ;;  %3762 = vrot.lane.b32.xlu0 %v10326_v9, %s5360_s20 }
 0x75b   : > { %3668 = vrot.lane.b32.xlu1 %v10444_v26, %s5359_s18 }
 0x75c   : > { %v10568_v42 = vpop.permute.xlu0 %3474 }
 0x75d   : > { %v10570_v23 = vpop.permute.xlu1 %3380 }
 0x75e   : > { %14576 = vst [vmem:[#allocation97_spill] sm:$0xff] %v10570_v23  ;;  %3862 = vrot.lane.b32.xlu0 %v14479_v56, %s5354_s5 }
 0x75f   : > { %3736 = vrot.lane.b32.xlu1 %v10341_v8, %s5360_s20 }
 0x760   : > { %v10576_v20 = vpop.permute.xlu0 %3478 }
 0x761   : > { %v10578_v10 = vpop.permute.xlu1 %3384 }
 0x762   : > { %14577 = vst [vmem:[#allocation188_spill] sm:$0xff] %v10578_v10 }
 0x763   : > { %3740 = vrot.lane.b32.xlu1 %v10356_v48, %s5360_s20 }
 0x764   : > { %v10582_v0 = vpop.permute.xlu0 %3482 }
 0x765   : > { %v10584_v55 = vpop.permute.xlu1 %3388 }
 0x766   : > { %14578 = vst [vmem:[#allocation189_spill] sm:$0xff] %v10584_v55 }
 0x767   : > { %3744 = vrot.lane.b32.xlu1 %v10371_v52, %s5360_s20 }
 0x768   : > { %v10588_v59 = vpop.permute.xlu0 %3486 }
 0x769   : > { %v10590_v4 = vpop.permute.xlu1 %3392 }
 0x76a   : > { %14579 = vst [vmem:[#allocation190_spill] sm:$0xff] %v10590_v4 }
 0x76b   : > { %3748 = vrot.lane.b32.xlu1 %v10386_v7, %s5360_s20 }
 0x76c   : > { %v10594_v34 = vpop.permute.xlu0 %3490 }
 0x76d   : > { %14580 = vst [vmem:[#allocation191_spill] sm:$0xff] %v10594_v34  ;;  %v10596_v9 = vpop.permute.xlu1 %3396 }
 0x76e   : > { %14581 = vst [vmem:[#allocation192_spill] sm:$0xff] %v10596_v9 }
 0x76f   : > { %3752 = vrot.lane.b32.xlu1 %v10401_v63, %s5360_s20 }
 0x770   : > { %v10600_v15 = vpop.permute.xlu0 %3542 }
 0x771   : > { %v10602_v54 = vpop.permute.xlu1 %3464 }
 0x772   : > { %v3508_v29 = vsel %vm446_vm2, %v10544_v11, %v10602_v54 }
 0x773   : > { %3756 = vrot.lane.b32.xlu1 %v10418_v41, %s5360_s20 }
 0x774   : > { %v10606_v51 = vpop.permute.xlu0 %3546 }
 0x775   : > { %v10608_v62 = vpop.permute.xlu1 %3468 }
 0x776   : > { %14582 = vst [vmem:[#allocation193_spill] sm:$0xff] %v10608_v62  ;;  %v3506_v34 = vsel %vm446_vm2, %v10552_v61, %v10608_v62 }
 0x777   : > { %3760 = vrot.lane.b32.xlu1 %v10435_v16, %s5360_s20 }
 0x778   : > { %v10612_v7 = vpop.permute.xlu0 %3550 }
 0x779   : > { %14583 = vst [vmem:[#allocation194_spill] sm:$0xff] %v10612_v7  ;;  %v10614_v52 = vpop.permute.xlu1 %3472 }
 0x77b   : > { %3764 = vrot.lane.b32.xlu1 %v10444_v26, %s5360_s20 }
 0x77c   : > { %v10618_v63 = vpop.permute.xlu0 %3554 }
 0x77d   : > { %v10620_v28 = vpop.permute.xlu1 %3476 }
 0x77e   : > { %14584 = vst [vmem:[#allocation195_spill] sm:$0xff] %v10620_v28 }
 0x780   : > { %v10622_v48 = vpop.permute.xlu0 %3558 }
 0x781   : > { %v10624_v41 = vpop.permute.xlu1 %3480 }
 0x782   : > { %14585 = vst [vmem:[#allocation196_spill] sm:$0xff] %v10624_v41 }
 0x784   : > { %v10626_v50 = vpop.permute.xlu0 %3562 }
 0x785   : > { %v10628_v8 = vpop.permute.xlu1 %3484 }
 0x786   : > { %14586 = vst [vmem:[#allocation197_spill] sm:$0xff] %v10628_v8 }
 0x788   : > { %v10630_v16 = vpop.permute.xlu0 %3566 }
 0x789   : > { %v10632_v36 = vpop.permute.xlu1 %3488 }
 0x78c   : > { %v10636_v4 = vpop.permute.xlu0 %3570 }
 0x78d   : > { %v10634_v43 = vpop.permute.xlu1 %3492  ;;  %14587 = vst [vmem:[#allocation198_spill] sm:$0xff] %v10636_v4 }
 0x790   : > { %v10640_v24 = vpop.permute.xlu0 %3638 }
 0x791   : > { %v10638_v26 = vpop.permute.xlu1 %3544 }
 0x792   : > { %v3588_v25 = vsel %vm770_vm4, %v10600_v15, %v10638_v26 }
 0x793   : > { %v3608_v40 = vmul.f32 %v3588_v25, %v5588_v39 }
 0x794   : > { %v10646_v55 = vpop.permute.xlu0 %3642 }
 0x795   : > { %v10642_v60 = vpop.permute.xlu1 %3548 }
 0x796   : > { %14588 = vst [vmem:[#allocation199_spill] sm:$0xff] %v10642_v60  ;;  %v3586_v3 = vsel %vm770_vm4, %v10606_v51, %v10642_v60 }
 0x797   : > { %v3610_v56 = vmul.f32 %v3586_v3, %v5588_v39 }
 0x798   : > { %v10650_v49 = vpop.permute.xlu0 %3646 }
 0x799   : > { %v10644_v58 = vpop.permute.xlu1 %3552 }
 0x79a   : > { %14589 = vst [vmem:[#allocation200_spill] sm:$0xff] %v10644_v58  ;;  %v3584_v62 = vsel %vm770_vm4, %v10612_v7, %v10644_v58 }
 0x79b   : > { %v3612_v7 = vmul.f32 %v3584_v62, %v5588_v39 }
 0x79c   : > { %v10656_v2 = vpop.permute.xlu0 %3650 }
 0x79d   : > { %v10648_v6 = vpop.permute.xlu1 %3556 }
 0x7a0   : > { %v10660_v19 = vpop.permute.xlu0 %3654 }
 0x7a1   : > { %v10652_v12 = vpop.permute.xlu1 %3560 }
 0x7a2   : > { %14590 = vst [vmem:[#allocation201_spill] sm:$0xff] %v10652_v12 }
 0x7a4   : > { %v10666_v35 = vpop.permute.xlu0 %3658 }
 0x7a5   : > { %v10654_v10 = vpop.permute.xlu1 %3564 }
 0x7a6   : > { %14591 = vst [vmem:[#allocation202_spill] sm:$0xff] %v10654_v10 }
 0x7a8   : > { %v10670_v37 = vpop.permute.xlu0 %3662 }
 0x7a9   : > { %v10658_v46 = vpop.permute.xlu1 %3568 }
 0x7ac   : > { %v10676_v47 = vpop.permute.xlu0 %3666 }
 0x7ad   : > { %v10662_v23 = vpop.permute.xlu1 %3572  ;;  %14595 = vst [vmem:[#allocation206_spill] sm:$0xff] %v10676_v47  ;;  %v3528_v47 = vmul.f32 %v3508_v29, %v5586_v38  ;;  %v3530_v29 = vmul.f32 %v3506_v34, %v5586_v38 }
 0x7af   : > { %v3624_v13 = vadd.f32 %v3608_v40, %v3528_v47  ;;  %v3504_v40 = vsel %vm446_vm2, %v10560_v57, %v10614_v52 }
 0x7b0   : > { %v10680_v31 = vpop.permute.xlu0 %3734 }
 0x7b1   : > { %v10664_v18 = vpop.permute.xlu1 %3640  ;;  %14597 = vst [vmem:[#allocation208_spill] sm:$0xff] %v10680_v31 }
 0x7b2   : > { %14592 = vst [vmem:[#allocation203_spill] sm:$0xff] %v10664_v18  ;;  %v3684_v27 = vsel %vm868_vm5, %v10640_v24, %v10664_v18 }
 0x7b3   : > { %v3704_v4 = vmul.f32 %v3684_v27, %v5588_v39 }
 0x7b4   : > { %v10690_v32 = vpop.permute.xlu0 %3738 }
 0x7b5   : > { %v10668_v14 = vpop.permute.xlu1 %3644  ;;  %v3720_v47 = vadd.f32 %v3704_v4, %v3624_v13  ;;  %v3502_v13 = vsel %vm446_vm2, %v10568_v42, %v10620_v28  ;;  %v3582_v4 = vsel %vm770_vm4, %v10618_v63, %v10648_v6 }
 0x7b6   : > { %14593 = vst [vmem:[#allocation204_spill] sm:$0xff] %v10668_v14  ;;  %v3682_v25 = vsel %vm868_vm5, %v10646_v55, %v10668_v14  ;;  %v3626_v14 = vadd.f32 %v3610_v56, %v3530_v29 }
 0x7b7   : > { %v3706_v3 = vmul.f32 %v3682_v25, %v5588_v39 }
 0x7b8   : > { %v10718_v45 = vpop.permute.xlu0 %3742 }
 0x7b9   : > { %v10672_v44 = vpop.permute.xlu1 %3648  ;;  %v3722_v62 = vadd.f32 %v3706_v3, %v3626_v14  ;;  %v3614_v14 = vmul.f32 %v3582_v4, %v5588_v39 }
 0x7ba   : > { %v3680_v58 = vsel %vm868_vm5, %v10650_v49, %v10672_v44 }
 0x7bb   : > { %v3708_v25 = vmul.f32 %v3680_v58, %v5588_v39 }
 0x7bc   : > { %v10760_v29 = vpop.permute.xlu0 %3746 }
 0x7bd   : > { %v10674_v22 = vpop.permute.xlu1 %3652 }
 0x7be   : > { %14594 = vst [vmem:[#allocation205_spill] sm:$0xff] %v10674_v22 }
 0x7c1   : > { %v10678_v5 = vpop.permute.xlu1 %3656 }
 0x7c2   : > { %14596 = vst [vmem:[#allocation207_spill] sm:$0xff] %v10678_v5 }
 0x7c5   : > { %v10682_v1 = vpop.permute.xlu1 %3660 }
 0x7c9   : > { %v10684_v21 = vpop.permute.xlu1 %3664 }
 0x7cd   : > { %v10701_v9 = vpop.permute.xlu1 %3668 }
 0x7d1   : > { %v10720_v60 = vpop.permute.xlu1 %3736 }
 0x7d2   : > { %14598 = vst [vmem:[#allocation209_spill] sm:$0xff] %v10720_v60  ;;  %v3780_v27 = vsel %vm965_vm6, %v10680_v31, %v10720_v60  ;;  %v3532_v31 = vmul.f32 %v3504_v40, %v5586_v38  ;;  %v14599_v40 = vld [vmem:[#allocation13_spill] sm:$0xff] }
 0x7d3   : > { %v3800_v34 = vmul.f32 %v3780_v27, %v5586_v38 }
 0x7d4   : > { %v3628_v28 = vadd.f32 %v3612_v7, %v3532_v31 }
 0x7d5   : > { %v10742_v18 = vadd.f32 %v3800_v34, %v3720_v47  ;;  %v10744_v60 = vpop.permute.xlu1 %3740  ;;  %v3678_v34 = vsel %vm868_vm5, %v10656_v2, %v10674_v22 }
 0x7d6   : > { %v3778_v56 = vsel %vm965_vm6, %v10690_v32, %v10744_v60  ;;  %v3724_v31 = vadd.f32 %v3708_v25, %v3628_v28  ;;  %v3710_v4 = vmul.f32 %v3678_v34, %v5588_v39  ;;  %v10804_v28 = vpop.permute.xlu0 %3750 }
 0x7d7   : > { %v3802_v27 = vmul.f32 %v3778_v56, %v5586_v38  ;;  %3866 = vrot.lane.b32.xlu0 %v10742_v18, %s5354_s5  ;;  %v10767_v47 = vadd.f32 %v10742_v18, %v14599_v40  ;;  %v3534_v56 = vmul.f32 %v3502_v13, %v5586_v38  ;;  %v3500_v40 = vsel %vm446_vm2, %v10576_v20, %v10624_v41 }
 0x7d8   : > { %v3676_v41 = vsel %vm868_vm5, %v10660_v19, %v10678_v5 }
 0x7d9   : > { %14600 = vst [vmem:[#allocation13_spill] sm:$0xff] %v10767_v47  ;;  %v10774_v58 = vadd.f32 %v3802_v27, %v3722_v62  ;;  %v10776_v3 = vpop.permute.xlu1 %3744  ;;  %v3580_v47 = vsel %vm770_vm4, %v10622_v48, %v10652_v12  ;;  %v14601_v62 = vld [vmem:[#allocation15_spill] sm:$0xff]  ;;  %v3630_v12 = vadd.f32 %v3614_v14, %v3534_v56  ;;  %v3578_v14 = vsel %vm770_vm4, %v10626_v50, %v10654_v10 }
 0x7da   : > { %v3776_v7 = vsel %vm965_vm6, %v10718_v45, %v10776_v3  ;;  %v3616_v22 = vmul.f32 %v3580_v47, %v5588_v39 }
 0x7db   : > { %v3804_v13 = vmul.f32 %v3776_v7, %v5586_v38  ;;  %3870 = vrot.lane.b32.xlu0 %v10774_v58, %s5354_s5  ;;  %v10797_v27 = vadd.f32 %v10774_v58, %v14601_v62  ;;  %v3536_v7 = vmul.f32 %v3500_v40, %v5586_v38  ;;  %v3498_v62 = vsel %vm446_vm2, %v10582_v0, %v10628_v8 }
 0x7dc   : > { %v3726_v56 = vadd.f32 %v3710_v4, %v3630_v12  ;;  %v3674_v8 = vsel %vm868_vm5, %v10666_v35, %v10682_v1  ;;  %v3538_v10 = vmul.f32 %v3498_v62, %v5586_v38  ;;  %v3618_v12 = vmul.f32 %v3578_v14, %v5588_v39  ;;  %v10857_v14 = vpop.permute.xlu0 %3754 }
 0x7dd   : > { %14602 = vst [vmem:[#allocation15_spill] sm:$0xff] %v10797_v27  ;;  %v10806_v25 = vadd.f32 %v3804_v13, %v3724_v31  ;;  %v10808_v34 = vpop.permute.xlu1 %3748  ;;  %v3712_v31 = vmul.f32 %v3676_v41, %v5588_v39  ;;  %v14603_v13 = vld [vmem:[#allocation19_spill] sm:$0xff]  ;;  %v3632_v5 = vadd.f32 %v3616_v22, %v3536_v7  ;;  %v3589_v22 = vsel %vm770_vm4, %v10662_v23, %v10600_v15 }
 0x7de   : > { %v3774_v47 = vsel %vm965_vm6, %v10760_v29, %v10808_v34  ;;  %v3672_v23 = vsel %vm868_vm5, %v10670_v37, %v10684_v21 }
 0x7df   : > { %v3806_v40 = vmul.f32 %v3774_v47, %v5586_v38  ;;  %3874 = vrot.lane.b32.xlu0 %v10806_v25, %s5354_s5  ;;  %v10829_v27 = vadd.f32 %v10806_v25, %v14603_v13  ;;  %v3496_v47 = vsel %vm446_vm2, %v10588_v59, %v10632_v36  ;;  %v3576_v13 = vsel %vm770_vm4, %v10630_v16, %v10658_v46 }
 0x7e0   : > { %v3728_v62 = vadd.f32 %v3712_v31, %v3632_v5  ;;  %v3540_v15 = vmul.f32 %v3496_v47, %v5586_v38  ;;  %v3634_v5 = vadd.f32 %v3618_v12, %v3538_v10  ;;  %v3620_v31 = vmul.f32 %v3576_v13, %v5588_v39 }
 0x7e1   : > { %14604 = vst [vmem:[#allocation19_spill] sm:$0xff] %v10829_v27  ;;  %v10837_v41 = vadd.f32 %v3806_v40, %v3726_v56  ;;  %v10839_v4 = vpop.permute.xlu1 %3752  ;;  %v3714_v56 = vmul.f32 %v3674_v8, %v5588_v39  ;;  %v3685_v47 = vsel %vm868_vm5, %v10701_v9, %v10640_v24  ;;  %v3716_v13 = vmul.f32 %v3672_v23, %v5588_v39 }
 0x7e2   : > { %v3772_v7 = vsel %vm965_vm6, %v10804_v28, %v10839_v4  ;;  %v3636_v24 = vadd.f32 %v3620_v31, %v3540_v15  ;;  %v3587_v15 = vsel %vm770_vm4, %v10638_v26, %v10606_v51  ;;  %v14608_v51 = vld [vmem:[#allocation203_spill] sm:$0xff] }
 0x7e3   : > { %v3808_v40 = vmul.f32 %v3772_v7, %v5586_v38  ;;  %3878 = vrot.lane.b32.xlu0 %v10837_v41, %s5354_s5  ;;  %v10865_v27 = vadd.f32 %v10837_v41, %v9934_v53  ;;  %v3509_v53 = vsel %vm446_vm2, %v10634_v43, %v10544_v11  ;;  %v3730_v12 = vadd.f32 %v3714_v56, %v3634_v5  ;;  %v10901_v11 = vpop.permute.xlu0 %3758 }
 0x7e4   : > { %v3511_v9 = vsel %vm266_vm3, %v3509_v53, 0.0  ;;  %v3732_v5 = vadd.f32 %v3716_v13, %v3636_v24  ;;  %v14606_v53 = vld [vmem:[#allocation165_spill] sm:$0xff]  ;;  %v3683_v26 = vsel %vm868_vm5, %v14608_v51, %v10646_v55  ;;  %v3609_v24 = vmul.f32 %v3587_v15, %v5588_v39 }
 0x7e5   : > { %14605 = vst [vmem:[#allocation210_spill] sm:$0xff] %v10865_v27  ;;  %v10873_v8 = vadd.f32 %v3808_v40, %v3728_v62  ;;  %v10875_v7 = vpop.permute.xlu1 %3756  ;;  %v3591_v27 = vsel %vm282_vm7, %v3589_v22, 0.0  ;;  %v3687_v22 = vsel %vm298_vm8, %v3685_v47, 0.0 }
 0x7e6   : > { %v3770_v10 = vsel %vm965_vm6, %v10857_v14, %v10875_v7  ;;  %v3607_v23 = vmul.f32 %v3591_v27, %v5588_v39  ;;  %v3527_v27 = vmul.f32 %v3511_v9, %v5586_v38 }
 0x7e7   : > { %v3810_v62 = vmul.f32 %v3770_v10, %v5586_v38  ;;  %3882 = vrot.lane.b32.xlu0 %v10873_v8, %s5354_s5  ;;  %v10897_v43 = vadd.f32 %v10873_v8, %v9966_v33  ;;  %v3703_v10 = vmul.f32 %v3687_v22, %v5588_v39  ;;  %v14610_v22 = vld [vmem:[#allocation194_spill] sm:$0xff] }
 0x7e9   : > { %v10905_v56 = vadd.f32 %v3810_v62, %v3730_v12  ;;  %v10907_v40 = vpop.permute.xlu1 %3760  ;;  %v3507_v12 = vsel %vm446_vm2, %v10602_v54, %v10552_v61  ;;  %v14612_v61 = vld [vmem:[#allocation209_spill] sm:$0xff] }
 0x7ea   : > { %v3768_v33 = vsel %vm965_vm6, %v10901_v11, %v10907_v40  ;;  %v3779_v55 = vsel %vm965_vm6, %v14612_v61, %v10690_v32 }
 0x7eb   : > { %v3812_v31 = vmul.f32 %v3768_v33, %v5586_v38  ;;  %3886 = vrot.lane.b32.xlu0 %v10905_v56, %s5354_s5  ;;  %v10923_v47 = vadd.f32 %v10905_v56, %v14606_v53  ;;  %v3623_v33 = vadd.f32 %v3607_v23, %v3527_v27  ;;  %v14609_v53 = vld [vmem:[#allocation208_spill] sm:$0xff]  ;;  %v14613_v23 = vld [vmem:[#allocation181_spill] sm:$0xff]  ;;  %v3705_v27 = vmul.f32 %v3683_v26, %v5588_v39 }
 0x7ed   : > { %14607 = vst [vmem:[#allocation165_spill] sm:$0xff] %v10923_v47  ;;  %v10935_v13 = vadd.f32 %v3812_v31, %v3732_v5  ;;  %v3765_v62 = vpop.permute.xlu1 %3764  ;;  %v14611_v47 = vld [vmem:[#allocation199_spill] sm:$0xff]  ;;  %v3529_v31 = vmul.f32 %v3507_v12, %v5586_v38  ;;  %v3801_v12 = vmul.f32 %v3779_v55, %v5586_v38  ;;  %v14619_v55 = vld [vmem:[#allocation186_spill] sm:$0xff] }
 0x7ee   : > { %v3781_v9 = vsel %vm965_vm6, %v3765_v62, %v14609_v53  ;;  %v3585_v54 = vsel %vm770_vm4, %v14611_v47, %v14610_v22  ;;  %v3719_v47 = vadd.f32 %v3703_v10, %v3623_v33  ;;  %v14615_v62 = vld [vmem:[#allocation193_spill] sm:$0xff]  ;;  %v14616_v53 = vld [vmem:[#allocation204_spill] sm:$0xff]  ;;  %v14618_v33 = vld [vmem:[#allocation27_spill] sm:$0xff] }
 0x7ef   : > { %v3783_v5 = vsel %vm314_vm9, %v3781_v9, 0.0  ;;  %3890 = vrot.lane.b32.xlu0 %v10935_v13, %s5354_s5  ;;  %v10955_v15 = vadd.f32 %v10935_v13, %v14613_v23  ;;  %v3505_v32 = vsel %vm446_vm2, %v14615_v62, %v10560_v57  ;;  %v3681_v9 = vsel %vm868_vm5, %v14616_v53, %v10650_v49  ;;  %v14617_v10 = vld [vmem:[#allocation200_spill] sm:$0xff]  ;;  %v14622_v62 = vld [vmem:[#allocation195_spill] sm:$0xff] }
 0x7f0   : > { %v3799_v51 = vmul.f32 %v3783_v5, %v5586_v38  ;;  %v3625_v22 = vadd.f32 %v3609_v24, %v3529_v31  ;;  %v3611_v61 = vmul.f32 %v3585_v54, %v5588_v39  ;;  %v3583_v26 = vsel %vm770_vm4, %v14617_v10, %v10618_v63  ;;  %v14626_v10 = vld [vmem:[#allocation196_spill] sm:$0xff] }
 0x7f1   : > { %14614 = vst [vmem:[#allocation203_spill] sm:$0xff] %v10955_v15  ;;  %v3777_v57 = vsel %vm965_vm6, %v10744_v60, %v10718_v45  ;;  %v3531_v49 = vmul.f32 %v3505_v32, %v5586_v38  ;;  %v3707_v54 = vmul.f32 %v3681_v9, %v5588_v39  ;;  %v3503_v45 = vsel %vm446_vm2, %v10614_v52, %v10568_v42  ;;  %v14625_v9 = vld [vmem:[#allocation201_spill] sm:$0xff] }
 0x7f2   : > { %v10970_v23 = vadd.f32 %v3799_v51, %v3719_v47  ;;  %v3721_v24 = vadd.f32 %v3705_v27, %v3625_v22  ;;  %v3679_v63 = vsel %vm868_vm5, %v10672_v44, %v10656_v2  ;;  %v3613_v31 = vmul.f32 %v3583_v26, %v5588_v39  ;;  %v14627_v26 = vld [vmem:[#allocation207_spill] sm:$0xff] }
 0x7f3   : > { %3926 = vrot.lane.b32.xlu0 %v14618_v33, %s5356_s11  ;;  %v3627_v60 = vadd.f32 %v3611_v61, %v3531_v49  ;;  %v3803_v47 = vmul.f32 %v3777_v57, %v5586_v38  ;;  %v3581_v51 = vsel %vm770_vm4, %v10648_v6, %v10622_v48  ;;  %v3775_v52 = vsel %vm965_vm6, %v10776_v3, %v10760_v29  ;;  %v14623_v6 = vld [vmem:[#allocation205_spill] sm:$0xff] }
 0x7f4   : > { %v10986_v5 = vadd.f32 %v10970_v23, %v14619_v55  ;;  %3864 = vrot.lane.b32.xlu1 %v10970_v23, %s5354_s5  ;;  %v10999_v27 = vadd.f32 %v3801_v12, %v3721_v24  ;;  %v3533_v44 = vmul.f32 %v3503_v45, %v5586_v38  ;;  %v3709_v42 = vmul.f32 %v3679_v63, %v5588_v39  ;;  %v14629_v24 = vld [vmem:[#allocation202_spill] sm:$0xff]  ;;  %v14630_v63 = vld [vmem:[#allocation197_spill] sm:$0xff] }
 0x7f5   : > { %v3723_v2 = vadd.f32 %v3707_v54, %v3627_v60  ;;  %v3501_v48 = vsel %vm446_vm2, %v14622_v62, %v10576_v20  ;;  %v3677_v29 = vsel %vm868_vm5, %v14623_v6, %v10660_v19  ;;  %v3805_v53 = vmul.f32 %v3775_v52, %v5586_v38  ;;  %v14636_v6 = vld [vmem:[#allocation50_spill] sm:$0xff] }
 0x7f6   : > { %14620 = vst [vmem:[#allocation208_spill] sm:$0xff] %v10986_v5  ;;  %14621 = vst [vmem:[#allocation194_spill] sm:$0xff] %v10999_v27  ;;  %v3629_v3 = vadd.f32 %v3613_v31, %v3533_v44  ;;  %v3579_v22 = vsel %vm770_vm4, %v14625_v9, %v10626_v50  ;;  %v3773_v20 = vsel %vm965_vm6, %v10808_v34, %v10804_v28  ;;  %v14633_v44 = vld [vmem:[#allocation191_spill] sm:$0xff]  ;;  %v14638_v9 = vld [vmem:[#allocation169_spill] sm:$0xff] }
 0x7f7   : > { %3930 = vrot.lane.b32.xlu0 %v10742_v18, %s5356_s11  ;;  %v3615_v18 = vmul.f32 %v3581_v51, %v5588_v39  ;;  %v11025_v32 = vadd.f32 %v3803_v47, %v3723_v2  ;;  %v3535_v19 = vmul.f32 %v3501_v48, %v5586_v38  ;;  %v3711_v12 = vmul.f32 %v3677_v29, %v5588_v39  ;;  %v14632_v47 = vld [vmem:[#allocation198_spill] sm:$0xff]  ;;  %v14637_v29 = vld [vmem:[#allocation192_spill] sm:$0xff] }
 0x7f8   : > { %3868 = vrot.lane.b32.xlu1 %v10999_v27, %s5354_s5  ;;  %v3725_v61 = vadd.f32 %v3709_v42, %v3629_v3  ;;  %v3499_v50 = vsel %vm446_vm2, %v14626_v10, %v10582_v0  ;;  %v3675_v28 = vsel %vm868_vm5, %v14627_v26, %v10666_v35  ;;  %v3807_v49 = vmul.f32 %v3773_v20, %v5586_v38  ;;  %v14634_v2 = vld [vmem:[#allocation206_spill] sm:$0xff]  ;;  %v3763_v42 = vpop.permute.xlu0 %3762  ;;  %v14641_v26 = vld [vmem:[#allocation125_spill] sm:$0xff] }
 0x7f9   : > { %14624 = vst [vmem:[#allocation199_spill] sm:$0xff] %v11025_v32  ;;  %v3631_v34 = vadd.f32 %v3615_v18, %v3535_v19  ;;  %v3577_v54 = vsel %vm770_vm4, %v14629_v24, %v10630_v16  ;;  %v3771_v0 = vsel %vm965_vm6, %v10839_v4, %v10857_v14  ;;  %v3537_v35 = vmul.f32 %v3499_v50, %v5586_v38 }
 0x7fa   : > { %v11051_v57 = vadd.f32 %v3805_v53, %v3725_v61  ;;  %v3713_v45 = vmul.f32 %v3675_v28, %v5588_v39  ;;  %v3497_v16 = vsel %vm446_vm2, %v14630_v63, %v10588_v59  ;;  %v3673_v4 = vsel %vm868_vm5, %v10682_v1, %v10670_v37  ;;  %v14642_v28 = vld [vmem:[#allocation102_spill] sm:$0xff] }
 0x7fb   : > { %3934 = vrot.lane.b32.xlu0 %v10774_v58, %s5356_s11  ;;  %v3617_v58 = vmul.f32 %v3579_v22, %v5588_v39  ;;  %v3727_v55 = vadd.f32 %v3711_v12, %v3631_v34  ;;  %v3809_v31 = vmul.f32 %v3771_v0, %v5586_v38  ;;  %v3575_v51 = vsel %vm770_vm4, %v10658_v46, %v14632_v47  ;;  %v14639_v22 = vld [vmem:[#allocation99_spill] sm:$0xff]  ;;  %v14646_v0 = vld [vmem:[#allocation85_spill] sm:$0xff]  ;;  %v14654_v47 = vld [vmem:[#allocation72_spill] sm:$0xff] }
 0x7fc   : > { %3872 = vrot.lane.b32.xlu1 %v11025_v32, %s5354_s5  ;;  %14628 = vst [vmem:[#allocation209_spill] sm:$0xff] %v11051_v57  ;;  %v3769_v59 = vsel %vm965_vm6, %v10875_v7, %v10901_v11  ;;  %v3539_v1 = vmul.f32 %v3497_v16, %v5586_v38  ;;  %v3715_v52 = vmul.f32 %v3673_v4, %v5588_v39  ;;  %v14651_v16 = vld [vmem:[#allocation53_spill] sm:$0xff] }
 0x7fd   : > { %v3633_v14 = vadd.f32 %v3617_v58, %v3537_v35  ;;  %v11077_v60 = vadd.f32 %v3807_v49, %v3727_v55  ;;  %v3495_v46 = vsel %vm446_vm2, %v10632_v36, %v14633_v44  ;;  %v3671_v7 = vsel %vm868_vm5, %v10684_v21, %v14634_v2  ;;  %v14644_v49 = vld [vmem:[#allocation55_spill] sm:$0xff]  ;;  %v14648_v55 = vld [vmem:[#allocation56_spill] sm:$0xff] }
 0x7fe   : > { %v3811_v48 = vmul.f32 %v3769_v59, %v5586_v38  ;;  %v3413_v3 = vsel %vm591_vm10, %v14637_v29, %v14636_v6  ;;  %v3767_v36 = vsel %vm965_vm6, %v10907_v40, %v3763_v42  ;;  %v3541_v21 = vmul.f32 %v3495_v46, %v5586_v38  ;;  %v14655_v59 = vld [vmem:[#allocation71_spill] sm:$0xff]  ;;  %v14658_v44 = vld [vmem:[#allocation68_spill] sm:$0xff]  ;;  %v14659_v46 = vld [vmem:[#allocation97_spill] sm:$0xff] }
 0x7ff   : > { %3938 = vrot.lane.b32.xlu0 %v10806_v25, %s5356_s11  ;;  %v3619_v25 = vmul.f32 %v3577_v54, %v5588_v39  ;;  %14631 = vst [vmem:[#allocation181_spill] sm:$0xff] %v11077_v60  ;;  %v3729_v37 = vadd.f32 %v3713_v45, %v3633_v14  ;;  %v3717_v53 = vmul.f32 %v3671_v7, %v5588_v39  ;;  %v3414_v19 = vsel %vm249_vm11, %v3413_v3, 0.0  ;;  %v14649_v45 = vld [vmem:[#allocation167_spill] sm:$0xff]  ;;  %v14660_v7 = vld [vmem:[#allocation100_spill] sm:$0xff]  ;;  %v14663_v3 = vld [vmem:[#allocation25_spill] sm:$0xff] }
 0x800   : > { %3876 = vrot.lane.b32.xlu1 %v11051_v57, %s5354_s5  ;;  %v3349_v20 = vsel %vm365_vm0, %v14639_v22, %v14638_v9  ;;  %v3411_v34 = vsel %vm591_vm10, %v14642_v28, %v14641_v26  ;;  %v3409_v63 = vsel %vm591_vm10, %v14649_v45, %v14648_v55  ;;  %v3405_v2 = vsel %vm591_vm10, %v14659_v46, %v14658_v44 }
 0x801   : > { %v3635_v11 = vadd.f32 %v3619_v25, %v3539_v1  ;;  %v11103_v62 = vadd.f32 %v3809_v31, %v3729_v37  ;;  %v3350_v12 = vsel %vm233_vm1, %v3349_v20, 0.0  ;;  %v14653_v31 = vld [vmem:[#allocation52_spill] sm:$0xff]  ;;  %v14656_v1 = vld [vmem:[#allocation103_spill] sm:$0xff] }
 0x802   : > { %v3430_v50 = vadd.f32 %v3414_v19, %v3350_v12  ;;  %v3343_v37 = vsel %vm365_vm0, %v14656_v1, %v14655_v59  ;;  %v14669_v12 = vld [vmem:[#allocation189_spill] sm:$0xff] }
 0x803   : > { %3942 = vrot.lane.b32.xlu0 %v10837_v41, %s5356_s11  ;;  %v3621_v41 = vmul.f32 %v3575_v51, %v5588_v39  ;;  %14635 = vst [vmem:[#allocation193_spill] sm:$0xff] %v11103_v62  ;;  %v3731_v18 = vadd.f32 %v3715_v52, %v3635_v11  ;;  %v3407_v51 = vsel %vm591_vm10, %v14654_v47, %v14653_v31  ;;  %v14661_v11 = vld [vmem:[#allocation95_spill] sm:$0xff] }
 0x804   : > { %3880 = vrot.lane.b32.xlu1 %v11077_v60, %s5354_s5  ;;  %v11149_v35 = vmul.f32 %v3430_v50, %v14646_v0  ;;  %v3436_v52 = vadd.f32 %v3407_v51, %v3343_v37  ;;  %v14670_v50 = vld [vmem:[#allocation48_spill] sm:$0xff]  ;;  %v14675_v37 = vld [vmem:[#allocation73_spill] sm:$0xff] }
 0x805   : > { %v3637_v40 = vadd.f32 %v3621_v41, %v3541_v21  ;;  %v11125_v61 = vadd.f32 %v3811_v48, %v3731_v18  ;;  %v3341_v41 = vsel %vm365_vm0, %v14661_v11, %v14660_v7  ;;  %v14665_v18 = vld [vmem:[#allocation57_spill] sm:$0xff] }
 0x806   : > { %14647 = vst [vmem:[#allocation186_spill] sm:$0xff] %v11149_v35  ;;  %v11194_v42 = vmul.f32 %v3436_v52, %v14646_v0  ;;  %v3438_v48 = vadd.f32 %v3405_v2, %v3341_v41  ;;  %v14676_v52 = vld [vmem:[#allocation166_spill] sm:$0xff] }
 0x807   : > { %3946 = vrot.lane.b32.xlu0 %v10873_v8, %s5356_s11  ;;  %14640 = vst [vmem:[#allocation204_spill] sm:$0xff] %v11125_v61  ;;  %v3813_v8 = vmul.f32 %v3767_v36, %v5586_v38  ;;  %v3733_v10 = vadd.f32 %v3717_v53, %v3637_v40  ;;  %v14664_v36 = vld [vmem:[#allocation188_spill] sm:$0xff]  ;;  %v14666_v53 = vld [vmem:[#allocation101_spill] sm:$0xff]  ;;  %v3335_v2 = vsel %vm365_vm0, %v14676_v52, %v14675_v37 }
 0x808   : > { %3884 = vrot.lane.b32.xlu1 %v11103_v62, %s5354_s5  ;;  %14662 = vst [vmem:[#allocation201_spill] sm:$0xff] %v11194_v42  ;;  %v3403_v21 = vsel %vm591_vm10, %v14664_v36, %v14663_v3  ;;  %v3339_v20 = vsel %vm365_vm0, %v14666_v53, %v14665_v18  ;;  %v11209_v19 = vmul.f32 %v3438_v48, %v14646_v0 }
 0x809   : > { %v11138_v58 = vadd.f32 %v3813_v8, %v3733_v10  ;;  %v3440_v40 = vadd.f32 %v3403_v21, %v3339_v20  ;;  %v14668_v8 = vld [vmem:[#allocation70_spill] sm:$0xff]  ;;  %v3412_v21 = vsel %vm591_vm10, %v14636_v6, %v14642_v28  ;;  %v3410_v6 = vsel %vm591_vm10, %v14641_v26, %v14649_v45 }
 0x80a   : > { %14667 = vst [vmem:[#allocation196_spill] sm:$0xff] %v11209_v19  ;;  %v3401_v10 = vsel %vm591_vm10, %v14669_v12, %v14668_v8  ;;  %v3408_v26 = vsel %vm591_vm10, %v14648_v55, %v14654_v47  ;;  %v3406_v55 = vsel %vm591_vm10, %v14653_v31, %v14659_v46  ;;  %v3404_v31 = vsel %vm591_vm10, %v14658_v44, %v14664_v36 }
 0x80b   : > { %3950 = vrot.lane.b32.xlu0 %v10905_v56, %s5356_s11  ;;  %14643 = vst [vmem:[#allocation200_spill] sm:$0xff] %v11138_v58  ;;  %v14645_v56 = vld [vmem:[#allocation143_spill] sm:$0xff]  ;;  %v3402_v44 = vsel %vm591_vm10, %v14663_v3, %v14669_v12  ;;  %v11337_v12 = vpop.permute.xlu0 %3862 }
 0x80c   : > { %3888 = vrot.lane.b32.xlu1 %v11125_v61, %s5354_s5  ;;  %v3347_v24 = vsel %vm365_vm0, %v14645_v56, %v14644_v49  ;;  %v3348_v20 = vsel %vm365_vm0, %v14638_v9, %v14645_v56  ;;  %v3346_v9 = vsel %vm365_vm0, %v14644_v49, %v14651_v16  ;;  %14684 = vst [vmem:[#allocation169_spill] sm:$0xff] %v11337_v12 }
 0x80d   : > { %v3432_v54 = vadd.f32 %v3411_v34, %v3347_v24  ;;  %v14671_v34 = vld [vmem:[#allocation65_spill] sm:$0xff]  ;;  %v3433_v56 = vadd.f32 %v3410_v6, %v3346_v9 }
 0x80e   : > { %v3337_v24 = vsel %vm365_vm0, %v14671_v34, %v14670_v50 }
 0x80f   : > { %3954 = vrot.lane.b32.xlu0 %v10935_v13, %s5356_s11  ;;  %v14650_v13 = vld [vmem:[#allocation59_spill] sm:$0xff]  ;;  %v11164_v14 = vmul.f32 %v3432_v54, %v14646_v0  ;;  %v11224_v54 = vmul.f32 %v3440_v40, %v14646_v0  ;;  %v11284_v45 = vmul.f32 %v3433_v56, %v14646_v0 }
 0x810   : > { %3892 = vrot.lane.b32.xlu1 %v11138_v58, %s5354_s5  ;;  %v3345_v4 = vsel %vm365_vm0, %v14651_v16, %v14650_v13  ;;  %v3344_v49 = vsel %vm365_vm0, %v14650_v13, %v14656_v1  ;;  %v3342_v13 = vsel %vm365_vm0, %v14655_v59, %v14661_v11  ;;  %v3340_v59 = vsel %vm365_vm0, %v14660_v7, %v14666_v53 }
 0x811   : > { %14652 = vst [vmem:[#allocation195_spill] sm:$0xff] %v11164_v14  ;;  %v3434_v25 = vadd.f32 %v3409_v63, %v3345_v4  ;;  %14672 = vst [vmem:[#allocation207_spill] sm:$0xff] %v11224_v54  ;;  %v3442_v63 = vadd.f32 %v3401_v10, %v3337_v24  ;;  %v14673_v4 = vld [vmem:[#allocation54_spill] sm:$0xff]  ;;  %v3431_v10 = vadd.f32 %v3412_v21, %v3348_v20 }
 0x812   : > { %14680 = vst [vmem:[#allocation191_spill] sm:$0xff] %v11284_v45  ;;  %v3435_v16 = vadd.f32 %v3408_v26, %v3344_v49  ;;  %v3437_v1 = vadd.f32 %v3406_v55, %v3342_v13  ;;  %v3439_v11 = vadd.f32 %v3404_v31, %v3340_v59  ;;  %v3338_v7 = vsel %vm365_vm0, %v14665_v18, %v14671_v34 }
 0x813   : > { %4022 = vrot.lane.b32.xlu0 %v11149_v35, %s5355_s24  ;;  %v11239_v41 = vmul.f32 %v3442_v63, %v14646_v0  ;;  %v11269_v28 = vmul.f32 %v3431_v10, %v14646_v0  ;;  %v3441_v53 = vadd.f32 %v3402_v44, %v3338_v7  ;;  %v3336_v18 = vsel %vm365_vm0, %v14670_v50, %v14676_v52 }
 0x814   : > { %3928 = vrot.lane.b32.xlu1 %v10970_v23, %s5356_s11  ;;  %v11179_v23 = vmul.f32 %v3434_v25, %v14646_v0  ;;  %v14674_v25 = vld [vmem:[#allocation190_spill] sm:$0xff]  ;;  %v11299_v47 = vmul.f32 %v3435_v16, %v14646_v0  ;;  %v11314_v46 = vmul.f32 %v3437_v1, %v14646_v0  ;;  %v11329_v36 = vmul.f32 %v3439_v11, %v14646_v0 }
 0x815   : > { %v3399_v51 = vsel %vm591_vm10, %v14674_v25, %v14673_v4  ;;  %14677 = vst [vmem:[#allocation202_spill] sm:$0xff] %v11239_v41  ;;  %14679 = vst [vmem:[#allocation198_spill] sm:$0xff] %v11269_v28  ;;  %v3400_v3 = vsel %vm591_vm10, %v14668_v8, %v14674_v25  ;;  %v11346_v34 = vmul.f32 %v3441_v53, %v14646_v0 }
 0x816   : > { %14657 = vst [vmem:[#allocation205_spill] sm:$0xff] %v11179_v23  ;;  %v3444_v48 = vadd.f32 %v3399_v51, %v3335_v2  ;;  %14681 = vst [vmem:[#allocation206_spill] sm:$0xff] %v11299_v47  ;;  %v3443_v24 = vadd.f32 %v3400_v3, %v3336_v18  ;;  %v3398_v8 = vsel %vm591_vm10, %v14673_v4, %v14637_v29 }
 0x817   : > { %4026 = vrot.lane.b32.xlu0 %v11164_v14, %s5355_s24  ;;  %14682 = vst [vmem:[#allocation50_spill] sm:$0xff] %v11314_v46  ;;  %14683 = vst [vmem:[#allocation192_spill] sm:$0xff] %v11329_v36  ;;  %v3334_v50 = vsel %vm365_vm0, %v14675_v37, %v14639_v22 }
 0x818   : > { %3932 = vrot.lane.b32.xlu1 %v10999_v27, %s5356_s11  ;;  %v11254_v40 = vmul.f32 %v3444_v48, %v14646_v0  ;;  %14685 = vst [vmem:[#allocation99_spill] sm:$0xff] %v11346_v34  ;;  %v11363_v25 = vmul.f32 %v3443_v24, %v14646_v0  ;;  %v3445_v51 = vadd.f32 %v3398_v8, %v3334_v50 }
 0x81a   : > { %14678 = vst [vmem:[#allocation197_spill] sm:$0xff] %v11254_v40  ;;  %14687 = vst [vmem:[#allocation102_spill] sm:$0xff] %v11363_v25  ;;  %v11372_v4 = vmul.f32 %v3445_v51, %v14646_v0 }
 0x81b   : > { %4030 = vrot.lane.b32.xlu0 %v11179_v23, %s5355_s24 }
 0x81c   : > { %3936 = vrot.lane.b32.xlu1 %v11025_v32, %s5356_s11  ;;  %14689 = vst [vmem:[#allocation143_spill] sm:$0xff] %v11372_v4 }
 0x81f   : > { %4034 = vrot.lane.b32.xlu0 %v11194_v42, %s5355_s24 }
 0x820   : > { %3940 = vrot.lane.b32.xlu1 %v11051_v57, %s5356_s11 }
 0x823   : > { %4038 = vrot.lane.b32.xlu0 %v11209_v19, %s5355_s24 }
 0x824   : > { %3944 = vrot.lane.b32.xlu1 %v11077_v60, %s5356_s11 }
 0x827   : > { %4042 = vrot.lane.b32.xlu0 %v11224_v54, %s5355_s24 }
 0x828   : > { %3948 = vrot.lane.b32.xlu1 %v11103_v62, %s5356_s11 }
 0x82b   : > { %4046 = vrot.lane.b32.xlu0 %v11239_v41, %s5355_s24 }
 0x82c   : > { %3952 = vrot.lane.b32.xlu1 %v11125_v61, %s5356_s11 }
 0x82f   : > { %4050 = vrot.lane.b32.xlu0 %v11254_v40, %s5355_s24 }
 0x830   : > { %3956 = vrot.lane.b32.xlu1 %v11138_v58, %s5356_s11 }
 0x833   : > { %4102 = vrot.lane.b32.xlu0 %v11149_v35, %s5358_s13 }
 0x834   : > { %4024 = vrot.lane.b32.xlu1 %v11269_v28, %s5355_s24 }
 0x837   : > { %4106 = vrot.lane.b32.xlu0 %v11164_v14, %s5358_s13 }
 0x838   : > { %4028 = vrot.lane.b32.xlu1 %v11284_v45, %s5355_s24 }
 0x83b   : > { %4110 = vrot.lane.b32.xlu0 %v11179_v23, %s5358_s13 }
 0x83c   : > { %4032 = vrot.lane.b32.xlu1 %v11299_v47, %s5355_s24 }
 0x83f   : > { %4114 = vrot.lane.b32.xlu0 %v11194_v42, %s5358_s13 }
 0x840   : > { %4036 = vrot.lane.b32.xlu1 %v11314_v46, %s5355_s24 }
 0x843   : > { %4118 = vrot.lane.b32.xlu0 %v11209_v19, %s5358_s13 }
 0x844   : > { %4040 = vrot.lane.b32.xlu1 %v11329_v36, %s5355_s24 }
 0x847   : > { %4122 = vrot.lane.b32.xlu0 %v11224_v54, %s5358_s13 }
 0x848   : > { %4044 = vrot.lane.b32.xlu1 %v11346_v34, %s5355_s24 }
 0x849   : > { %v11360_v63 = vpop.permute.xlu0 %3866 }
 0x84a   : > { %14686 = vst [vmem:[#allocation125_spill] sm:$0xff] %v11360_v63 }
 0x84b   : > { %4126 = vrot.lane.b32.xlu0 %v11239_v41, %s5358_s13 }
 0x84c   : > { %4048 = vrot.lane.b32.xlu1 %v11363_v25, %s5355_s24 }
 0x84d   : > { %v11369_v29 = vpop.permute.xlu0 %3870 }
 0x84e   : > { %14688 = vst [vmem:[#allocation55_spill] sm:$0xff] %v11369_v29 }
 0x84f   : > { %4130 = vrot.lane.b32.xlu0 %v11254_v40, %s5358_s13 }
 0x850   : > { %4052 = vrot.lane.b32.xlu1 %v11372_v4, %s5355_s24 }
 0x851   : > { %v11378_v22 = vpop.permute.xlu0 %3874 }
 0x852   : > { %14690 = vst [vmem:[#allocation56_spill] sm:$0xff] %v11378_v22 }
 0x853   : > { %4198 = vrot.lane.b32.xlu0 %v11149_v35, %s5359_s18 }
 0x854   : > { %4104 = vrot.lane.b32.xlu1 %v11269_v28, %s5358_s13 }
 0x855   : > { %v11384_v37 = vpop.permute.xlu0 %3878 }
 0x856   : > { %14691 = vst [vmem:[#allocation167_spill] sm:$0xff] %v11384_v37 }
 0x857   : > { %4202 = vrot.lane.b32.xlu0 %v11164_v14, %s5359_s18 }
 0x858   : > { %4108 = vrot.lane.b32.xlu1 %v11284_v45, %s5358_s13 }
 0x859   : > { %v11390_v52 = vpop.permute.xlu0 %3882 }
 0x85a   : > { %14692 = vst [vmem:[#allocation59_spill] sm:$0xff] %v11390_v52 }
 0x85b   : > { %4206 = vrot.lane.b32.xlu0 %v11179_v23, %s5359_s18 }
 0x85c   : > { %4112 = vrot.lane.b32.xlu1 %v11299_v47, %s5358_s13 }
 0x85d   : > { %v11396_v2 = vpop.permute.xlu0 %3886 }
 0x85e   : > { %14693 = vst [vmem:[#allocation53_spill] sm:$0xff] %v11396_v2 }
 0x85f   : > { %4210 = vrot.lane.b32.xlu0 %v11194_v42, %s5359_s18 }
 0x860   : > { %4116 = vrot.lane.b32.xlu1 %v11314_v46, %s5358_s13 }
 0x861   : > { %v11402_v48 = vpop.permute.xlu0 %3890 }
 0x862   : > { %14694 = vst [vmem:[#allocation52_spill] sm:$0xff] %v11402_v48 }
 0x863   : > { %4214 = vrot.lane.b32.xlu0 %v11209_v19, %s5359_s18 }
 0x864   : > { %4120 = vrot.lane.b32.xlu1 %v11329_v36, %s5358_s13 }
 0x865   : > { %v11408_v21 = vpop.permute.xlu0 %3926 }
 0x866   : > { %14695 = vst [vmem:[#allocation72_spill] sm:$0xff] %v11408_v21  ;;  %v11410_v20 = vpop.permute.xlu1 %3864 }
 0x867   : > { %14696 = vst [vmem:[#allocation71_spill] sm:$0xff] %v11410_v20  ;;  %4218 = vrot.lane.b32.xlu0 %v11224_v54, %s5359_s18 }
 0x868   : > { %4124 = vrot.lane.b32.xlu1 %v11346_v34, %s5358_s13 }
 0x869   : > { %v11416_v10 = vpop.permute.xlu0 %3930 }
 0x86a   : > { %14697 = vst [vmem:[#allocation103_spill] sm:$0xff] %v11416_v10  ;;  %v11418_v6 = vpop.permute.xlu1 %3868 }
 0x86b   : > { %14698 = vst [vmem:[#allocation68_spill] sm:$0xff] %v11418_v6  ;;  %4222 = vrot.lane.b32.xlu0 %v11239_v41, %s5359_s18 }
 0x86c   : > { %4128 = vrot.lane.b32.xlu1 %v11363_v25, %s5358_s13 }
 0x86d   : > { %v11424_v9 = vpop.permute.xlu0 %3934 }
 0x86e   : > { %14699 = vst [vmem:[#allocation97_spill] sm:$0xff] %v11424_v9  ;;  %v11426_v56 = vpop.permute.xlu1 %3872 }
 0x86f   : > { %14700 = vst [vmem:[#allocation100_spill] sm:$0xff] %v11426_v56  ;;  %4226 = vrot.lane.b32.xlu0 %v11254_v40, %s5359_s18 }
 0x870   : > { %4132 = vrot.lane.b32.xlu1 %v11372_v4, %s5358_s13 }
 0x871   : > { %v11432_v26 = vpop.permute.xlu0 %3938 }
 0x872   : > { %14701 = vst [vmem:[#allocation95_spill] sm:$0xff] %v11432_v26  ;;  %v11434_v49 = vpop.permute.xlu1 %3876 }
 0x873   : > { %14702 = vst [vmem:[#allocation25_spill] sm:$0xff] %v11434_v49  ;;  %4294 = vrot.lane.b32.xlu0 %v11149_v35, %s5360_s20 }
 0x874   : > { %4200 = vrot.lane.b32.xlu1 %v11269_v28, %s5359_s18 }
 0x875   : > { %v11440_v16 = vpop.permute.xlu0 %3942 }
 0x876   : > { %14703 = vst [vmem:[#allocation188_spill] sm:$0xff] %v11440_v16  ;;  %v11442_v55 = vpop.permute.xlu1 %3880 }
 0x877   : > { %14704 = vst [vmem:[#allocation57_spill] sm:$0xff] %v11442_v55  ;;  %4298 = vrot.lane.b32.xlu0 %v11164_v14, %s5360_s20 }
 0x878   : > { %4204 = vrot.lane.b32.xlu1 %v11284_v45, %s5359_s18 }
 0x879   : > { %v11448_v13 = vpop.permute.xlu0 %3946 }
 0x87a   : > { %14705 = vst [vmem:[#allocation101_spill] sm:$0xff] %v11448_v13  ;;  %v11450_v1 = vpop.permute.xlu1 %3884 }
 0x87b   : > { %14706 = vst [vmem:[#allocation70_spill] sm:$0xff] %v11450_v1  ;;  %4302 = vrot.lane.b32.xlu0 %v11179_v23, %s5360_s20 }
 0x87c   : > { %4208 = vrot.lane.b32.xlu1 %v11299_v47, %s5359_s18 }
 0x87d   : > { %v11456_v31 = vpop.permute.xlu0 %3950 }
 0x87e   : > { %14707 = vst [vmem:[#allocation189_spill] sm:$0xff] %v11456_v31  ;;  %v11458_v59 = vpop.permute.xlu1 %3888 }
 0x87f   : > { %14708 = vst [vmem:[#allocation48_spill] sm:$0xff] %v11458_v59  ;;  %4306 = vrot.lane.b32.xlu0 %v11194_v42, %s5360_s20 }
 0x880   : > { %4212 = vrot.lane.b32.xlu1 %v11314_v46, %s5359_s18 }
 0x881   : > { %v11464_v11 = vpop.permute.xlu0 %3954 }
 0x882   : > { %14709 = vst [vmem:[#allocation65_spill] sm:$0xff] %v11464_v11  ;;  %v11466_v44 = vpop.permute.xlu1 %3892 }
 0x883   : > { %14710 = vst [vmem:[#allocation54_spill] sm:$0xff] %v11466_v44  ;;  %4310 = vrot.lane.b32.xlu0 %v11209_v19, %s5360_s20 }
 0x884   : > { %4216 = vrot.lane.b32.xlu1 %v11329_v36, %s5359_s18 }
 0x885   : > { %v11472_v7 = vpop.permute.xlu0 %4022 }
 0x886   : > { %v11474_v53 = vpop.permute.xlu1 %3928 }
 0x887   : > { %14711 = vst [vmem:[#allocation190_spill] sm:$0xff] %v11474_v53  ;;  %4314 = vrot.lane.b32.xlu0 %v11224_v54, %s5360_s20 }
 0x888   : > { %4220 = vrot.lane.b32.xlu1 %v11346_v34, %s5359_s18 }
 0x889   : > { %v11480_v3 = vpop.permute.xlu0 %4026 }
 0x88a   : > { %v11482_v18 = vpop.permute.xlu1 %3932 }
 0x88b   : > { %14712 = vst [vmem:[#allocation73_spill] sm:$0xff] %v11482_v18  ;;  %4318 = vrot.lane.b32.xlu0 %v11239_v41, %s5360_s20 }
 0x88c   : > { %4224 = vrot.lane.b32.xlu1 %v11363_v25, %s5359_s18 }
 0x88d   : > { %v11488_v24 = vpop.permute.xlu0 %4030 }
 0x88e   : > { %v11490_v8 = vpop.permute.xlu1 %3936 }
 0x88f   : > { %14713 = vst [vmem:[#allocation166_spill] sm:$0xff] %v11490_v8  ;;  %4322 = vrot.lane.b32.xlu0 %v11254_v40, %s5360_s20 }
 0x890   : > { %4228 = vrot.lane.b32.xlu1 %v11372_v4, %s5359_s18 }
 0x891   : > { %v11496_v50 = vpop.permute.xlu0 %4034 }
 0x892   : > { %v11498_v51 = vpop.permute.xlu1 %3940 }
 0x893   : > { %14714 = vst [vmem:[#allocation211_spill] sm:$0xff] %v11498_v51  ;;  %4422 = vrot.lane.b32.xlu0 %v14618_v33, %s5354_s5 }
 0x894   : > { %4296 = vrot.lane.b32.xlu1 %v11269_v28, %s5360_s20 }
 0x895   : > { %v11504_v58 = vpop.permute.xlu0 %4038 }
 0x896   : > { %v11506_v61 = vpop.permute.xlu1 %3944 }
 0x897   : > { %14715 = vst [vmem:[#allocation212_spill] sm:$0xff] %v11506_v61 }
 0x898   : > { %4300 = vrot.lane.b32.xlu1 %v11284_v45, %s5360_s20 }
 0x899   : > { %v11510_v62 = vpop.permute.xlu0 %4042 }
 0x89a   : > { %v11512_v60 = vpop.permute.xlu1 %3948 }
 0x89b   : > { %14716 = vst [vmem:[#allocation213_spill] sm:$0xff] %v11512_v60 }
 0x89c   : > { %4304 = vrot.lane.b32.xlu1 %v11299_v47, %s5360_s20 }
 0x89d   : > { %v11516_v57 = vpop.permute.xlu0 %4046 }
 0x89e   : > { %v11518_v32 = vpop.permute.xlu1 %3952 }
 0x89f   : > { %14717 = vst [vmem:[#allocation214_spill] sm:$0xff] %v11518_v32 }
 0x8a0   : > { %4308 = vrot.lane.b32.xlu1 %v11314_v46, %s5360_s20 }
 0x8a1   : > { %v11522_v27 = vpop.permute.xlu0 %4050 }
 0x8a2   : > { %14718 = vst [vmem:[#allocation215_spill] sm:$0xff] %v11522_v27  ;;  %v11524_v35 = vpop.permute.xlu1 %3956 }
 0x8a3   : > { %14719 = vst [vmem:[#allocation216_spill] sm:$0xff] %v11524_v35 }
 0x8a4   : > { %4312 = vrot.lane.b32.xlu1 %v11329_v36, %s5360_s20 }
 0x8a5   : > { %v11528_v40 = vpop.permute.xlu0 %4102 }
 0x8a6   : > { %v11530_v41 = vpop.permute.xlu1 %4024 }
 0x8a7   : > { %v4068_v53 = vsel %vm446_vm2, %v11472_v7, %v11530_v41 }
 0x8a8   : > { %4316 = vrot.lane.b32.xlu1 %v11346_v34, %s5360_s20  ;;  %v4088_v21 = vmul.f32 %v4068_v53, %v5586_v38 }
 0x8a9   : > { %v11534_v54 = vpop.permute.xlu0 %4106 }
 0x8aa   : > { %v11536_v19 = vpop.permute.xlu1 %4028 }
 0x8ab   : > { %14720 = vst [vmem:[#allocation217_spill] sm:$0xff] %v11536_v19 }
 0x8ac   : > { %4320 = vrot.lane.b32.xlu1 %v11363_v25, %s5360_s20 }
 0x8ad   : > { %v11540_v46 = vpop.permute.xlu0 %4110 }
 0x8ae   : > { %14721 = vst [vmem:[#allocation218_spill] sm:$0xff] %v11540_v46  ;;  %v11542_v42 = vpop.permute.xlu1 %4032 }
 0x8b0   : > { %4324 = vrot.lane.b32.xlu1 %v11372_v4, %s5360_s20 }
 0x8b1   : > { %v11546_v36 = vpop.permute.xlu0 %4114 }
 0x8b2   : > { %v11548_v47 = vpop.permute.xlu1 %4036 }
 0x8b3   : > { %14722 = vst [vmem:[#allocation219_spill] sm:$0xff] %v11548_v47 }
 0x8b5   : > { %v11550_v23 = vpop.permute.xlu0 %4118 }
 0x8b6   : > { %v11552_v34 = vpop.permute.xlu1 %4040 }
 0x8b7   : > { %14723 = vst [vmem:[#allocation220_spill] sm:$0xff] %v11552_v34 }
 0x8b9   : > { %v11554_v45 = vpop.permute.xlu0 %4122 }
 0x8ba   : > { %v11556_v14 = vpop.permute.xlu1 %4044 }
 0x8bb   : > { %14724 = vst [vmem:[#allocation221_spill] sm:$0xff] %v11556_v14 }
 0x8bd   : > { %v11558_v25 = vpop.permute.xlu0 %4126 }
 0x8be   : > { %v11560_v28 = vpop.permute.xlu1 %4048 }
 0x8bf   : > { %14725 = vst [vmem:[#allocation222_spill] sm:$0xff] %v11560_v28 }
 0x8c1   : > { %v11564_v48 = vpop.permute.xlu0 %4130 }
 0x8c2   : > { %v11562_v59 = vpop.permute.xlu1 %4052  ;;  %14726 = vst [vmem:[#allocation223_spill] sm:$0xff] %v11564_v48 }
 0x8c5   : > { %v11568_v32 = vpop.permute.xlu0 %4198 }
 0x8c6   : > { %v11566_v4 = vpop.permute.xlu1 %4104 }
 0x8c7   : > { %v4148_v20 = vsel %vm770_vm4, %v11528_v40, %v11566_v4 }
 0x8c8   : > { %v4168_v44 = vmul.f32 %v4148_v20, %v5588_v39 }
 0x8c9   : > { %v11574_v2 = vpop.permute.xlu0 %4202 }
 0x8ca   : > { %v11570_v11 = vpop.permute.xlu1 %4108  ;;  %v4184_v48 = vadd.f32 %v4168_v44, %v4088_v21 }
 0x8cb   : > { %14727 = vst [vmem:[#allocation224_spill] sm:$0xff] %v11570_v11  ;;  %v4146_v35 = vsel %vm770_vm4, %v11534_v54, %v11570_v11 }
 0x8cc   : > { %v4170_v5 = vmul.f32 %v4146_v35, %v5588_v39  ;;  %v4064_v35 = vsel %vm446_vm2, %v11488_v24, %v11542_v42 }
 0x8cd   : > { %v11578_v31 = vpop.permute.xlu0 %4206 }
 0x8ce   : > { %v11572_v1 = vpop.permute.xlu1 %4112 }
 0x8cf   : > { %14728 = vst [vmem:[#allocation225_spill] sm:$0xff] %v11572_v1 }
 0x8d1   : > { %v11584_v61 = vpop.permute.xlu0 %4210 }
 0x8d2   : > { %v11576_v60 = vpop.permute.xlu1 %4116 }
 0x8d5   : > { %v11588_v49 = vpop.permute.xlu0 %4214 }
 0x8d6   : > { %v11580_v55 = vpop.permute.xlu1 %4120 }
 0x8d7   : > { %14729 = vst [vmem:[#allocation226_spill] sm:$0xff] %v11580_v55 }
 0x8d9   : > { %v11594_v16 = vpop.permute.xlu0 %4218 }
 0x8da   : > { %v11582_v52 = vpop.permute.xlu1 %4124 }
 0x8db   : > { %14730 = vst [vmem:[#allocation227_spill] sm:$0xff] %v11582_v52 }
 0x8dd   : > { %v11598_v22 = vpop.permute.xlu0 %4222 }
 0x8de   : > { %v11586_v13 = vpop.permute.xlu1 %4128 }
 0x8e1   : > { %v11604_v6 = vpop.permute.xlu0 %4226 }
 0x8e2   : > { %v11590_v37 = vpop.permute.xlu1 %4132  ;;  %14733 = vst [vmem:[#allocation230_spill] sm:$0xff] %v11604_v6  ;;  %v4066_v6 = vsel %vm446_vm2, %v11480_v3, %v11536_v19  ;;  %v4144_v19 = vsel %vm770_vm4, %v11540_v46, %v11572_v1 }
 0x8e3   : > { %v4090_v53 = vmul.f32 %v4066_v6, %v5586_v38  ;;  %v4172_v11 = vmul.f32 %v4144_v19, %v5588_v39 }
 0x8e5   : > { %v11608_v18 = vpop.permute.xlu0 %4294 }
 0x8e6   : > { %v11592_v51 = vpop.permute.xlu1 %4200  ;;  %14735 = vst [vmem:[#allocation232_spill] sm:$0xff] %v11608_v18 }
 0x8e7   : > { %v4244_v10 = vsel %vm868_vm5, %v11568_v32, %v11592_v51 }
 0x8e8   : > { %v4264_v27 = vmul.f32 %v4244_v10, %v5588_v39 }
 0x8e9   : > { %v11618_v63 = vpop.permute.xlu0 %4298 }
 0x8ea   : > { %v11596_v56 = vpop.permute.xlu1 %4204  ;;  %v4280_v21 = vadd.f32 %v4264_v27, %v4184_v48  ;;  %v4062_v27 = vsel %vm446_vm2, %v11496_v50, %v11548_v47  ;;  %v4142_v48 = vsel %vm770_vm4, %v11546_v36, %v11576_v60 }
 0x8eb   : > { %14731 = vst [vmem:[#allocation228_spill] sm:$0xff] %v11596_v56  ;;  %v4242_v20 = vsel %vm868_vm5, %v11574_v2, %v11596_v56  ;;  %v4186_v56 = vadd.f32 %v4170_v5, %v4090_v53 }
 0x8ec   : > { %v4266_v44 = vmul.f32 %v4242_v20, %v5588_v39 }
 0x8ed   : > { %v11646_v33 = vpop.permute.xlu0 %4302 }
 0x8ee   : > { %v11600_v8 = vpop.permute.xlu1 %4208  ;;  %v4282_v19 = vadd.f32 %v4266_v44, %v4186_v56  ;;  %v4174_v56 = vmul.f32 %v4142_v48, %v5588_v39 }
 0x8ef   : > { %v4240_v1 = vsel %vm868_vm5, %v11578_v31, %v11600_v8 }
 0x8f0   : > { %v4268_v20 = vmul.f32 %v4240_v1, %v5588_v39 }
 0x8f1   : > { %v11688_v53 = vpop.permute.xlu0 %4306 }
 0x8f2   : > { %v11602_v26 = vpop.permute.xlu1 %4212 }
 0x8f3   : > { %14732 = vst [vmem:[#allocation229_spill] sm:$0xff] %v11602_v26 }
 0x8f6   : > { %v11606_v29 = vpop.permute.xlu1 %4216 }
 0x8f7   : > { %14734 = vst [vmem:[#allocation231_spill] sm:$0xff] %v11606_v29 }
 0x8fa   : > { %v11610_v9 = vpop.permute.xlu1 %4220 }
 0x8fe   : > { %v11612_v0 = vpop.permute.xlu1 %4224 }
 0x902   : > { %v11629_v12 = vpop.permute.xlu1 %4228 }
 0x906   : > { %v11648_v15 = vpop.permute.xlu1 %4296 }
 0x907   : > { %14736 = vst [vmem:[#allocation233_spill] sm:$0xff] %v11648_v15  ;;  %v4340_v10 = vsel %vm965_vm6, %v11608_v18, %v11648_v15  ;;  %v4092_v18 = vmul.f32 %v4064_v35, %v5586_v38  ;;  %v14737_v35 = vld [vmem:[#allocation13_spill] sm:$0xff] }
 0x908   : > { %v4360_v6 = vmul.f32 %v4340_v10, %v5586_v38 }
 0x909   : > { %v4188_v47 = vadd.f32 %v4172_v11, %v4092_v18 }
 0x90a   : > { %v11670_v46 = vadd.f32 %v4360_v6, %v4280_v21  ;;  %v11672_v15 = vpop.permute.xlu1 %4300  ;;  %v4238_v6 = vsel %vm868_vm5, %v11584_v61, %v11602_v26 }
 0x90b   : > { %v4338_v5 = vsel %vm965_vm6, %v11618_v63, %v11672_v15  ;;  %v4284_v18 = vadd.f32 %v4268_v20, %v4188_v47  ;;  %v4270_v48 = vmul.f32 %v4238_v6, %v5588_v39  ;;  %v11732_v47 = vpop.permute.xlu0 %4310 }
 0x90c   : > { %v4362_v10 = vmul.f32 %v4338_v5, %v5586_v38  ;;  %4426 = vrot.lane.b32.xlu0 %v11670_v46, %s5354_s5  ;;  %v11695_v21 = vadd.f32 %v11670_v46, %v14737_v35  ;;  %v4094_v5 = vmul.f32 %v4062_v27, %v5586_v38  ;;  %v4060_v35 = vsel %vm446_vm2, %v11504_v58, %v11552_v34 }
 0x90d   : > { %v4236_v34 = vsel %vm868_vm5, %v11588_v49, %v11606_v29 }
 0x90e   : > { %14738 = vst [vmem:[#allocation13_spill] sm:$0xff] %v11695_v21  ;;  %v11702_v1 = vadd.f32 %v4362_v10, %v4282_v19  ;;  %v11704_v44 = vpop.permute.xlu1 %4304  ;;  %v4140_v21 = vsel %vm770_vm4, %v11550_v23, %v11580_v55  ;;  %v14739_v19 = vld [vmem:[#allocation15_spill] sm:$0xff]  ;;  %v4190_v55 = vadd.f32 %v4174_v56, %v4094_v5  ;;  %v4138_v56 = vsel %vm770_vm4, %v11554_v45, %v11582_v52 }
 0x90f   : > { %v4336_v11 = vsel %vm965_vm6, %v11646_v33, %v11704_v44  ;;  %v4176_v26 = vmul.f32 %v4140_v21, %v5588_v39 }
 0x910   : > { %v4364_v27 = vmul.f32 %v4336_v11, %v5586_v38  ;;  %4430 = vrot.lane.b32.xlu0 %v11702_v1, %s5354_s5  ;;  %v11725_v10 = vadd.f32 %v11702_v1, %v14739_v19  ;;  %v4096_v11 = vmul.f32 %v4060_v35, %v5586_v38  ;;  %v4058_v19 = vsel %vm446_vm2, %v11510_v62, %v11556_v14 }
 0x911   : > { %v4286_v5 = vadd.f32 %v4270_v48, %v4190_v55  ;;  %v4234_v14 = vsel %vm868_vm5, %v11594_v16, %v11610_v9  ;;  %v4098_v52 = vmul.f32 %v4058_v19, %v5586_v38  ;;  %v4178_v55 = vmul.f32 %v4138_v56, %v5588_v39  ;;  %v11785_v56 = vpop.permute.xlu0 %4314 }
 0x912   : > { %14740 = vst [vmem:[#allocation15_spill] sm:$0xff] %v11725_v10  ;;  %v11734_v20 = vadd.f32 %v4364_v27, %v4284_v18  ;;  %v11736_v6 = vpop.permute.xlu1 %4308  ;;  %v4272_v18 = vmul.f32 %v4236_v34, %v5588_v39  ;;  %v14741_v27 = vld [vmem:[#allocation19_spill] sm:$0xff]  ;;  %v4192_v29 = vadd.f32 %v4176_v26, %v4096_v11  ;;  %v4149_v26 = vsel %vm770_vm4, %v11590_v37, %v11528_v40 }
 0x913   : > { %v4334_v21 = vsel %vm965_vm6, %v11688_v53, %v11736_v6  ;;  %v4232_v40 = vsel %vm868_vm5, %v11598_v22, %v11612_v0  ;;  %v4194_v37 = vadd.f32 %v4178_v55, %v4098_v52 }
 0x914   : > { %v4366_v35 = vmul.f32 %v4334_v21, %v5586_v38  ;;  %4434 = vrot.lane.b32.xlu0 %v11734_v20, %s5354_s5  ;;  %v11757_v10 = vadd.f32 %v11734_v20, %v14741_v27  ;;  %v4056_v21 = vsel %vm446_vm2, %v11516_v57, %v11560_v28  ;;  %v4136_v27 = vsel %vm770_vm4, %v11558_v25, %v11586_v13 }
 0x915   : > { %v4288_v19 = vadd.f32 %v4272_v18, %v4192_v29  ;;  %v4100_v29 = vmul.f32 %v4056_v21, %v5586_v38  ;;  %v4180_v18 = vmul.f32 %v4136_v27, %v5588_v39  ;;  %v4245_v21 = vsel %vm868_vm5, %v11629_v12, %v11568_v32 }
 0x916   : > { %14742 = vst [vmem:[#allocation19_spill] sm:$0xff] %v11757_v10  ;;  %v11765_v34 = vadd.f32 %v4366_v35, %v4286_v5  ;;  %v11767_v48 = vpop.permute.xlu1 %4312  ;;  %v4274_v5 = vmul.f32 %v4234_v14, %v5588_v39  ;;  %v14743_v10 = vld [vmem:[#allocation210_spill] sm:$0xff]  ;;  %v4276_v27 = vmul.f32 %v4232_v40, %v5588_v39 }
 0x917   : > { %v4332_v11 = vsel %vm965_vm6, %v11732_v47, %v11767_v48  ;;  %v4196_v12 = vadd.f32 %v4180_v18, %v4100_v29  ;;  %v4147_v29 = vsel %vm770_vm4, %v11566_v4, %v11534_v54  ;;  %v4243_v54 = vsel %vm868_vm5, %v11592_v51, %v11574_v2 }
 0x918   : > { %v4368_v35 = vmul.f32 %v4332_v11, %v5586_v38  ;;  %4438 = vrot.lane.b32.xlu0 %v11765_v34, %s5354_s5  ;;  %v11793_v28 = vadd.f32 %v11765_v34, %v14743_v10  ;;  %v4069_v10 = vsel %vm446_vm2, %v11562_v59, %v11472_v7  ;;  %v4290_v55 = vadd.f32 %v4274_v5, %v4194_v37  ;;  %v11829_v7 = vpop.permute.xlu0 %4318 }
 0x919   : > { %v4071_v32 = vsel %vm266_vm3, %v4069_v10, 0.0  ;;  %v4292_v37 = vadd.f32 %v4276_v27, %v4196_v12  ;;  %v14746_v10 = vld [vmem:[#allocation165_spill] sm:$0xff] }
 0x91a   : > { %14744 = vst [vmem:[#allocation210_spill] sm:$0xff] %v11793_v28  ;;  %v11801_v14 = vadd.f32 %v4368_v35, %v4288_v19  ;;  %v11803_v11 = vpop.permute.xlu1 %4316  ;;  %v4151_v28 = vsel %vm282_vm7, %v4149_v26, 0.0  ;;  %v4247_v26 = vsel %vm298_vm8, %v4245_v21, 0.0 }
 0x91b   : > { %v4330_v52 = vsel %vm965_vm6, %v11785_v56, %v11803_v11  ;;  %v4167_v40 = vmul.f32 %v4151_v28, %v5588_v39  ;;  %v4087_v28 = vmul.f32 %v4071_v32, %v5586_v38 }
 0x91c   : > { %v4370_v19 = vmul.f32 %v4330_v52, %v5586_v38  ;;  %4442 = vrot.lane.b32.xlu0 %v11801_v14, %s5354_s5  ;;  %v11825_v59 = vadd.f32 %v11801_v14, %v10897_v43  ;;  %v4263_v52 = vmul.f32 %v4247_v26, %v5588_v39  ;;  %v14749_v26 = vld [vmem:[#allocation218_spill] sm:$0xff] }
 0x91d   : > { %v4183_v12 = vadd.f32 %v4167_v40, %v4087_v28  ;;  %v14752_v40 = vld [vmem:[#allocation203_spill] sm:$0xff] }
 0x91e   : > { %14745 = vst [vmem:[#allocation234_spill] sm:$0xff] %v11825_v59  ;;  %v11833_v5 = vadd.f32 %v4370_v19, %v4290_v55  ;;  %v11835_v35 = vpop.permute.xlu1 %4320  ;;  %v4067_v55 = vsel %vm446_vm2, %v11530_v41, %v11480_v3  ;;  %v4169_v19 = vmul.f32 %v4147_v29, %v5588_v39  ;;  %v14751_v3 = vld [vmem:[#allocation233_spill] sm:$0xff]  ;;  %v14832_v59 = vld [vmem:[#allocation94_spill] sm:$0xff] }
 0x91f   : > { %v4328_v43 = vsel %vm965_vm6, %v11829_v7, %v11835_v35  ;;  %v4339_v2 = vsel %vm965_vm6, %v14751_v3, %v11618_v63  ;;  %v4279_v28 = vadd.f32 %v4263_v52, %v4183_v12  ;;  %v14756_v52 = vld [vmem:[#allocation225_spill] sm:$0xff]  ;;  %v14757_v12 = vld [vmem:[#allocation27_spill] sm:$0xff] }
 0x920   : > { %v4372_v18 = vmul.f32 %v4328_v43, %v5586_v38  ;;  %4446 = vrot.lane.b32.xlu0 %v11833_v5, %s5354_s5  ;;  %v11851_v21 = vadd.f32 %v11833_v5, %v14746_v10  ;;  %v14748_v43 = vld [vmem:[#allocation232_spill] sm:$0xff] }
 0x921   : > { %v14750_v10 = vld [vmem:[#allocation224_spill] sm:$0xff] }
 0x922   : > { %14747 = vst [vmem:[#allocation165_spill] sm:$0xff] %v11851_v21  ;;  %v11863_v4 = vadd.f32 %v4372_v18, %v4292_v37  ;;  %v4325_v27 = vpop.permute.xlu1 %4324  ;;  %v4145_v41 = vsel %vm770_vm4, %v14750_v10, %v14749_v26  ;;  %v4089_v37 = vmul.f32 %v4067_v55, %v5586_v38  ;;  %v4265_v18 = vmul.f32 %v4243_v54, %v5588_v39 }
 0x923   : > { %v4341_v32 = vsel %vm965_vm6, %v4325_v27, %v14748_v43  ;;  %v14754_v43 = vld [vmem:[#allocation217_spill] sm:$0xff]  ;;  %v4171_v3 = vmul.f32 %v4145_v41, %v5588_v39  ;;  %v4361_v55 = vmul.f32 %v4339_v2, %v5586_v38  ;;  %v4143_v54 = vsel %vm770_vm4, %v14756_v52, %v11546_v36  ;;  %v14758_v2 = vld [vmem:[#allocation208_spill] sm:$0xff] }
 0x924   : > { %v4343_v51 = vsel %vm314_vm9, %v4341_v32, 0.0  ;;  %4450 = vrot.lane.b32.xlu0 %v11863_v4, %s5354_s5  ;;  %v11883_v29 = vadd.f32 %v11863_v4, %v14752_v40  ;;  %v4065_v63 = vsel %vm446_vm2, %v14754_v43, %v11488_v24  ;;  %v14755_v32 = vld [vmem:[#allocation228_spill] sm:$0xff]  ;;  %v4185_v10 = vadd.f32 %v4169_v19, %v4089_v37  ;;  %v14761_v43 = vld [vmem:[#allocation219_spill] sm:$0xff] }
 0x925   : > { %v4359_v27 = vmul.f32 %v4343_v51, %v5586_v38  ;;  %v4241_v26 = vsel %vm868_vm5, %v14755_v32, %v11578_v31  ;;  %v4337_v24 = vsel %vm965_vm6, %v11672_v15, %v11646_v33  ;;  %v4091_v31 = vmul.f32 %v4065_v63, %v5586_v38  ;;  %v14765_v52 = vld [vmem:[#allocation220_spill] sm:$0xff] }
 0x926   : > { %14753 = vst [vmem:[#allocation232_spill] sm:$0xff] %v11883_v29  ;;  %v4281_v19 = vadd.f32 %v4265_v18, %v4185_v10  ;;  %v4267_v41 = vmul.f32 %v4241_v26, %v5588_v39  ;;  %v4063_v15 = vsel %vm446_vm2, %v11542_v42, %v11496_v50  ;;  %v4239_v33 = vsel %vm868_vm5, %v11600_v8, %v11584_v61  ;;  %v14764_v26 = vld [vmem:[#allocation226_spill] sm:$0xff]  ;;  %v14829_v29 = vld [vmem:[#allocation37_spill] sm:$0xff] }
 0x927   : > { %v11898_v40 = vadd.f32 %v4359_v27, %v4279_v28  ;;  %v4187_v36 = vadd.f32 %v4171_v3, %v4091_v31  ;;  %v4173_v37 = vmul.f32 %v4143_v54, %v5588_v39  ;;  %v4363_v28 = vmul.f32 %v4337_v24, %v5586_v38  ;;  %v14766_v54 = vld [vmem:[#allocation231_spill] sm:$0xff] }
 0x928   : > { %4486 = vrot.lane.b32.xlu0 %v14757_v12, %s5356_s11  ;;  %v11927_v18 = vadd.f32 %v4361_v55, %v4281_v19  ;;  %v4141_v27 = vsel %vm770_vm4, %v11576_v60, %v11550_v23  ;;  %v4335_v42 = vsel %vm965_vm6, %v11704_v44, %v11688_v53  ;;  %v4093_v61 = vmul.f32 %v4063_v15, %v5586_v38  ;;  %v14762_v23 = vld [vmem:[#allocation229_spill] sm:$0xff]  ;;  %v14768_v31 = vld [vmem:[#allocation227_spill] sm:$0xff] }
 0x929   : > { %4424 = vrot.lane.b32.xlu1 %v11898_v40, %s5354_s5  ;;  %v11916_v51 = vadd.f32 %v11898_v40, %v14758_v2  ;;  %v4283_v8 = vadd.f32 %v4267_v41, %v4187_v36  ;;  %v4269_v50 = vmul.f32 %v4239_v33, %v5588_v39  ;;  %v4061_v60 = vsel %vm446_vm2, %v14761_v43, %v11504_v58  ;;  %v14769_v15 = vld [vmem:[#allocation221_spill] sm:$0xff] }
 0x92a   : > { %14760 = vst [vmem:[#allocation224_spill] sm:$0xff] %v11927_v18  ;;  %v4237_v53 = vsel %vm868_vm5, %v14762_v23, %v11588_v49  ;;  %v4189_v44 = vadd.f32 %v4173_v37, %v4093_v61  ;;  %v4365_v32 = vmul.f32 %v4335_v42, %v5586_v38  ;;  %v4139_v10 = vsel %vm770_vm4, %v14764_v26, %v11554_v45  ;;  %v14771_v37 = vld [vmem:[#allocation223_spill] sm:$0xff]  ;;  %v14773_v61 = vld [vmem:[#allocation222_spill] sm:$0xff]  ;;  %v14776_v23 = vld [vmem:[#allocation72_spill] sm:$0xff] }
 0x92b   : > { %14759 = vst [vmem:[#allocation218_spill] sm:$0xff] %v11916_v51  ;;  %v11953_v63 = vadd.f32 %v4363_v28, %v4283_v8  ;;  %v4333_v58 = vsel %vm965_vm6, %v11736_v6, %v11732_v47  ;;  %v4095_v49 = vmul.f32 %v4061_v60, %v5586_v38  ;;  %v4271_v55 = vmul.f32 %v4237_v53, %v5588_v39  ;;  %v14772_v42 = vld [vmem:[#allocation215_spill] sm:$0xff]  ;;  %v14774_v8 = vld [vmem:[#allocation230_spill] sm:$0xff]  ;;  %v14777_v53 = vld [vmem:[#allocation216_spill] sm:$0xff] }
 0x92c   : > { %4490 = vrot.lane.b32.xlu0 %v11670_v46, %s5356_s11  ;;  %v4175_v46 = vmul.f32 %v4141_v27, %v5588_v39  ;;  %v4285_v3 = vadd.f32 %v4269_v50, %v4189_v44  ;;  %v4059_v45 = vsel %vm446_vm2, %v14765_v52, %v11510_v62  ;;  %v4235_v47 = vsel %vm868_vm5, %v14766_v54, %v11594_v16  ;;  %v4323_v50 = vpop.permute.xlu0 %4322 }
 0x92d   : > { %4428 = vrot.lane.b32.xlu1 %v11927_v18, %s5354_s5  ;;  %14763 = vst [vmem:[#allocation233_spill] sm:$0xff] %v11953_v63  ;;  %v4367_v12 = vmul.f32 %v4333_v58, %v5586_v38  ;;  %v4137_v19 = vsel %vm770_vm4, %v14768_v31, %v11558_v25  ;;  %v4331_v62 = vsel %vm965_vm6, %v11767_v48, %v11785_v56  ;;  %v14779_v58 = vld [vmem:[#allocation54_spill] sm:$0xff]  ;;  %v14784_v31 = vld [vmem:[#allocation125_spill] sm:$0xff] }
 0x92e   : > { %v4191_v6 = vadd.f32 %v4175_v46, %v4095_v49  ;;  %v11979_v24 = vadd.f32 %v4365_v32, %v4285_v3  ;;  %v4097_v16 = vmul.f32 %v4059_v45, %v5586_v38  ;;  %v4273_v2 = vmul.f32 %v4235_v47, %v5588_v39  ;;  %v14781_v47 = vld [vmem:[#allocation103_spill] sm:$0xff] }
 0x92f   : > { %v4057_v25 = vsel %vm446_vm2, %v14769_v15, %v11516_v57  ;;  %v4233_v48 = vsel %vm868_vm5, %v11610_v9, %v11598_v22  ;;  %v4369_v36 = vmul.f32 %v4331_v62, %v5586_v38  ;;  %v4135_v28 = vsel %vm770_vm4, %v11586_v13, %v14771_v37  ;;  %v14789_v15 = vld [vmem:[#allocation73_spill] sm:$0xff]  ;;  %v14792_v37 = vld [vmem:[#allocation95_spill] sm:$0xff] }
 0x930   : > { %4494 = vrot.lane.b32.xlu0 %v11702_v1, %s5356_s11  ;;  %v4177_v1 = vmul.f32 %v4139_v10, %v5588_v39  ;;  %14767 = vst [vmem:[#allocation203_spill] sm:$0xff] %v11979_v24  ;;  %v4287_v41 = vadd.f32 %v4271_v55, %v4191_v6  ;;  %v4329_v57 = vsel %vm965_vm6, %v11803_v11, %v11829_v7  ;;  %v14778_v10 = vld [vmem:[#allocation169_spill] sm:$0xff]  ;;  %v14782_v6 = vld [vmem:[#allocation190_spill] sm:$0xff] }
 0x931   : > { %4432 = vrot.lane.b32.xlu1 %v11953_v63, %s5354_s5  ;;  %v4099_v22 = vmul.f32 %v4057_v25, %v5586_v38  ;;  %v4275_v27 = vmul.f32 %v4233_v48, %v5588_v39  ;;  %v4055_v13 = vsel %vm446_vm2, %v14773_v61, %v14772_v42  ;;  %v4231_v11 = vsel %vm868_vm5, %v11612_v0, %v14774_v8  ;;  %v14791_v48 = vld [vmem:[#allocation68_spill] sm:$0xff] }
 0x932   : > { %v4193_v56 = vadd.f32 %v4177_v1, %v4097_v16  ;;  %v12005_v33 = vadd.f32 %v4367_v12, %v4287_v41  ;;  %v4371_v60 = vmul.f32 %v4329_v57, %v5586_v38  ;;  %v3973_v44 = vsel %vm591_vm10, %v14777_v53, %v14776_v23  ;;  %v14786_v16 = vld [vmem:[#allocation85_spill] sm:$0xff]  ;;  %v14796_v61 = vld [vmem:[#allocation188_spill] sm:$0xff] }
 0x933   : > { %v4327_v46 = vsel %vm965_vm6, %v11835_v35, %v4323_v50  ;;  %v4101_v0 = vmul.f32 %v4055_v13, %v5586_v38  ;;  %v4277_v26 = vmul.f32 %v4231_v11, %v5588_v39  ;;  %v3909_v49 = vsel %vm365_vm0, %v14779_v58, %v14778_v10  ;;  %v14797_v13 = vld [vmem:[#allocation211_spill] sm:$0xff] }
 0x934   : > { %4498 = vrot.lane.b32.xlu0 %v11734_v20, %s5356_s11  ;;  %v4179_v20 = vmul.f32 %v4137_v19, %v5588_v39  ;;  %14770 = vst [vmem:[#allocation217_spill] sm:$0xff] %v12005_v33  ;;  %v4289_v9 = vadd.f32 %v4273_v2, %v4193_v56  ;;  %v3974_v3 = vsel %vm249_vm11, %v3973_v44, 0.0  ;;  %v3910_v52 = vsel %vm233_vm1, %v3909_v49, 0.0  ;;  %v14788_v2 = vld [vmem:[#allocation97_spill] sm:$0xff]  ;;  %v14798_v11 = vld [vmem:[#allocation167_spill] sm:$0xff] }
 0x935   : > { %4436 = vrot.lane.b32.xlu1 %v11979_v24, %s5354_s5  ;;  %v3990_v54 = vadd.f32 %v3974_v3, %v3910_v52  ;;  %v3971_v1 = vsel %vm591_vm10, %v14782_v6, %v14781_v47  ;;  %v3969_v25 = vsel %vm591_vm10, %v14789_v15, %v14788_v2  ;;  %v3965_v8 = vsel %vm591_vm10, %v14797_v13, %v14796_v61  ;;  %v14800_v44 = vld [vmem:[#allocation101_spill] sm:$0xff] }
 0x936   : > { %v4195_v7 = vadd.f32 %v4179_v20, %v4099_v22  ;;  %v12031_v43 = vadd.f32 %v4369_v36, %v4289_v9  ;;  %v14794_v22 = vld [vmem:[#allocation56_spill] sm:$0xff]  ;;  %v14805_v52 = vld [vmem:[#allocation213_spill] sm:$0xff] }
 0x937   : > { %v12077_v41 = vmul.f32 %v3990_v54, %v14786_v16  ;;  %v14795_v9 = vld [vmem:[#allocation100_spill] sm:$0xff]  ;;  %v14806_v54 = vld [vmem:[#allocation53_spill] sm:$0xff] }
 0x938   : > { %4502 = vrot.lane.b32.xlu0 %v11765_v34, %s5356_s11  ;;  %v4181_v34 = vmul.f32 %v4135_v28, %v5588_v39  ;;  %14775 = vst [vmem:[#allocation228_spill] sm:$0xff] %v12031_v43  ;;  %v4291_v32 = vadd.f32 %v4275_v27, %v4195_v7  ;;  %v14793_v28 = vld [vmem:[#allocation166_spill] sm:$0xff]  ;;  %v3903_v27 = vsel %vm365_vm0, %v14795_v9, %v14794_v22  ;;  %v14799_v7 = vld [vmem:[#allocation25_spill] sm:$0xff] }
 0x939   : > { %4440 = vrot.lane.b32.xlu1 %v12005_v33, %s5354_s5  ;;  %14787 = vst [vmem:[#allocation208_spill] sm:$0xff] %v12077_v41  ;;  %v3967_v57 = vsel %vm591_vm10, %v14793_v28, %v14792_v37  ;;  %v14847_v39 = vld [vmem:[#allocation45_spill] sm:$0xff] }
 0x93a   : > { %v4197_v35 = vadd.f32 %v4181_v34, %v4101_v0  ;;  %v12053_v55 = vadd.f32 %v4371_v60, %v4291_v32  ;;  %v3996_v42 = vadd.f32 %v3967_v57, %v3903_v27  ;;  %v3901_v34 = vsel %vm365_vm0, %v14799_v7, %v14798_v11  ;;  %v14802_v32 = vld [vmem:[#allocation59_spill] sm:$0xff]  ;;  %v14810_v27 = vld [vmem:[#allocation52_spill] sm:$0xff] }
 0x93b   : > { %v3998_v60 = vadd.f32 %v3965_v8, %v3901_v34 }
 0x93c   : > { %4506 = vrot.lane.b32.xlu0 %v11801_v14, %s5356_s11  ;;  %14780 = vst [vmem:[#allocation225_spill] sm:$0xff] %v12053_v55  ;;  %v4373_v14 = vmul.f32 %v4327_v46, %v5586_v38  ;;  %v4293_v45 = vadd.f32 %v4277_v26, %v4197_v35  ;;  %v12122_v50 = vmul.f32 %v3996_v42, %v14786_v16  ;;  %v14801_v46 = vld [vmem:[#allocation212_spill] sm:$0xff]  ;;  %v14803_v26 = vld [vmem:[#allocation57_spill] sm:$0xff] }
 0x93d   : > { %4444 = vrot.lane.b32.xlu1 %v12031_v43, %s5354_s5  ;;  %v3963_v0 = vsel %vm591_vm10, %v14801_v46, %v14800_v44  ;;  %v3899_v49 = vsel %vm365_vm0, %v14803_v26, %v14802_v32  ;;  %v12137_v3 = vmul.f32 %v3998_v60, %v14786_v16  ;;  %v14811_v42 = vld [vmem:[#allocation48_spill] sm:$0xff] }
 0x93e   : > { %v12066_v12 = vadd.f32 %v4373_v14, %v4293_v45  ;;  %v4000_v35 = vadd.f32 %v3963_v0, %v3899_v49  ;;  %v14804_v14 = vld [vmem:[#allocation189_spill] sm:$0xff]  ;;  %v3895_v8 = vsel %vm365_vm0, %v14811_v42, %v14810_v27  ;;  %v3972_v0 = vsel %vm591_vm10, %v14776_v23, %v14782_v6 }
 0x93f   : > { %v3961_v45 = vsel %vm591_vm10, %v14805_v52, %v14804_v14  ;;  %v3970_v23 = vsel %vm591_vm10, %v14781_v47, %v14789_v15  ;;  %v3968_v47 = vsel %vm591_vm10, %v14788_v2, %v14793_v28  ;;  %v3966_v2 = vsel %vm591_vm10, %v14792_v37, %v14797_v13 }
 0x940   : > { %4510 = vrot.lane.b32.xlu0 %v11833_v5, %s5356_s11  ;;  %14783 = vst [vmem:[#allocation27_spill] sm:$0xff] %v12066_v12  ;;  %v14785_v5 = vld [vmem:[#allocation71_spill] sm:$0xff]  ;;  %v3964_v37 = vsel %vm591_vm10, %v14796_v61, %v14801_v46  ;;  %v3962_v61 = vsel %vm591_vm10, %v14800_v44, %v14805_v52  ;;  %v12265_v52 = vpop.permute.xlu0 %4422 }
 0x941   : > { %4448 = vrot.lane.b32.xlu1 %v12053_v55, %s5354_s5  ;;  %v3907_v19 = vsel %vm365_vm0, %v14785_v5, %v14784_v31  ;;  %v3908_v49 = vsel %vm365_vm0, %v14778_v10, %v14785_v5  ;;  %v3906_v10 = vsel %vm365_vm0, %v14784_v31, %v14791_v48 }
 0x942   : > { %v3992_v62 = vadd.f32 %v3971_v1, %v3907_v19  ;;  %v14807_v1 = vld [vmem:[#allocation70_spill] sm:$0xff]  ;;  %v3993_v5 = vadd.f32 %v3970_v23, %v3906_v10 }
 0x943   : > { %v3897_v19 = vsel %vm365_vm0, %v14807_v1, %v14806_v54 }
 0x944   : > { %4514 = vrot.lane.b32.xlu0 %v11863_v4, %s5356_s11  ;;  %v14790_v4 = vld [vmem:[#allocation55_spill] sm:$0xff]  ;;  %v12092_v20 = vmul.f32 %v3992_v62, %v14786_v16  ;;  %v12152_v62 = vmul.f32 %v4000_v35, %v14786_v16  ;;  %v12212_v15 = vmul.f32 %v3993_v5, %v14786_v16 }
 0x945   : > { %4452 = vrot.lane.b32.xlu1 %v12066_v12, %s5354_s5  ;;  %v3905_v56 = vsel %vm365_vm0, %v14791_v48, %v14790_v4  ;;  %v3904_v31 = vsel %vm365_vm0, %v14790_v4, %v14795_v9  ;;  %v3902_v4 = vsel %vm365_vm0, %v14794_v22, %v14799_v7  ;;  %v3900_v22 = vsel %vm365_vm0, %v14798_v11, %v14803_v26  ;;  %s5020_s5 = scalar_lea.sflag [#allocation8], %s5484_s29 }
 0x946   : > { %v3994_v36 = vadd.f32 %v3969_v25, %v3905_v56  ;;  %v4002_v25 = vadd.f32 %v3961_v45, %v3897_v19  ;;  %v14808_v56 = vld [vmem:[#allocation65_spill] sm:$0xff]  ;;  %v3991_v45 = vadd.f32 %v3972_v0, %v3908_v49  ;;  %v3995_v48 = vadd.f32 %v3968_v47, %v3904_v31 }
 0x947   : > { %v3997_v9 = vadd.f32 %v3966_v2, %v3902_v4  ;;  %v3999_v7 = vadd.f32 %v3964_v37, %v3900_v22  ;;  %v3898_v11 = vsel %vm365_vm0, %v14802_v32, %v14807_v1  ;;  %v3896_v32 = vsel %vm365_vm0, %v14806_v54, %v14811_v42  ;;  %v14818_v2 = vld [vmem:[#allocation32_spill] sm:$0xff]  ;;  %v14819_v4 = vld [vmem:[#allocation91_spill] sm:$0xff]  ;;  %v14820_v37 = vld [vmem:[#allocation33_spill] sm:$0xff] }
 0x948   : > { %4582 = vrot.lane.b32.xlu0 %v12077_v41, %s5355_s24  ;;  %v12167_v34 = vmul.f32 %v4002_v25, %v14786_v16  ;;  %v12197_v6 = vmul.f32 %v3991_v45, %v14786_v16  ;;  %v12227_v28 = vmul.f32 %v3995_v48, %v14786_v16  ;;  %v4001_v26 = vadd.f32 %v3962_v61, %v3898_v11  ;;  %v14821_v22 = vld [vmem:[#allocation76_spill] sm:$0xff]  ;;  %v14822_v61 = vld [vmem:[#allocation34_spill] sm:$0xff] }
 0x949   : > { %4488 = vrot.lane.b32.xlu1 %v11898_v40, %s5356_s11  ;;  %v12107_v40 = vmul.f32 %v3994_v36, %v14786_v16  ;;  %v14809_v36 = vld [vmem:[#allocation214_spill] sm:$0xff]  ;;  %v12242_v13 = vmul.f32 %v3997_v9, %v14786_v16  ;;  %v12257_v46 = vmul.f32 %v3999_v7, %v14786_v16  ;;  %v3894_v54 = vsel %vm365_vm0, %v14810_v27, %v14779_v58 }
 0x94a   : > { %v3959_v57 = vsel %vm591_vm10, %v14809_v36, %v14808_v56  ;;  %v3960_v44 = vsel %vm591_vm10, %v14804_v14, %v14809_v36  ;;  %v12274_v1 = vmul.f32 %v4001_v26, %v14786_v16  ;;  %v3958_v14 = vsel %vm591_vm10, %v14808_v56, %v14777_v53  ;;  %v14823_v11 = vld [vmem:[#allocation86_spill] sm:$0xff] }
 0x94b   : > { %v4004_v60 = vadd.f32 %v3959_v57, %v3895_v8  ;;  %v4003_v19 = vadd.f32 %v3960_v44, %v3896_v32  ;;  %v4005_v57 = vadd.f32 %v3958_v14, %v3894_v54  ;;  %v1048_v9 = vadd.f32 %v14819_v4, %v14818_v2  ;;  %v14825_v32 = vld [vmem:[#allocation35_spill] sm:$0xff]  ;;  %v14827_v54 = vld [vmem:[#allocation36_spill] sm:$0xff] }
 0x94c   : > { %4586 = vrot.lane.b32.xlu0 %v12092_v20, %s5355_s24  ;;  %v1049_v7 = vadd.f32 %v14821_v22, %v14820_v37  ;;  %v1050_v26 = vadd.f32 %v14823_v11, %v14822_v61  ;;  %v14833_v4 = vld [vmem:[#allocation39_spill] sm:$0xff]  ;;  %v14834_v37 = vld [vmem:[#allocation61_spill] sm:$0xff]  ;;  %v14835_v61 = vld [vmem:[#allocation40_spill] sm:$0xff] }
 0x94d   : > { %4492 = vrot.lane.b32.xlu1 %v11927_v18, %s5356_s11  ;;  %v12182_v35 = vmul.f32 %v4004_v60, %v14786_v16  ;;  %v12291_v36 = vmul.f32 %v4003_v19, %v14786_v16  ;;  %v12300_v56 = vmul.f32 %v4005_v57, %v14786_v16  ;;  %v14826_v19 = vld [vmem:[#allocation75_spill] sm:$0xff]  ;;  %v1055_v22 = vadd.f32 %v14834_v37, %v14833_v4  ;;  %v14836_v11 = vld [vmem:[#allocation82_spill] sm:$0xff]  ;;  %v14846_v4 = vld [vmem:[#allocation92_spill] sm:$0xff] }
 0x94e   : > { %v1051_v14 = vadd.f32 %v14826_v19, %v14825_v32  ;;  %v14828_v57 = vld [vmem:[#allocation87_spill] sm:$0xff]  ;;  %v1060_v37 = vadd.f32 %v14846_v4, %v14845_v30 }
 0x94f   : > { %14812 = vst [vmem:[#allocation219_spill] sm:$0xff] %v12300_v56  ;;  %v14838_v32 = vld [vmem:[#allocation47_spill] sm:$0xff] }
 0x950   : > { %4590 = vrot.lane.b32.xlu0 %v12107_v40, %s5355_s24  ;;  %v14844_v18 = vld [vmem:[#allocation63_spill] sm:$0xff] }
 0x951   : > { %4496 = vrot.lane.b32.xlu1 %v11953_v63, %s5356_s11  ;;  %v14839_v63 = vld [vmem:[#allocation31_spill] sm:$0xff] }
 0x954   : > { %4594 = vrot.lane.b32.xlu0 %v12122_v50, %s5355_s24 }
 0x955   : > { %4500 = vrot.lane.b32.xlu1 %v11979_v24, %s5356_s11  ;;  %v14837_v24 = vld [vmem:[#allocation41_spill] sm:$0xff] }
 0x956   : > { %v1057_v19 = vadd.f32 %v14838_v32, %v14837_v24 }
 0x958   : > { %4598 = vrot.lane.b32.xlu0 %v12137_v3, %s5355_s24 }
 0x959   : > { %4504 = vrot.lane.b32.xlu1 %v12005_v33, %s5356_s11  ;;  %v1056_v33 = vadd.f32 %v14836_v11, %v14835_v61  ;;  %v14848_v61 = vld [vmem:[#allocation49_spill] sm:$0xff] }
 0x95a   : > { %v1061_v11 = vadd.f32 %v14848_v61, %v14847_v39  ;;  %v14857_v39 = vld [vmem:[#allocation112_spill] sm:$0xff] }
 0x95c   : > { %4602 = vrot.lane.b32.xlu0 %v12152_v62, %s5355_s24 }
 0x95d   : > { %4508 = vrot.lane.b32.xlu1 %v12031_v43, %s5356_s11  ;;  %v14831_v43 = vld [vmem:[#allocation38_spill] sm:$0xff] }
 0x95e   : > { %v1054_v2 = vadd.f32 %v14832_v59, %v14831_v43  ;;  %v14842_v59 = vld [vmem:[#allocation81_spill] sm:$0xff] }
 0x960   : > { %4606 = vrot.lane.b32.xlu0 %v12167_v34, %s5355_s24 }
 0x961   : > { %4512 = vrot.lane.b32.xlu1 %v12053_v55, %s5356_s11  ;;  %v14830_v55 = vld [vmem:[#allocation60_spill] sm:$0xff] }
 0x962   : > { %v1053_v21 = vadd.f32 %v14830_v55, %v14829_v29  ;;  %v14841_v29 = vld [vmem:[#allocation42_spill] sm:$0xff]  ;;  %v14843_v55 = vld [vmem:[#allocation43_spill] sm:$0xff] }
 0x963   : > { %v1058_v43 = vadd.f32 %v14842_v59, %v14841_v29  ;;  %v1059_v51 = vadd.f32 %v14844_v18, %v14843_v55  ;;  %v14854_v29 = vld [vmem:[#allocation93_spill] sm:$0xff]  ;;  %v14856_v55 = vld [vmem:[#allocation108_spill] sm:$0xff] }
 0x964   : > { %4610 = vrot.lane.b32.xlu0 %v12182_v35, %s5355_s24  ;;  %v1610_v59 = vadd.f32 %v14854_v29, %v1050_v26  ;;  %v14855_v18 = vld [vmem:[#allocation105_spill] sm:$0xff]  ;;  %v1613_v61 = vadd.f32 %v14857_v39, %v1053_v21  ;;  %v14866_v21 = vld [vmem:[#allocation58_spill] sm:$0xff] }
 0x965   : > { %4516 = vrot.lane.b32.xlu1 %v12066_v12, %s5356_s11  ;;  %v1052_v12 = vadd.f32 %v14828_v57, %v14827_v54  ;;  %v14840_v54 = vld [vmem:[#allocation77_spill] sm:$0xff]  ;;  %v1611_v30 = vadd.f32 %v14855_v18, %v1051_v14  ;;  %v14864_v14 = vld [vmem:[#allocation23_spill] sm:$0xff]  ;;  %v1621_v39 = vadd.f32 %v14866_v21, %v1061_v11 }
 0x966   : > { %v1047_v57 = vadd.f32 %v14840_v54, %v14839_v63  ;;  %v14851_v63 = vld [vmem:[#allocation111_spill] sm:$0xff]  ;;  %v14852_v54 = vld [vmem:[#allocation12_spill] sm:$0xff]  ;;  %v1619_v18 = vadd.f32 %v14864_v14, %v1059_v51  ;;  %v14874_v51 = vld [vmem:[#allocation137_spill] sm:$0xff] }
 0x967   : > { %v1612_v4 = vadd.f32 %v14856_v55, %v1052_v12  ;;  %v14865_v12 = vld [vmem:[#allocation110_spill] sm:$0xff]  ;;  %v14875_v14 = vld [vmem:[#allocation139_spill] sm:$0xff] }
 0x968   : > { %4662 = vrot.lane.b32.xlu0 %v12077_v41, %s5358_s13  ;;  %v1607_v32 = vadd.f32 %v14851_v63, %v1047_v57  ;;  %v14859_v57 = vld [vmem:[#allocation121_spill] sm:$0xff]  ;;  %v14860_v63 = vld [vmem:[#allocation116_spill] sm:$0xff]  ;;  %v1620_v55 = vadd.f32 %v14865_v12, %v1060_v37  ;;  %v2171_v37 = vadd.f32 %v14874_v51, %v1611_v30  ;;  %v14876_v12 = vld [vmem:[#allocation74_spill] sm:$0xff] }
 0x969   : > { %4584 = vrot.lane.b32.xlu1 %v12197_v6, %s5355_s24  ;;  %v2172_v11 = vadd.f32 %v14875_v14, %v1612_v4  ;;  %v2173_v21 = vadd.f32 %v14876_v12, %v1613_v61  ;;  %v14882_v30 = vld [vmem:[#allocation67_spill] sm:$0xff]  ;;  %v14883_v4 = vld [vmem:[#allocation136_spill] sm:$0xff] }
 0x96a   : > { %v2179_v51 = vadd.f32 %v14882_v30, %v1619_v18  ;;  %v2180_v14 = vadd.f32 %v14883_v4, %v1620_v55  ;;  %v14884_v61 = vld [vmem:[#allocation64_spill] sm:$0xff] }
 0x96b   : > { %v2181_v12 = vadd.f32 %v14884_v61, %v1621_v39  ;;  %v14890_v18 = vld [vmem:[#allocation144_spill] sm:$0xff]  ;;  %v14892_v39 = vld [vmem:[#allocation151_spill] sm:$0xff] }
 0x96c   : > { %4666 = vrot.lane.b32.xlu0 %v12092_v20, %s5358_s13  ;;  %v14891_v55 = vld [vmem:[#allocation160_spill] sm:$0xff]  ;;  %v2733_v4 = vadd.f32 %v14892_v39, %v2173_v21 }
 0x96d   : > { %4588 = vrot.lane.b32.xlu1 %v12212_v15, %s5355_s24  ;;  %v2732_v30 = vadd.f32 %v14891_v55, %v2172_v11  ;;  %v14899_v21 = vld [vmem:[#allocation104_spill] sm:$0xff]  ;;  %v14902_v55 = vld [vmem:[#allocation154_spill] sm:$0xff] }
 0x96e   : > { %v14904_v39 = vld [vmem:[#allocation176_spill] sm:$0xff] }
 0x970   : > { %4670 = vrot.lane.b32.xlu0 %v12107_v40, %s5358_s13 }
 0x971   : > { %4592 = vrot.lane.b32.xlu1 %v12227_v28, %s5355_s24 }
 0x974   : > { %4674 = vrot.lane.b32.xlu0 %v12122_v50, %s5358_s13 }
 0x975   : > { %4596 = vrot.lane.b32.xlu1 %v12242_v13, %s5355_s24 }
 0x978   : > { %4678 = vrot.lane.b32.xlu0 %v12137_v3, %s5358_s13 }
 0x979   : > { %4600 = vrot.lane.b32.xlu1 %v12257_v46, %s5355_s24 }
 0x97c   : > { %4682 = vrot.lane.b32.xlu0 %v12152_v62, %s5358_s13 }
 0x97d   : > { %4604 = vrot.lane.b32.xlu1 %v12274_v1, %s5355_s24 }
 0x97e   : > { %v12288_v25 = vpop.permute.xlu0 %4426 }
 0x980   : > { %4686 = vrot.lane.b32.xlu0 %v12167_v34, %s5358_s13 }
 0x981   : > { %4608 = vrot.lane.b32.xlu1 %v12291_v36, %s5355_s24 }
 0x982   : > { %v12297_v53 = vpop.permute.xlu0 %4430 }
 0x984   : > { %4688 = vrot.lane.b32.xlu0 %v12291_v36, %s5358_s13 }
 0x985   : > { %4612 = vrot.lane.b32.xlu1 %v12300_v56, %s5355_s24  ;;  %s5257_s24 = scalar_lea.vmem %s5049_s6, 2048 }
 0x986   : > { %v12306_v58 = vpop.permute.xlu0 %4434  ;;  %p5258_p11 = scmp.ne.s32.totalorder %s5049_s6, %s5257_s24  ;;  %p5265_p5 = scmp.lt.s32.totalorder %s5263_s9, %s5257_s24 }
 0x988   : > { %4758 = vrot.lane.b32.xlu0 %v12077_v41, %s5359_s18  ;;  %p5259_p13 = pnand %p5258_p11, %p14949_p12  ;;  %p5266_p8 = por %p5265_p5, %p5264_p3 }
 0x989   : > { %4664 = vrot.lane.b32.xlu1 %v12197_v6, %s5358_s13 }
 0x98a   : > { %v12312_v27 = vpop.permute.xlu0 %4438  ;;  %p5260_p1 = pneg %p5259_p13 }
 0x98c   : > { %4760 = vrot.lane.b32.xlu0 %v12197_v6, %s5359_s18  ;;  %p5267_p10 = pnand %p5266_p8, %p5260_p1 }
 0x98d   : > { %4668 = vrot.lane.b32.xlu1 %v12212_v15, %s5358_s13 }
 0x98e   : > { %v12318_v42 = vpop.permute.xlu0 %4442 }
 0x98f   : > { %14813 = vst [vmem:[#allocation229_spill] sm:$0xff] %v12318_v42 }
 0x990   : > { %4764 = vrot.lane.b32.xlu0 %v12212_v15, %s5359_s18 }
 0x991   : > { %4672 = vrot.lane.b32.xlu1 %v12227_v28, %s5358_s13 }
 0x992   : > { %v12324_v8 = vpop.permute.xlu0 %4446 }
 0x993   : > { %14814 = vst [vmem:[#allocation226_spill] sm:$0xff] %v12324_v8 }
 0x994   : > { %4768 = vrot.lane.b32.xlu0 %v12227_v28, %s5359_s18 }
 0x995   : > { %4676 = vrot.lane.b32.xlu1 %v12242_v13, %s5358_s13 }
 0x996   : > { %v12330_v60 = vpop.permute.xlu0 %4450 }
 0x997   : > { %14815 = vst [vmem:[#allocation220_spill] sm:$0xff] %v12330_v60  ;;  %v14853_v60 = vld [vmem:[#allocation113_spill] sm:$0xff] }
 0x998   : > { %4772 = vrot.lane.b32.xlu0 %v12242_v13, %s5359_s18  ;;  %v1609_v8 = vadd.f32 %v14853_v60, %v1049_v7  ;;  %v1616_v60 = vadd.f32 %v14860_v63, %v1056_v33  ;;  %v14861_v7 = vld [vmem:[#allocation106_spill] sm:$0xff]  ;;  %v14871_v33 = vld [vmem:[#allocation96_spill] sm:$0xff] }
 0x999   : > { %4680 = vrot.lane.b32.xlu1 %v12257_v46, %s5358_s13  ;;  %v1617_v26 = vadd.f32 %v14861_v7, %v1057_v19  ;;  %v14872_v19 = vld [vmem:[#allocation132_spill] sm:$0xff] }
 0x99a   : > { %v12336_v0 = vpop.permute.xlu0 %4486  ;;  %v2169_v7 = vadd.f32 %v14872_v19, %v1609_v8  ;;  %v14881_v19 = vld [vmem:[#allocation141_spill] sm:$0xff] }
 0x99b   : > { %14816 = vst [vmem:[#allocation231_spill] sm:$0xff] %v12336_v0  ;;  %v12338_v49 = vpop.permute.xlu1 %4424 }
 0x99c   : > { %4776 = vrot.lane.b32.xlu0 %v12257_v46, %s5359_s18 }
 0x99d   : > { %4684 = vrot.lane.b32.xlu1 %v12274_v1, %s5358_s13 }
 0x99e   : > { %v12344_v45 = vpop.permute.xlu0 %4490 }
 0x99f   : > { %v12346_v23 = vpop.permute.xlu1 %4428 }
 0x9a0   : > { %4780 = vrot.lane.b32.xlu0 %v12274_v1, %s5359_s18 }
 0x9a1   : > { %4692 = vrot.lane.b32.xlu1 %v12300_v56, %s5358_s13 }
 0x9a2   : > { %v12352_v10 = vpop.permute.xlu0 %4494 }
 0x9a3   : > { %v12354_v5 = vpop.permute.xlu1 %4432 }
 0x9a4   : > { %4784 = vrot.lane.b32.xlu0 %v12291_v36, %s5359_s18 }
 0x9a5   : > { %4690 = vrot.lane.b32.xlu1 %v12182_v35, %s5358_s13 }
 0x9a6   : > { %v12360_v47 = vpop.permute.xlu0 %4498 }
 0x9a7   : > { %v12362_v31 = vpop.permute.xlu1 %4436 }
 0x9a8   : > { %4854 = vrot.lane.b32.xlu0 %v12077_v41, %s5360_s20  ;;  %v1608_v41 = vadd.f32 %v14852_v54, %v1048_v9  ;;  %v1615_v9 = vadd.f32 %v14859_v57, %v1055_v22  ;;  %v14862_v54 = vld [vmem:[#allocation120_spill] sm:$0xff]  ;;  %v14870_v22 = vld [vmem:[#allocation130_spill] sm:$0xff] }
 0x9a9   : > { %4788 = vrot.lane.b32.xlu1 %v12300_v56, %s5359_s18  ;;  %v1618_v29 = vadd.f32 %v14862_v54, %v1058_v43  ;;  %v2167_v57 = vadd.f32 %v14870_v22, %v1607_v32  ;;  %v14873_v43 = vld [vmem:[#allocation128_spill] sm:$0xff]  ;;  %v14878_v32 = vld [vmem:[#allocation131_spill] sm:$0xff]  ;;  %v14879_v22 = vld [vmem:[#allocation129_spill] sm:$0xff] }
 0x9aa   : > { %v12368_v48 = vpop.permute.xlu0 %4502  ;;  %v2168_v63 = vadd.f32 %v14871_v33, %v1608_v41  ;;  %v2170_v54 = vadd.f32 %v14873_v43, %v1610_v59  ;;  %v2175_v41 = vadd.f32 %v14878_v32, %v1615_v9  ;;  %v2176_v8 = vadd.f32 %v14879_v22, %v1616_v60  ;;  %v14880_v33 = vld [vmem:[#allocation69_spill] sm:$0xff]  ;;  %v14887_v32 = vld [vmem:[#allocation124_spill] sm:$0xff] }
 0x9ab   : > { %14817 = vst [vmem:[#allocation227_spill] sm:$0xff] %v12368_v48  ;;  %v12376_v44 = vpop.permute.xlu1 %4440  ;;  %v2177_v59 = vadd.f32 %v14880_v33, %v1617_v26  ;;  %v2178_v43 = vadd.f32 %v14881_v19, %v1618_v29  ;;  %v14886_v48 = vld [vmem:[#allocation150_spill] sm:$0xff]  ;;  %v14888_v22 = vld [vmem:[#allocation152_spill] sm:$0xff]  ;;  %v2731_v19 = vadd.f32 %v14890_v18, %v2171_v37 }
 0x9ac   : > { %14824 = vst [vmem:[#allocation221_spill] sm:$0xff] %v12376_v44  ;;  %4856 = vrot.lane.b32.xlu0 %v12197_v6, %s5360_s20  ;;  %v2727_v9 = vadd.f32 %v14886_v48, %v2167_v57  ;;  %v2728_v60 = vadd.f32 %v14887_v32, %v2168_v63  ;;  %v2729_v26 = vadd.f32 %v14888_v22, %v2169_v7  ;;  %v14889_v33 = vld [vmem:[#allocation148_spill] sm:$0xff]  ;;  %v14894_v48 = vld [vmem:[#allocation161_spill] sm:$0xff]  ;;  %v14897_v32 = vld [vmem:[#allocation162_spill] sm:$0xff] }
 0x9ad   : > { %4762 = vrot.lane.b32.xlu1 %v12092_v20, %s5359_s18  ;;  %v2730_v29 = vadd.f32 %v14889_v33, %v2170_v54  ;;  %v12472_v57 = vadd.f32 %v14894_v48, %v2175_v41  ;;  %v14895_v63 = vld [vmem:[#allocation149_spill] sm:$0xff]  ;;  %v12481_v37 = vadd.f32 %v14897_v32, %v2178_v43  ;;  %v12486_v22 = vadd.f32 %v14899_v21, %v2179_v51  ;;  %v14901_v18 = vld [vmem:[#allocation46_spill] sm:$0xff]  ;;  %v14907_v32 = vld [vmem:[#allocation183_spill] sm:$0xff] }
 0x9ae   : > { %v12406_v38 = vpop.permute.xlu0 %4506  ;;  %v12475_v7 = vadd.f32 %v14895_v63, %v2176_v8  ;;  %v14896_v54 = vld [vmem:[#allocation145_spill] sm:$0xff]  ;;  %v12492_v41 = vadd.f32 %v14901_v18, %v2181_v12  ;;  %v14906_v63 = vld [vmem:[#allocation168_spill] sm:$0xff]  ;;  %v4467_v51 = vsel %vm365_vm0, %v12338_v49, %v12288_v25  ;;  %v14910_v18 = vld [vmem:[#allocation191_spill] sm:$0xff] }
 0x9af   : > { %14849 = vst [vmem:[#allocation223_spill] sm:$0xff] %v12406_v38  ;;  %v12408_v24 = vpop.permute.xlu1 %4444  ;;  %v14858_v38 = vld [vmem:[#allocation119_spill] sm:$0xff] }
 0x9b0   : > { %14850 = vst [vmem:[#allocation215_spill] sm:$0xff] %v12408_v24  ;;  %4860 = vrot.lane.b32.xlu0 %v12212_v15, %s5360_s20  ;;  %v1614_v44 = vadd.f32 %v14858_v38, %v1054_v2  ;;  %v14867_v38 = vld [vmem:[#allocation80_spill] sm:$0xff]  ;;  %v14868_v2 = vld [vmem:[#allocation123_spill] sm:$0xff] }
 0x9b1   : > { %4766 = vrot.lane.b32.xlu1 %v12107_v40, %s5359_s18  ;;  %v1606_v42 = vadd.f32 %v14868_v2, %v14867_v38  ;;  %v14877_v38 = vld [vmem:[#allocation135_spill] sm:$0xff] }
 0x9b2   : > { %v12426_v24 = vpop.permute.xlu0 %4510  ;;  %v2174_v2 = vadd.f32 %v14877_v38, %v1614_v44  ;;  %v14885_v44 = vld [vmem:[#allocation134_spill] sm:$0xff] }
 0x9b3   : > { %14863 = vst [vmem:[#allocation222_spill] sm:$0xff] %v12426_v24  ;;  %v12433_v56 = vpop.permute.xlu1 %4448  ;;  %v2166_v38 = vadd.f32 %v14885_v44, %v1606_v42  ;;  %v14893_v42 = vld [vmem:[#allocation156_spill] sm:$0xff]  ;;  %v12478_v44 = vadd.f32 %v14896_v54, %v2177_v59  ;;  %v3287_v59 = vadd.f32 %v14904_v39, %v2727_v9  ;;  %v3289_v54 = vadd.f32 %v14906_v63, %v2729_v26  ;;  %v14908_v9 = vld [vmem:[#allocation198_spill] sm:$0xff]  ;;  %v14909_v26 = vld [vmem:[#allocation195_spill] sm:$0xff] }
 0x9b4   : > { %14869 = vst [vmem:[#allocation230_spill] sm:$0xff] %v12433_v56  ;;  %4864 = vrot.lane.b32.xlu0 %v12227_v28, %s5360_s20  ;;  %v2734_v61 = vadd.f32 %v14893_v42, %v2174_v2  ;;  %v14900_v2 = vld [vmem:[#allocation157_spill] sm:$0xff]  ;;  %v14905_v42 = vld [vmem:[#allocation172_spill] sm:$0xff]  ;;  %v14912_v63 = vld [vmem:[#allocation175_spill] sm:$0xff] }
 0x9b5   : > { %4770 = vrot.lane.b32.xlu1 %v12122_v50, %s5359_s18  ;;  %v12489_v33 = vadd.f32 %v14900_v2, %v2180_v14  ;;  %v12495_v8 = vadd.f32 %v14902_v55, %v2166_v38  ;;  %v3288_v48 = vadd.f32 %v14905_v42, %v2728_v60  ;;  %v4468_v14 = vsel %vm365_vm0, %v12265_v52, %v12338_v49  ;;  %v14911_v39 = vld [vmem:[#allocation205_spill] sm:$0xff] }
 0x9b6   : > { %v12451_v56 = vpop.permute.xlu0 %4514  ;;  %v3847_v60 = vadd.f32 %v14908_v9, %v3287_v59  ;;  %v3849_v55 = vadd.f32 %v14910_v18, %v3289_v54  ;;  %v4465_v54 = vsel %vm365_vm0, %v12346_v23, %v12297_v53  ;;  %v14917_v18 = vld [vmem:[#allocation173_spill] sm:$0xff] }
 0x9b7   : > { %v12457_v24 = vpop.permute.xlu1 %4452  ;;  %14903 = vst [vmem:[#allocation216_spill] sm:$0xff] %v12495_v8 }
 0x9b8   : > { %4868 = vrot.lane.b32.xlu0 %v12242_v13, %s5360_s20  ;;  %v4407_v8 = vadd.f32 %v12197_v6, %v3847_v60 }
 0x9b9   : > { %4774 = vrot.lane.b32.xlu1 %v12137_v3, %s5359_s18 }
 0x9ba   : > { %v12483_v11 = vpop.permute.xlu0 %4582 }
 0x9bb   : > { %14898 = vst [vmem:[#allocation72_spill] sm:$0xff] %v12483_v11  ;;  %v4489_v43 = vpop.permute.xlu1 %4488  ;;  %v3290_v11 = vadd.f32 %v14907_v32, %v2730_v29  ;;  %v3848_v29 = vadd.f32 %v14909_v26, %v3288_v48  ;;  %v14913_v32 = vld [vmem:[#allocation179_spill] sm:$0xff]  ;;  %v14915_v26 = vld [vmem:[#allocation201_spill] sm:$0xff] }
 0x9bc   : > { %v4531_v12 = vsel %vm591_vm10, %v4489_v43, %v12344_v45  ;;  %v4532_v38 = vsel %vm591_vm10, %v12336_v0, %v4489_v43  ;;  %4872 = vrot.lane.b32.xlu0 %v12257_v46, %s5360_s20  ;;  %v3291_v43 = vadd.f32 %v14912_v63, %v2731_v19  ;;  %v3292_v0 = vadd.f32 %v14913_v32, %v2732_v30 }
 0x9bd   : > { %v4551_v21 = vadd.f32 %v4532_v38, %v4468_v14  ;;  %v4552_v2 = vadd.f32 %v4531_v12, %v4467_v51  ;;  %4778 = vrot.lane.b32.xlu1 %v12152_v62, %s5359_s18  ;;  %v3850_v42 = vadd.f32 %v14911_v39, %v3290_v11  ;;  %v4408_v59 = vadd.f32 %v12092_v20, %v3848_v29 }
 0x9be   : > { %v12521_v49 = vpop.permute.xlu0 %4586  ;;  %v4466_v19 = vsel %vm365_vm0, %v12288_v25, %v12346_v23  ;;  %v14914_v25 = vld [vmem:[#allocation206_spill] sm:$0xff]  ;;  %v3852_v29 = vadd.f32 %v14915_v26, %v3292_v0  ;;  %v4463_v0 = vsel %vm365_vm0, %v12354_v5, %v12306_v58 }
 0x9bf   : > { %v4567_v48 = vmul.f32 %v4551_v21, %v14786_v16  ;;  %v4568_v51 = vmul.f32 %v4552_v2, %v14786_v16  ;;  %v4493_v14 = vpop.permute.xlu1 %4492  ;;  %v3851_v23 = vadd.f32 %v14914_v25, %v3291_v43  ;;  %v14916_v21 = vld [vmem:[#allocation184_spill] sm:$0xff]  ;;  %v4410_v39 = vadd.f32 %v12107_v40, %v3850_v42 }
 0x9c0   : > { %v4529_v6 = vsel %vm591_vm10, %v4493_v14, %v12352_v10  ;;  %v4530_v30 = vsel %vm591_vm10, %v12344_v45, %v4493_v14  ;;  %4876 = vrot.lane.b32.xlu0 %v12274_v1, %s5360_s20  ;;  %v3293_v2 = vadd.f32 %v14916_v21, %v2733_v4  ;;  %v3294_v45 = vadd.f32 %v14917_v18, %v2734_v61  ;;  %v14919_v14 = vld [vmem:[#allocation196_spill] sm:$0xff] }
 0x9c1   : > { %v4967_v11 = vadd.f32 %v4567_v48, %v4407_v8  ;;  %v4968_v12 = vadd.f32 %v4568_v51, %v4408_v59  ;;  %v4553_v38 = vadd.f32 %v4530_v30, %v4466_v19  ;;  %v4554_v9 = vadd.f32 %v4529_v6, %v4465_v54  ;;  %4782 = vrot.lane.b32.xlu1 %v12167_v34, %s5359_s18  ;;  %v14920_v19 = vld [vmem:[#allocation51_spill] sm:$0xff] }
 0x9c2   : > { %v12549_v60 = vpop.permute.xlu0 %4590  ;;  %v4409_v8 = vadd.f32 %v12212_v15, %v3849_v55  ;;  %v4464_v4 = vsel %vm365_vm0, %v12297_v53, %v12354_v5  ;;  %v14918_v53 = vld [vmem:[#allocation50_spill] sm:$0xff]  ;;  %v3854_v54 = vadd.f32 %v14919_v14, %v3294_v45  ;;  %v3295_v6 = vadd.f32 %v14920_v19, %v12472_v57  ;;  %v14923_v45 = vld [vmem:[#allocation219_spill] sm:$0xff] }
 0x9c3   : > { %4999 = vst [vmem:[%s12556_s23 + $0x8] sm:$0xff] %v4967_v11  ;;  %5000 = vst [vmem:[%s12556_s23 + $0x10] sm:$0xff] %v4968_v12  ;;  %v4569_v63 = vmul.f32 %v4553_v38, %v14786_v16  ;;  %v4570_v43 = vmul.f32 %v4554_v9, %v14786_v16  ;;  %v4497_v32 = vpop.permute.xlu1 %4496  ;;  %v3853_v5 = vadd.f32 %v14918_v53, %v3293_v2 }
 0x9c4   : > { %v4527_v15 = vsel %vm591_vm10, %v4497_v32, %v12360_v47  ;;  %v4528_v61 = vsel %vm591_vm10, %v12352_v10, %v4497_v32  ;;  %4880 = vrot.lane.b32.xlu0 %v12291_v36, %s5360_s20  ;;  %v14921_v10 = vld [vmem:[#allocation185_spill] sm:$0xff]  ;;  %v4411_v11 = vadd.f32 %v12227_v28, %v3851_v23  ;;  %v4412_v12 = vadd.f32 %v12122_v50, %v3852_v29  ;;  %v14922_v28 = vld [vmem:[#allocation227_spill] sm:$0xff] }
 0x9c5   : > { %v4969_v55 = vadd.f32 %v4569_v63, %v4409_v8  ;;  %v4970_v42 = vadd.f32 %v4570_v43, %v4410_v39  ;;  %v4555_v59 = vadd.f32 %v4528_v61, %v4464_v4  ;;  %v4556_v48 = vadd.f32 %v4527_v15, %v4463_v0  ;;  %4786 = vrot.lane.b32.xlu1 %v12182_v35, %s5359_s18  ;;  %v14924_v39 = vld [vmem:[#allocation192_spill] sm:$0xff]  ;;  %v14926_v43 = vld [vmem:[#allocation62_spill] sm:$0xff] }
 0x9c6   : > { %v12582_v51 = vpop.permute.xlu0 %4594  ;;  %v3296_v30 = vadd.f32 %v14921_v10, %v12475_v7  ;;  %v4461_v57 = vsel %vm365_vm0, %v12362_v31, %v12312_v27  ;;  %v4462_v7 = vsel %vm365_vm0, %v12306_v58, %v12362_v31  ;;  %v3855_v63 = vadd.f32 %v14924_v39, %v3295_v6  ;;  %v14925_v58 = vld [vmem:[#allocation207_spill] sm:$0xff]  ;;  %v14927_v0 = vld [vmem:[#allocation180_spill] sm:$0xff] }
 0x9c7   : > { %5001 = vst [vmem:[%s12556_s23 + $0x18] sm:$0xff] %v4969_v55  ;;  %5002 = vst [vmem:[%s12556_s23 + $0x20] sm:$0xff] %v4970_v42  ;;  %v4571_v38 = vmul.f32 %v4555_v59, %v14786_v16  ;;  %v4572_v9 = vmul.f32 %v4556_v48, %v14786_v16  ;;  %v4501_v25 = vpop.permute.xlu1 %4500  ;;  %v3297_v32 = vadd.f32 %v14926_v43, %v12478_v44  ;;  %v14928_v59 = vld [vmem:[#allocation229_spill] sm:$0xff] }
 0x9c8   : > { %v4525_v23 = vsel %vm591_vm10, %v4501_v25, %v14922_v28  ;;  %v4526_v26 = vsel %vm591_vm10, %v12360_v47, %v4501_v25  ;;  %v3856_v31 = vadd.f32 %v14925_v58, %v3296_v30  ;;  %v3298_v4 = vadd.f32 %v14927_v0, %v12481_v37  ;;  %v14929_v48 = vld [vmem:[#allocation221_spill] sm:$0xff]  ;;  %v14931_v30 = vld [vmem:[#allocation99_spill] sm:$0xff]  ;;  %v14934_v25 = vld [vmem:[#allocation174_spill] sm:$0xff] }
 0x9c9   : > { %v4971_v29 = vadd.f32 %v4571_v38, %v4411_v11  ;;  %v4972_v21 = vadd.f32 %v4572_v9, %v4412_v12  ;;  %v4557_v2 = vadd.f32 %v4526_v26, %v4462_v7  ;;  %v4558_v18 = vadd.f32 %v4525_v23, %v4461_v57  ;;  %4884 = vrot.lane.b32.xlu1 %v14923_v45, %s5360_s20  ;;  %v14933_v38 = vld [vmem:[#allocation66_spill] sm:$0xff] }
 0x9ca   : > { %v12612_v8 = vpop.permute.xlu0 %4598  ;;  %v4413_v47 = vadd.f32 %v12242_v13, %v3853_v5  ;;  %v4414_v15 = vadd.f32 %v12137_v3, %v3854_v54  ;;  %v4459_v44 = vsel %vm365_vm0, %v14929_v48, %v14928_v59  ;;  %v4460_v37 = vsel %vm365_vm0, %v12312_v27, %v14929_v48  ;;  %v14930_v13 = vld [vmem:[#allocation223_spill] sm:$0xff]  ;;  %v14932_v27 = vld [vmem:[#allocation202_spill] sm:$0xff] }
 0x9cb   : > { %5003 = vst [vmem:[%s12556_s23 + $0x28] sm:$0xff] %v4971_v29  ;;  %5004 = vst [vmem:[%s12556_s23 + $0x30] sm:$0xff] %v4972_v21  ;;  %v4573_v61 = vmul.f32 %v4557_v2, %v14786_v16  ;;  %v4574_v55 = vmul.f32 %v4558_v18, %v14786_v16  ;;  %v4505_v42 = vpop.permute.xlu1 %4504  ;;  %v3857_v11 = vadd.f32 %v14931_v30, %v3297_v32  ;;  %v14935_v29 = vld [vmem:[#allocation226_spill] sm:$0xff]  ;;  %v14936_v21 = vld [vmem:[#allocation215_spill] sm:$0xff] }
 0x9cc   : > { %v4523_v53 = vsel %vm591_vm10, %v4505_v42, %v14930_v13  ;;  %v4524_v5 = vsel %vm591_vm10, %v14922_v28, %v4505_v42  ;;  %v3858_v12 = vadd.f32 %v14932_v27, %v3298_v4  ;;  %v3299_v9 = vadd.f32 %v14933_v38, %v12486_v22  ;;  %v14938_v0 = vld [vmem:[#allocation102_spill] sm:$0xff]  ;;  %v14941_v42 = vld [vmem:[#allocation220_spill] sm:$0xff] }
 0x9cd   : > { %v4973_v14 = vadd.f32 %v4573_v61, %v4413_v47  ;;  %v4974_v54 = vadd.f32 %v4574_v55, %v4414_v15  ;;  %v4559_v19 = vadd.f32 %v4524_v5, %v4460_v37  ;;  %v4560_v6 = vadd.f32 %v4523_v53, %v4459_v44  ;;  %4858 = vrot.lane.b32.xlu1 %v12092_v20, %s5360_s20  ;;  %v14939_v47 = vld [vmem:[#allocation197_spill] sm:$0xff]  ;;  %v14940_v61 = vld [vmem:[#allocation140_spill] sm:$0xff] }
 0x9ce   : > { %v12642_v10 = vpop.permute.xlu0 %4602  ;;  %v3300_v57 = vadd.f32 %v14934_v25, %v12489_v33  ;;  %v4415_v7 = vadd.f32 %v12257_v46, %v3855_v63  ;;  %v4416_v28 = vadd.f32 %v12152_v62, %v3856_v31  ;;  %v4457_v22 = vsel %vm365_vm0, %v14936_v21, %v14935_v29  ;;  %v14937_v46 = vld [vmem:[#allocation222_spill] sm:$0xff] }
 0x9cf   : > { %5005 = vst [vmem:[%s12556_s23 + $0x38] sm:$0xff] %v4973_v14  ;;  %5006 = vst [vmem:[%s12556_s23 + $0x40] sm:$0xff] %v4974_v54  ;;  %v4575_v20 = vmul.f32 %v4559_v19, %v14786_v16  ;;  %v4576_v23 = vmul.f32 %v4560_v6, %v14786_v16  ;;  %v4509_v26 = vpop.permute.xlu1 %4508  ;;  %v4458_v33 = vsel %vm365_vm0, %v14928_v59, %v14936_v21  ;;  %v14942_v59 = vld [vmem:[#allocation230_spill] sm:$0xff] }
 0x9d0   : > { %v4521_v2 = vsel %vm591_vm10, %v4509_v26, %v14937_v46  ;;  %v4522_v18 = vsel %vm591_vm10, %v14930_v13, %v4509_v26  ;;  %v4417_v43 = vadd.f32 %v12274_v1, %v3857_v11  ;;  %v3859_v4 = vadd.f32 %v14938_v0, %v3299_v9  ;;  %v14943_v11 = vld [vmem:[#allocation143_spill] sm:$0xff] }
 0x9d1   : > { %v4975_v39 = vadd.f32 %v4575_v20, %v4415_v7  ;;  %v4976_v63 = vadd.f32 %v4576_v23, %v4416_v28  ;;  %v4561_v58 = vadd.f32 %v4522_v18, %v4458_v33  ;;  %v4562_v31 = vadd.f32 %v4521_v2, %v4457_v22  ;;  %4862 = vrot.lane.b32.xlu1 %v12107_v40, %s5360_s20  ;;  %v14946_v23 = vld [vmem:[#allocation231_spill] sm:$0xff] }
 0x9d2   : > { %v12673_v32 = vpop.permute.xlu0 %4606  ;;  %v3860_v15 = vadd.f32 %v14939_v47, %v3300_v57  ;;  %v3301_v55 = vadd.f32 %v14940_v61, %v12492_v41  ;;  %v4455_v48 = vsel %vm365_vm0, %v14942_v59, %v14941_v42  ;;  %v4418_v40 = vadd.f32 %v12167_v34, %v3858_v12  ;;  %v14945_v12 = vld [vmem:[#allocation158_spill] sm:$0xff] }
 0x9d3   : > { %5007 = vst [vmem:[%s12556_s23 + $0x48] sm:$0xff] %v4975_v39  ;;  %5008 = vst [vmem:[%s12556_s23 + $0x50] sm:$0xff] %v4976_v63  ;;  %v4577_v1 = vmul.f32 %v4561_v58, %v14786_v16  ;;  %v4578_v44 = vmul.f32 %v4562_v31, %v14786_v16  ;;  %v4513_v37 = vpop.permute.xlu1 %4512  ;;  %v4456_v41 = vsel %vm365_vm0, %v14935_v29, %v14942_v59  ;;  %v14948_v58 = vld [vmem:[#allocation208_spill] sm:$0xff] }
 0x9d4   : > { %v4469_v13 = vsel %vm365_vm0, %v12457_v24, %v12265_v52  ;;  %v4519_v53 = vsel %vm591_vm10, %v4513_v37, %v12451_v56  ;;  %v4520_v5 = vsel %vm591_vm10, %v14937_v46, %v4513_v37  ;;  %v3861_v27 = vadd.f32 %v14943_v11, %v3301_v55  ;;  %v14944_v52 = vld [vmem:[#allocation216_spill] sm:$0xff] }
 0x9d5   : > { %v4977_v14 = vadd.f32 %v4577_v1, %v4417_v43  ;;  %v4978_v54 = vadd.f32 %v4578_v44, %v4418_v40  ;;  %v4563_v19 = vadd.f32 %v4520_v5, %v4456_v41  ;;  %v4564_v6 = vadd.f32 %v4519_v53, %v4455_v48  ;;  %4866 = vrot.lane.b32.xlu1 %v12122_v50, %s5360_s20 }
 0x9d6   : > { %v12704_v30 = vpop.permute.xlu0 %4610  ;;  %v3286_v38 = vadd.f32 %v14945_v12, %v14944_v52  ;;  %v4419_v9 = vadd.f32 %v12291_v36, %v3859_v4  ;;  %v4420_v25 = vadd.f32 %v12182_v35, %v3860_v15  ;;  %v4454_v28 = vsel %vm365_vm0, %v14941_v42, %v12457_v24  ;;  %v14947_v24 = vld [vmem:[#allocation186_spill] sm:$0xff] }
 0x9d7   : > { %5009 = vst [vmem:[%s12556_s23 + $0x58] sm:$0xff] %v4977_v14  ;;  %5010 = vst [vmem:[%s12556_s23 + $0x60] sm:$0xff] %v4978_v54  ;;  %v4579_v57 = vmul.f32 %v4563_v19, %v14786_v16  ;;  %v4580_v7 = vmul.f32 %v4564_v6, %v14786_v16  ;;  %v4517_v50 = vpop.permute.xlu1 %4516  ;;  %v4470_v20 = vsel %vm233_vm1, %v4469_v13, 0.0 }
 0x9d8   : > { %v4518_v36 = vsel %vm591_vm10, %v12451_v56, %v4517_v50  ;;  %v4533_v26 = vsel %vm591_vm10, %v4517_v50, %v14946_v23  ;;  %v3846_v46 = vadd.f32 %v14947_v24, %v3286_v38  ;;  %v4421_v56 = vadd.f32 %v14923_v45, %v3861_v27 }
 0x9d9   : > { %v4979_v29 = vadd.f32 %v4579_v57, %v4419_v9  ;;  %v4980_v21 = vadd.f32 %v4580_v7, %v4420_v25  ;;  %v4534_v22 = vsel %vm249_vm11, %v4533_v26, 0.0  ;;  %v4565_v33 = vadd.f32 %v4518_v36, %v4454_v28  ;;  %4870 = vrot.lane.b32.xlu1 %v12137_v3, %s5360_s20 }
 0x9da   : > { %v4550_v2 = vadd.f32 %v4534_v22, %v4470_v20  ;;  %v12732_v18 = vpop.permute.xlu0 %4662  ;;  %v4406_v3 = vadd.f32 %v14948_v58, %v3846_v46 }
 0x9db   : > { %5011 = vst [vmem:[%s12556_s23 + $0x68] sm:$0xff] %v4979_v29  ;;  %5012 = vst [vmem:[%s12556_s23 + $0x70] sm:$0xff] %v4980_v21  ;;  %v4581_v39 = vmul.f32 %v4565_v33, %v14786_v16  ;;  %v12738_v63 = vpop.permute.xlu1 %4584 }
 0x9dc   : > { %v4566_v31 = vmul.f32 %v4550_v2, %v14786_v16  ;;  %v12746_v43 = vsel %vm446_vm2, %v12738_v63, %v12521_v49 }
 0x9dd   : > { %v4981_v0 = vadd.f32 %v4581_v39, %v4421_v56  ;;  %4874 = vrot.lane.b32.xlu1 %v12152_v62, %s5360_s20 }
 0x9de   : > { %v4966_v45 = vadd.f32 %v4566_v31, %v4406_v3  ;;  %v12750_v4 = vpop.permute.xlu0 %4666 }
 0x9df   : > { %5013 = vst [vmem:[%s12556_s23 + $0x78] sm:$0xff] %v4981_v0  ;;  %v4589_v47 = vpop.permute.xlu1 %4588 }
 0x9e0   : > { %4998 = vst [vmem:[%s12556_s23] sm:$0xff] %v4966_v45  ;;  %v12758_v16 = vsel %vm446_vm2, %v4589_v47, %v12549_v60  ;;  %v12763_v15 = vsel %vm446_vm2, %v12521_v49, %v4589_v47 }
 0x9e1   : > { %4878 = vrot.lane.b32.xlu1 %v12167_v34, %s5360_s20 }
 0x9e2   : > { %v12775_v62 = vpop.permute.xlu0 %4670 }
 0x9e3   : > { %v4593_v61 = vpop.permute.xlu1 %4592 }
 0x9e4   : > { %5270 = shalt.err (!%p5267_p10)
}
 0x9e5   : > { %s5271_s10 = scalar_lea.hbm %s12772_s4, 2048  ;;  %s5275_s18 = scalar_lea.hbm %s13260_s3, 4096 }
 0x9e6   : > { %p5272_p2 = scmp.ne.s32.totalorder %s12772_s4, %s5271_s10  ;;  %p5276_p7 = scmp.lt.s32.totalorder %s12772_s4, %s13260_s3 }
 0x9e7   : > { %p5277_p0 = scmp.lt.s32.totalorder %s5275_s18, %s5271_s10 }
 0x9e8   : > { %p5273_p4 = pnand %p5272_p2, %p14949_p12 }
 0x9e9   : > { %p5278_p6 = por %p5277_p0, %p5276_p7 }
 0x9ea   : > { %p5274_p9 = pneg %p5273_p4 }
 0x9ec   : > { %p5279_p11 = pnand %p5278_p6, %p5274_p9 }
 0x9ee   : > { %5282 = shalt.err (!%p5279_p11)
}
 0x9ef   : > { %5174 = dma.vmem_to_hbm [thread:$0]  (%p14949_p12), %s5049_s6, 2048, %s12772_s4, %s5020_s5   ;;  %v4623_v34 = vsel %vm446_vm2, %v4593_v61, %v12582_v51  ;;  %v4624_v49 = vsel %vm446_vm2, %v12549_v60, %v4593_v61  ;;  %4882 = vrot.lane.b32.xlu1 %v12182_v35, %s5360_s20  ;;  %v4675_v55 = vpop.permute.xlu0 %4674  ;;  %v4597_v42 = vpop.permute.xlu1 %4596  ;;  %v14950_v19 = vld [vmem:[#allocation17_spill] sm:$0xff]  ;;  %v14951_v11 = vld [vmem:[#allocation18_spill] sm:$0xff]  ;;  %v14952_v52 = vld [vmem:[#allocation72_spill] sm:$0xff] }
 0x9f0   : > { %v4621_v59 = vsel %vm446_vm2, %v4597_v42, %v12612_v8  ;;  %v4622_v48 = vsel %vm446_vm2, %v12582_v51, %v4597_v42  ;;  %v4649_v50 = vmul.f32 %v12746_v43, %v14950_v19  ;;  %v4650_v33 = vmul.f32 %v12763_v15, %v14950_v19  ;;  %s5034_s20 = sshll.u32 %s5681_s12, 4  ;;  %s5032_s4 = scalar_lea.hbm %s13259_s2, %s5169_s27  ;;  %s5035_s20 = int_to_ptr.vmem [resolvable:$true] %s5034_s20 }
 0x9f1   : > { %v4651_v24 = vmul.f32 %v12758_v16, %v14950_v19  ;;  %v4652_v43 = vmul.f32 %v4624_v49, %v14950_v19  ;;  %v4653_v0 = vmul.f32 %v4623_v34, %v14950_v19  ;;  %v4654_v34 = vmul.f32 %v4622_v48, %v14950_v19  ;;  %s5015_s6 = scalar_lea.sflag [#allocation5], %s5484_s29  ;;  %s5283_s5 = scalar_lea.vmem %s5035_s20, 2048 }
 0x9f2   : > { %v4655_v49 = vmul.f32 %v4621_v59, %v14950_v19  ;;  %p5284_p13 = scmp.ne.s32.totalorder %s5035_s20, %s5283_s5  ;;  %s5362_s24 = smov [#allocation6]  }
 0x9f3   : > { %v12808_v40 = vpop.permute.xlu0 %4678  ;;  %v4601_v1 = vpop.permute.xlu1 %4600  ;;  %s5287_s7 = sshll.u32 %s5362_s24, 4  ;;  %s5288_s7 = int_to_ptr.vmem [resolvable:$false] %s5287_s7 }
 0x9f4   : > { %v12813_v60 = vsel %vm446_vm2, %v4601_v1, %v12642_v10  ;;  %v4620_v35 = vsel %vm446_vm2, %v12612_v8, %v4601_v1  ;;  %p5285_p1 = pnand %p5284_p13, %p14949_p12  ;;  %s5289_s8 = scalar_lea.vmem %s5288_s7, 4096 }
 0x9f5   : > { %v4656_v59 = vmul.f32 %v4620_v35, %v14950_v19  ;;  %v4657_v48 = vmul.f32 %v12813_v60, %v14950_v19  ;;  %p5290_p5 = scmp.lt.s32.totalorder %s5035_s20, %s5288_s7  ;;  %p5291_p8 = scmp.lt.s32.totalorder %s5289_s8, %s5283_s5 }
 0x9f6   : > { %p5286_p3 = pneg %p5285_p1 }
 0x9f7   : > { %v12818_v44 = vpop.permute.xlu0 %4682  ;;  %v4605_v37 = vpop.permute.xlu1 %4604  ;;  %p5292_p10 = por %p5291_p8, %p5290_p5 }
 0x9f8   : > { %v12823_v41 = vsel %vm446_vm2, %v4605_v37, %v12673_v32  ;;  %v12828_v51 = vsel %vm446_vm2, %v12642_v10, %v4605_v37 }
 0x9f9   : > { %v4658_v60 = vmul.f32 %v12828_v51, %v14950_v19  ;;  %p5293_p2 = pnand %p5292_p10, %p5286_p3 }
 0x9fb   : > { %v12830_v13 = vpop.permute.xlu0 %4686  ;;  %v4609_v53 = vpop.permute.xlu1 %4608 }
 0x9fc   : > { %v12835_v8 = vsel %vm446_vm2, %v4609_v53, %v12704_v30  ;;  %v4616_v5 = vsel %vm446_vm2, %v12673_v32, %v4609_v53  ;;  %v4628_v32 = vsel %vm446_vm2, %v14952_v52, %v12738_v63 }
 0x9fd   : > { %v4660_v6 = vmul.f32 %v4616_v5, %v14950_v19  ;;  %v4648_v7 = vmul.f32 %v4628_v32, %v14950_v19 }
 0x9ff   : > { %v12840_v14 = vpop.permute.xlu0 %4688  ;;  %v4613_v54 = vpop.permute.xlu1 %4612 }
 0xa00   : > { %v4696_v10 = vsel %vm770_vm4, %v12830_v13, %v12840_v14  ;;  %v4629_v30 = vsel %vm446_vm2, %v4613_v54, %v14952_v52 }
 0xa01   : > { %v4740_v27 = vmul.f32 %v4696_v10, %v14951_v11 }
 0xa03   : > { %v12855_v12 = vadd.f32 %v4740_v27, %v4660_v6  ;;  %v12857_v38 = vpop.permute.xlu0 %4758  ;;  %v4665_v9 = vpop.permute.xlu1 %4664 }
 0xa04   : > { %v4707_v25 = vsel %vm770_vm4, %v4665_v9, %v12750_v4  ;;  %v4708_v57 = vsel %vm770_vm4, %v12732_v18, %v4665_v9 }
 0xa05   : > { %v4728_v28 = vmul.f32 %v4708_v57, %v14951_v11  ;;  %v4729_v20 = vmul.f32 %v4707_v25, %v14951_v11 }
 0xa07   : > { %v12870_v36 = vpop.permute.xlu0 %4760  ;;  %v12872_v23 = vadd.f32 %v4728_v28, %v4648_v7  ;;  %v12874_v26 = vadd.f32 %v4729_v20, %v4649_v50  ;;  %v4669_v29 = vpop.permute.xlu1 %4668  ;;  %v4659_v7 = vmul.f32 %v12823_v41, %v14950_v19 }
 0xa08   : > { %v4705_v21 = vsel %vm770_vm4, %v4669_v29, %v12775_v62  ;;  %v4706_v22 = vsel %vm770_vm4, %v12750_v4, %v4669_v29 }
 0xa09   : > { %v4730_v46 = vmul.f32 %v4706_v22, %v14951_v11  ;;  %v4731_v2 = vmul.f32 %v4705_v21, %v14951_v11  ;;  %v4631_v21 = vsel %vm266_vm3, %v4629_v30, 0.0 }
 0xa0b   : > { %v12888_v56 = vpop.permute.xlu0 %4764  ;;  %v12890_v39 = vadd.f32 %v4730_v46, %v4650_v33  ;;  %v12892_v63 = vadd.f32 %v4731_v2, %v4651_v24  ;;  %v4673_v58 = vpop.permute.xlu1 %4672  ;;  %v4647_v33 = vmul.f32 %v4631_v21, %v14950_v19 }
 0xa0c   : > { %v4703_v3 = vsel %vm770_vm4, %v4673_v58, %v4675_v55  ;;  %v4704_v31 = vsel %vm770_vm4, %v12775_v62, %v4673_v58 }
 0xa0d   : > { %v4732_v45 = vmul.f32 %v4704_v31, %v14951_v11  ;;  %v4733_v4 = vmul.f32 %v4703_v3, %v14951_v11  ;;  %v4804_v3 = vsel %vm868_vm5, %v12857_v38, %v12870_v36 }
 0xa0f   : > { %v12903_v47 = vpop.permute.xlu0 %4768  ;;  %v12905_v16 = vadd.f32 %v4732_v45, %v4652_v43  ;;  %v12907_v15 = vadd.f32 %v4733_v4, %v4653_v0  ;;  %v4677_v61 = vpop.permute.xlu1 %4676  ;;  %v4824_v4 = vmul.f32 %v4804_v3, %v14951_v11  ;;  %v14968_v3 = vld [vmem:[#allocation90_spill] sm:$0xff] }
 0xa10   : > { %v4701_v42 = vsel %vm770_vm4, %v4677_v61, %v12808_v40  ;;  %v4702_v62 = vsel %vm770_vm4, %v4675_v55, %v4677_v61 }
 0xa11   : > { %v4734_v1 = vmul.f32 %v4702_v62, %v14951_v11  ;;  %v4735_v37 = vmul.f32 %v4701_v42, %v14951_v11  ;;  %v4840_v42 = vadd.f32 %v4824_v4, %v12872_v23  ;;  %v14959_v23 = vld [vmem:[#allocation20_spill] sm:$0xff]  ;;  %v14969_v4 = vld [vmem:[#allocation98_spill] sm:$0xff] }
 0xa13   : > { %v12918_v53 = vpop.permute.xlu0 %4772  ;;  %v12920_v5 = vadd.f32 %v4734_v1, %v4654_v34  ;;  %v12922_v10 = vadd.f32 %v4735_v37, %v4655_v49  ;;  %v4681_v54 = vpop.permute.xlu1 %4680  ;;  %v14954_v1 = vld [vmem:[#allocation13_spill] sm:$0xff] }
 0xa14   : > { %v4699_v6 = vsel %vm770_vm4, %v4681_v54, %v12818_v44  ;;  %v4700_v55 = vsel %vm770_vm4, %v12808_v40, %v4681_v54 }
 0xa15   : > { %v4736_v27 = vmul.f32 %v4700_v55, %v14951_v11  ;;  %v4737_v52 = vmul.f32 %v4699_v6, %v14951_v11 }
 0xa17   : > { %v12935_v32 = vpop.permute.xlu0 %4776  ;;  %v12937_v9 = vadd.f32 %v4736_v27, %v4656_v59  ;;  %v12939_v25 = vadd.f32 %v4737_v52, %v4657_v48  ;;  %v4685_v57 = vpop.permute.xlu1 %4684  ;;  %v14955_v59 = vld [vmem:[#allocation14_spill] sm:$0xff]  ;;  %v14957_v52 = vld [vmem:[#allocation16_spill] sm:$0xff] }
 0xa18   : > { %v4697_v40 = vsel %vm770_vm4, %v4685_v57, %v12830_v13  ;;  %v4698_v35 = vsel %vm770_vm4, %v12818_v44, %v4685_v57  ;;  %v14956_v48 = vld [vmem:[#allocation78_spill] sm:$0xff]  ;;  %v14958_v57 = vld [vmem:[#allocation88_spill] sm:$0xff] }
 0xa19   : > { %v4738_v50 = vmul.f32 %v4698_v35, %v14951_v11  ;;  %v4739_v28 = vmul.f32 %v4697_v40, %v14951_v11  ;;  %v1033_v27 = vadd.f32 %v14956_v48, %v14955_v59  ;;  %v1035_v40 = vadd.f32 %v14958_v57, %v14957_v52  ;;  %v14960_v35 = vld [vmem:[#allocation83_spill] sm:$0xff]  ;;  %v14972_v59 = vld [vmem:[#allocation118_spill] sm:$0xff] }
 0xa1a   : > { %v14973_v52 = vld [vmem:[#allocation122_spill] sm:$0xff] }
 0xa1b   : > { %v12953_v20 = vpop.permute.xlu0 %4780  ;;  %v12957_v13 = vadd.f32 %v4738_v50, %v4658_v60  ;;  %v12959_v22 = vadd.f32 %v4739_v28, %v4659_v7  ;;  %v4693_v44 = vpop.permute.xlu1 %4692  ;;  %v1037_v60 = vadd.f32 %v14960_v35, %v14959_v23  ;;  %v14961_v50 = vld [vmem:[#allocation22_spill] sm:$0xff]  ;;  %v14962_v28 = vld [vmem:[#allocation89_spill] sm:$0xff] }
 0xa1c   : > { %v4709_v51 = vsel %vm770_vm4, %v4693_v44, %v12732_v18  ;;  %v4661_v18 = vmul.f32 %v12835_v8, %v14950_v19  ;;  %v1039_v21 = vadd.f32 %v14962_v28, %v14961_v50  ;;  %v14963_v44 = vld [vmem:[#allocation24_spill] sm:$0xff]  ;;  %v14974_v23 = vld [vmem:[#allocation109_spill] sm:$0xff]  ;;  %v14975_v50 = vld [vmem:[#allocation115_spill] sm:$0xff] }
 0xa1d   : > { %v4711_v41 = vsel %vm282_vm7, %v4709_v51, 0.0  ;;  %v14964_v51 = vld [vmem:[#allocation84_spill] sm:$0xff] }
 0xa1e   : > { %v4727_v24 = vmul.f32 %v4711_v41, %v14951_v11  ;;  %v1041_v41 = vadd.f32 %v14964_v51, %v14963_v44  ;;  %v1599_v48 = vadd.f32 %v14972_v59, %v1039_v21  ;;  %v14977_v44 = vld [vmem:[#allocation127_spill] sm:$0xff]  ;;  %v14980_v21 = vld [vmem:[#allocation28_spill] sm:$0xff]  ;;  %v14985_v59 = vld [vmem:[#allocation153_spill] sm:$0xff] }
 0xa1f   : > { %v12968_v46 = vpop.permute.xlu0 %4784  ;;  %v4691_v2 = vpop.permute.xlu1 %4690 }
 0xa20   : > { %v12970_v30 = vadd.f32 %v4727_v24, %v4647_v33  ;;  %v4695_v58 = vsel %vm770_vm4, %v12840_v14, %v4691_v2  ;;  %v14965_v33 = vld [vmem:[#allocation26_spill] sm:$0xff]  ;;  %v14966_v24 = vld [vmem:[#allocation79_spill] sm:$0xff]  ;;  %v1601_v57 = vadd.f32 %v14973_v52, %v1041_v41 }
 0xa21   : > { %v4741_v31 = vmul.f32 %v4695_v58, %v14951_v11  ;;  %v1043_v2 = vadd.f32 %v14966_v24, %v14965_v33  ;;  %v14978_v33 = vld [vmem:[#allocation133_spill] sm:$0xff]  ;;  %v14981_v41 = vld [vmem:[#allocation126_spill] sm:$0xff] }
 0xa23   : > { %v4855_v43 = vpop.permute.xlu0 %4854  ;;  %v12982_v0 = vadd.f32 %v4741_v31, %v4661_v18  ;;  %v4789_v45 = vpop.permute.xlu1 %4788  ;;  %v14967_v18 = vld [vmem:[#allocation29_spill] sm:$0xff]  ;;  %v1603_v35 = vadd.f32 %v14974_v23, %v1043_v2  ;;  %v14982_v2 = vld [vmem:[#allocation138_spill] sm:$0xff] }
 0xa24   : > { %v4805_v58 = vsel %vm868_vm5, %v4789_v45, %v12857_v38  ;;  %v1045_v31 = vadd.f32 %v14968_v3, %v14967_v18  ;;  %v14976_v38 = vld [vmem:[#allocation114_spill] sm:$0xff]  ;;  %v2161_v3 = vadd.f32 %v14980_v21, %v1601_v57  ;;  %v14991_v21 = vld [vmem:[#allocation187_spill] sm:$0xff] }
 0xa26   : > { %v1605_v28 = vadd.f32 %v14975_v50, %v1045_v31  ;;  %v14983_v31 = vld [vmem:[#allocation163_spill] sm:$0xff] }
 0xa27   : > { %v12985_v61 = vpop.permute.xlu0 %4856  ;;  %v4763_v8 = vpop.permute.xlu1 %4762 }
 0xa28   : > { %v4900_v14 = vsel %vm965_vm6, %v4855_v43, %v12985_v61  ;;  %v4802_v57 = vsel %vm868_vm5, %v4763_v8, %v12888_v56 }
 0xa29   : > { %v4920_v62 = vmul.f32 %v4900_v14, %v14950_v19  ;;  %v1593_v14 = vadd.f32 %v14969_v4, %v1033_v27  ;;  %v4807_v27 = vsel %vm298_vm8, %v4805_v58, 0.0  ;;  %v2163_v4 = vadd.f32 %v14981_v41, %v1603_v35  ;;  %v14987_v35 = vld [vmem:[#allocation21_spill] sm:$0xff]  ;;  %v14992_v41 = vld [vmem:[#allocation155_spill] sm:$0xff] }
 0xa2a   : > { %v4803_v58 = vsel %vm868_vm5, %v12870_v36, %v4763_v8  ;;  %v2721_v50 = vadd.f32 %v14987_v35, %v2161_v3 }
 0xa2b   : > { %v4936_v34 = vadd.f32 %v4920_v62, %v4840_v42  ;;  %v4767_v49 = vpop.permute.xlu1 %4766  ;;  %v14970_v42 = vld [vmem:[#allocation107_spill] sm:$0xff]  ;;  %v2153_v45 = vadd.f32 %v14976_v38, %v1593_v14 }
 0xa2c   : > { %v1595_v62 = vadd.f32 %v14970_v42, %v1035_v40  ;;  %v13039_v42 = vadd.f32 %v14982_v2, %v1605_v28  ;;  %v14988_v28 = vld [vmem:[#allocation146_spill] sm:$0xff]  ;;  %v4801_v36 = vsel %vm868_vm5, %v12888_v56, %v4767_v49  ;;  %v4800_v8 = vsel %vm868_vm5, %v4767_v49, %v12903_v47 }
 0xa2d   : > { %v4952_v37 = vadd.f32 %v4936_v34, %v14954_v1  ;;  %v13021_v34 = vpop.permute.xlu0 %4860  ;;  %v14971_v1 = vld [vmem:[#allocation117_spill] sm:$0xff]  ;;  %v2713_v14 = vadd.f32 %v14983_v31, %v2153_v45  ;;  %v13054_v38 = vadd.f32 %v14988_v28, %v2163_v4  ;;  %v14989_v45 = vld [vmem:[#allocation171_spill] sm:$0xff]  ;;  %v4826_v2 = vmul.f32 %v4802_v57, %v14951_v11  ;;  %v14993_v31 = vld [vmem:[#allocation170_spill] sm:$0xff] }
 0xa2e   : > { %v2155_v51 = vadd.f32 %v14977_v44, %v1595_v62 }
 0xa2f   : > { %4984 = vst [vmem:[%s5681_s12 + $0x10] sm:$0xff] %v4952_v37  ;;  %v12994_v54 = vpop.permute.xlu1 %4770  ;;  %v1597_v37 = vadd.f32 %v14971_v1, %v1037_v60  ;;  %v14979_v60 = vld [vmem:[#allocation142_spill] sm:$0xff]  ;;  %v14984_v1 = vld [vmem:[#allocation147_spill] sm:$0xff]  ;;  %v3273_v44 = vadd.f32 %v14989_v45, %v2713_v14  ;;  %v13073_v14 = vadd.f32 %v14993_v31, %v2721_v50  ;;  %v4842_v50 = vadd.f32 %v4826_v2, %v12890_v39 }
 0xa30   : > { %v2159_v18 = vadd.f32 %v14979_v60, %v1599_v48  ;;  %v2715_v62 = vadd.f32 %v14984_v1, %v2155_v51  ;;  %v4823_v48 = vmul.f32 %v4807_v27, %v14951_v11  ;;  %v4825_v27 = vmul.f32 %v4803_v58, %v14951_v11  ;;  %v14998_v2 = vld [vmem:[#allocation15_spill] sm:$0xff] }
 0xa31   : > { %v2157_v24 = vadd.f32 %v14978_v33, %v1597_v37  ;;  %v14986_v37 = vld [vmem:[#allocation164_spill] sm:$0xff]  ;;  %v4865_v51 = vpop.permute.xlu0 %4864  ;;  %v4799_v58 = vsel %vm868_vm5, %v12903_v47, %v12994_v54  ;;  %v4798_v47 = vsel %vm868_vm5, %v12994_v54, %v12918_v53 }
 0xa32   : > { %v2719_v23 = vadd.f32 %v14986_v37, %v2159_v18  ;;  %v4839_v1 = vadd.f32 %v4823_v48, %v12970_v30  ;;  %v14995_v37 = vld [vmem:[#allocation199_spill] sm:$0xff]  ;;  %v4841_v57 = vadd.f32 %v4825_v27, %v12874_v26 }
 0xa33   : > { %v12996_v6 = vpop.permute.xlu1 %4774  ;;  %v2717_v52 = vadd.f32 %v14985_v59, %v2157_v24  ;;  %v14990_v24 = vld [vmem:[#allocation177_spill] sm:$0xff]  ;;  %v14994_v59 = vld [vmem:[#allocation194_spill] sm:$0xff] }
 0xa34   : > { %v3275_v60 = vadd.f32 %v14990_v24, %v2715_v62  ;;  %v3279_v4 = vadd.f32 %v14992_v41, %v2719_v23  ;;  %v4827_v62 = vmul.f32 %v4801_v36, %v14951_v11  ;;  %v4829_v36 = vmul.f32 %v4799_v58, %v14951_v11  ;;  %v15000_v58 = vld [vmem:[#allocation209_spill] sm:$0xff] }
 0xa35   : > { %v3277_v3 = vadd.f32 %v14991_v21, %v2717_v52  ;;  %v3833_v52 = vadd.f32 %v14994_v59, %v3273_v44  ;;  %v4869_v28 = vpop.permute.xlu0 %4868  ;;  %v4797_v54 = vsel %vm868_vm5, %v12918_v53, %v12996_v6  ;;  %v4830_v21 = vmul.f32 %v4798_v47, %v14951_v11 }
 0xa36   : > { %v3835_v23 = vadd.f32 %v14995_v37, %v3275_v60  ;;  %v4843_v44 = vadd.f32 %v4827_v62, %v12892_v63  ;;  %v4796_v63 = vsel %vm868_vm5, %v12996_v6, %v12935_v32  ;;  %v4845_v62 = vadd.f32 %v4829_v36, %v12907_v15 }
 0xa37   : > { %v12998_v55 = vpop.permute.xlu1 %4778  ;;  %v4831_v6 = vmul.f32 %v4797_v54, %v14951_v11  ;;  %v3837_v59 = vadd.f32 %v15000_v58, %v3277_v3  ;;  %v15008_v58 = vld [vmem:[#allocation234_spill] sm:$0xff] }
 0xa38   : > { %v4794_v3 = vsel %vm868_vm5, %v12998_v55, %v12953_v20 }
 0xa3b   : > { %v13006_v7 = vpop.permute.xlu1 %4782 }
 0xa3f   : > { %v13032_v40 = vpop.permute.xlu1 %4786 }
 0xa43   : > { %v4885_v33 = vpop.permute.xlu1 %4884 }
 0xa44   : > { %v4901_v18 = vsel %vm965_vm6, %v4885_v33, %v4855_v43  ;;  %v4828_v43 = vmul.f32 %v4800_v8, %v14951_v11  ;;  %v14996_v33 = vld [vmem:[#allocation218_spill] sm:$0xff] }
 0xa45   : > { %v4903_v56 = vsel %vm314_vm9, %v4901_v18, 0.0 }
 0xa46   : > { %v4919_v49 = vmul.f32 %v4903_v56, %v14950_v19  ;;  %v4844_v39 = vadd.f32 %v4828_v43, %v12905_v16 }
 0xa47   : > { %v4859_v29 = vpop.permute.xlu1 %4858 }
 0xa48   : > { %v4935_v35 = vadd.f32 %v4919_v49, %v4839_v1  ;;  %v4898_v30 = vsel %vm965_vm6, %v4859_v29, %v13021_v34  ;;  %v4899_v48 = vsel %vm965_vm6, %v12985_v61, %v4859_v29  ;;  %v14997_v61 = vld [vmem:[#allocation224_spill] sm:$0xff]  ;;  %v14999_v49 = vld [vmem:[#allocation233_spill] sm:$0xff]  ;;  %v4873_v29 = vpop.permute.xlu0 %4872 }
 0xa49   : > { %v4921_v26 = vmul.f32 %v4899_v48, %v14950_v19  ;;  %v4922_v45 = vmul.f32 %v4898_v30, %v14950_v19  ;;  %v4393_v60 = vadd.f32 %v14997_v61, %v3833_v52  ;;  %v4395_v43 = vadd.f32 %v14999_v49, %v3835_v23  ;;  %v15001_v48 = vld [vmem:[#allocation19_spill] sm:$0xff] }
 0xa4a   : > { %v4951_v24 = vadd.f32 %v4935_v35, %v14996_v33  ;;  %v4832_v52 = vmul.f32 %v4796_v63, %v14951_v11  ;;  %v4846_v35 = vadd.f32 %v4830_v21, %v12920_v5  ;;  %v4847_v5 = vadd.f32 %v4831_v6, %v12922_v10 }
 0xa4b   : > { %v4937_v27 = vadd.f32 %v4921_v26, %v4841_v57  ;;  %v4938_v8 = vadd.f32 %v4922_v45, %v4842_v50  ;;  %v4863_v18 = vpop.permute.xlu1 %4862  ;;  %v4834_v61 = vmul.f32 %v4794_v3, %v14951_v11  ;;  %v4792_v10 = vsel %vm868_vm5, %v13006_v7, %v12968_v46 }
 0xa4c   : > { %4983 = vst [vmem:[%s5681_s12 + $0x8] sm:$0xff] %v4951_v24  ;;  %v4896_v16 = vsel %vm965_vm6, %v4863_v18, %v4865_v51  ;;  %v4897_v53 = vsel %vm965_vm6, %v13021_v34, %v4863_v18  ;;  %v4795_v34 = vsel %vm868_vm5, %v12935_v32, %v12998_v55  ;;  %v15003_v55 = vld [vmem:[#allocation181_spill] sm:$0xff]  ;;  %v4848_v24 = vadd.f32 %v4832_v52, %v12937_v9  ;;  %v15004_v18 = vld [vmem:[#allocation210_spill] sm:$0xff] }
 0xa4d   : > { %v4953_v41 = vadd.f32 %v4937_v27, %v4393_v60  ;;  %v4954_v56 = vadd.f32 %v4938_v8, %v14998_v2  ;;  %v4923_v31 = vmul.f32 %v4897_v53, %v14950_v19  ;;  %v4924_v1 = vmul.f32 %v4896_v16, %v14950_v19  ;;  %v4877_v27 = vpop.permute.xlu0 %4876  ;;  %v15005_v53 = vld [vmem:[#allocation182_spill] sm:$0xff] }
 0xa4e   : > { %v4833_v45 = vmul.f32 %v4795_v34, %v14951_v11  ;;  %v3839_v33 = vadd.f32 %v15003_v55, %v3279_v4  ;;  %v4793_v4 = vsel %vm868_vm5, %v12953_v20, %v13006_v7  ;;  %v15006_v20 = vld [vmem:[#allocation217_spill] sm:$0xff] }
 0xa4f   : > { %4985 = vst [vmem:[%s5681_s12 + $0x18] sm:$0xff] %v4953_v41  ;;  %4986 = vst [vmem:[%s5681_s12 + $0x20] sm:$0xff] %v4954_v56  ;;  %v4939_v37 = vadd.f32 %v4923_v31, %v4843_v44  ;;  %v4940_v57 = vadd.f32 %v4924_v1, %v4844_v39  ;;  %v4867_v15 = vpop.permute.xlu1 %4866  ;;  %v15002_v44 = vld [vmem:[#allocation203_spill] sm:$0xff]  ;;  %v3283_v41 = vadd.f32 %v15005_v53, %v13054_v38  ;;  %v15007_v56 = vld [vmem:[#allocation193_spill] sm:$0xff] }
 0xa50   : > { %v4894_v23 = vsel %vm965_vm6, %v4867_v15, %v4869_v28  ;;  %v4895_v32 = vsel %vm965_vm6, %v4865_v51, %v4867_v15  ;;  %v4397_v36 = vadd.f32 %v15002_v44, %v3837_v59  ;;  %v4849_v2 = vadd.f32 %v4833_v45, %v12939_v25  ;;  %v15010_v15 = vld [vmem:[#allocation204_spill] sm:$0xff] }
 0xa51   : > { %v4955_v30 = vadd.f32 %v4939_v37, %v4395_v43  ;;  %v4956_v50 = vadd.f32 %v4940_v57, %v15001_v48  ;;  %v4925_v47 = vmul.f32 %v4895_v32, %v14950_v19  ;;  %v4926_v26 = vmul.f32 %v4894_v23, %v14950_v19  ;;  %v15009_v37 = vld [vmem:[#allocation159_spill] sm:$0xff] }
 0xa52   : > { %v4399_v7 = vadd.f32 %v15006_v20, %v3839_v33  ;;  %v3841_v31 = vadd.f32 %v15007_v56, %v13073_v14  ;;  %v4835_v1 = vmul.f32 %v4793_v4, %v14951_v11  ;;  %v4836_v38 = vmul.f32 %v4792_v10, %v14951_v11 }
 0xa53   : > { %4987 = vst [vmem:[%s5681_s12 + $0x28] sm:$0xff] %v4955_v30  ;;  %4988 = vst [vmem:[%s5681_s12 + $0x30] sm:$0xff] %v4956_v50  ;;  %v4941_v51 = vadd.f32 %v4925_v47, %v4845_v62  ;;  %v4942_v60 = vadd.f32 %v4926_v26, %v4846_v35  ;;  %v4871_v39 = vpop.permute.xlu1 %4870  ;;  %v4791_v25 = vsel %vm868_vm5, %v12968_v46, %v13032_v40  ;;  %v4881_v40 = vpop.permute.xlu0 %4880  ;;  %v15012_v26 = vld [vmem:[#allocation165_spill] sm:$0xff] }
 0xa54   : > { %v4892_v9 = vsel %vm965_vm6, %v4871_v39, %v4873_v29  ;;  %v4893_v54 = vsel %vm965_vm6, %v4869_v28, %v4871_v39  ;;  %v4850_v28 = vadd.f32 %v4834_v61, %v12957_v13  ;;  %v2725_v57 = vadd.f32 %v15009_v37, %v13039_v42 }
 0xa55   : > { %v4957_v8 = vadd.f32 %v4941_v51, %v4397_v36  ;;  %v4958_v21 = vadd.f32 %v4942_v60, %v15004_v18  ;;  %v4927_v63 = vmul.f32 %v4893_v54, %v14950_v19  ;;  %v4928_v16 = vmul.f32 %v4892_v9, %v14950_v19  ;;  %v15013_v36 = vld [vmem:[#allocation178_spill] sm:$0xff]  ;;  %v15015_v51 = vld [vmem:[#allocation200_spill] sm:$0xff] }
 0xa56   : > { %v3843_v35 = vadd.f32 %v15010_v15, %v3283_v41  ;;  %v4851_v46 = vadd.f32 %v4835_v1, %v12959_v22  ;;  %v4852_v48 = vadd.f32 %v4836_v38, %v12855_v12  ;;  %v4837_v50 = vmul.f32 %v4791_v25, %v14951_v11  ;;  %v15014_v11 = vld [vmem:[#allocation225_spill] sm:$0xff]  ;;  %v15016_v9 = vld [vmem:[#allocation232_spill] sm:$0xff] }
 0xa57   : > { %4989 = vst [vmem:[%s5681_s12 + $0x38] sm:$0xff] %v4957_v8  ;;  %4990 = vst [vmem:[%s5681_s12 + $0x40] sm:$0xff] %v4958_v21  ;;  %v4943_v62 = vadd.f32 %v4927_v63, %v4847_v5  ;;  %v4944_v6 = vadd.f32 %v4928_v16, %v4848_v24  ;;  %v4875_v49 = vpop.permute.xlu1 %4874  ;;  %v3285_v12 = vadd.f32 %v15013_v36, %v2725_v57  ;;  %v15017_v8 = vld [vmem:[#allocation27_spill] sm:$0xff] }
 0xa58   : > { %v4890_v14 = vsel %vm965_vm6, %v4875_v49, %v4877_v27  ;;  %v4891_v13 = vsel %vm965_vm6, %v4873_v29, %v4875_v49  ;;  %v15011_v29 = vld [vmem:[#allocation228_spill] sm:$0xff]  ;;  %v4403_v55 = vadd.f32 %v15014_v11, %v3843_v35  ;;  %v4853_v10 = vadd.f32 %v4837_v50, %v12982_v0 }
 0xa59   : > { %v4959_v43 = vadd.f32 %v4943_v62, %v4399_v7  ;;  %v4960_v59 = vadd.f32 %v4944_v6, %v15008_v58  ;;  %v4929_v52 = vmul.f32 %v4891_v13, %v14950_v19  ;;  %v4930_v34 = vmul.f32 %v4890_v14, %v14950_v19 }
 0xa5a   : > { %v4401_v3 = vadd.f32 %v15011_v29, %v3841_v31  ;;  %v3845_v60 = vadd.f32 %v15015_v51, %v3285_v12 }
 0xa5b   : > { %4991 = vst [vmem:[%s5681_s12 + $0x48] sm:$0xff] %v4959_v43  ;;  %4992 = vst [vmem:[%s5681_s12 + $0x50] sm:$0xff] %v4960_v59  ;;  %v4945_v23 = vadd.f32 %v4929_v52, %v4849_v2  ;;  %v4946_v32 = vadd.f32 %v4930_v34, %v4850_v28  ;;  %v4879_v30 = vpop.permute.xlu1 %4878 }
 0xa5c   : > { %v4888_v42 = vsel %vm965_vm6, %v4879_v30, %v4881_v40  ;;  %v4889_v22 = vsel %vm965_vm6, %v4877_v27, %v4879_v30  ;;  %v4405_v18 = vadd.f32 %v15017_v8, %v3845_v60 }
 0xa5d   : > { %v4961_v47 = vadd.f32 %v4945_v23, %v4401_v3  ;;  %v4962_v5 = vadd.f32 %v4946_v32, %v15012_v26  ;;  %v4931_v45 = vmul.f32 %v4889_v22, %v14950_v19  ;;  %v4932_v44 = vmul.f32 %v4888_v42, %v14950_v19 }
 0xa5f   : > { %4993 = vst [vmem:[%s5681_s12 + $0x58] sm:$0xff] %v4961_v47  ;;  %4994 = vst [vmem:[%s5681_s12 + $0x60] sm:$0xff] %v4962_v5  ;;  %v4947_v33 = vadd.f32 %v4931_v45, %v4851_v46  ;;  %v4948_v24 = vadd.f32 %v4932_v44, %v4852_v48 }
 0xa61   : > { %v4883_v61 = vpop.permute.xlu1 %4882  ;;  %v4963_v4 = vadd.f32 %v4947_v33, %v4403_v55  ;;  %v4964_v54 = vadd.f32 %v4948_v24, %v15016_v9 }
 0xa62   : > { %v4887_v39 = vsel %vm965_vm6, %v4881_v40, %v4883_v61 }
 0xa63   : > { %v4933_v27 = vmul.f32 %v4887_v39, %v14950_v19  ;;  %4995 = vst [vmem:[%s5681_s12 + $0x68] sm:$0xff] %v4963_v4  ;;  %4996 = vst [vmem:[%s5681_s12 + $0x70] sm:$0xff] %v4964_v54 }
 0xa65   : > { %v4949_v21 = vadd.f32 %v4933_v27, %v4853_v10 }
 0xa67   : > { %v4965_v63 = vadd.f32 %v4949_v21, %v4405_v18 }
 0xa69   : > { %4997 = vst [vmem:[%s5681_s12 + $0x78] sm:$0xff] %v4965_v63 }
 0xa6a   : > { %5296 = shalt.err (!%p5293_p2)
}
 0xa6b   : > { %s5297_s0 = scalar_lea.hbm %s5032_s4, 2048  ;;  %s5301_s27 = scalar_lea.hbm %s13259_s2, 4096 }
 0xa6c   : > { %p5298_p4 = scmp.ne.s32.totalorder %s5032_s4, %s5297_s0  ;;  %p5302_p0 = scmp.lt.s32.totalorder %s5032_s4, %s13259_s2 }
 0xa6d   : > { %p5303_p6 = scmp.lt.s32.totalorder %s5301_s27, %s5297_s0 }
 0xa6e   : > { %p5299_p9 = pnand %p5298_p4, %p14949_p12 }
 0xa6f   : > { %p5304_p11 = por %p5303_p6, %p5302_p0 }
 0xa70   : > { %p5300_p7 = pneg %p5299_p9 }
 0xa72   : > { %p5305_p13 = pnand %p5304_p11, %p5300_p7 }
 0xa74   : > { %5308 = shalt.err (!%p5305_p13)
}
 0xa75   : > { %5173 = dma.vmem_to_hbm [thread:$0]  (%p14949_p12), %s5035_s20, 2048, %s5032_s4, %s5015_s6  }
 0xa76 PF: > { %s5060_s11 = sand.u32 1, %s5339_s14   ;;  %p15018_p1 = scmp.ne.s32.totalorder %s13815_s26, 0 }
 0xa77   : > { %p15019_p3 = scmp.ge.s32.totalorder %s5351_s17, 2  ;;  %s5061_s13 = scalar_lea.sflag [#allocation5], %s5060_s11 }
 0xa79   : > { %p5182_p5 = pnand %p15019_p3, %p15018_p1 }
 0xa7b   : > { %p5183_p8 = pneg %p5182_p5 }
 0xa7d   : > { %5330 = dma.done.wait (%p5183_p8), %s5061_s13, 2048  }
 0xa7e   : > { %5332 = vsyncadd (%p5183_p8), %s5061_s13, 4294965248  ;;  %s5070_s18 = scalar_lea.sflag [#allocation8], %s5060_s11 }
 0xa7f   : > { %5334 = dma.done.wait (%p5183_p8), %s5070_s18, 2048  }
 0xa80   : > { %5336 = vsyncadd (%p5183_p8), %s5070_s18, 4294965248  ;;  %p21_p12 = scmp.ge.s32.totalorder %s5411_s19, 4   ;;  %s15020_s14 = smov %s5343_s15 }
 0xa81   : > { %s15021_s15 = smov %s5347_s16  ;;  %s15022_s16 = smov %s5423_s22 }
 0xa82   : > { %s15023_s17 = smov %s5411_s19  ;;  %23 = sbr.rel (!%p21_p12) target bundleno = 9 (0x9), region = 90 }
 0xa87   :  { %5075 = vsyncpa [#allocation4], 1 }
 0xa88   :  { %5077 = vsyncpa [#allocation4 + $0x1], 1 }
 0xa89   :  { %5078 = vsyncpa [#allocation5], 1 }
 0xa8a   :  { %5080 = vsyncpa [#allocation5 + $0x1], 1 }
 0xa8b   :  { %5081 = vsyncpa [#allocation8], 1 }
 0xa8c   :  { %5083 = vsyncpa [#allocation8 + $0x1], 1 }

</bundles_post_ra>
